<compile_context>
chip_gen: v6e
topology: v6e:2x2x1
jax: 0.10.0
libtpu: 0.0.40
codegen_flags: <defaults>
</compile_context>

<pallas_src>
import functools

import numpy as np
import jax
import jax.numpy as jnp
from jax import lax
from jax.experimental import pallas as pl
from jax.experimental.pallas import tpu as pltpu

EPS = 1e-5


# ---------------------------------------------------------------------------
# Kernel
# ---------------------------------------------------------------------------
def _encoding_residual_kernel(x_ref, g1_ref, be1_ref, w1_ref, b1_ref,
                              g2_ref, be2_ref, w2_ref, b2_ref,
                              se1_ref, se2_ref, o_ref, pad_ref, *, C):
    N, H, WC = x_ref.shape
    W = WC // C
    NH = N * H
    inv_M = 1.0 / float(N * H * W)     # BN population size
    inv_HW = 1.0 / float(H * W)        # SE average pool size

    x3 = x_ref[...]                    # (N, H, W*C) f32, lane-dense

    # ---- tiny lane-axis helpers (avoid last-dim-splitting reshapes) --------
    def fold_w(v):                     # (R, W*C) -> (R, C): sum the W channel groups
        acc = v[:, 0:C]
        for w in range(1, W):
            acc = acc + v[:, w * C:(w + 1) * C]
        return acc

    def tile_lane(v):                  # (R, C) -> (R, W*C): repeat channel vector W times
        return jnp.concatenate([v] * W, axis=-1)

    # ---- training-mode BatchNorm2d + Swish, fully lane-dense ---------------
    def bn_swish(v3, gamma, beta):
        vf = v3.reshape(NH, WC)                              # leading-dim merge only
        cs = jnp.sum(vf, axis=0, keepdims=True)              # (1, W*C)
        cq = jnp.sum(vf * vf, axis=0, keepdims=True)         # (1, W*C)  (same traversal)
        mean = fold_w(cs) * inv_M                            # (1, C)
        var = jnp.maximum(fold_w(cq) * inv_M - mean * mean, 0.0)   # biased var, clamped
        a_c = gamma * lax.rsqrt(var + EPS)                   # (1, C)
        b_c = beta - mean * a_c                              # (1, C)
        a_l = tile_lane(a_c)[None]                           # (1, 1, W*C)
        b_l = tile_lane(b_c)[None]
        u = v3 * a_l + b_l
        # Swish u / (1 + exp(-u)) via EUP exp + approximate reciprocal
        return u * pl.reciprocal(1.0 + jnp.exp(-u), approx=True)

    # ---- 3x3 SAME conv as ONE block-banded MXU matmul -----------------------
    def conv3x3(v3, w_ref_, bias_lane):
        pad_ref[:, 1:H + 1, :] = v3                          # halo rows stay zero
        lhs = jnp.concatenate(                               # (N*H, 3*W*C)
            [pad_ref[:, 0:H, :].reshape(NH, WC),             # dy = 0 (h-1)
             pad_ref[:, 1:H + 1, :].reshape(NH, WC),         # dy = 1 (h)
             pad_ref[:, 2:H + 2, :].reshape(NH, WC)],        # dy = 2 (h+1)
            axis=-1)
        out = jnp.dot(lhs.astype(jnp.bfloat16), w_ref_[...],
                      preferred_element_type=jnp.float32)    # (N*H, W*C) f32
        return (out + bias_lane).reshape(N, H, WC)

    # zero only the two H-halo rows once (interior fully rewritten per conv)
    zero_row = jnp.zeros((N, 1, WC), jnp.float32)
    pad_ref[:, 0:1, :] = zero_row
    pad_ref[:, H + 1:H + 2, :] = zero_row

    h = bn_swish(x3, g1_ref[...], be1_ref[...])
    h = conv3x3(h, w1_ref, b1_ref[...])
    h = bn_swish(h, g2_ref[...], be2_ref[...])
    h = conv3x3(h, w2_ref, b2_ref[...])

    # ---- Squeeze-and-Excitation --------------------------------------------
    pooled = fold_w(jnp.sum(h, axis=1)) * inv_HW             # (N, C) global avg pool
    z = jnp.maximum(jnp.dot(pooled.astype(jnp.bfloat16), se1_ref[...],
                            preferred_element_type=jnp.float32), 0.0)   # (N, C//r)
    t = jnp.dot(z.astype(jnp.bfloat16), se2_ref[...],
                preferred_element_type=jnp.float32)                      # (N, C)
    s = pl.reciprocal(1.0 + jnp.exp(-t), approx=True)        # sigmoid, (N, C)

    o_ref[...] = x3 + h * tile_lane(s)[:, None, :]           # lane-dense unmasked store


# ---------------------------------------------------------------------------
# One-time parameter preprocessing (hoisted out of the per-call wrapper)
# ---------------------------------------------------------------------------
def _pack_conv_banded(w_oihw, W):
    """(Cout, Cin, 3, 3) OIHW conv weight -> block-banded (3*W*Cin, W*Cout) bf16.

    Row index   = dy*W*Cin + w_in*Cin + ci   (matches the dy-concatenated LHS)
    Column index= w_out*Cout + co            (matches the lane-dense output)
    The band structure encodes dx in {-1,0,+1} and zero padding at w boundaries.
    """
    w = np.asarray(w_oihw, dtype=np.float32)          # (Cout, Cin, 3, 3)
    C = w.shape[0]
    wt = np.transpose(w, (2, 3, 1, 0))                # (dy, dx, ci, co)
    bw = np.zeros((3, W, C, W, C), np.float32)
    for w_out in range(W):
        for dx in range(3):
            w_in = w_out + dx - 1
            if 0 <= w_in < W:
                bw[:, w_in, :, w_out, :] = wt[:, dx, :, :]
    return jnp.asarray(bw.reshape(3 * W * C, W * C), dtype=jnp.bfloat16)


def prepare_encoding_residual_params(params, W):
    C = params["bn1_gamma"].shape[0]
    f32 = jnp.float32
    return {
        "g1": params["bn1_gamma"].reshape(1, C).astype(f32),
        "be1": params["bn1_beta"].reshape(1, C).astype(f32),
        "g2": params["bn2_gamma"].reshape(1, C).astype(f32),
        "be2": params["bn2_beta"].reshape(1, C).astype(f32),
        "w1": _pack_conv_banded(params["conv1_w"], W),
        "w2": _pack_conv_banded(params["conv2_w"], W),
        "b1": jnp.tile(params["conv1_b"].astype(f32), W).reshape(1, W * C),
        "b2": jnp.tile(params["conv2_b"].astype(f32), W).reshape(1, W * C),
        "se1": params["se_fc1_w"].T.astype(jnp.bfloat16),   # (C, C//r)
        "se2": params["se_fc2_w"].T.astype(jnp.bfloat16),   # (C//r, C)
    }


# ---------------------------------------------------------------------------
# PyTorch-compatible wrapper (NCHW in / NCHW out)
# ---------------------------------------------------------------------------
def encoding_residual_cell(x_nchw, prepped):
    N, C, H, W = x_nchw.shape
    # NCHW -> lane-dense (N, H, W*C) slab (channels-last, then fold W into lanes)
    x = jnp.transpose(x_nchw, (0, 2, 3, 1)).reshape(N, H, W * C)

    kernel = functools.partial(_encoding_residual_kernel, C=C)
    vmem = pl.BlockSpec(memory_space=pltpu.MemorySpace.VMEM)

    out = pl.pallas_call(
        kernel,
        out_shape=jax.ShapeDtypeStruct((N, H, W * C), jnp.float32),
        in_specs=[vmem] * 11,
        out_specs=vmem,
        scratch_shapes=[pltpu.VMEM((N, H + 2, W * C), jnp.float32)],   # H-padded scratch
        compiler_params=pltpu.CompilerParams(vmem_limit_bytes=32 * 1024 * 1024),
    )(x, prepped["g1"], prepped["be1"], prepped["w1"], prepped["b1"],
      prepped["g2"], prepped["be2"], prepped["w2"], prepped["b2"],
      prepped["se1"], prepped["se2"])

    return jnp.transpose(out.reshape(N, H, W, C), (0, 3, 1, 2))        # back to NCHW


# ---------------------------------------------------------------------------
# Pure-JAX reference (mirrors the PyTorch module) for a correctness check.
# ---------------------------------------------------------------------------
def _reference(x, params):
    def bn_swish(v, g, b):
        mean = v.mean(axis=(0, 2, 3), keepdims=True)
        var = ((v - mean) ** 2).mean(axis=(0, 2, 3), keepdims=True)
        u = (v - mean) / jnp.sqrt(var + EPS) * g.reshape(1, -1, 1, 1) + b.reshape(1, -1, 1, 1)
        return u / (1.0 + jnp.exp(-u))

    def conv(v, w, b):
        y = lax.conv_general_dilated(v, w, (1, 1), "SAME",
                                     dimension_numbers=("NCHW", "OIHW", "NCHW"))
        return y + b.reshape(1, -1, 1, 1)

    h = bn_swish(x, params["bn1_gamma"], params["bn1_beta"])
    h = conv(h, params["conv1_w"], params["conv1_b"])
    h = bn_swish(h, params["bn2_gamma"], params["bn2_beta"])
    h = conv(h, params["conv2_w"], params["conv2_b"])
    pooled = h.mean(axis=(2, 3))                              # (N, C)
    z = jnp.maximum(pooled @ params["se_fc1_w"].T, 0.0)
    s = jax.nn.sigmoid(z @ params["se_fc2_w"].T)
    return x + h * s[:, :, None, None]


def _init_params(key, C, reduction=16):
    hidden = C // reduction
    ks = jax.random.split(key, 8)
    f32 = jnp.float32
    return {
        "bn1_gamma": 1.0 + 0.1 * jax.random.normal(ks[0], (C,), f32),
        "bn1_beta": 0.1 * jax.random.normal(ks[1], (C,), f32),
        "bn2_gamma": 1.0 + 0.1 * jax.random.normal(ks[2], (C,), f32),
        "bn2_beta": 0.1 * jax.random.normal(ks[3], (C,), f32),
        "conv1_w": jax.random.normal(ks[4], (C, C, 3, 3), f32) / jnp.sqrt(9.0 * C),
        "conv1_b": 0.1 * jax.random.normal(ks[5], (C,), f32),
        "conv2_w": jax.random.normal(ks[6], (C, C, 3, 3), f32) / jnp.sqrt(9.0 * C),
        "conv2_b": 0.1 * jax.random.normal(ks[7], (C,), f32),
        "se_fc1_w": jax.random.normal(jax.random.fold_in(key, 100), (hidden, C), f32) / jnp.sqrt(1.0 * C),
        "se_fc2_w": jax.random.normal(jax.random.fold_in(key, 101), (C, hidden), f32) / jnp.sqrt(1.0 * hidden),
    }


if __name__ == "__main__":
    key = jax.random.PRNGKey(0)
    # channels must be >= reduction(=16) for the SE bottleneck to be non-empty
    N, C, H, W = 2, 32, 16, 16
    x = jax.random.normal(jax.random.fold_in(key, 7), (N, C, H, W), jnp.float32)
    params = _init_params(jax.random.fold_in(key, 13), C)

    # one-time parameter preprocessing (banded conv pack, bf16 casts, lane biases)
    prepped = prepare_encoding_residual_params(params, W)

    fwd = jax.jit(encoding_residual_cell)
    out = jax.block_until_ready(fwd(x, prepped))

    ref = _reference(x, params)
    assert out.shape == ref.shape == (N, C, H, W)
    err = float(jnp.max(jnp.abs(out - ref)))
    if not err < 5e-2:
        raise AssertionError(f"mismatch vs reference, max abs err = {err}")

    print("KERNEL_OK")
</pallas_src>

<mosaic_0001>
module attributes {stable_mosaic.version = 11 : i64} {
  func.func @_encoding_residual_kernel(%arg0: memref<2x16x512xf32, #tpu.memory_space<vmem>>, %arg1: memref<1x32xf32, #tpu.memory_space<vmem>>, %arg2: memref<1x32xf32, #tpu.memory_space<vmem>>, %arg3: memref<1536x512xbf16, #tpu.memory_space<vmem>>, %arg4: memref<1x512xf32, #tpu.memory_space<vmem>>, %arg5: memref<1x32xf32, #tpu.memory_space<vmem>>, %arg6: memref<1x32xf32, #tpu.memory_space<vmem>>, %arg7: memref<1536x512xbf16, #tpu.memory_space<vmem>>, %arg8: memref<1x512xf32, #tpu.memory_space<vmem>>, %arg9: memref<32x2xbf16, #tpu.memory_space<vmem>>, %arg10: memref<2x32xbf16, #tpu.memory_space<vmem>>, %arg11: memref<2x16x512xf32, #tpu.memory_space<vmem>>, %arg12: memref<2x18x512xf32, #tpu.memory_space<vmem>>) attributes {dimension_semantics = [], scalar_prefetch = 0 : i64, scratch_operands = 1 : i64, tpu.core_type = #tpu.core_type<tc>} {
    %c0 = arith.constant 0 : index
    %c0_0 = arith.constant 0 : index
    %c0_1 = arith.constant 0 : index
    %0 = vector.load %arg0[%c0, %c0_0, %c0_1] : memref<2x16x512xf32, #tpu.memory_space<vmem>>, vector<2x16x512xf32>
    %cst = arith.constant 0.000000e+00 : f32
    %1 = vector.broadcast %cst : f32 to vector<2x1x512xf32>
    %c0_2 = arith.constant 0 : index
    %c0_3 = arith.constant 0 : index
    %c0_4 = arith.constant 0 : index
    %2 = vector.load %arg12[%c0_2, %c0_3, %c0_4] : memref<2x18x512xf32, #tpu.memory_space<vmem>>, vector<2x1x512xf32>
    tpu.vector_store %arg12[%c0_2, %c0_3, %c0_4], %1 {strides = array<i32>} : memref<2x18x512xf32, #tpu.memory_space<vmem>>, vector<2x1x512xf32>,
    %c0_5 = arith.constant 0 : index
    %c17 = arith.constant 17 : index
    %c0_6 = arith.constant 0 : index
    %3 = vector.load %arg12[%c0_5, %c17, %c0_6] : memref<2x18x512xf32, #tpu.memory_space<vmem>>, vector<2x1x512xf32>
    tpu.vector_store %arg12[%c0_5, %c17, %c0_6], %1 {strides = array<i32>} : memref<2x18x512xf32, #tpu.memory_space<vmem>>, vector<2x1x512xf32>,
    %c0_7 = arith.constant 0 : index
    %c0_8 = arith.constant 0 : index
    %4 = vector.load %arg1[%c0_7, %c0_8] : memref<1x32xf32, #tpu.memory_space<vmem>>, vector<1x32xf32>
    %c0_9 = arith.constant 0 : index
    %c0_10 = arith.constant 0 : index
    %5 = vector.load %arg2[%c0_9, %c0_10] : memref<1x32xf32, #tpu.memory_space<vmem>>, vector<1x32xf32>
    %6 = vector.shape_cast %0 : vector<2x16x512xf32> to vector<32x512xf32>
    %cst_11 = arith.constant dense<0.000000e+00> : vector<512xf32>
    %7 = vector.multi_reduction <add>, %6, %cst_11 [0] : vector<32x512xf32> to vector<512xf32>
    %8 = vector.shape_cast %7 : vector<512xf32> to vector<1x512xf32>
    %9 = arith.mulf %6, %6 : vector<32x512xf32>
    %cst_12 = arith.constant dense<0.000000e+00> : vector<512xf32>
    %10 = vector.multi_reduction <add>, %9, %cst_12 [0] : vector<32x512xf32> to vector<512xf32>
    %11 = vector.shape_cast %10 : vector<512xf32> to vector<1x512xf32>
    %12 = vector.extract_strided_slice %8 {offsets = [0, 0], sizes = [1, 32], strides = [1, 1]} : vector<1x512xf32> to vector<1x32xf32>
    %13 = vector.extract_strided_slice %8 {offsets = [0, 32], sizes = [1, 32], strides = [1, 1]} : vector<1x512xf32> to vector<1x32xf32>
    %14 = arith.addf %12, %13 : vector<1x32xf32>
    %15 = vector.extract_strided_slice %8 {offsets = [0, 64], sizes = [1, 32], strides = [1, 1]} : vector<1x512xf32> to vector<1x32xf32>
    %16 = arith.addf %14, %15 : vector<1x32xf32>
    %17 = vector.extract_strided_slice %8 {offsets = [0, 96], sizes = [1, 32], strides = [1, 1]} : vector<1x512xf32> to vector<1x32xf32>
    %18 = arith.addf %16, %17 : vector<1x32xf32>
    %19 = vector.extract_strided_slice %8 {offsets = [0, 128], sizes = [1, 32], strides = [1, 1]} : vector<1x512xf32> to vector<1x32xf32>
    %20 = arith.addf %18, %19 : vector<1x32xf32>
    %21 = vector.extract_strided_slice %8 {offsets = [0, 160], sizes = [1, 32], strides = [1, 1]} : vector<1x512xf32> to vector<1x32xf32>
    %22 = arith.addf %20, %21 : vector<1x32xf32>
    %23 = vector.extract_strided_slice %8 {offsets = [0, 192], sizes = [1, 32], strides = [1, 1]} : vector<1x512xf32> to vector<1x32xf32>
    %24 = arith.addf %22, %23 : vector<1x32xf32>
    %25 = vector.extract_strided_slice %8 {offsets = [0, 224], sizes = [1, 32], strides = [1, 1]} : vector<1x512xf32> to vector<1x32xf32>
    %26 = arith.addf %24, %25 : vector<1x32xf32>
    %27 = vector.extract_strided_slice %8 {offsets = [0, 256], sizes = [1, 32], strides = [1, 1]} : vector<1x512xf32> to vector<1x32xf32>
    %28 = arith.addf %26, %27 : vector<1x32xf32>
    %29 = vector.extract_strided_slice %8 {offsets = [0, 288], sizes = [1, 32], strides = [1, 1]} : vector<1x512xf32> to vector<1x32xf32>
    %30 = arith.addf %28, %29 : vector<1x32xf32>
    %31 = vector.extract_strided_slice %8 {offsets = [0, 320], sizes = [1, 32], strides = [1, 1]} : vector<1x512xf32> to vector<1x32xf32>
    %32 = arith.addf %30, %31 : vector<1x32xf32>
    %33 = vector.extract_strided_slice %8 {offsets = [0, 352], sizes = [1, 32], strides = [1, 1]} : vector<1x512xf32> to vector<1x32xf32>
    %34 = arith.addf %32, %33 : vector<1x32xf32>
    %35 = vector.extract_strided_slice %8 {offsets = [0, 384], sizes = [1, 32], strides = [1, 1]} : vector<1x512xf32> to vector<1x32xf32>
    %36 = arith.addf %34, %35 : vector<1x32xf32>
    %37 = vector.extract_strided_slice %8 {offsets = [0, 416], sizes = [1, 32], strides = [1, 1]} : vector<1x512xf32> to vector<1x32xf32>
    %38 = arith.addf %36, %37 : vector<1x32xf32>
    %39 = vector.extract_strided_slice %8 {offsets = [0, 448], sizes = [1, 32], strides = [1, 1]} : vector<1x512xf32> to vector<1x32xf32>
    %40 = arith.addf %38, %39 : vector<1x32xf32>
    %41 = vector.extract_strided_slice %8 {offsets = [0, 480], sizes = [1, 32], strides = [1, 1]} : vector<1x512xf32> to vector<1x32xf32>
    %42 = arith.addf %40, %41 : vector<1x32xf32>
    %cst_13 = arith.constant 0.001953125 : f32
    %43 = vector.broadcast %cst_13 : f32 to vector<1x32xf32>
    %44 = arith.mulf %42, %43 : vector<1x32xf32>
    %45 = vector.extract_strided_slice %11 {offsets = [0, 0], sizes = [1, 32], strides = [1, 1]} : vector<1x512xf32> to vector<1x32xf32>
    %46 = vector.extract_strided_slice %11 {offsets = [0, 32], sizes = [1, 32], strides = [1, 1]} : vector<1x512xf32> to vector<1x32xf32>
    %47 = arith.addf %45, %46 : vector<1x32xf32>
    %48 = vector.extract_strided_slice %11 {offsets = [0, 64], sizes = [1, 32], strides = [1, 1]} : vector<1x512xf32> to vector<1x32xf32>
    %49 = arith.addf %47, %48 : vector<1x32xf32>
    %50 = vector.extract_strided_slice %11 {offsets = [0, 96], sizes = [1, 32], strides = [1, 1]} : vector<1x512xf32> to vector<1x32xf32>
    %51 = arith.addf %49, %50 : vector<1x32xf32>
    %52 = vector.extract_strided_slice %11 {offsets = [0, 128], sizes = [1, 32], strides = [1, 1]} : vector<1x512xf32> to vector<1x32xf32>
    %53 = arith.addf %51, %52 : vector<1x32xf32>
    %54 = vector.extract_strided_slice %11 {offsets = [0, 160], sizes = [1, 32], strides = [1, 1]} : vector<1x512xf32> to vector<1x32xf32>
    %55 = arith.addf %53, %54 : vector<1x32xf32>
    %56 = vector.extract_strided_slice %11 {offsets = [0, 192], sizes = [1, 32], strides = [1, 1]} : vector<1x512xf32> to vector<1x32xf32>
    %57 = arith.addf %55, %56 : vector<1x32xf32>
    %58 = vector.extract_strided_slice %11 {offsets = [0, 224], sizes = [1, 32], strides = [1, 1]} : vector<1x512xf32> to vector<1x32xf32>
    %59 = arith.addf %57, %58 : vector<1x32xf32>
    %60 = vector.extract_strided_slice %11 {offsets = [0, 256], sizes = [1, 32], strides = [1, 1]} : vector<1x512xf32> to vector<1x32xf32>
    %61 = arith.addf %59, %60 : vector<1x32xf32>
    %62 = vector.extract_strided_slice %11 {offsets = [0, 288], sizes = [1, 32], strides = [1, 1]} : vector<1x512xf32> to vector<1x32xf32>
    %63 = arith.addf %61, %62 : vector<1x32xf32>
    %64 = vector.extract_strided_slice %11 {offsets = [0, 320], sizes = [1, 32], strides = [1, 1]} : vector<1x512xf32> to vector<1x32xf32>
    %65 = arith.addf %63, %64 : vector<1x32xf32>
    %66 = vector.extract_strided_slice %11 {offsets = [0, 352], sizes = [1, 32], strides = [1, 1]} : vector<1x512xf32> to vector<1x32xf32>
    %67 = arith.addf %65, %66 : vector<1x32xf32>
    %68 = vector.extract_strided_slice %11 {offsets = [0, 384], sizes = [1, 32], strides = [1, 1]} : vector<1x512xf32> to vector<1x32xf32>
    %69 = arith.addf %67, %68 : vector<1x32xf32>
    %70 = vector.extract_strided_slice %11 {offsets = [0, 416], sizes = [1, 32], strides = [1, 1]} : vector<1x512xf32> to vector<1x32xf32>
    %71 = arith.addf %69, %70 : vector<1x32xf32>
    %72 = vector.extract_strided_slice %11 {offsets = [0, 448], sizes = [1, 32], strides = [1, 1]} : vector<1x512xf32> to vector<1x32xf32>
    %73 = arith.addf %71, %72 : vector<1x32xf32>
    %74 = vector.extract_strided_slice %11 {offsets = [0, 480], sizes = [1, 32], strides = [1, 1]} : vector<1x512xf32> to vector<1x32xf32>
    %75 = arith.addf %73, %74 : vector<1x32xf32>
    %cst_14 = arith.constant 0.001953125 : f32
    %76 = vector.broadcast %cst_14 : f32 to vector<1x32xf32>
    %77 = arith.mulf %75, %76 : vector<1x32xf32>
    %78 = arith.mulf %44, %44 : vector<1x32xf32>
    %79 = arith.subf %77, %78 : vector<1x32xf32>
    %cst_15 = arith.constant 0.000000e+00 : f32
    %80 = vector.broadcast %cst_15 : f32 to vector<1x32xf32>
    %81 = arith.maximumf %79, %80 : vector<1x32xf32>
    %cst_16 = arith.constant 9.99999974E-6 : f32
    %82 = vector.broadcast %cst_16 : f32 to vector<1x32xf32>
    %83 = arith.addf %81, %82 : vector<1x32xf32>
    %84 = math.rsqrt %83 : vector<1x32xf32>
    %85 = arith.mulf %4, %84 : vector<1x32xf32>
    %86 = arith.mulf %44, %85 : vector<1x32xf32>
    %87 = arith.subf %5, %86 : vector<1x32xf32>
    %88 = tpu.concatenate %85, %85, %85, %85, %85, %85, %85, %85, %85, %85, %85, %85, %85, %85, %85, %85 in 1 : vector<1x32xf32>, vector<1x32xf32>, vector<1x32xf32>, vector<1x32xf32>, vector<1x32xf32>, vector<1x32xf32>, vector<1x32xf32>, vector<1x32xf32>, vector<1x32xf32>, vector<1x32xf32>, vector<1x32xf32>, vector<1x32xf32>, vector<1x32xf32>, vector<1x32xf32>, vector<1x32xf32>, vector<1x32xf32> -> vector<1x512xf32>
    %89 = vector.shape_cast %88 : vector<1x512xf32> to vector<1x1x512xf32>
    %90 = tpu.concatenate %87, %87, %87, %87, %87, %87, %87, %87, %87, %87, %87, %87, %87, %87, %87, %87 in 1 : vector<1x32xf32>, vector<1x32xf32>, vector<1x32xf32>, vector<1x32xf32>, vector<1x32xf32>, vector<1x32xf32>, vector<1x32xf32>, vector<1x32xf32>, vector<1x32xf32>, vector<1x32xf32>, vector<1x32xf32>, vector<1x32xf32>, vector<1x32xf32>, vector<1x32xf32>, vector<1x32xf32>, vector<1x32xf32> -> vector<1x512xf32>
    %91 = vector.shape_cast %90 : vector<1x512xf32> to vector<1x1x512xf32>
    %92 = vector.broadcast %89 : vector<1x1x512xf32> to vector<2x16x512xf32>
    %93 = arith.mulf %0, %92 : vector<2x16x512xf32>
    %94 = vector.broadcast %91 : vector<1x1x512xf32> to vector<2x16x512xf32>
    %95 = arith.addf %93, %94 : vector<2x16x512xf32>
    %cst_17 = arith.constant 0.000000e+00 : f32
    %96 = vector.broadcast %cst_17 : f32 to vector<2x16x512xf32>
    %97 = arith.subf %96, %95 : vector<2x16x512xf32>
    %98 = math.exp %97 : vector<2x16x512xf32>
    %cst_18 = arith.constant 1.000000e+00 : f32
    %99 = vector.broadcast %cst_18 : f32 to vector<2x16x512xf32>
    %100 = arith.addf %99, %98 : vector<2x16x512xf32>
    %101 = tpu.reciprocal %100 {approx = true} : vector<2x16x512xf32> -> vector<2x16x512xf32>
    %102 = arith.mulf %95, %101 : vector<2x16x512xf32>
    %c0_19 = arith.constant 0 : index
    %c0_20 = arith.constant 0 : index
    %103 = vector.load %arg4[%c0_19, %c0_20] : memref<1x512xf32, #tpu.memory_space<vmem>>, vector<1x512xf32>
    %c0_21 = arith.constant 0 : index
    %c1 = arith.constant 1 : index
    %c0_22 = arith.constant 0 : index
    %104 = vector.load %arg12[%c0_21, %c1, %c0_22] : memref<2x18x512xf32, #tpu.memory_space<vmem>>, vector<2x16x512xf32>
    tpu.vector_store %arg12[%c0_21, %c1, %c0_22], %102 {strides = array<i32>} : memref<2x18x512xf32, #tpu.memory_space<vmem>>, vector<2x16x512xf32>,
    %c0_23 = arith.constant 0 : index
    %c0_24 = arith.constant 0 : index
    %c0_25 = arith.constant 0 : index
    %105 = vector.load %arg12[%c0_23, %c0_24, %c0_25] : memref<2x18x512xf32, #tpu.memory_space<vmem>>, vector<2x16x512xf32>
    %106 = vector.shape_cast %105 : vector<2x16x512xf32> to vector<32x512xf32>
    %c0_26 = arith.constant 0 : index
    %c1_27 = arith.constant 1 : index
    %c0_28 = arith.constant 0 : index
    %107 = vector.load %arg12[%c0_26, %c1_27, %c0_28] : memref<2x18x512xf32, #tpu.memory_space<vmem>>, vector<2x16x512xf32>
    %108 = vector.shape_cast %107 : vector<2x16x512xf32> to vector<32x512xf32>
    %c0_29 = arith.constant 0 : index
    %c2 = arith.constant 2 : index
    %c0_30 = arith.constant 0 : index
    %109 = vector.load %arg12[%c0_29, %c2, %c0_30] : memref<2x18x512xf32, #tpu.memory_space<vmem>>, vector<2x16x512xf32>
    %110 = vector.shape_cast %109 : vector<2x16x512xf32> to vector<32x512xf32>
    %111 = tpu.concatenate %106, %108, %110 in 1 : vector<32x512xf32>, vector<32x512xf32>, vector<32x512xf32> -> vector<32x1536xf32>
    %112 = arith.truncf %111 : vector<32x1536xf32> to vector<32x1536xbf16>
    %c0_31 = arith.constant 0 : index
    %c0_32 = arith.constant 0 : index
    %113 = vector.load %arg3[%c0_31, %c0_32] : memref<1536x512xbf16, #tpu.memory_space<vmem>>, vector<1536x512xbf16>
    %cst_33 = arith.constant dense<0.000000e+00> : vector<32x512xf32>
    %114 = tpu.matmul %112, %113, %cst_33 {dimension_numbers = #tpu.dot_dimension_numbers<[1], [0], [0], [1], [0, 0, 1, 1], [], []>} : vector<32x1536xbf16>, vector<1536x512xbf16>, vector<32x512xf32> -> vector<32x512xf32>
    %115 = vector.broadcast %103 : vector<1x512xf32> to vector<32x512xf32>
    %116 = arith.addf %114, %115 : vector<32x512xf32>
    %117 = vector.shape_cast %116 : vector<32x512xf32> to vector<2x16x512xf32>
    %c0_34 = arith.constant 0 : index
    %c0_35 = arith.constant 0 : index
    %118 = vector.load %arg5[%c0_34, %c0_35] : memref<1x32xf32, #tpu.memory_space<vmem>>, vector<1x32xf32>
    %c0_36 = arith.constant 0 : index
    %c0_37 = arith.constant 0 : index
    %119 = vector.load %arg6[%c0_36, %c0_37] : memref<1x32xf32, #tpu.memory_space<vmem>>, vector<1x32xf32>
    %120 = vector.shape_cast %117 : vector<2x16x512xf32> to vector<32x512xf32>
    %cst_38 = arith.constant dense<0.000000e+00> : vector<512xf32>
    %121 = vector.multi_reduction <add>, %120, %cst_38 [0] : vector<32x512xf32> to vector<512xf32>
    %122 = vector.shape_cast %121 : vector<512xf32> to vector<1x512xf32>
    %123 = arith.mulf %120, %120 : vector<32x512xf32>
    %cst_39 = arith.constant dense<0.000000e+00> : vector<512xf32>
    %124 = vector.multi_reduction <add>, %123, %cst_39 [0] : vector<32x512xf32> to vector<512xf32>
    %125 = vector.shape_cast %124 : vector<512xf32> to vector<1x512xf32>
    %126 = vector.extract_strided_slice %122 {offsets = [0, 0], sizes = [1, 32], strides = [1, 1]} : vector<1x512xf32> to vector<1x32xf32>
    %127 = vector.extract_strided_slice %122 {offsets = [0, 32], sizes = [1, 32], strides = [1, 1]} : vector<1x512xf32> to vector<1x32xf32>
    %128 = arith.addf %126, %127 : vector<1x32xf32>
    %129 = vector.extract_strided_slice %122 {offsets = [0, 64], sizes = [1, 32], strides = [1, 1]} : vector<1x512xf32> to vector<1x32xf32>
    %130 = arith.addf %128, %129 : vector<1x32xf32>
    %131 = vector.extract_strided_slice %122 {offsets = [0, 96], sizes = [1, 32], strides = [1, 1]} : vector<1x512xf32> to vector<1x32xf32>
    %132 = arith.addf %130, %131 : vector<1x32xf32>
    %133 = vector.extract_strided_slice %122 {offsets = [0, 128], sizes = [1, 32], strides = [1, 1]} : vector<1x512xf32> to vector<1x32xf32>
    %134 = arith.addf %132, %133 : vector<1x32xf32>
    %135 = vector.extract_strided_slice %122 {offsets = [0, 160], sizes = [1, 32], strides = [1, 1]} : vector<1x512xf32> to vector<1x32xf32>
    %136 = arith.addf %134, %135 : vector<1x32xf32>
    %137 = vector.extract_strided_slice %122 {offsets = [0, 192], sizes = [1, 32], strides = [1, 1]} : vector<1x512xf32> to vector<1x32xf32>
    %138 = arith.addf %136, %137 : vector<1x32xf32>
    %139 = vector.extract_strided_slice %122 {offsets = [0, 224], sizes = [1, 32], strides = [1, 1]} : vector<1x512xf32> to vector<1x32xf32>
    %140 = arith.addf %138, %139 : vector<1x32xf32>
    %141 = vector.extract_strided_slice %122 {offsets = [0, 256], sizes = [1, 32], strides = [1, 1]} : vector<1x512xf32> to vector<1x32xf32>
    %142 = arith.addf %140, %141 : vector<1x32xf32>
    %143 = vector.extract_strided_slice %122 {offsets = [0, 288], sizes = [1, 32], strides = [1, 1]} : vector<1x512xf32> to vector<1x32xf32>
    %144 = arith.addf %142, %143 : vector<1x32xf32>
    %145 = vector.extract_strided_slice %122 {offsets = [0, 320], sizes = [1, 32], strides = [1, 1]} : vector<1x512xf32> to vector<1x32xf32>
    %146 = arith.addf %144, %145 : vector<1x32xf32>
    %147 = vector.extract_strided_slice %122 {offsets = [0, 352], sizes = [1, 32], strides = [1, 1]} : vector<1x512xf32> to vector<1x32xf32>
    %148 = arith.addf %146, %147 : vector<1x32xf32>
    %149 = vector.extract_strided_slice %122 {offsets = [0, 384], sizes = [1, 32], strides = [1, 1]} : vector<1x512xf32> to vector<1x32xf32>
    %150 = arith.addf %148, %149 : vector<1x32xf32>
    %151 = vector.extract_strided_slice %122 {offsets = [0, 416], sizes = [1, 32], strides = [1, 1]} : vector<1x512xf32> to vector<1x32xf32>
    %152 = arith.addf %150, %151 : vector<1x32xf32>
    %153 = vector.extract_strided_slice %122 {offsets = [0, 448], sizes = [1, 32], strides = [1, 1]} : vector<1x512xf32> to vector<1x32xf32>
    %154 = arith.addf %152, %153 : vector<1x32xf32>
    %155 = vector.extract_strided_slice %122 {offsets = [0, 480], sizes = [1, 32], strides = [1, 1]} : vector<1x512xf32> to vector<1x32xf32>
    %156 = arith.addf %154, %155 : vector<1x32xf32>
    %cst_40 = arith.constant 0.001953125 : f32
    %157 = vector.broadcast %cst_40 : f32 to vector<1x32xf32>
    %158 = arith.mulf %156, %157 : vector<1x32xf32>
    %159 = vector.extract_strided_slice %125 {offsets = [0, 0], sizes = [1, 32], strides = [1, 1]} : vector<1x512xf32> to vector<1x32xf32>
    %160 = vector.extract_strided_slice %125 {offsets = [0, 32], sizes = [1, 32], strides = [1, 1]} : vector<1x512xf32> to vector<1x32xf32>
    %161 = arith.addf %159, %160 : vector<1x32xf32>
    %162 = vector.extract_strided_slice %125 {offsets = [0, 64], sizes = [1, 32], strides = [1, 1]} : vector<1x512xf32> to vector<1x32xf32>
    %163 = arith.addf %161, %162 : vector<1x32xf32>
    %164 = vector.extract_strided_slice %125 {offsets = [0, 96], sizes = [1, 32], strides = [1, 1]} : vector<1x512xf32> to vector<1x32xf32>
    %165 = arith.addf %163, %164 : vector<1x32xf32>
    %166 = vector.extract_strided_slice %125 {offsets = [0, 128], sizes = [1, 32], strides = [1, 1]} : vector<1x512xf32> to vector<1x32xf32>
    %167 = arith.addf %165, %166 : vector<1x32xf32>
    %168 = vector.extract_strided_slice %125 {offsets = [0, 160], sizes = [1, 32], strides = [1, 1]} : vector<1x512xf32> to vector<1x32xf32>
    %169 = arith.addf %167, %168 : vector<1x32xf32>
    %170 = vector.extract_strided_slice %125 {offsets = [0, 192], sizes = [1, 32], strides = [1, 1]} : vector<1x512xf32> to vector<1x32xf32>
    %171 = arith.addf %169, %170 : vector<1x32xf32>
    %172 = vector.extract_strided_slice %125 {offsets = [0, 224], sizes = [1, 32], strides = [1, 1]} : vector<1x512xf32> to vector<1x32xf32>
    %173 = arith.addf %171, %172 : vector<1x32xf32>
    %174 = vector.extract_strided_slice %125 {offsets = [0, 256], sizes = [1, 32], strides = [1, 1]} : vector<1x512xf32> to vector<1x32xf32>
    %175 = arith.addf %173, %174 : vector<1x32xf32>
    %176 = vector.extract_strided_slice %125 {offsets = [0, 288], sizes = [1, 32], strides = [1, 1]} : vector<1x512xf32> to vector<1x32xf32>
    %177 = arith.addf %175, %176 : vector<1x32xf32>
    %178 = vector.extract_strided_slice %125 {offsets = [0, 320], sizes = [1, 32], strides = [1, 1]} : vector<1x512xf32> to vector<1x32xf32>
    %179 = arith.addf %177, %178 : vector<1x32xf32>
    %180 = vector.extract_strided_slice %125 {offsets = [0, 352], sizes = [1, 32], strides = [1, 1]} : vector<1x512xf32> to vector<1x32xf32>
    %181 = arith.addf %179, %180 : vector<1x32xf32>
    %182 = vector.extract_strided_slice %125 {offsets = [0, 384], sizes = [1, 32], strides = [1, 1]} : vector<1x512xf32> to vector<1x32xf32>
    %183 = arith.addf %181, %182 : vector<1x32xf32>
    %184 = vector.extract_strided_slice %125 {offsets = [0, 416], sizes = [1, 32], strides = [1, 1]} : vector<1x512xf32> to vector<1x32xf32>
    %185 = arith.addf %183, %184 : vector<1x32xf32>
    %186 = vector.extract_strided_slice %125 {offsets = [0, 448], sizes = [1, 32], strides = [1, 1]} : vector<1x512xf32> to vector<1x32xf32>
    %187 = arith.addf %185, %186 : vector<1x32xf32>
    %188 = vector.extract_strided_slice %125 {offsets = [0, 480], sizes = [1, 32], strides = [1, 1]} : vector<1x512xf32> to vector<1x32xf32>
    %189 = arith.addf %187, %188 : vector<1x32xf32>
    %cst_41 = arith.constant 0.001953125 : f32
    %190 = vector.broadcast %cst_41 : f32 to vector<1x32xf32>
    %191 = arith.mulf %189, %190 : vector<1x32xf32>
    %192 = arith.mulf %158, %158 : vector<1x32xf32>
    %193 = arith.subf %191, %192 : vector<1x32xf32>
    %cst_42 = arith.constant 0.000000e+00 : f32
    %194 = vector.broadcast %cst_42 : f32 to vector<1x32xf32>
    %195 = arith.maximumf %193, %194 : vector<1x32xf32>
    %cst_43 = arith.constant 9.99999974E-6 : f32
    %196 = vector.broadcast %cst_43 : f32 to vector<1x32xf32>
    %197 = arith.addf %195, %196 : vector<1x32xf32>
    %198 = math.rsqrt %197 : vector<1x32xf32>
    %199 = arith.mulf %118, %198 : vector<1x32xf32>
    %200 = arith.mulf %158, %199 : vector<1x32xf32>
    %201 = arith.subf %119, %200 : vector<1x32xf32>
    %202 = tpu.concatenate %199, %199, %199, %199, %199, %199, %199, %199, %199, %199, %199, %199, %199, %199, %199, %199 in 1 : vector<1x32xf32>, vector<1x32xf32>, vector<1x32xf32>, vector<1x32xf32>, vector<1x32xf32>, vector<1x32xf32>, vector<1x32xf32>, vector<1x32xf32>, vector<1x32xf32>, vector<1x32xf32>, vector<1x32xf32>, vector<1x32xf32>, vector<1x32xf32>, vector<1x32xf32>, vector<1x32xf32>, vector<1x32xf32> -> vector<1x512xf32>
    %203 = vector.shape_cast %202 : vector<1x512xf32> to vector<1x1x512xf32>
    %204 = tpu.concatenate %201, %201, %201, %201, %201, %201, %201, %201, %201, %201, %201, %201, %201, %201, %201, %201 in 1 : vector<1x32xf32>, vector<1x32xf32>, vector<1x32xf32>, vector<1x32xf32>, vector<1x32xf32>, vector<1x32xf32>, vector<1x32xf32>, vector<1x32xf32>, vector<1x32xf32>, vector<1x32xf32>, vector<1x32xf32>, vector<1x32xf32>, vector<1x32xf32>, vector<1x32xf32>, vector<1x32xf32>, vector<1x32xf32> -> vector<1x512xf32>
    %205 = vector.shape_cast %204 : vector<1x512xf32> to vector<1x1x512xf32>
    %206 = vector.broadcast %203 : vector<1x1x512xf32> to vector<2x16x512xf32>
    %207 = arith.mulf %117, %206 : vector<2x16x512xf32>
    %208 = vector.broadcast %205 : vector<1x1x512xf32> to vector<2x16x512xf32>
    %209 = arith.addf %207, %208 : vector<2x16x512xf32>
    %cst_44 = arith.constant 0.000000e+00 : f32
    %210 = vector.broadcast %cst_44 : f32 to vector<2x16x512xf32>
    %211 = arith.subf %210, %209 : vector<2x16x512xf32>
    %212 = math.exp %211 : vector<2x16x512xf32>
    %cst_45 = arith.constant 1.000000e+00 : f32
    %213 = vector.broadcast %cst_45 : f32 to vector<2x16x512xf32>
    %214 = arith.addf %213, %212 : vector<2x16x512xf32>
    %215 = tpu.reciprocal %214 {approx = true} : vector<2x16x512xf32> -> vector<2x16x512xf32>
    %216 = arith.mulf %209, %215 : vector<2x16x512xf32>
    %c0_46 = arith.constant 0 : index
    %c0_47 = arith.constant 0 : index
    %217 = vector.load %arg8[%c0_46, %c0_47] : memref<1x512xf32, #tpu.memory_space<vmem>>, vector<1x512xf32>
    %c0_48 = arith.constant 0 : index
    %c1_49 = arith.constant 1 : index
    %c0_50 = arith.constant 0 : index
    %218 = vector.load %arg12[%c0_48, %c1_49, %c0_50] : memref<2x18x512xf32, #tpu.memory_space<vmem>>, vector<2x16x512xf32>
    tpu.vector_store %arg12[%c0_48, %c1_49, %c0_50], %216 {strides = array<i32>} : memref<2x18x512xf32, #tpu.memory_space<vmem>>, vector<2x16x512xf32>,
    %c0_51 = arith.constant 0 : index
    %c0_52 = arith.constant 0 : index
    %c0_53 = arith.constant 0 : index
    %219 = vector.load %arg12[%c0_51, %c0_52, %c0_53] : memref<2x18x512xf32, #tpu.memory_space<vmem>>, vector<2x16x512xf32>
    %220 = vector.shape_cast %219 : vector<2x16x512xf32> to vector<32x512xf32>
    %c0_54 = arith.constant 0 : index
    %c1_55 = arith.constant 1 : index
    %c0_56 = arith.constant 0 : index
    %221 = vector.load %arg12[%c0_54, %c1_55, %c0_56] : memref<2x18x512xf32, #tpu.memory_space<vmem>>, vector<2x16x512xf32>
    %222 = vector.shape_cast %221 : vector<2x16x512xf32> to vector<32x512xf32>
    %c0_57 = arith.constant 0 : index
    %c2_58 = arith.constant 2 : index
    %c0_59 = arith.constant 0 : index
    %223 = vector.load %arg12[%c0_57, %c2_58, %c0_59] : memref<2x18x512xf32, #tpu.memory_space<vmem>>, vector<2x16x512xf32>
    %224 = vector.shape_cast %223 : vector<2x16x512xf32> to vector<32x512xf32>
    %225 = tpu.concatenate %220, %222, %224 in 1 : vector<32x512xf32>, vector<32x512xf32>, vector<32x512xf32> -> vector<32x1536xf32>
    %226 = arith.truncf %225 : vector<32x1536xf32> to vector<32x1536xbf16>
    %c0_60 = arith.constant 0 : index
    %c0_61 = arith.constant 0 : index
    %227 = vector.load %arg7[%c0_60, %c0_61] : memref<1536x512xbf16, #tpu.memory_space<vmem>>, vector<1536x512xbf16>
    %cst_62 = arith.constant dense<0.000000e+00> : vector<32x512xf32>
    %228 = tpu.matmul %226, %227, %cst_62 {dimension_numbers = #tpu.dot_dimension_numbers<[1], [0], [0], [1], [0, 0, 1, 1], [], []>} : vector<32x1536xbf16>, vector<1536x512xbf16>, vector<32x512xf32> -> vector<32x512xf32>
    %229 = vector.broadcast %217 : vector<1x512xf32> to vector<32x512xf32>
    %230 = arith.addf %228, %229 : vector<32x512xf32>
    %231 = vector.shape_cast %230 : vector<32x512xf32> to vector<2x16x512xf32>
    %cst_63 = arith.constant dense<0.000000e+00> : vector<2x512xf32>
    %232 = vector.multi_reduction <add>, %231, %cst_63 [1] : vector<2x16x512xf32> to vector<2x512xf32>
    %233 = vector.extract_strided_slice %232 {offsets = [0, 0], sizes = [2, 32], strides = [1, 1]} : vector<2x512xf32> to vector<2x32xf32>
    %234 = vector.extract_strided_slice %232 {offsets = [0, 32], sizes = [2, 32], strides = [1, 1]} : vector<2x512xf32> to vector<2x32xf32>
    %235 = arith.addf %233, %234 : vector<2x32xf32>
    %236 = vector.extract_strided_slice %232 {offsets = [0, 64], sizes = [2, 32], strides = [1, 1]} : vector<2x512xf32> to vector<2x32xf32>
    %237 = arith.addf %235, %236 : vector<2x32xf32>
    %238 = vector.extract_strided_slice %232 {offsets = [0, 96], sizes = [2, 32], strides = [1, 1]} : vector<2x512xf32> to vector<2x32xf32>
    %239 = arith.addf %237, %238 : vector<2x32xf32>
    %240 = vector.extract_strided_slice %232 {offsets = [0, 128], sizes = [2, 32], strides = [1, 1]} : vector<2x512xf32> to vector<2x32xf32>
    %241 = arith.addf %239, %240 : vector<2x32xf32>
    %242 = vector.extract_strided_slice %232 {offsets = [0, 160], sizes = [2, 32], strides = [1, 1]} : vector<2x512xf32> to vector<2x32xf32>
    %243 = arith.addf %241, %242 : vector<2x32xf32>
    %244 = vector.extract_strided_slice %232 {offsets = [0, 192], sizes = [2, 32], strides = [1, 1]} : vector<2x512xf32> to vector<2x32xf32>
    %245 = arith.addf %243, %244 : vector<2x32xf32>
    %246 = vector.extract_strided_slice %232 {offsets = [0, 224], sizes = [2, 32], strides = [1, 1]} : vector<2x512xf32> to vector<2x32xf32>
    %247 = arith.addf %245, %246 : vector<2x32xf32>
    %248 = vector.extract_strided_slice %232 {offsets = [0, 256], sizes = [2, 32], strides = [1, 1]} : vector<2x512xf32> to vector<2x32xf32>
    %249 = arith.addf %247, %248 : vector<2x32xf32>
    %250 = vector.extract_strided_slice %232 {offsets = [0, 288], sizes = [2, 32], strides = [1, 1]} : vector<2x512xf32> to vector<2x32xf32>
    %251 = arith.addf %249, %250 : vector<2x32xf32>
    %252 = vector.extract_strided_slice %232 {offsets = [0, 320], sizes = [2, 32], strides = [1, 1]} : vector<2x512xf32> to vector<2x32xf32>
    %253 = arith.addf %251, %252 : vector<2x32xf32>
    %254 = vector.extract_strided_slice %232 {offsets = [0, 352], sizes = [2, 32], strides = [1, 1]} : vector<2x512xf32> to vector<2x32xf32>
    %255 = arith.addf %253, %254 : vector<2x32xf32>
    %256 = vector.extract_strided_slice %232 {offsets = [0, 384], sizes = [2, 32], strides = [1, 1]} : vector<2x512xf32> to vector<2x32xf32>
    %257 = arith.addf %255, %256 : vector<2x32xf32>
    %258 = vector.extract_strided_slice %232 {offsets = [0, 416], sizes = [2, 32], strides = [1, 1]} : vector<2x512xf32> to vector<2x32xf32>
    %259 = arith.addf %257, %258 : vector<2x32xf32>
    %260 = vector.extract_strided_slice %232 {offsets = [0, 448], sizes = [2, 32], strides = [1, 1]} : vector<2x512xf32> to vector<2x32xf32>
    %261 = arith.addf %259, %260 : vector<2x32xf32>
    %262 = vector.extract_strided_slice %232 {offsets = [0, 480], sizes = [2, 32], strides = [1, 1]} : vector<2x512xf32> to vector<2x32xf32>
    %263 = arith.addf %261, %262 : vector<2x32xf32>
    %cst_64 = arith.constant 3.906250e-03 : f32
    %264 = vector.broadcast %cst_64 : f32 to vector<2x32xf32>
    %265 = arith.mulf %263, %264 : vector<2x32xf32>
    %266 = arith.truncf %265 : vector<2x32xf32> to vector<2x32xbf16>
    %c0_65 = arith.constant 0 : index
    %c0_66 = arith.constant 0 : index
    %267 = vector.load %arg9[%c0_65, %c0_66] : memref<32x2xbf16, #tpu.memory_space<vmem>>, vector<32x2xbf16>
    %cst_67 = arith.constant dense<0.000000e+00> : vector<2x2xf32>
    %268 = tpu.matmul %266, %267, %cst_67 {dimension_numbers = #tpu.dot_dimension_numbers<[1], [0], [0], [1], [0, 0, 1, 1], [], []>} : vector<2x32xbf16>, vector<32x2xbf16>, vector<2x2xf32> -> vector<2x2xf32>
    %cst_68 = arith.constant 0.000000e+00 : f32
    %269 = vector.broadcast %cst_68 : f32 to vector<2x2xf32>
    %270 = arith.maximumf %268, %269 : vector<2x2xf32>
    %271 = arith.truncf %270 : vector<2x2xf32> to vector<2x2xbf16>
    %c0_69 = arith.constant 0 : index
    %c0_70 = arith.constant 0 : index
    %272 = vector.load %arg10[%c0_69, %c0_70] : memref<2x32xbf16, #tpu.memory_space<vmem>>, vector<2x32xbf16>
    %cst_71 = arith.constant dense<0.000000e+00> : vector<2x32xf32>
    %273 = tpu.matmul %271, %272, %cst_71 {dimension_numbers = #tpu.dot_dimension_numbers<[1], [0], [0], [1], [0, 0, 1, 1], [], []>} : vector<2x2xbf16>, vector<2x32xbf16>, vector<2x32xf32> -> vector<2x32xf32>
    %cst_72 = arith.constant 0.000000e+00 : f32
    %274 = vector.broadcast %cst_72 : f32 to vector<2x32xf32>
    %275 = arith.subf %274, %273 : vector<2x32xf32>
    %276 = math.exp %275 : vector<2x32xf32>
    %cst_73 = arith.constant 1.000000e+00 : f32
    %277 = vector.broadcast %cst_73 : f32 to vector<2x32xf32>
    %278 = arith.addf %277, %276 : vector<2x32xf32>
    %279 = tpu.reciprocal %278 {approx = true} : vector<2x32xf32> -> vector<2x32xf32>
    %280 = tpu.concatenate %279, %279, %279, %279, %279, %279, %279, %279, %279, %279, %279, %279, %279, %279, %279, %279 in 1 : vector<2x32xf32>, vector<2x32xf32>, vector<2x32xf32>, vector<2x32xf32>, vector<2x32xf32>, vector<2x32xf32>, vector<2x32xf32>, vector<2x32xf32>, vector<2x32xf32>, vector<2x32xf32>, vector<2x32xf32>, vector<2x32xf32>, vector<2x32xf32>, vector<2x32xf32>, vector<2x32xf32>, vector<2x32xf32> -> vector<2x512xf32>
    %281 = vector.shape_cast %280 : vector<2x512xf32> to vector<2x1x512xf32>
    %282 = vector.broadcast %281 : vector<2x1x512xf32> to vector<2x16x512xf32>
    %283 = arith.mulf %231, %282 : vector<2x16x512xf32>
    %284 = arith.addf %0, %283 : vector<2x16x512xf32>
    %c0_74 = arith.constant 0 : index
    %c0_75 = arith.constant 0 : index
    %c0_76 = arith.constant 0 : index
    %285 = vector.load %arg11[%c0_74, %c0_75, %c0_76] : memref<2x16x512xf32, #tpu.memory_space<vmem>>, vector<2x16x512xf32>
    tpu.vector_store %arg11[%c0_74, %c0_75, %c0_76], %284 {strides = array<i32>} : memref<2x16x512xf32, #tpu.memory_space<vmem>>, vector<2x16x512xf32>,
    return
  }
}

</mosaic_0001>

<bundles_post_ra>
// kernel: encoding_residual_cell.1
= control target key start
LH: loop header
LB: loop body
LE: loop exit
PB: predicated region body
PF: predicated region fallthrough
CT: control target
= control target key end

     0   :  { %16 = vsyncpa [#allocation4], 0  ;;  %s11623_s0 = inlined_call_operand.vmem [shape: f32[2,16,512], index: 0, kind: input, shape index: {}]   ;;  %s11624_s1 = inlined_call_operand.hbm [shape: f32[1,32], index: 1, kind: input, shape index: {}]   ;;  %s11625_s2 = inlined_call_operand.hbm [shape: f32[1,32], index: 2, kind: input, shape index: {}]   ;;  %s11626_s3 = inlined_call_operand.hbm [shape: bf16[1536,512], index: 3, kind: input, shape index: {}]   ;;  %s11627_s4 = inlined_call_operand.hbm [shape: f32[1,512], index: 4, kind: input, shape index: {}]   ;;  %s11628_s5 = inlined_call_operand.hbm [shape: f32[1,32], index: 5, kind: input, shape index: {}]   ;;  %s11629_s6 = inlined_call_operand.hbm [shape: f32[1,32], index: 6, kind: input, shape index: {}]   ;;  %s11630_s7 = inlined_call_operand.hbm [shape: bf16[1536,512], index: 7, kind: input, shape index: {}]   ;;  %s11631_s8 = inlined_call_operand.hbm [shape: f32[1,512], index: 8, kind: input, shape index: {}]   ;;  %s11632_s9 = inlined_call_operand.vmem [shape: bf16[32,2], index: 9, kind: input, shape index: {}]   ;;  %s11633_s10 = inlined_call_operand.hbm [shape: bf16[2,32], index: 10, kind: input, shape index: {}]   ;;  %s11634_s11 = inlined_call_operand.vmem [shape: f32[2,16,512], index: 11, kind: output, shape index: {}]  }
   0x1   :  { %17 = vsyncpa [#allocation6], 0 }
   0x2   :  { %18 = vsyncpa [#allocation9], 0 }
   0x3   :  { %19 = vsyncpa [#allocation12], 0 }
   0x4   :  { %20 = vsyncpa [#allocation15], 0  ;;  %s10239_s17 = smov [#allocation5]   ;;  %s10240_s19 = smov [#allocation8]  }
   0x5   :  { %s39_s18 = sshll.u32 %s10239_s17, 4  ;;  %s61_s20 = sshll.u32 %s10240_s19, 4  ;;  %s40_s18 = int_to_ptr.vmem [resolvable:$true] %s39_s18  ;;  %s62_s20 = int_to_ptr.vmem [resolvable:$true] %s61_s20 }
   0x6   :  { %s10057_s21 = scalar_lea.vmem %s40_s18, 16  ;;  %s10061_s22 = scalar_lea.vmem %s40_s18, 32 }
   0x7   :  { %p10058_p0 = scmp.ne.s32.totalorder %s40_s18, %s10057_s21  ;;  %p10062_p1 = scmp.lt.s32.totalorder %s40_s18, %s40_s18 }
   0x8   :  { %p10063_p2 = scmp.lt.s32.totalorder %s10061_s22, %s10057_s21 }
   0xa   :  { %p10064_p3 = por %p10063_p2, %p10062_p1 }
   0xc   :  { %p10065_p4 = pnand %p10064_p3, %p10058_p0 }
   0xe   :  { %10068 = shalt.err (!%p10065_p4)
}
   0xf   :  { %42 = dma.hbm_to_vmem [thread:$0]  %s11625_s2, 16, %s40_s18, [#allocation6]  }
  0x10   :  { %s10077_s25 = scalar_lea.vmem %s62_s20, 64  ;;  %p10082_p6 = scmp.lt.s32.totalorder %s62_s20, %s62_s20 }
  0x11   :  { %p10078_p5 = scmp.ne.s32.totalorder %s62_s20, %s10077_s25  ;;  %p10083_p7 = scmp.lt.s32.totalorder %s10077_s25, %s10077_s25 }
  0x13   :  { %p10084_p8 = por %p10083_p7, %p10082_p6 }
  0x15   :  { %p10085_p9 = pnand %p10084_p8, %p10078_p5 }
  0x17   :  { %10088 = shalt.err (!%p10085_p9)
}
  0x18   :  { %64 = dma.hbm_to_vmem [thread:$0]  %s11627_s4, 64, %s62_s20, [#allocation9]  }
  0x19   :  { %s10241_s28 = smov [#allocation11]   ;;  %s10242_s30 = smov [#allocation14]  }
  0x1a   :  { %s81_s29 = sshll.u32 %s10241_s28, 4  ;;  %s103_s12 = sshll.u32 %s10242_s30, 4  ;;  %s82_s29 = int_to_ptr.vmem [resolvable:$true] %s81_s29  ;;  %s104_s12 = int_to_ptr.vmem [resolvable:$true] %s103_s12 }
  0x1b   :  { %s10097_s13 = scalar_lea.vmem %s82_s29, 16  ;;  %s10101_s2 = scalar_lea.vmem %s82_s29, 32 }
  0x1c   :  { %p10098_p10 = scmp.ne.s32.totalorder %s82_s29, %s10097_s13  ;;  %p10102_p11 = scmp.lt.s32.totalorder %s82_s29, %s82_s29 }
  0x1d   :  { %p10103_p12 = scmp.lt.s32.totalorder %s10101_s2, %s10097_s13 }
  0x1f   :  { %p10104_p13 = por %p10103_p12, %p10102_p11 }
  0x21   :  { %p10105_p0 = pnand %p10104_p13, %p10098_p10 }
  0x23   :  { %10108 = shalt.err (!%p10105_p0)
}
  0x24   :  { %84 = dma.hbm_to_vmem [thread:$0]  %s11629_s6, 16, %s82_s29, [#allocation12]  }
  0x25   :  { %s10117_s16 = scalar_lea.vmem %s104_s12, 64  ;;  %p10122_p2 = scmp.lt.s32.totalorder %s104_s12, %s104_s12 }
  0x26   :  { %p10118_p1 = scmp.ne.s32.totalorder %s104_s12, %s10117_s16  ;;  %p10123_p3 = scmp.lt.s32.totalorder %s10117_s16, %s10117_s16 }
  0x28   :  { %p10124_p4 = por %p10123_p3, %p10122_p2 }
  0x2a   :  { %p10125_p5 = pnand %p10124_p4, %p10118_p1 }
  0x2c   :  { %10128 = shalt.err (!%p10125_p5)
}
  0x2d   :  { %106 = dma.hbm_to_vmem [thread:$0]  %s11631_s8, 64, %s104_s12, [#allocation15]  }
  0x2e   :  { %s10243_s18 = smov [#allocation3]   ;;  %s10244_s20 = smov [#allocation7]  }
  0x2f   :  { %s29_s19 = sshll.u32 %s10243_s18, 4  ;;  %s48_s21 = sshll.u32 %s10244_s20, 4  ;;  %s30_s19 = int_to_ptr.vmem [resolvable:$true] %s29_s19  ;;  %s49_s21 = int_to_ptr.vmem [resolvable:$true] %s48_s21 }
  0x30   :  { %s10137_s22 = scalar_lea.vmem %s30_s19, 16  ;;  %s10141_s6 = scalar_lea.vmem %s30_s19, 32 }
  0x31   :  { %p10138_p6 = scmp.ne.s32.totalorder %s30_s19, %s10137_s22  ;;  %p10142_p7 = scmp.lt.s32.totalorder %s30_s19, %s30_s19 }
  0x32   :  { %p10143_p8 = scmp.lt.s32.totalorder %s10141_s6, %s10137_s22 }
  0x34   :  { %p10144_p9 = por %p10143_p8, %p10142_p7 }
  0x36   :  { %p10145_p10 = pnand %p10144_p9, %p10138_p6 }
  0x38   :  { %10148 = shalt.err (!%p10145_p10)
}
  0x39   :  { %32 = dma.hbm_to_vmem [thread:$0]  %s11624_s1, 16, %s30_s19, [#allocation4]  }
  0x3a   :  { %s10157_s25 = scalar_lea.vmem %s49_s21, 49152  ;;  %p10162_p12 = scmp.lt.s32.totalorder %s49_s21, %s49_s21 }
  0x3b   :  { %p10158_p11 = scmp.ne.s32.totalorder %s49_s21, %s10157_s25  ;;  %p10163_p13 = scmp.lt.s32.totalorder %s10157_s25, %s10157_s25 }
  0x3d   :  { %p10164_p0 = por %p10163_p13, %p10162_p12 }
  0x3f   :  { %p10165_p1 = pnand %p10164_p0, %p10158_p11 }
  0x41   :  { %10168 = shalt.err (!%p10165_p1)
}
  0x42   :  { %s10245_s8 = smov 256   ;;  %s10246_s26 = smov 16  }
  0x43   :  { %54 = dma.hbm_to_vmem [thread:$0]  %s11626_s3, 49152, %s49_s21, [#allocation6], %s10245_s8, %s10245_s8, %s10246_s26  }
  0x44   :  { %s10247_s29 = smov [#allocation10]   ;;  %s10248_s12 = smov [#allocation13]  }
  0x45   :  { %s71_s30 = sshll.u32 %s10247_s29, 4  ;;  %s90_s13 = sshll.u32 %s10248_s12, 4  ;;  %s72_s30 = int_to_ptr.vmem [resolvable:$true] %s71_s30  ;;  %s91_s13 = int_to_ptr.vmem [resolvable:$true] %s90_s13 }
  0x46   :  { %s10177_s1 = scalar_lea.vmem %s72_s30, 16  ;;  %s10181_s2 = scalar_lea.vmem %s72_s30, 32 }
  0x47   :  { %p10178_p2 = scmp.ne.s32.totalorder %s72_s30, %s10177_s1  ;;  %p10182_p3 = scmp.lt.s32.totalorder %s72_s30, %s72_s30 }
  0x48   :  { %p10183_p4 = scmp.lt.s32.totalorder %s10181_s2, %s10177_s1 }
  0x4a   :  { %p10184_p5 = por %p10183_p4, %p10182_p3 }
  0x4c   :  { %p10185_p6 = pnand %p10184_p5, %p10178_p2 }
  0x4e   :  { %10188 = shalt.err (!%p10185_p6)
}
  0x4f   :  { %74 = dma.hbm_to_vmem [thread:$0]  %s11628_s5, 16, %s72_s30, [#allocation9]  }
  0x50   :  { %s10197_s16 = scalar_lea.vmem %s91_s13, 49152  ;;  %p10202_p8 = scmp.lt.s32.totalorder %s91_s13, %s91_s13 }
  0x51   :  { %p10198_p7 = scmp.ne.s32.totalorder %s91_s13, %s10197_s16  ;;  %p10203_p9 = scmp.lt.s32.totalorder %s10197_s16, %s10197_s16 }
  0x53   :  { %p10204_p10 = por %p10203_p9, %p10202_p8 }
  0x55   :  { %p10205_p11 = pnand %p10204_p10, %p10198_p7 }
  0x57   :  { %10208 = shalt.err (!%p10205_p11)
}
  0x58   :  { %96 = dma.hbm_to_vmem [thread:$0]  %s11630_s7, 49152, %s91_s13, [#allocation12], %s10245_s8, %s10245_s8, %s10246_s26  }
  0x59   :  { %s10249_s17 = smov [#allocation16]  }
  0x5a   :  { %s115_s18 = sshll.u32 %s10249_s17, 4  ;;  %s116_s18 = int_to_ptr.vmem [resolvable:$true] %s115_s18 }
  0x5b   :  { %s10217_s19 = scalar_lea.vmem %s116_s18, 16  ;;  %s10221_s20 = scalar_lea.vmem %s116_s18, 32 }
  0x5c   :  { %p10218_p12 = scmp.ne.s32.totalorder %s116_s18, %s10217_s19  ;;  %p10222_p13 = scmp.lt.s32.totalorder %s116_s18, %s116_s18 }
  0x5d   :  { %p10223_p0 = scmp.lt.s32.totalorder %s10221_s20, %s10217_s19 }
  0x5f   :  { %p10224_p1 = por %p10223_p0, %p10222_p13 }
  0x61   :  { %p10225_p2 = pnand %p10224_p1, %p10218_p12 }
  0x63   :  { %10228 = shalt.err (!%p10225_p2)
}
  0x64   :  { %118 = dma.hbm_to_vmem [thread:$0]  %s11633_s10, 16, %s116_s18, [#allocation15]  }
  0x65   :  { %10229 = dma.done.wait [#allocation4], 16  }
  0x66   :  { %10230 = vsyncadd [#allocation4], 4294967280 }
  0x67   :  { %10231 = dma.done.wait [#allocation6], 49168  }
  0x68   :  { %10232 = vsyncadd [#allocation6], 4294918128 }
  0x69   :  { %10233 = dma.done.wait [#allocation9], 80  }
  0x6a   :  { %10234 = vsyncadd [#allocation9], 4294967216 }
  0x6b   :  { %10235 = dma.done.wait [#allocation12], 49168  }
  0x6c   :  { %10236 = vsyncadd [#allocation12], 4294918128 }
  0x6d   :  { %10237 = dma.done.wait [#allocation15], 80  }
  0x6e   :  { %10238 = vsyncadd [#allocation15], 4294967216  ;;  %v147_v0 = vld [vmem:[%s11623_s0] sm:$0xff]  ;;  %v148_v4 = vld [vmem:[%s11623_s0 + $0x8] sm:$0xff]  ;;  %s10250_s6 = smov 32   ;;  %s10251_s23 = smov 96  }
  0x6f   :  { %v151_v1 = vld [vmem:[%s11623_s0 + $0x20] sm:$0xff]  ;;  %v152_v5 = vld [vmem:[%s11623_s0 + $0x28] sm:$0xff]  ;;  %v216_v6 = vmul.f32 %v147_v0, %v147_v0  ;;  %v149_v12 = vld [vmem:[%s11623_s0 + $0x10] sm:$0xff]  ;;  %v217_v13 = vmul.f32 %v148_v4, %v148_v4  ;;  %s10252_s25 = smov 64   ;;  %vm402_vm1 = vcmask 261120   ;;  %vm404_vm2 = vcmask 523264  }
  0x70   :  { %v155_v2 = vld [vmem:[%s11623_s0 + $0x40] sm:$0xff]  ;;  %v180_v3 = vadd.f32 %v151_v1, %v147_v0  ;;  %v220_v7 = vmul.f32 %v151_v1, %v151_v1  ;;  %v156_v10 = vld [vmem:[%s11623_s0 + $0x48] sm:$0xff]  ;;  %v189_v11 = vadd.f32 %v152_v5, %v148_v4  ;;  %v221_v14 = vmul.f32 %v152_v5, %v152_v5  ;;  %v153_v17 = vld [vmem:[%s11623_s0 + $0x30] sm:$0xff] }
  0x71   :  { %v224_v8 = vmul.f32 %v155_v2, %v155_v2  ;;  %v159_v9 = vld [vmem:[%s11623_s0 + $0x60] sm:$0xff]  ;;  %v160_v16 = vld [vmem:[%s11623_s0 + $0x68] sm:$0xff]  ;;  %v157_v18 = vld [vmem:[%s11623_s0 + $0x50] sm:$0xff]  ;;  %v225_v21 = vmul.f32 %v156_v10, %v156_v10  ;;  %v198_v23 = vadd.f32 %v153_v17, %v149_v12  ;;  %v218_v30 = vmul.f32 %v149_v12, %v149_v12 }
  0x72   :  { %v181_v15 = vadd.f32 %v180_v3, %v155_v2  ;;  %v228_v19 = vmul.f32 %v159_v9, %v159_v9  ;;  %v232_v20 = vadd.f32 %v220_v7, %v216_v6  ;;  %v190_v22 = vadd.f32 %v189_v11, %v156_v10  ;;  %v161_v26 = vld [vmem:[%s11623_s0 + $0x70] sm:$0xff]  ;;  %v150_v49 = vld [vmem:[%s11623_s0 + $0x18] sm:$0xff] }
  0x73   :  { %v241_v24 = vadd.f32 %v221_v14, %v217_v13  ;;  %v199_v29 = vadd.f32 %v198_v23, %v157_v18  ;;  %v222_v31 = vmul.f32 %v153_v17, %v153_v17  ;;  %v229_v34 = vmul.f32 %v160_v16, %v160_v16  ;;  %v154_v50 = vld [vmem:[%s11623_s0 + $0x38] sm:$0xff] }
  0x74   :  { %v182_v25 = vadd.f32 %v181_v15, %v159_v9  ;;  %v233_v27 = vadd.f32 %v232_v20, %v224_v8  ;;  %v191_v28 = vadd.f32 %v190_v22, %v160_v16  ;;  %v226_v41 = vmul.f32 %v157_v18, %v157_v18  ;;  %v158_v60 = vld [vmem:[%s11623_s0 + $0x58] sm:$0xff] }
  0x75   :  { %v242_v35 = vadd.f32 %v241_v24, %v225_v21  ;;  %v200_v37 = vadd.f32 %v199_v29, %v161_v26  ;;  %v250_v42 = vadd.f32 %v222_v31, %v218_v30  ;;  %v230_v52 = vmul.f32 %v161_v26, %v161_v26  ;;  %v162_v5 = vld [vmem:[%s11623_s0 + $0x78] sm:$0xff] }
  0x76   :  { %v183_v32 = vrot.slane %v182_v25, 4  ;;  %v234_v33 = vadd.f32 %v233_v27, %v228_v19  ;;  %v192_v36 = vrot.slane %v191_v28, 4  ;;  %v207_v62 = vadd.f32 %v154_v50, %v150_v49 }
  0x77   :  { %v201_v40 = vrot.slane %v200_v37, 4  ;;  %v243_v45 = vadd.f32 %v242_v35, %v229_v34  ;;  %v251_v53 = vadd.f32 %v250_v42, %v226_v41  ;;  %v219_v63 = vmul.f32 %v150_v49, %v150_v49  ;;  %v8729_v41 = vld [vmem:[#allocation7 + $0x2e4] ss:$16 sps:$4 sm:$0xff]  }
  0x78   :  { %v184_v38 = vadd.f32 %v183_v32, %v182_v25  ;;  %v193_v39 = vadd.f32 %v192_v36, %v191_v28  ;;  %v235_v44 = vrot.slane %v234_v33, 4  ;;  %v223_v0 = vmul.f32 %v154_v50, %v154_v50  ;;  %3255 = vmatprep.subr.bf16.mxu1 %v8729_v41 }
  0x79   :  { %v202_v47 = vadd.f32 %v201_v40, %v200_v37  ;;  %v244_v57 = vrot.slane %v243_v45, 4  ;;  %v252_v61 = vadd.f32 %v251_v53, %v230_v52  ;;  %v208_v7 = vadd.f32 %v207_v62, %v158_v60  ;;  %v8727_v40 = vld [vmem:[#allocation7 + $0xe4] ss:$16 sps:$4 sm:$0xff]  }
  0x7a   :  { %v185_v43 = vrot.slane %v184_v38, 2  ;;  %v194_v46 = vrot.slane %v193_v39, 2  ;;  %v236_v56 = vadd.f32 %v235_v44, %v234_v33  ;;  %v227_v8 = vmul.f32 %v158_v60, %v158_v60  ;;  %3202 = vmatprep.subr.bf16.mxu0 %v8727_v40  ;;  %v8732_v40 = vld [vmem:[#allocation7 + $0x2e0] ss:$16 sps:$4 sm:$0xff]  }
  0x7b   :  { %v203_v55 = vrot.slane %v202_v47, 2  ;;  %v245_v4 = vadd.f32 %v244_v57, %v243_v45  ;;  %v253_v6 = vrot.slane %v252_v61, 4  ;;  %v259_v12 = vadd.f32 %v223_v0, %v219_v63  ;;  %3256 = vmatpush1.bf16.msra.mxu1 %v8732_v40  ;;  %v8810_v40 = vld [vmem:[#allocation7 + $0x340] ss:$16 sps:$4 sm:$0xff]  }
  0x7c   :  { %v186_v48 = vadd.f32 %v185_v43, %v184_v38  ;;  %v195_v51 = vadd.f32 %v194_v46, %v193_v39  ;;  %v237_v3 = vrot.slane %v236_v56, 2  ;;  %v209_v14 = vadd.f32 %v208_v7, %v162_v5 }
  0x7d   :  { %v204_v2 = vadd.f32 %v203_v55, %v202_v47  ;;  %v246_v11 = vrot.slane %v245_v4, 2  ;;  %v254_v13 = vadd.f32 %v253_v6, %v252_v61  ;;  %v231_v15 = vmul.f32 %v162_v5, %v162_v5 }
  0x7e   :  { %v187_v54 = vrot.slane %v186_v48, 1  ;;  %v196_v58 = vrot.slane %v195_v51, 1  ;;  %v238_v10 = vadd.f32 %v237_v3, %v236_v56  ;;  %v260_v19 = vadd.f32 %v259_v12, %v227_v8 }
  0x7f   :  { %v205_v9 = vrot.slane %v204_v2, 1  ;;  %v247_v18 = vadd.f32 %v246_v11, %v245_v4  ;;  %v210_v20 = vrot.slane %v209_v14, 4  ;;  %v255_v23 = vrot.slane %v254_v13, 2 }
  0x80   :  { %v10385_v59 = vadd.f32 %v187_v54, %v186_v48  ;;  %v10394_v1 = vadd.f32 %v196_v58, %v195_v51  ;;  %v239_v17 = vrot.slane %v238_v10, 1  ;;  %v261_v24 = vadd.f32 %v260_v19, %v231_v15 }
  0x81   :  { %v10407_v16 = vadd.f32 %v205_v9, %v204_v2  ;;  %v248_v22 = vrot.slane %v247_v18, 1  ;;  %v256_v26 = vadd.f32 %v255_v23, %v254_v13  ;;  %v211_v27 = vadd.f32 %v210_v20, %v209_v14 }
  0x82   :  { %277 = vrot.lane.b32.xlu1 %v10385_v59, %s10250_s6  ;;  %269 = vrot.lane.b32.xlu0 %v10385_v59, %s10251_s23  ;;  %v240_v21 = vadd.f32 %v239_v17, %v238_v10  ;;  %v262_v28 = vrot.slane %v261_v24, 4  ;;  %v163_v41 = vlaneseq  ;;  %vm406_vm3 = vcmask 785408  }
  0x83   :  { %v249_v25 = vadd.f32 %v248_v22, %v247_v18  ;;  %v257_v29 = vrot.slane %v256_v26, 1  ;;  %v212_v30 = vrot.slane %v211_v27, 2  ;;  %vm578_vm4 = vcmask 1040384  }
  0x84   :  { %v263_v31 = vadd.f32 %v262_v28, %v261_v24  ;;  %vm165_vm0 = vcmp.lt.s32.totalorder %v163_v41, 512  ;;  %vm707_vm5 = vcmask 1046528   ;;  %vm796_vm6 = vcmask 1045504  }
  0x85   :  { %v258_v32 = vadd.f32 %v257_v29, %v256_v26  ;;  %v213_v33 = vadd.f32 %v212_v30, %v211_v27  ;;  %vm10254_vm7 = vmmov 0   ;;  %vm7671_vm8 = vcmask 1041409  }
  0x86   :  { %287 = vrot.lane.b32.xlu1 %v10394_v1, %s10252_s25  ;;  %273 = vrot.lane.b32.xlu0 %v10385_v59, %s10252_s25  ;;  %v264_v34 = vrot.slane %v263_v31, 2  ;;  %vm7732_vm9 = vcmask 15360  }
  0x87   :  { %v214_v35 = vrot.slane %v213_v33, 1 }
  0x88   :  { %v265_v36 = vadd.f32 %v264_v34, %v263_v31 }
  0x89   :  { %v215_v37 = vadd.f32 %v214_v35, %v213_v33 }
  0x8a   :  { %291 = vrot.lane.b32.xlu1 %v10394_v1, %s10250_s6  ;;  %283 = vrot.lane.b32.xlu0 %v10394_v1, %s10251_s23  ;;  %v266_v38 = vrot.slane %v265_v36, 1 }
  0x8c   :  { %v267_v39 = vadd.f32 %v266_v38, %v265_v36  ;;  %v8731_v38 = vld [vmem:[#allocation7 + $0xe0] ss:$16 sps:$4 sm:$0xff]  }
  0x8d   :  { %3203 = vmatpush1.bf16.msra.mxu0 %v8731_v38  ;;  %v8809_v38 = vld [vmem:[#allocation7 + $0x140] ss:$16 sps:$4 sm:$0xff]  }
  0x8e   :  { %301 = vrot.lane.b32.xlu1 %v10407_v16, %s10252_s25  ;;  %297 = vrot.lane.b32.xlu0 %v10407_v16, %s10251_s23 }
  0x92   :  { %325 = vrot.lane.b32.xlu1 %v240_v21, %s10251_s23  ;;  %329 = vrot.lane.b32.xlu0 %v240_v21, %s10252_s25 }
  0x96   :  { %333 = vrot.lane.b32.xlu1 %v240_v21, %s10250_s6  ;;  %339 = vrot.lane.b32.xlu0 %v249_v25, %s10251_s23 }
  0x9a   :  { %305 = vrot.lane.b32.xlu1 %v10407_v16, %s10250_s6  ;;  %343 = vrot.lane.b32.xlu0 %v249_v25, %s10252_s25 }
  0x9e   :  { %347 = vrot.lane.b32.xlu1 %v249_v25, %s10250_s6  ;;  %353 = vrot.lane.b32.xlu0 %v258_v32, %s10251_s23 }
  0xa2   :  { %361 = vrot.lane.b32.xlu1 %v258_v32, %s10250_s6  ;;  %357 = vrot.lane.b32.xlu0 %v258_v32, %s10252_s25 }
  0xa6   :  { %315 = vrot.lane.b32.xlu1 %v215_v37, %s10252_s25  ;;  %311 = vrot.lane.b32.xlu0 %v215_v37, %s10251_s23 }
  0xaa   :  { %319 = vrot.lane.b32.xlu1 %v215_v37, %s10250_s6  ;;  %367 = vrot.lane.b32.xlu0 %v267_v39, %s10251_s23 }
  0xae   :  { %371 = vrot.lane.b32.xlu0 %v267_v39, %s10252_s25  ;;  %375 = vrot.lane.b32.xlu1 %v267_v39, %s10250_s6 }
  0xf4   :  { %v278_v42 = vpop.permute.xlu1 %277  ;;  %v270_v43 = vpop.permute.xlu0 %269 }
  0xf5   :  { %v272_v44 = vadd.f32 %v270_v43, %v10385_v59  ;;  %v8737_v43 = vld [vmem:[#allocation7 + $0xc0] ss:$16 sps:$4 sm:$0xff]  }
  0xf8   :  { %v288_v45 = vpop.permute.xlu1 %287  ;;  %v274_v46 = vpop.permute.xlu0 %273 }
  0xf9   :  { %v276_v47 = vadd.f32 %v274_v46, %v272_v44  ;;  %v8738_v44 = vld [vmem:[#allocation7 + $0x2c0] ss:$16 sps:$4 sm:$0xff]   ;;  %v178_v46 = vld [vmem:[#allocation3] sm:$0x1] }
  0xfb   :  { %v280_v48 = vadd.f32 %v278_v42, %v276_v47  ;;  %v8735_v42 = vld [vmem:[#allocation7 + $0x2c4] ss:$16 sps:$4 sm:$0xff]  }
  0xfc   :  { %v292_v49 = vpop.permute.xlu1 %291  ;;  %v284_v50 = vpop.permute.xlu0 %283  ;;  %3257 = vmatprep.subr.bf16.mxu1 %v8735_v42  ;;  %v8739_v47 = vld [vmem:[#allocation7 + $0xa4] ss:$16 sps:$4 sm:$0xff]   ;;  %v8815_v42 = vld [vmem:[#allocation7 + $0x120] ss:$16 sps:$4 sm:$0xff]  }
  0xfd   :  { %v281_v51 = vadd.f32 %v280_v48, %v10394_v1  ;;  %3258 = vmatpush1.bf16.msra.mxu1 %v8738_v44  ;;  %v8741_v48 = vld [vmem:[#allocation7 + $0x2a4] ss:$16 sps:$4 sm:$0xff]  }
  0xfe   :  { %3259 = vmatprep.subr.bf16.mxu1 %v8741_v48  ;;  %v8817_v44 = vld [vmem:[#allocation7 + $0x104] ss:$16 sps:$4 sm:$0xff]   ;;  %v8822_v48 = vld [vmem:[#allocation7 + $0x300] ss:$16 sps:$4 sm:$0xff]  }
  0xff   :  { %v286_v52 = vadd.f32 %v284_v50, %v281_v51  ;;  %v8744_v50 = vld [vmem:[#allocation7 + $0x2a0] ss:$16 sps:$4 sm:$0xff]  }
 0x100   :  { %v302_v53 = vpop.permute.xlu1 %301  ;;  %v298_v54 = vpop.permute.xlu0 %297 }
 0x101   :  { %v290_v55 = vadd.f32 %v288_v45, %v286_v52  ;;  %v10434_v45 = vshrl.u32 %v163_v41, 7  ;;  %3260 = vmatpush1.bf16.msra.mxu1 %v8744_v50  ;;  %v8811_v41 = vld [vmem:[#allocation7 + $0x124] ss:$16 sps:$4 sm:$0xff]  }
 0x102   :  { %v8828_v50 = vld [vmem:[#allocation7 + $0x6e4] ss:$16 sps:$4 sm:$0xff]  }
 0x103   :  { %v294_v58 = vadd.f32 %v292_v49, %v290_v55  ;;  %11649 = vst [vmem:[#allocation22_spill] sm:$0xff] %v10434_v45  ;;  %v8743_v49 = vld [vmem:[#allocation7 + $0xa0] ss:$16 sps:$4 sm:$0xff]   ;;  %v10437_v51 = vsub.s32 0, %v10434_v45 }
 0x104   :  { %v326_v56 = vpop.permute.xlu1 %325  ;;  %v330_v57 = vpop.permute.xlu0 %329 }
 0x105   :  { %v328_v60 = vadd.f32 %v326_v56, %v240_v21  ;;  %v295_v59 = vadd.f32 %v294_v58, %v10407_v16  ;;  %v8749_v56 = vld [vmem:[#allocation7 + $0x80] ss:$16 sps:$4 sm:$0xff]   ;;  %v179_v58 = vld [vmem:[#allocation5] sm:$0x1] }
 0x107   :  { %v332_v61 = vadd.f32 %v330_v57, %v328_v60  ;;  %v300_v5 = vadd.f32 %v298_v54, %v295_v59  ;;  %v8747_v54 = vld [vmem:[#allocation7 + $0x284] ss:$16 sps:$4 sm:$0xff]   ;;  %v8750_v57 = vld [vmem:[#allocation7 + $0x280] ss:$16 sps:$4 sm:$0xff]  }
 0x108   :  { %v334_v62 = vpop.permute.xlu1 %333  ;;  %v340_v63 = vpop.permute.xlu0 %339  ;;  %3261 = vmatprep.subr.bf16.mxu1 %v8747_v54  ;;  %v8751_v60 = vld [vmem:[#allocation7 + $0x64] ss:$16 sps:$4 sm:$0xff]   ;;  %v8755_v59 = vld [vmem:[#allocation7 + $0x60] ss:$16 sps:$4 sm:$0xff]  }
 0x109   :  { %v336_v0 = vadd.f32 %v334_v62, %v332_v61  ;;  %v304_v9 = vadd.f32 %v302_v53, %v300_v5  ;;  %v8745_v53 = vld [vmem:[#allocation7 + $0x84] ss:$16 sps:$4 sm:$0xff]   ;;  %3262 = vmatpush1.bf16.msra.mxu1 %v8750_v57 }
 0x10a   :  { %v8753_v61 = vld [vmem:[#allocation7 + $0x264] ss:$16 sps:$4 sm:$0xff]  }
 0x10b   :  { %v337_v2 = vadd.f32 %v336_v0, %v249_v25  ;;  %v8756_v0 = vld [vmem:[#allocation7 + $0x260] ss:$16 sps:$4 sm:$0xff]   ;;  %3263 = vmatprep.subr.bf16.mxu1 %v8753_v61 }
 0x10c   :  { %v306_v3 = vpop.permute.xlu1 %305  ;;  %v344_v4 = vpop.permute.xlu0 %343 }
 0x10d   :  { %v342_v6 = vadd.f32 %v340_v63, %v337_v2  ;;  %v308_v11 = vadd.f32 %v306_v3, %v304_v9  ;;  %v8757_v2 = vld [vmem:[#allocation7 + $0x44] ss:$16 sps:$4 sm:$0xff]   ;;  %3264 = vmatpush1.bf16.msra.mxu1 %v8756_v0  ;;  %v8767_v9 = vld [vmem:[#allocation7 + $0x20] ss:$16 sps:$4 sm:$0xff]  }
 0x10e   :  { %v8759_v3 = vld [vmem:[#allocation7 + $0x244] ss:$16 sps:$4 sm:$0xff]  }
 0x10f   :  { %v346_v1 = vadd.f32 %v344_v4, %v342_v6  ;;  %v309_v18 = vadd.f32 %v308_v11, %v215_v37  ;;  %v8761_v6 = vld [vmem:[#allocation7 + $0x40] ss:$16 sps:$4 sm:$0xff]   ;;  %3265 = vmatprep.subr.bf16.mxu1 %v8759_v3  ;;  %v8769_v11 = vld [vmem:[#allocation7 + $0x4] ss:$16 sps:$4 sm:$0xff]  }
 0x110   :  { %v348_v7 = vpop.permute.xlu1 %347  ;;  %v354_v8 = vpop.permute.xlu0 %353  ;;  %v10017_v0 = vld [vmem:[%s11623_s0 + $0x8] sm:$0xff] }
 0x111   :  { %v350_v10 = vadd.f32 %v348_v7, %v346_v1  ;;  %v8762_v1 = vld [vmem:[#allocation7 + $0x240] ss:$16 sps:$4 sm:$0xff]   ;;  %v8763_v7 = vld [vmem:[#allocation7 + $0x24] ss:$16 sps:$4 sm:$0xff]  }
 0x112   :  { %3266 = vmatpush1.bf16.msra.mxu1 %v8762_v1  ;;  %v10018_v3 = vld [vmem:[%s11623_s0 + $0x28] sm:$0xff] }
 0x113   :  { %v351_v12 = vadd.f32 %v350_v10, %v258_v32  ;;  %v8768_v10 = vld [vmem:[#allocation7 + $0x220] ss:$16 sps:$4 sm:$0xff]  }
 0x114   :  { %v362_v13 = vpop.permute.xlu1 %361  ;;  %v358_v14 = vpop.permute.xlu0 %357 }
 0x115   :  { %v356_v15 = vadd.f32 %v354_v8, %v351_v12  ;;  %v8765_v8 = vld [vmem:[#allocation7 + $0x224] ss:$16 sps:$4 sm:$0xff]  }
 0x116   :  { %3267 = vmatprep.subr.bf16.mxu1 %v8765_v8  ;;  %v8771_v12 = vld [vmem:[#allocation7 + $0x204] ss:$16 sps:$4 sm:$0xff]  }
 0x117   :  { %v360_v17 = vadd.f32 %v358_v14, %v356_v15  ;;  %3268 = vmatpush1.bf16.msra.mxu1 %v8768_v10  ;;  %v8774_v14 = vld [vmem:[#allocation7 + $0x200] ss:$16 sps:$4 sm:$0xff]   ;;  %v8775_v15 = vld [vmem:[#allocation7 + $0x1e4] ss:$16 sps:$4 sm:$0xff]  }
 0x118   :  { %v316_v19 = vpop.permute.xlu1 %315  ;;  %v312_v16 = vpop.permute.xlu0 %311  ;;  %3269 = vmatprep.subr.bf16.mxu1 %v8771_v12 }
 0x119   :  { %v364_v20 = vadd.f32 %v362_v13, %v360_v17  ;;  %v314_v21 = vadd.f32 %v312_v16, %v309_v18  ;;  %v8773_v13 = vld [vmem:[#allocation7] ss:$16 sps:$4 sm:$0xff]   ;;  %v8777_v17 = vld [vmem:[#allocation7 + $0x3e4] ss:$16 sps:$4 sm:$0xff]  }
 0x11a   :  { %v8779_v18 = vld [vmem:[#allocation7 + $0x1e0] ss:$16 sps:$4 sm:$0xff]   ;;  %v8781_v16 = vld [vmem:[#allocation7 + $0x1c4] ss:$16 sps:$4 sm:$0xff]  }
 0x11b   :  { %v318_v22 = vadd.f32 %v316_v19, %v314_v21  ;;  %v365_v23 = vadd.f32 %v364_v20, %v267_v39  ;;  %v8733_v39 = vld [vmem:[#allocation7 + $0xc4] ss:$16 sps:$4 sm:$0xff]   ;;  %v8780_v19 = vld [vmem:[#allocation7 + $0x3e0] ss:$16 sps:$4 sm:$0xff]   ;;  %3270 = vmatpush1.bf16.msra.mxu1 %v8774_v14  ;;  %v11635_v21 = vmov 0.0  }
 0x11c   :  { %v320_v24 = vpop.permute.xlu1 %319  ;;  %v368_v25 = vpop.permute.xlu0 %367  ;;  %3204 = vmatprep.subr.bf16.mxu0 %v8733_v39  ;;  %v8783_v20 = vld [vmem:[#allocation7 + $0x3c4] ss:$16 sps:$4 sm:$0xff]   ;;  %167 = vst.msk [vmem:[#allocation2] ss:$8 sm:$0xf] %vm165_vm0, %v11635_v21  ;;  %3271 = vmatprep.subr.bf16.mxu1 %v8777_v17  ;;  %v10024_v17 = vld [vmem:[%s11623_s0 + $0x30] sm:$0xff] }
 0x11d   :  { %v322_v26 = vadd.f32 %v320_v24, %v318_v22  ;;  %v370_v27 = vadd.f32 %v368_v25, %v365_v23  ;;  %3205 = vmatpush1.bf16.msra.mxu0 %v8737_v43  ;;  %170 = vst.msk [vmem:[#allocation2 + $0x60] ss:$8 sm:$0xf] %vm165_vm0, %v11635_v21  ;;  %173 = vst.msk [vmem:[#allocation2 + $0x41] ss:$8 sm:$0xf] %vm165_vm0, %v11635_v21 }
 0x11e   :  { %3206 = vmatprep.subr.bf16.mxu0 %v8739_v47  ;;  %176 = vst.msk [vmem:[#allocation2 + $0xa1] ss:$8 sm:$0xf] %vm165_vm0, %v11635_v21  ;;  %v8785_v22 = vld [vmem:[#allocation7 + $0x1c0] ss:$16 sps:$4 sm:$0xff]  }
 0x11f   :  { %v323_v30 = vmul.f32 0.001953125, %v322_v26  ;;  %v8786_v23 = vld [vmem:[#allocation7 + $0x3c0] ss:$16 sps:$4 sm:$0xff]   ;;  %v8787_v24 = vld [vmem:[#allocation7 + $0x1a4] ss:$16 sps:$4 sm:$0xff]   ;;  %3272 = vmatpush2.bf16.msra.mxu1 %v8780_v19 }
 0x120   :  { %v372_v28 = vpop.permute.xlu0 %371  ;;  %v376_v29 = vpop.permute.xlu1 %375  ;;  %v8789_v25 = vld [vmem:[#allocation7 + $0x3a4] ss:$16 sps:$4 sm:$0xff]   ;;  %3273 = vmatprep.subr.bf16.mxu1 %v8783_v20  ;;  %v8791_v26 = vld [vmem:[#allocation7 + $0x1a0] ss:$16 sps:$4 sm:$0xff]  }
 0x121   :  { %v374_v31 = vadd.f32 %v372_v28, %v370_v27  ;;  %v380_v33 = vmul.f32 %v323_v30, %v323_v30  ;;  %3207 = vmatpush1.bf16.msra.mxu0 %v8743_v49  ;;  %v8792_v27 = vld [vmem:[#allocation7 + $0x3a0] ss:$16 sps:$4 sm:$0xff]   ;;  %v8793_v28 = vld [vmem:[#allocation7 + $0x184] ss:$16 sps:$4 sm:$0xff]  }
 0x122   :  { %3208 = vmatprep.subr.bf16.mxu0 %v8745_v53  ;;  %v8813_v39 = vld [vmem:[#allocation7 + $0x324] ss:$16 sps:$4 sm:$0xff]   ;;  %v8816_v43 = vld [vmem:[#allocation7 + $0x320] ss:$16 sps:$4 sm:$0xff]  }
 0x123   :  { %v378_v32 = vadd.f32 %v376_v29, %v374_v31  ;;  %v8795_v29 = vld [vmem:[#allocation7 + $0x384] ss:$16 sps:$4 sm:$0xff]   ;;  %3274 = vmatpush2.bf16.msra.mxu1 %v8786_v23  ;;  %v8798_v31 = vld [vmem:[#allocation7 + $0x380] ss:$16 sps:$4 sm:$0xff]  }
 0x124   :  { %3275 = vmatprep.subr.bf16.mxu1 %v8789_v25  ;;  %v8821_v47 = vld [vmem:[#allocation7 + $0x100] ss:$16 sps:$4 sm:$0xff]   ;;  %v8825_v49 = vld [vmem:[#allocation7 + $0x4e4] ss:$16 sps:$4 sm:$0xff]  }
 0x125   :  { %v379_v34 = vmul.f32 0.001953125, %v378_v32  ;;  %3209 = vmatpush1.bf16.msra.mxu0 %v8749_v56  ;;  %v8799_v32 = vld [vmem:[#allocation7 + $0x164] ss:$16 sps:$4 sm:$0xff]  }
 0x126   :  { %3210 = vmatprep.subr.bf16.mxu0 %v8751_v60  ;;  %v10025_v19 = vld [vmem:[%s11623_s0 + $0x48] sm:$0xff]  ;;  %v10027_v23 = vld [vmem:[%s11623_s0 + $0x58] sm:$0xff] }
 0x127   :  { %v381_v35 = vsub.f32 %v379_v34, %v380_v33  ;;  %v8801_v33 = vld [vmem:[#allocation7 + $0x364] ss:$16 sps:$4 sm:$0xff]   ;;  %3276 = vmatpush2.bf16.msra.mxu1 %v8792_v27  ;;  %v8803_v34 = vld [vmem:[#allocation7 + $0x160] ss:$16 sps:$4 sm:$0xff]  }
 0x128   :  { %3277 = vmatprep.subr.bf16.mxu1 %v8795_v29  ;;  %v10026_v20 = vld [vmem:[%s11623_s0 + $0x68] sm:$0xff]  ;;  %v10028_v25 = vld [vmem:[%s11623_s0 + $0x78] sm:$0xff]  ;;  %v10029_v27 = vld [vmem:[%s11623_s0 + $0x40] sm:$0xff] }
 0x129   :  { %v382_v36 = vmax.f32 %v381_v35, 0.0  ;;  %3211 = vmatpush1.bf16.msra.mxu0 %v8755_v59  ;;  %v8804_v35 = vld [vmem:[#allocation7 + $0x360] ss:$16 sps:$4 sm:$0xff]  }
 0x12a   :  { %3212 = vmatprep.subr.bf16.mxu0 %v8757_v2  ;;  %v10030_v29 = vld [vmem:[%s11623_s0 + $0x60] sm:$0xff] }
 0x12b   :  { %v383_v37 = vadd.f32 1e-05, %v382_v36  ;;  %v8805_v36 = vld [vmem:[#allocation7 + $0x144] ss:$16 sps:$4 sm:$0xff]   ;;  %3278 = vmatpush2.bf16.msra.mxu1 %v8798_v31 }
 0x12c   :  { %3279 = vmatprep.subr.bf16.mxu1 %v8801_v33 }
 0x12d   :  { %9881 = vrsqrt.f32 %v383_v37  ;;  %3213 = vmatpush1.bf16.msra.mxu0 %v8761_v6  ;;  %v8807_v37 = vld [vmem:[#allocation7 + $0x344] ss:$16 sps:$4 sm:$0xff]  }
 0x12e   :  { %3214 = vmatprep.subr.bf16.mxu0 %v8763_v7  ;;  %v10019_v6 = vld [vmem:[%s11623_s0 + $0x18] sm:$0xff] }
 0x12f   :  { %3280 = vmatpush2.bf16.msra.mxu1 %v8804_v35 }
 0x130   :  { %3281 = vmatprep.subr.bf16.mxu1 %v8807_v37 }
 0x131   :  { %3215 = vmatpush1.bf16.msra.mxu0 %v8767_v9  ;;  %v10021_v9 = vld [vmem:[%s11623_s0] sm:$0xff] }
 0x132   :  { %3216 = vmatprep.subr.bf16.mxu0 %v8769_v11  ;;  %v10022_v11 = vld [vmem:[%s11623_s0 + $0x20] sm:$0xff] }
 0x133   :  { %3282 = vmatpush2.bf16.msra.mxu1 %v8810_v40 }
 0x134   :  { %3283 = vmatprep.subr.bf16.mxu1 %v8813_v39 }
 0x135   :  { %3217 = vmatpush1.bf16.msra.mxu0 %v8773_v13  ;;  %v10023_v13 = vld [vmem:[%s11623_s0 + $0x10] sm:$0xff] }
 0x136   :  { %3218 = vmatprep.subr.bf16.mxu0 %v8775_v15 }
 0x137   :  { %3284 = vmatpush2.bf16.msra.mxu1 %v8816_v43 }
 0x139   :  { %3219 = vmatpush2.bf16.msra.mxu0 %v8779_v18 }
 0x13a   :  { %v9882_v52 = vpop.eup %9881  ;;  %3220 = vmatprep.subr.bf16.mxu0 %v8781_v16 }
 0x13b   :  { %v10439_v55 = vmul.f32 %v9882_v52, %v178_v46  ;;  %v8819_v46 = vld [vmem:[#allocation7 + $0x304] ss:$16 sps:$4 sm:$0xff]  }
 0x13c   :  { %3285 = vmatprep.subr.bf16.mxu1 %v8819_v46 }
 0x13d   :  { %v392_v62 = vrot.slane %v10439_v55, %v10437_v51  ;;  %v386_v63 = vmul.f32 %v10439_v55, %v323_v30  ;;  %3221 = vmatpush2.bf16.msra.mxu0 %v8785_v22  ;;  %v8797_v30 = vld [vmem:[#allocation7 + $0x180] ss:$16 sps:$4 sm:$0xff]   ;;  %3286 = vmatpush2.bf16.msra.mxu1 %v8822_v48 }
 0x13e   :  { %3222 = vmatprep.subr.bf16.mxu0 %v8787_v24  ;;  %3361 = vmatprep.subr.bf16.mxu1 %v8828_v50 }
 0x13f   :  { %396 = vrot.lane.b32.xlu1 %v392_v62, %s10252_s25  ;;  %393 = vrot.lane.b32.xlu0 %v392_v62, %s10250_s6  ;;  %v10446_v4 = vsub.f32 %v179_v58, %v386_v63 }
 0x141   :  { %v412_v5 = vrot.slane %v10446_v4, %v10437_v51  ;;  %3223 = vmatpush2.bf16.msra.mxu0 %v8791_v26 }
 0x142   :  { %3224 = vmatprep.subr.bf16.mxu0 %v8793_v28 }
 0x143   :  { %399 = vrot.lane.b32.xlu0 %v392_v62, %s10251_s23  ;;  %413 = vrot.lane.b32.xlu1 %v412_v5, %s10250_s6 }
 0x145   :  { %3225 = vmatpush2.bf16.msra.mxu0 %v8797_v30 }
 0x146   :  { %3226 = vmatprep.subr.bf16.mxu0 %v8799_v32 }
 0x147   :  { %416 = vrot.lane.b32.xlu0 %v412_v5, %s10252_s25  ;;  %419 = vrot.lane.b32.xlu1 %v412_v5, %s10251_s23 }
 0x149   :  { %3227 = vmatpush2.bf16.msra.mxu0 %v8803_v34 }
 0x14a   :  { %3228 = vmatprep.subr.bf16.mxu0 %v8805_v36 }
 0x14d   :  { %3229 = vmatpush2.bf16.msra.mxu0 %v8809_v38 }
 0x14e   :  { %3230 = vmatprep.subr.bf16.mxu0 %v8811_v41 }
 0x151   :  { %3231 = vmatpush2.bf16.msra.mxu0 %v8815_v42 }
 0x152   :  { %3232 = vmatprep.subr.bf16.mxu0 %v8817_v44 }
 0x155   :  { %3233 = vmatpush2.bf16.msra.mxu0 %v8821_v47  ;;  %v10031_v47 = vld [vmem:[%s11623_s0 + $0x50] sm:$0xff] }
 0x156   :  { %3308 = vmatprep.subr.bf16.mxu0 %v8825_v49 }
 0x1b1   :  { %v397_v52 = vpop.permute.xlu1 %396  ;;  %v394_v53 = vpop.permute.xlu0 %393 }
 0x1b2   :  { %v403_v54 = vsel %vm402_vm1, %v10439_v55, %v394_v53 }
 0x1b3   :  { %v405_v56 = vsel %vm404_vm2, %v403_v54, %v397_v52 }
 0x1b5   :  { %v400_v57 = vpop.permute.xlu0 %399  ;;  %v414_v58 = vpop.permute.xlu1 %413 }
 0x1b6   :  { %v407_v60 = vsel %vm406_vm3, %v405_v56, %v400_v57  ;;  %v422_v62 = vsel %vm402_vm1, %v10446_v4, %v414_v58  ;;  %v10020_v4 = vld [vmem:[%s11623_s0 + $0x38] sm:$0xff]  ;;  %v10032_v58 = vld [vmem:[%s11623_s0 + $0x70] sm:$0xff] }
 0x1b7   :  { %v428_v61 = vrot.slane %v407_v60, %v10437_v51 }
 0x1b9   :  { %v417_v63 = vpop.permute.xlu0 %416  ;;  %v420_v59 = vpop.permute.xlu1 %419  ;;  %v430_v55 = vmul.f32 %v10017_v0, %v428_v61  ;;  %v434_v5 = vmul.f32 %v10018_v3, %v428_v61  ;;  %v432_v1 = vmul.f32 %v10019_v6, %v428_v61  ;;  %v436_v7 = vmul.f32 %v10020_v4, %v428_v61 }
 0x1ba   :  { %v423_v2 = vsel %vm404_vm2, %v422_v62, %v417_v63  ;;  %v429_v10 = vmul.f32 %v10021_v9, %v428_v61  ;;  %v433_v12 = vmul.f32 %v10022_v11, %v428_v61  ;;  %v431_v14 = vmul.f32 %v10023_v13, %v428_v61 }
 0x1bb   :  { %v424_v8 = vsel %vm406_vm3, %v423_v2, %v420_v59  ;;  %v435_v18 = vmul.f32 %v10024_v17, %v428_v61  ;;  %v438_v16 = vmul.f32 %v10025_v19, %v428_v61  ;;  %v442_v22 = vmul.f32 %v10026_v20, %v428_v61 }
 0x1bc   :  { %v10490_v15 = vrot.slane %v424_v8, %v10437_v51  ;;  %v440_v24 = vmul.f32 %v10027_v23, %v428_v61  ;;  %v444_v26 = vmul.f32 %v10028_v25, %v428_v61  ;;  %v437_v28 = vmul.f32 %v10029_v27, %v428_v61 }
 0x1bd   :  { %v441_v30 = vmul.f32 %v10030_v29, %v428_v61  ;;  %v439_v48 = vmul.f32 %v10031_v47, %v428_v61  ;;  %v443_v60 = vmul.f32 %v10032_v58, %v428_v61 }
 0x1be   :  { %v10514_v31 = vadd.f32 %v10490_v15, %v430_v55  ;;  %v10517_v32 = vadd.f32 %v10490_v15, %v434_v5  ;;  %v10520_v33 = vadd.f32 %v10490_v15, %v432_v1  ;;  %v10523_v34 = vadd.f32 %v10490_v15, %v436_v7 }
 0x1bf   :  { %v10526_v35 = vadd.f32 %v10490_v15, %v429_v10  ;;  %v10529_v36 = vadd.f32 %v10490_v15, %v433_v12  ;;  %v10532_v37 = vadd.f32 %v10490_v15, %v431_v14  ;;  %v10535_v38 = vadd.f32 %v10490_v15, %v435_v18 }
 0x1c0   :  { %v466_v40 = vsub.f32 0.0, %v10514_v31  ;;  %v470_v41 = vsub.f32 0.0, %v10517_v32  ;;  %v468_v39 = vsub.f32 0.0, %v10520_v33  ;;  %v472_v42 = vsub.f32 0.0, %v10523_v34 }
 0x1c1   :  { %v465_v43 = vsub.f32 0.0, %v10526_v35  ;;  %v469_v44 = vsub.f32 0.0, %v10529_v36  ;;  %v467_v46 = vsub.f32 0.0, %v10532_v37  ;;  %v10548_v53 = vadd.f32 %v10490_v15, %v438_v16 }
 0x1c2   :  { %v483_v49 = vmul.f32 1.442695, %v466_v40  ;;  %v491_v50 = vmul.f32 1.442695, %v470_v41  ;;  %v487_v52 = vmul.f32 1.442695, %v468_v39  ;;  %v10552_v57 = vadd.f32 %v10490_v15, %v442_v22 }
 0x1c3   :  { %v495_v54 = vmul.f32 1.442695, %v472_v42  ;;  %v471_v56 = vsub.f32 0.0, %v10535_v38  ;;  %v481_v62 = vmul.f32 1.442695, %v465_v43  ;;  %v474_v59 = vsub.f32 0.0, %v10548_v53 }
 0x1c4   :  { %9883 = vpow2.f32 %v483_v49  ;;  %v489_v63 = vmul.f32 1.442695, %v469_v44  ;;  %v478_v0 = vsub.f32 0.0, %v10552_v57  ;;  %v10560_v55 = vadd.f32 %v10490_v15, %v440_v24 }
 0x1c5   :  { %9885 = vpow2.f32 %v491_v50  ;;  %v10563_v2 = vadd.f32 %v10490_v15, %v444_v26  ;;  %v485_v3 = vmul.f32 1.442695, %v467_v46  ;;  %v10566_v5 = vadd.f32 %v10490_v15, %v437_v28 }
 0x1c6   :  { %9887 = vpow2.f32 %v487_v52  ;;  %v10569_v61 = vadd.f32 %v10490_v15, %v441_v30  ;;  %v493_v6 = vmul.f32 1.442695, %v471_v56  ;;  %v476_v1 = vsub.f32 0.0, %v10560_v55 }
 0x1c7   :  { %9889 = vpow2.f32 %v495_v54  ;;  %v480_v4 = vsub.f32 0.0, %v10563_v2  ;;  %v499_v7 = vmul.f32 1.442695, %v474_v59  ;;  %v473_v8 = vsub.f32 0.0, %v10566_v5 }
 0x1c8   :  { %9891 = vpow2.f32 %v481_v62  ;;  %v10575_v9 = vadd.f32 %v10490_v15, %v439_v48  ;;  %v507_v10 = vmul.f32 1.442695, %v478_v0  ;;  %v477_v11 = vsub.f32 0.0, %v10569_v61 }
 0x1c9   :  { %9893 = vpow2.f32 %v489_v63  ;;  %v10579_v12 = vadd.f32 %v10490_v15, %v443_v60  ;;  %v503_v13 = vmul.f32 1.442695, %v476_v1  ;;  %v511_v17 = vmul.f32 1.442695, %v480_v4 }
 0x1ca   :  { %9895 = vpow2.f32 %v485_v3  ;;  %v475_v14 = vsub.f32 0.0, %v10575_v9  ;;  %v497_v19 = vmul.f32 1.442695, %v473_v8  ;;  %v505_v16 = vmul.f32 1.442695, %v477_v11 }
 0x1cb   :  { %9897 = vpow2.f32 %v493_v6  ;;  %v479_v18 = vsub.f32 0.0, %v10579_v12 }
 0x1cc   :  { %9899 = vpow2.f32 %v499_v7  ;;  %v501_v20 = vmul.f32 1.442695, %v475_v14 }
 0x1cd   :  { %9901 = vpow2.f32 %v507_v10  ;;  %v509_v22 = vmul.f32 1.442695, %v479_v18 }
 0x1ce   :  { %9903 = vpow2.f32 %v503_v13 }
 0x1cf   :  { %9905 = vpow2.f32 %v511_v17 }
 0x1d0   :  { %9907 = vpow2.f32 %v497_v19 }
 0x1d1   :  { %v9884_v23 = vpop.eup %9883  ;;  %9909 = vpow2.f32 %v505_v16 }
 0x1d2   :  { %v9886_v15 = vpop.eup %9885  ;;  %v514_v24 = vadd.f32 1.0, %v9884_v23  ;;  %9911 = vpow2.f32 %v501_v20 }
 0x1d3   :  { %v9888_v25 = vpop.eup %9887  ;;  %v518_v26 = vadd.f32 1.0, %v9886_v15  ;;  %9913 = vpow2.f32 %v509_v22 }
 0x1d4   :  { %v9890_v27 = vpop.eup %9889  ;;  %9915 = vrcp.f32 %v514_v24  ;;  %v516_v28 = vadd.f32 1.0, %v9888_v25 }
 0x1d5   :  { %v9892_v29 = vpop.eup %9891  ;;  %9917 = vrcp.f32 %v518_v26  ;;  %v520_v30 = vadd.f32 1.0, %v9890_v27 }
 0x1d6   :  { %v9894_v40 = vpop.eup %9893  ;;  %9919 = vrcp.f32 %v516_v28  ;;  %v513_v41 = vadd.f32 1.0, %v9892_v29 }
 0x1d7   :  { %v9896_v39 = vpop.eup %9895  ;;  %9921 = vrcp.f32 %v520_v30  ;;  %v517_v42 = vadd.f32 1.0, %v9894_v40 }
 0x1d8   :  { %v9898_v43 = vpop.eup %9897  ;;  %9923 = vrcp.f32 %v513_v41  ;;  %v515_v44 = vadd.f32 1.0, %v9896_v39 }
 0x1d9   :  { %v9900_v46 = vpop.eup %9899  ;;  %9925 = vrcp.f32 %v517_v42  ;;  %v519_v47 = vadd.f32 1.0, %v9898_v43 }
 0x1da   :  { %v9902_v48 = vpop.eup %9901  ;;  %9927 = vrcp.f32 %v515_v44  ;;  %v522_v49 = vadd.f32 1.0, %v9900_v46 }
 0x1db   :  { %v9904_v50 = vpop.eup %9903  ;;  %9929 = vrcp.f32 %v519_v47  ;;  %v526_v52 = vadd.f32 1.0, %v9902_v48 }
 0x1dc   :  { %v9906_v54 = vpop.eup %9905  ;;  %9931 = vrcp.f32 %v522_v49  ;;  %v524_v56 = vadd.f32 1.0, %v9904_v50 }
 0x1dd   :  { %v9908_v58 = vpop.eup %9907  ;;  %9933 = vrcp.f32 %v526_v52  ;;  %v528_v60 = vadd.f32 1.0, %v9906_v54 }
 0x1de   :  { %v9910_v62 = vpop.eup %9909  ;;  %9935 = vrcp.f32 %v524_v56  ;;  %v521_v63 = vadd.f32 1.0, %v9908_v58 }
 0x1df   :  { %v9912_v59 = vpop.eup %9911  ;;  %9937 = vrcp.f32 %v528_v60  ;;  %v525_v0 = vadd.f32 1.0, %v9910_v62  ;;  %v8823_v60 = vld [vmem:[#allocation7 + $0x4e0] ss:$16 sps:$4 sm:$0xff]  }
 0x1e0   :  { %v9914_v3 = vpop.eup %9913  ;;  %9939 = vrcp.f32 %v521_v63  ;;  %v523_v6 = vadd.f32 1.0, %v9912_v59 }
 0x1e1   :  { %v9916_v1 = vpop.eup %9915  ;;  %9941 = vrcp.f32 %v525_v0  ;;  %v527_v4 = vadd.f32 1.0, %v9914_v3  ;;  %v8826_v0 = vld [vmem:[#allocation7 + $0x6e0] ss:$16 sps:$4 sm:$0xff]  }
 0x1e2   :  { %v9918_v7 = vpop.eup %9917  ;;  %v546_v8 = vmul.f32 %v9916_v1, %v10514_v31  ;;  %9943 = vrcp.f32 %v523_v6  ;;  %v8831_v6 = vld [vmem:[#allocation7 + $0x4c4] ss:$16 sps:$4 sm:$0xff]  }
 0x1e3   :  { %v9920_v10 = vpop.eup %9919  ;;  %v550_v11 = vmul.f32 %v9918_v7, %v10517_v32  ;;  %9945 = vrcp.f32 %v527_v4 }
 0x1e4   :  { %v9922_v13 = vpop.eup %9921  ;;  %v580_v14 = vrot.slane %v546_v8, 7  ;;  %v548_v17 = vmul.f32 %v9920_v10, %v10520_v33 }
 0x1e5   :  { %v9924_v18 = vpop.eup %9923  ;;  %v585_v19 = vrot.slane %v550_v11, 7  ;;  %v552_v16 = vmul.f32 %v9922_v13, %v10523_v34  ;;  %v8834_v11 = vld [vmem:[#allocation7 + $0x6c4] ss:$16 sps:$4 sm:$0xff]  }
 0x1e6   :  { %v9926_v20 = vpop.eup %9925  ;;  %628 = vst [vmem:[#allocation2 + $0x8] sm:$0xfe] %v580_v14  ;;  %v582_v22 = vrot.slane %v548_v17, 7  ;;  %v545_v23 = vmul.f32 %v9924_v18, %v10526_v35 }
 0x1e7   :  { %v9928_v15 = vpop.eup %9927  ;;  %636 = vst [vmem:[#allocation2 + $0x48] sm:$0x1] %v585_v19  ;;  %v589_v31 = vrot.slane %v552_v16, 7  ;;  %v549_v24 = vmul.f32 %v9926_v20, %v10529_v36  ;;  %v10595_v43 = vsel %vm578_vm4, %v580_v14, %v585_v19  ;;  %v8829_v19 = vld [vmem:[#allocation7 + $0x4c0] ss:$16 sps:$4 sm:$0xff]  }
 0x1e8   :  { %v9930_v32 = vpop.eup %9929  ;;  %630 = vst [vmem:[#allocation2 + $0x18] sm:$0xfe] %v582_v22  ;;  %v579_v25 = vrot.slane %v545_v23, 7  ;;  %v547_v26 = vmul.f32 %v9928_v15, %v10532_v37  ;;  %v8837_v20 = vld [vmem:[#allocation7 + $0x4a4] ss:$16 sps:$4 sm:$0xff]  }
 0x1e9   :  { %v9932_v33 = vpop.eup %9931  ;;  %638 = vst [vmem:[#allocation2 + $0x58] sm:$0x1] %v589_v31  ;;  %v583_v27 = vrot.slane %v549_v24, 7  ;;  %v551_v34 = vmul.f32 %v9930_v32, %v10535_v38  ;;  %v10602_v49 = vsel %vm578_vm4, %v582_v22, %v589_v31  ;;  %v8832_v24 = vld [vmem:[#allocation7 + $0x6c0] ss:$16 sps:$4 sm:$0xff]  }
 0x1ea   :  { %v9934_v28 = vpop.eup %9933  ;;  %627 = vst [vmem:[#allocation2] sm:$0xfe] %v579_v25  ;;  %v581_v29 = vrot.slane %v547_v26, 7  ;;  %v554_v35 = vmul.f32 %v9932_v33, %v10548_v53  ;;  %v8840_v33 = vld [vmem:[#allocation7 + $0x6a4] ss:$16 sps:$4 sm:$0xff]  }
 0x1eb   :  { %v9936_v30 = vpop.eup %9935  ;;  %635 = vst [vmem:[#allocation2 + $0x40] sm:$0x1] %v583_v27  ;;  %v587_v40 = vrot.slane %v551_v34, 7  ;;  %v558_v36 = vmul.f32 %v9934_v28, %v10552_v57  ;;  %v10614_v62 = vsel %vm578_vm4, %v579_v25, %v583_v27  ;;  %v712_v27 = vrot.slane %v10595_v43, 1  ;;  %v8835_v28 = vld [vmem:[#allocation7 + $0x4a0] ss:$16 sps:$4 sm:$0xff]  }
 0x1ec   :  { %v9938_v41 = vpop.eup %9937  ;;  %629 = vst [vmem:[#allocation2 + $0x10] sm:$0xfe] %v581_v29  ;;  %v592_v39 = vrot.slane %v554_v35, 7  ;;  %v556_v37 = vmul.f32 %v9936_v30, %v10560_v55  ;;  %v718_v34 = vrot.slane %v10602_v49, 1 }
 0x1ed   :  { %v9940_v42 = vpop.eup %9939  ;;  %v652_v38 = vld [vmem:[#allocation2 + $0x8] sm:$0xff]  ;;  %637 = vst [vmem:[#allocation2 + $0x50] sm:$0x1] %v587_v40  ;;  %v597_v44 = vrot.slane %v558_v36, 7  ;;  %v560_v46 = vmul.f32 %v9938_v41, %v10563_v2  ;;  %v10623_v1 = vsel %vm578_vm4, %v581_v29, %v587_v40  ;;  %v8838_v36 = vld [vmem:[#allocation7 + $0x6a0] ss:$16 sps:$4 sm:$0xff]  }
 0x1ee   :  { %v9942_v53 = vpop.eup %9941  ;;  %v10599_v47 = vpack.c.bf16 %v10595_v43, %v652_v38  ;;  %640 = vst [vmem:[#allocation2 + $0x68] sm:$0xfe] %v592_v39  ;;  %v594_v57 = vrot.slane %v556_v37, 7  ;;  %v553_v52 = vmul.f32 %v9940_v42, %v10566_v5  ;;  %v668_v8 = vld [vmem:[#allocation2 + $0x8] sm:$0xfe] }
 0x1ef   :  { %v9944_v48 = vpop.eup %9943  ;;  %v654_v55 = vld [vmem:[#allocation2 + $0x18] sm:$0xff]  ;;  %648 = vst [vmem:[#allocation2 + $0xa8] sm:$0x1] %v597_v44  ;;  %v601_v50 = vrot.slane %v560_v46, 7  ;;  %v557_v54 = vmul.f32 %v9942_v53, %v10569_v61  ;;  %v672_v10 = vld [vmem:[#allocation2 + $0x48] sm:$0x1]  ;;  %v10630_v17 = vsel %vm578_vm4, %v592_v39, %v597_v44 }
 0x1f0   :  { %v9946_v56 = vpop.eup %9945  ;;  %3234 = vmatprep.mubr.bf16.mxu0 %v10599_v47  ;;  %v10608_v2 = vpack.c.bf16 %v10602_v49, %v654_v55  ;;  %642 = vst [vmem:[#allocation2 + $0x78] sm:$0xfe] %v594_v57  ;;  %v10611_v58 = vmul.f32 %v9944_v48, %v10575_v9  ;;  %v591_v59 = vrot.slane %v553_v52, 7  ;;  %v670_v13 = vld [vmem:[#allocation2 + $0x18] sm:$0xfe]  ;;  %v711_v22 = vrot.slane %v668_v8, 1 }
 0x1f1   :  { %v651_v63 = vld [vmem:[#allocation2] sm:$0xff]  ;;  %650 = vst [vmem:[#allocation2 + $0xb8] sm:$0x1] %v601_v50  ;;  %v595_v5 = vrot.slane %v557_v54, 7  ;;  %v559_v61 = vmul.f32 %v9946_v56, %v10579_v12  ;;  %v674_v14 = vld [vmem:[#allocation2 + $0x58] sm:$0x1]  ;;  %v10637_v15 = vsel %vm578_vm4, %v594_v57, %v601_v50 }
 0x1f2   :  { %3287 = vmatprep.mubr.bf16.mxu1 %v10608_v2  ;;  %v10619_v3 = vpack.c.bf16 %v10614_v62, %v651_v63  ;;  %v593_v9 = vrot.slane %v10611_v58, 7  ;;  %639 = vst [vmem:[#allocation2 + $0x60] sm:$0xfe] %v591_v59  ;;  %v722_v23 = vrot.slane %v672_v10, 1  ;;  %v717_v32 = vrot.slane %v670_v13, 1 }
 0x1f3   :  { %v653_v4 = vld [vmem:[#allocation2 + $0x10] sm:$0xff]  ;;  %647 = vst [vmem:[#allocation2 + $0xa0] sm:$0x1] %v595_v5  ;;  %v599_v7 = vrot.slane %v559_v61, 7  ;;  %v726_v25 = vrot.slane %v674_v14, 1  ;;  %v10647_v29 = vsel %vm578_vm4, %v591_v59, %v595_v5  ;;  %v713_v30 = vsel %vm707_vm5, %v711_v22, %v712_v27 }
 0x1f4   :  { %3235 = vmatmul.mubr.bf16.vlgmr.msra.gmra.mxu0 %v10619_v3  ;;  %v10627_v12 = vpack.c.bf16 %v10623_v1, %v653_v4  ;;  %641 = vst [vmem:[#allocation2 + $0x70] sm:$0xfe] %v593_v9  ;;  %v723_v40 = vsel %vm707_vm5, %v712_v27, %v722_v23  ;;  %v719_v42 = vsel %vm707_vm5, %v717_v32, %v718_v34  ;;  %v8843_v46 = vld [vmem:[#allocation7 + $0x484] ss:$16 sps:$4 sm:$0xff]   ;;  %v8841_v55 = vld [vmem:[#allocation7 + $0x480] ss:$16 sps:$4 sm:$0xff]  }
 0x1f5   :  { %3309 = vmatpush1.bf16.msra.mxu0 %v8823_v60  ;;  %v660_v18 = vld [vmem:[#allocation2 + $0x68] sm:$0xff]  ;;  %649 = vst [vmem:[#allocation2 + $0xb0] sm:$0x1] %v599_v7  ;;  %v10655_v39 = vsel %vm578_vm4, %v593_v9, %v599_v7  ;;  %v727_v38 = vsel %vm707_vm5, %v718_v34, %v726_v25  ;;  %v10663_v53 = vpack.c.bf16 %v723_v40, %v713_v30  ;;  %v8844_v50 = vld [vmem:[#allocation7 + $0x680] ss:$16 sps:$4 sm:$0xff]  }
 0x1f6   :  { %3288 = vmatmul.mubr.bf16.vlgmr.msra.gmra.mxu1 %v10627_v12  ;;  %v10634_v16 = vpack.c.bf16 %v10630_v17, %v660_v18  ;;  %3310 = vmatprep.subr.bf16.mxu0 %v8831_v6  ;;  %v8846_v57 = vld [vmem:[#allocation7 + $0x684] ss:$16 sps:$4 sm:$0xff]   ;;  %v10666_v48 = vpack.c.bf16 %v727_v38, %v719_v42  ;;  %v8847_v56 = vld [vmem:[#allocation7 + $0x460] ss:$16 sps:$4 sm:$0xff]  }
 0x1f7   :  { %3362 = vmatpush1.bf16.msra.mxu1 %v8826_v0  ;;  %v662_v31 = vld [vmem:[#allocation2 + $0x78] sm:$0xff]  ;;  %v8850_v58 = vld [vmem:[#allocation7 + $0x660] ss:$16 sps:$4 sm:$0xff]  }
 0x1f8   :  { %3244 = vmatprep.mubr.bf16.mxu0 %v10634_v16  ;;  %v10641_v26 = vpack.c.bf16 %v10637_v15, %v662_v31  ;;  %3363 = vmatprep.subr.bf16.mxu1 %v8834_v11  ;;  %v8849_v52 = vld [vmem:[#allocation7 + $0x464] ss:$16 sps:$4 sm:$0xff]   ;;  %v8853_v59 = vld [vmem:[#allocation7 + $0x440] ss:$16 sps:$4 sm:$0xff]  }
 0x1f9   :  { %3311 = vmatpush1.bf16.msra.mxu0 %v8829_v19  ;;  %v659_v35 = vld [vmem:[#allocation2 + $0x60] sm:$0xff]  ;;  %v8852_v54 = vld [vmem:[#allocation7 + $0x664] ss:$16 sps:$4 sm:$0xff]  }
 0x1fa   :  { %3297 = vmatprep.mubr.bf16.mxu1 %v10641_v26  ;;  %3312 = vmatprep.subr.bf16.mxu0 %v8837_v20  ;;  %v10652_v41 = vpack.c.bf16 %v10647_v29, %v659_v35  ;;  %v8855_v60 = vld [vmem:[#allocation7 + $0x444] ss:$16 sps:$4 sm:$0xff]   ;;  %v8856_v5 = vld [vmem:[#allocation7 + $0x640] ss:$16 sps:$4 sm:$0xff]  }
 0x1fb   :  { %3364 = vmatpush1.bf16.msra.mxu1 %v8832_v24  ;;  %v661_v37 = vld [vmem:[#allocation2 + $0x70] sm:$0xff]  ;;  %v8858_v63 = vld [vmem:[#allocation7 + $0x644] ss:$16 sps:$4 sm:$0xff]  }
 0x1fc   :  { %3365 = vmatprep.subr.bf16.mxu1 %v8840_v33  ;;  %v10660_v44 = vpack.c.bf16 %v10655_v39, %v661_v37  ;;  %3245 = vmatmul.mubr.bf16.gmra.mxu0 %v10652_v41  ;;  %v8861_v61 = vld [vmem:[#allocation7 + $0x424] ss:$16 sps:$4 sm:$0xff]   ;;  %v8859_v6 = vld [vmem:[#allocation7 + $0x420] ss:$16 sps:$4 sm:$0xff]  }
 0x1fd   :  { %3313 = vmatpush1.bf16.msra.mxu0 %v8835_v28  ;;  %3340 = vmatprep.mubr.bf16.mxu0 %v10663_v53  ;;  %v8864_v0 = vld [vmem:[#allocation7 + $0x624] ss:$16 sps:$4 sm:$0xff]   ;;  %v8862_v9 = vld [vmem:[#allocation7 + $0x620] ss:$16 sps:$4 sm:$0xff]  }
 0x1fe   :  { %3298 = vmatmul.mubr.bf16.gmra.mxu1 %v10660_v44  ;;  %3314 = vmatprep.subr.bf16.mxu0 %v8843_v46  ;;  %v8867_v4 = vld [vmem:[#allocation7 + $0x404] ss:$16 sps:$4 sm:$0xff]   ;;  %v8865_v8 = vld [vmem:[#allocation7 + $0x400] ss:$16 sps:$4 sm:$0xff]  }
 0x1ff   :  { %3366 = vmatpush1.bf16.msra.mxu1 %v8838_v36  ;;  %3393 = vmatprep.mubr.bf16.mxu1 %v10666_v48  ;;  %v8870_v7 = vld [vmem:[#allocation7 + $0x604] ss:$16 sps:$4 sm:$0xff]   ;;  %v8868_v10 = vld [vmem:[#allocation7 + $0x600] ss:$16 sps:$4 sm:$0xff]  }
 0x200   :  { %3367 = vmatprep.subr.bf16.mxu1 %v8846_v57  ;;  %v8873_v11 = vld [vmem:[#allocation7 + $0x5e4] ss:$16 sps:$4 sm:$0xff]   ;;  %v8871_v14 = vld [vmem:[#allocation7 + $0x5e0] ss:$16 sps:$4 sm:$0xff]  }
 0x201   :  { %3315 = vmatpush1.bf16.msra.mxu0 %v8841_v55  ;;  %v8876_v13 = vld [vmem:[#allocation7 + $0x7e4] ss:$16 sps:$4 sm:$0xff]   ;;  %v8874_v18 = vld [vmem:[#allocation7 + $0x7e0] ss:$16 sps:$4 sm:$0xff]  }
 0x202   :  { %3316 = vmatprep.subr.bf16.mxu0 %v8849_v52  ;;  %v8879_v19 = vld [vmem:[#allocation7 + $0x5c4] ss:$16 sps:$4 sm:$0xff]   ;;  %v8877_v22 = vld [vmem:[#allocation7 + $0x5c0] ss:$16 sps:$4 sm:$0xff]  }
 0x203   :  { %3368 = vmatpush1.bf16.msra.mxu1 %v8844_v50  ;;  %v8882_v20 = vld [vmem:[#allocation7 + $0x7c4] ss:$16 sps:$4 sm:$0xff]   ;;  %v8880_v23 = vld [vmem:[#allocation7 + $0x7c0] ss:$16 sps:$4 sm:$0xff]  }
 0x204   :  { %3369 = vmatprep.subr.bf16.mxu1 %v8852_v54  ;;  %v8885_v31 = vld [vmem:[#allocation7 + $0x5a4] ss:$16 sps:$4 sm:$0xff]   ;;  %v8883_v32 = vld [vmem:[#allocation7 + $0x5a0] ss:$16 sps:$4 sm:$0xff]   ;;  %v671_v54 = vld [vmem:[#allocation2 + $0x40] sm:$0x1] }
 0x205   :  { %3317 = vmatpush1.bf16.msra.mxu0 %v8847_v56  ;;  %v8888_v24 = vld [vmem:[#allocation7 + $0x7a4] ss:$16 sps:$4 sm:$0xff]   ;;  %v8886_v25 = vld [vmem:[#allocation7 + $0x7a0] ss:$16 sps:$4 sm:$0xff]  }
 0x206   :  { %3318 = vmatprep.subr.bf16.mxu0 %v8855_v60  ;;  %v8891_v33 = vld [vmem:[#allocation7 + $0x584] ss:$16 sps:$4 sm:$0xff]   ;;  %v8889_v34 = vld [vmem:[#allocation7 + $0x580] ss:$16 sps:$4 sm:$0xff]  }
 0x207   :  { %3370 = vmatpush1.bf16.msra.mxu1 %v8850_v58  ;;  %v8894_v27 = vld [vmem:[#allocation7 + $0x784] ss:$16 sps:$4 sm:$0xff]   ;;  %v8892_v28 = vld [vmem:[#allocation7 + $0x780] ss:$16 sps:$4 sm:$0xff]   ;;  %v673_v58 = vld [vmem:[#allocation2 + $0x50] sm:$0x1] }
 0x208   :  { %3371 = vmatprep.subr.bf16.mxu1 %v8858_v63  ;;  %v8897_v35 = vld [vmem:[#allocation7 + $0x564] ss:$16 sps:$4 sm:$0xff]   ;;  %v8895_v40 = vld [vmem:[#allocation7 + $0x560] ss:$16 sps:$4 sm:$0xff]  }
 0x209   :  { %3319 = vmatpush1.bf16.msra.mxu0 %v8853_v59  ;;  %v8900_v30 = vld [vmem:[#allocation7 + $0x764] ss:$16 sps:$4 sm:$0xff]   ;;  %v8898_v36 = vld [vmem:[#allocation7 + $0x760] ss:$16 sps:$4 sm:$0xff]  }
 0x20a   :  { %3320 = vmatprep.subr.bf16.mxu0 %v8861_v61  ;;  %v8903_v37 = vld [vmem:[#allocation7 + $0x544] ss:$16 sps:$4 sm:$0xff]   ;;  %v8901_v38 = vld [vmem:[#allocation7 + $0x540] ss:$16 sps:$4 sm:$0xff]  }
 0x20b   :  { %3372 = vmatpush1.bf16.msra.mxu1 %v8856_v5  ;;  %v8906_v42 = vld [vmem:[#allocation7 + $0x744] ss:$16 sps:$4 sm:$0xff]   ;;  %v8904_v46 = vld [vmem:[#allocation7 + $0x740] ss:$16 sps:$4 sm:$0xff]  }
 0x20c   :  { %3373 = vmatprep.subr.bf16.mxu1 %v8864_v0  ;;  %v8909_v57 = vld [vmem:[#allocation7 + $0x524] ss:$16 sps:$4 sm:$0xff]   ;;  %v8907_v55 = vld [vmem:[#allocation7 + $0x520] ss:$16 sps:$4 sm:$0xff]  }
 0x20d   :  { %3321 = vmatpush1.bf16.msra.mxu0 %v8859_v6  ;;  %v8912_v50 = vld [vmem:[#allocation7 + $0x724] ss:$16 sps:$4 sm:$0xff]   ;;  %v667_v52 = vld [vmem:[#allocation2] sm:$0xfe]  ;;  %v669_v56 = vld [vmem:[#allocation2 + $0x10] sm:$0xfe] }
 0x20e   :  { %3322 = vmatprep.subr.bf16.mxu0 %v8867_v4  ;;  %v676_v60 = vld [vmem:[#allocation2 + $0x68] sm:$0xfe]  ;;  %v680_v63 = vld [vmem:[#allocation2 + $0xa8] sm:$0x1]  ;;  %v678_v59 = vld [vmem:[#allocation2 + $0x78] sm:$0xfe] }
 0x20f   :  { %3374 = vmatpush1.bf16.msra.mxu1 %v8862_v9  ;;  %v682_v5 = vld [vmem:[#allocation2 + $0xb8] sm:$0x1]  ;;  %v8910_v61 = vld [vmem:[#allocation7 + $0x720] ss:$16 sps:$4 sm:$0xff]   ;;  %v708_v9 = vrot.slane %v667_v52, 1  ;;  %v720_v4 = vrot.slane %v671_v54, 1 }
 0x210   :  { %3375 = vmatprep.subr.bf16.mxu1 %v8870_v7  ;;  %v8915_v0 = vld [vmem:[#allocation7 + $0x504] ss:$16 sps:$4 sm:$0xff]   ;;  %v714_v7 = vrot.slane %v669_v56, 1  ;;  %v8919_v52 = vld [vmem:[#allocation7 + $0x8e0] ss:$16 sps:$4 sm:$0xff]  }
 0x211   :  { %3323 = vmatpush1.bf16.msra.mxu0 %v8865_v8  ;;  %v8918_v6 = vld [vmem:[#allocation7 + $0x704] ss:$16 sps:$4 sm:$0xff]   ;;  %v724_v8 = vrot.slane %v673_v58, 1  ;;  %v8922_v58 = vld [vmem:[#allocation7 + $0xae0] ss:$16 sps:$4 sm:$0xff]  }
 0x212   :  { %3324 = vmatprep.subr.bf16.mxu0 %v8873_v11  ;;  %v742_v11 = vrot.slane %v680_v63, 1  ;;  %v767_v54 = vld [vmem:[#allocation2 + $0x18] sm:$0xfc]  ;;  %v771_v56 = vld [vmem:[#allocation2 + $0x58] sm:$0x3] }
 0x213   :  { %3376 = vmatpush1.bf16.msra.mxu1 %v8868_v10  ;;  %v731_v10 = vrot.slane %v676_v60, 1 }
 0x214   :  { %3377 = vmatprep.subr.bf16.mxu1 %v8876_v13  ;;  %v737_v13 = vrot.slane %v678_v59, 1  ;;  %v8927_v59 = vld [vmem:[#allocation7 + $0x8c4] ss:$16 sps:$4 sm:$0xff]  }
 0x215   :  { %3325 = vmatpush2.bf16.msra.mxu0 %v8871_v14  ;;  %v746_v14 = vrot.slane %v682_v5, 1 }
 0x216   :  { %3326 = vmatprep.subr.bf16.mxu0 %v8879_v19  ;;  %v715_v19 = vrot.slane %v10623_v1, 1 }
 0x217   :  { %3378 = vmatpush2.bf16.msra.mxu1 %v8874_v18  ;;  %v709_v18 = vrot.slane %v10614_v62, 1 }
 0x218   :  { %3379 = vmatprep.subr.bf16.mxu1 %v8882_v20  ;;  %v8913_v20 = vld [vmem:[#allocation7 + $0x500] ss:$16 sps:$4 sm:$0xff]  }
 0x219   :  { %3327 = vmatpush2.bf16.msra.mxu0 %v8877_v22  ;;  %v8916_v22 = vld [vmem:[#allocation7 + $0x700] ss:$16 sps:$4 sm:$0xff]  }
 0x21a   :  { %3328 = vmatprep.subr.bf16.mxu0 %v8885_v31  ;;  %v732_v31 = vrot.slane %v10630_v17, 1 }
 0x21b   :  { %3380 = vmatpush2.bf16.msra.mxu1 %v8880_v23  ;;  %v8921_v23 = vld [vmem:[#allocation7 + $0x8e4] ss:$16 sps:$4 sm:$0xff]  }
 0x21c   :  { %3381 = vmatprep.subr.bf16.mxu1 %v8888_v24  ;;  %v738_v24 = vrot.slane %v10637_v15, 1 }
 0x21d   :  { %3329 = vmatpush2.bf16.msra.mxu0 %v8883_v32  ;;  %v710_v32 = vsel %vm707_vm5, %v708_v9, %v709_v18 }
 0x21e   :  { %3330 = vmatprep.subr.bf16.mxu0 %v8891_v33  ;;  %v716_v33 = vsel %vm707_vm5, %v714_v7, %v715_v19 }
 0x21f   :  { %3382 = vmatpush2.bf16.msra.mxu1 %v8886_v25  ;;  %v721_v25 = vsel %vm707_vm5, %v709_v18, %v720_v4  ;;  %v801_v18 = vrot.slane %v10595_v43, 2 }
 0x220   :  { %3383 = vmatprep.subr.bf16.mxu1 %v8894_v27  ;;  %v725_v27 = vsel %vm707_vm5, %v715_v19, %v724_v8  ;;  %v729_v8 = vrot.slane %v10647_v29, 1  ;;  %v8928_v19 = vld [vmem:[#allocation7 + $0xac0] ss:$16 sps:$4 sm:$0xff]  }
 0x221   :  { %3331 = vmatpush2.bf16.msra.mxu0 %v8889_v34  ;;  %v8924_v34 = vld [vmem:[#allocation7 + $0xae4] ss:$16 sps:$4 sm:$0xff]  }
 0x222   :  { %3332 = vmatprep.subr.bf16.mxu0 %v8897_v35  ;;  %v743_v35 = vsel %vm707_vm5, %v732_v31, %v742_v11  ;;  %v815_v11 = vrot.slane %v771_v56, 2  ;;  %v8946_v56 = vld [vmem:[#allocation7 + $0xa60] ss:$16 sps:$4 sm:$0xff]  }
 0x223   :  { %3384 = vmatpush2.bf16.msra.mxu1 %v8892_v28  ;;  %v733_v28 = vsel %vm707_vm5, %v731_v10, %v732_v31  ;;  %v806_v10 = vrot.slane %v767_v54, 2  ;;  %v807_v31 = vrot.slane %v10602_v49, 2  ;;  %v8943_v54 = vld [vmem:[#allocation7 + $0x860] ss:$16 sps:$4 sm:$0xff]  }
 0x224   :  { %3385 = vmatprep.subr.bf16.mxu1 %v8900_v30  ;;  %v739_v30 = vsel %vm707_vm5, %v737_v13, %v738_v24  ;;  %v10686_v60 = vpack.c.bf16 %v743_v35, %v733_v28  ;;  %v8925_v13 = vld [vmem:[#allocation7 + $0x8c0] ss:$16 sps:$4 sm:$0xff]  }
 0x225   :  { %3333 = vmatpush2.bf16.msra.mxu0 %v8895_v40  ;;  %v747_v40 = vsel %vm707_vm5, %v738_v24, %v746_v14  ;;  %v735_v14 = vrot.slane %v10655_v39, 1  ;;  %v8931_v35 = vld [vmem:[#allocation7 + $0x8a0] ss:$16 sps:$4 sm:$0xff]  }
 0x226   :  { %3334 = vmatprep.subr.bf16.mxu0 %v8903_v37  ;;  %v679_v37 = vld [vmem:[#allocation2 + $0xa0] sm:$0x1]  ;;  %v10688_v63 = vpack.c.bf16 %v747_v40, %v739_v30  ;;  %v8934_v30 = vld [vmem:[#allocation7 + $0xaa0] ss:$16 sps:$4 sm:$0xff]  }
 0x227   :  { %3386 = vmatpush2.bf16.msra.mxu1 %v8898_v36  ;;  %v675_v36 = vld [vmem:[#allocation2 + $0x60] sm:$0xfe] }
 0x228   :  { %3387 = vmatprep.subr.bf16.mxu1 %v8906_v42  ;;  %v765_v42 = vld [vmem:[#allocation2 + $0x8] sm:$0xfc]  ;;  %v728_v5 = vrot.slane %v675_v36, 1 }
 0x229   :  { %3335 = vmatpush2.bf16.msra.mxu0 %v8901_v38  ;;  %v677_v38 = vld [vmem:[#allocation2 + $0x70] sm:$0xfe]  ;;  %v800_v4 = vrot.slane %v765_v42, 2  ;;  %v8939_v36 = vld [vmem:[#allocation7 + $0x884] ss:$16 sps:$4 sm:$0xff]  }
 0x22a   :  { %3336 = vmatprep.subr.bf16.mxu0 %v8909_v57  ;;  %v769_v57 = vld [vmem:[#allocation2 + $0x48] sm:$0x3] }
 0x22b   :  { %3388 = vmatpush2.bf16.msra.mxu1 %v8904_v46  ;;  %v681_v46 = vld [vmem:[#allocation2 + $0xb0] sm:$0x1]  ;;  %v811_v7 = vrot.slane %v769_v57, 2  ;;  %v8942_v42 = vld [vmem:[#allocation7 + $0xa84] ss:$16 sps:$4 sm:$0xff]  }
 0x22c   :  { %3389 = vmatprep.subr.bf16.mxu1 %v8912_v50  ;;  %v10684_v50 = vpack.c.bf16 %v725_v27, %v716_v33  ;;  %v744_v9 = vrot.slane %v681_v46, 1  ;;  %v802_v33 = vsel %vm796_vm6, %v800_v4, %v801_v18  ;;  %v808_v27 = vsel %vm796_vm6, %v806_v10, %v807_v31  ;;  %v8940_v46 = vld [vmem:[#allocation7 + $0xa80] ss:$16 sps:$4 sm:$0xff]   ;;  %v8945_v57 = vld [vmem:[#allocation7 + $0x864] ss:$16 sps:$4 sm:$0xff]  }
 0x22d   :  { %3337 = vmatpush2.bf16.msra.mxu0 %v8907_v55  ;;  %v10682_v55 = vpack.c.bf16 %v721_v25, %v710_v32  ;;  %v8936_v25 = vld [vmem:[#allocation7 + $0xaa4] ss:$16 sps:$4 sm:$0xff]   ;;  %v812_v43 = vsel %vm796_vm6, %v801_v18, %v811_v7  ;;  %v8958_v4 = vld [vmem:[#allocation7 + $0xa20] ss:$16 sps:$4 sm:$0xff]  }
 0x22e   :  { %3338 = vmatprep.subr.bf16.mxu0 %v8915_v0  ;;  %v8930_v0 = vld [vmem:[#allocation7 + $0xac4] ss:$16 sps:$4 sm:$0xff]   ;;  %v745_v32 = vsel %vm707_vm5, %v735_v14, %v744_v9  ;;  %v10710_v40 = vpack.c.bf16 %v812_v43, %v802_v33  ;;  %v8955_v9 = vld [vmem:[#allocation7 + $0x820] ss:$16 sps:$4 sm:$0xff]  }
 0x22f   :  { %3390 = vmatpush2.bf16.msra.mxu1 %v8910_v61  ;;  %v740_v61 = vrot.slane %v679_v37, 1  ;;  %v8963_v7 = vld [vmem:[#allocation7 + $0x804] ss:$16 sps:$4 sm:$0xff]   ;;  %v8961_v10 = vld [vmem:[#allocation7 + $0x800] ss:$16 sps:$4 sm:$0xff]  }
 0x230   :  { %3391 = vmatprep.subr.bf16.mxu1 %v8918_v6  ;;  %v734_v6 = vrot.slane %v677_v38, 1  ;;  %v8937_v38 = vld [vmem:[#allocation7 + $0x880] ss:$16 sps:$4 sm:$0xff]   ;;  %v8987_v43 = vld [vmem:[#allocation7 + $0x984] ss:$16 sps:$4 sm:$0xff]  }
 0x231   :  { %3339 = vmatpush2.bf16.msra.mxu0 %v8913_v20  ;;  %v730_v20 = vsel %vm707_vm5, %v728_v5, %v729_v8  ;;  %v8949_v5 = vld [vmem:[#allocation7 + $0x840] ss:$16 sps:$4 sm:$0xff]  }
 0x232   :  { %3414 = vmatprep.subr.bf16.mxu0 %v8921_v23  ;;  %v8933_v23 = vld [vmem:[#allocation7 + $0x8a4] ss:$16 sps:$4 sm:$0xff]   ;;  %v736_v24 = vsel %vm707_vm5, %v734_v6, %v735_v14  ;;  %v8967_v18 = vld [vmem:[#allocation7 + $0x9e0] ss:$16 sps:$4 sm:$0xff]  }
 0x233   :  { %3392 = vmatpush2.bf16.msra.mxu1 %v8916_v22  ;;  %v741_v22 = vsel %vm707_vm5, %v729_v8, %v740_v61  ;;  %v10708_v49 = vpack.c.bf16 %v745_v32, %v736_v24  ;;  %v8952_v61 = vld [vmem:[#allocation7 + $0xa40] ss:$16 sps:$4 sm:$0xff]   ;;  %v8960_v6 = vld [vmem:[#allocation7 + $0xa24] ss:$16 sps:$4 sm:$0xff]  }
 0x234   :  { %3467 = vmatprep.subr.bf16.mxu1 %v8924_v34  ;;  %3341 = vmatmul.mubr.bf16.vlgmr.msra.gmra.mxu0 %v10682_v55  ;;  %v816_v34 = vsel %vm796_vm6, %v807_v31, %v815_v11  ;;  %v10706_v28 = vpack.c.bf16 %v741_v22, %v730_v20  ;;  %v8966_v8 = vld [vmem:[#allocation7 + $0xa04] ss:$16 sps:$4 sm:$0xff]   ;;  %v8964_v11 = vld [vmem:[#allocation7 + $0xa00] ss:$16 sps:$4 sm:$0xff]  }
 0x235   :  { %3350 = vmatprep.mubr.bf16.mxu0 %v10686_v60  ;;  %3415 = vmatpush1.bf16.msra.mxu0 %v8919_v52  ;;  %v10713_v37 = vpack.c.bf16 %v816_v34, %v808_v27  ;;  %v8948_v52 = vld [vmem:[#allocation7 + $0xa64] ss:$16 sps:$4 sm:$0xff]   ;;  %v8976_v31 = vld [vmem:[#allocation7 + $0xbc0] ss:$16 sps:$4 sm:$0xff]  }
 0x236   :  { %3394 = vmatmul.mubr.bf16.vlgmr.msra.gmra.mxu1 %v10684_v50  ;;  %3416 = vmatprep.subr.bf16.mxu0 %v8927_v59  ;;  %v8954_v59 = vld [vmem:[#allocation7 + $0xa44] ss:$16 sps:$4 sm:$0xff]   ;;  %v8982_v33 = vld [vmem:[#allocation7 + $0xba0] ss:$16 sps:$4 sm:$0xff]  }
 0x237   :  { %3403 = vmatprep.mubr.bf16.mxu1 %v10688_v63  ;;  %3468 = vmatpush1.bf16.msra.mxu1 %v8922_v58  ;;  %v8951_v58 = vld [vmem:[#allocation7 + $0x844] ss:$16 sps:$4 sm:$0xff]   ;;  %v8985_v34 = vld [vmem:[#allocation7 + $0x980] ss:$16 sps:$4 sm:$0xff]  }
 0x238   :  { %3469 = vmatprep.subr.bf16.mxu1 %v8930_v0  ;;  %v8957_v0 = vld [vmem:[#allocation7 + $0x824] ss:$16 sps:$4 sm:$0xff]  }
 0x239   :  { %3417 = vmatpush1.bf16.msra.mxu0 %v8925_v13  ;;  %v8969_v13 = vld [vmem:[#allocation7 + $0x9e4] ss:$16 sps:$4 sm:$0xff]  }
 0x23a   :  { %3418 = vmatprep.subr.bf16.mxu0 %v8933_v23  ;;  %v8972_v14 = vld [vmem:[#allocation7 + $0xbe4] ss:$16 sps:$4 sm:$0xff]   ;;  %v8973_v23 = vld [vmem:[#allocation7 + $0x9c0] ss:$16 sps:$4 sm:$0xff]  }
 0x23b   :  { %3470 = vmatpush1.bf16.msra.mxu1 %v8928_v19  ;;  %v8970_v19 = vld [vmem:[#allocation7 + $0xbe0] ss:$16 sps:$4 sm:$0xff]   ;;  %v8975_v20 = vld [vmem:[#allocation7 + $0x9c4] ss:$16 sps:$4 sm:$0xff]  }
 0x23c   :  { %3351 = vmatmul.mubr.bf16.gmra.mxu0 %v10706_v28  ;;  %3471 = vmatprep.subr.bf16.mxu1 %v8936_v25  ;;  %v8978_v22 = vld [vmem:[#allocation7 + $0xbc4] ss:$16 sps:$4 sm:$0xff]   ;;  %v8979_v25 = vld [vmem:[#allocation7 + $0x9a0] ss:$16 sps:$4 sm:$0xff]  }
 0x23d   :  { %3446 = vmatprep.mubr.bf16.mxu0 %v10710_v40  ;;  %3419 = vmatpush1.bf16.msra.mxu0 %v8931_v35  ;;  %v8981_v24 = vld [vmem:[#allocation7 + $0x9a4] ss:$16 sps:$4 sm:$0xff]   ;;  %v8988_v35 = vld [vmem:[#allocation7 + $0xb80] ss:$16 sps:$4 sm:$0xff]  }
 0x23e   :  { %3404 = vmatmul.mubr.bf16.gmra.mxu1 %v10708_v49  ;;  %3420 = vmatprep.subr.bf16.mxu0 %v8939_v36  ;;  %v8984_v32 = vld [vmem:[#allocation7 + $0xba4] ss:$16 sps:$4 sm:$0xff]  }
 0x23f   :  { %3499 = vmatprep.mubr.bf16.mxu1 %v10713_v37  ;;  %3472 = vmatpush1.bf16.msra.mxu1 %v8934_v30  ;;  %v8990_v27 = vld [vmem:[#allocation7 + $0xb84] ss:$16 sps:$4 sm:$0xff]  }
 0x240   :  { %3473 = vmatprep.subr.bf16.mxu1 %v8942_v42  ;;  %v8993_v30 = vld [vmem:[#allocation7 + $0x964] ss:$16 sps:$4 sm:$0xff]   ;;  %v8991_v42 = vld [vmem:[#allocation7 + $0x960] ss:$16 sps:$4 sm:$0xff]  }
 0x241   :  { %3421 = vmatpush1.bf16.msra.mxu0 %v8937_v38  ;;  %v8996_v36 = vld [vmem:[#allocation7 + $0xb64] ss:$16 sps:$4 sm:$0xff]   ;;  %v8994_v38 = vld [vmem:[#allocation7 + $0xb60] ss:$16 sps:$4 sm:$0xff]  }
 0x242   :  { %3422 = vmatprep.subr.bf16.mxu0 %v8945_v57  ;;  %v9002_v57 = vld [vmem:[#allocation7 + $0xb44] ss:$16 sps:$4 sm:$0xff]  }
 0x243   :  { %3474 = vmatpush1.bf16.msra.mxu1 %v8940_v46  ;;  %v8999_v46 = vld [vmem:[#allocation7 + $0x944] ss:$16 sps:$4 sm:$0xff]  }
 0x244   :  { %3475 = vmatprep.subr.bf16.mxu1 %v8948_v52  ;;  %v8997_v52 = vld [vmem:[#allocation7 + $0x940] ss:$16 sps:$4 sm:$0xff]  }
 0x245   :  { %3423 = vmatpush1.bf16.msra.mxu0 %v8943_v54  ;;  %v9000_v54 = vld [vmem:[#allocation7 + $0xb40] ss:$16 sps:$4 sm:$0xff]  }
 0x246   :  { %3424 = vmatprep.subr.bf16.mxu0 %v8951_v58  ;;  %v9003_v58 = vld [vmem:[#allocation7 + $0x920] ss:$16 sps:$4 sm:$0xff]  }
 0x247   :  { %3476 = vmatpush1.bf16.msra.mxu1 %v8946_v56  ;;  %v9005_v56 = vld [vmem:[#allocation7 + $0x924] ss:$16 sps:$4 sm:$0xff]  }
 0x248   :  { %3477 = vmatprep.subr.bf16.mxu1 %v8954_v59  ;;  %v9008_v59 = vld [vmem:[#allocation7 + $0xb24] ss:$16 sps:$4 sm:$0xff]  }
 0x249   :  { %3425 = vmatpush1.bf16.msra.mxu0 %v8949_v5  ;;  %v9006_v5 = vld [vmem:[#allocation7 + $0xb20] ss:$16 sps:$4 sm:$0xff]  }
 0x24a   :  { %3426 = vmatprep.subr.bf16.mxu0 %v8957_v0  ;;  %v768_v0 = vld [vmem:[#allocation2 + $0x40] sm:$0x3] }
 0x24b   :  { %3478 = vmatpush1.bf16.msra.mxu1 %v8952_v61  ;;  %v764_v61 = vld [vmem:[#allocation2] sm:$0xfc] }
 0x24c   :  { %3479 = vmatprep.subr.bf16.mxu1 %v8960_v6  ;;  %v766_v6 = vld [vmem:[#allocation2 + $0x10] sm:$0xfc] }
 0x24d   :  { %3427 = vmatpush1.bf16.msra.mxu0 %v8955_v9  ;;  %v770_v9 = vld [vmem:[#allocation2 + $0x50] sm:$0x3] }
 0x24e   :  { %3428 = vmatprep.subr.bf16.mxu0 %v8963_v7  ;;  %v777_v7 = vld [vmem:[#allocation2 + $0xa8] sm:$0x3] }
 0x24f   :  { %3480 = vmatpush1.bf16.msra.mxu1 %v8958_v4  ;;  %v773_v4 = vld [vmem:[#allocation2 + $0x68] sm:$0xfc] }
 0x250   :  { %3481 = vmatprep.subr.bf16.mxu1 %v8966_v8  ;;  %v9011_v8 = vld [vmem:[#allocation7 + $0x904] ss:$16 sps:$4 sm:$0xff]  }
 0x251   :  { %3429 = vmatpush1.bf16.msra.mxu0 %v8961_v10  ;;  %v775_v10 = vld [vmem:[#allocation2 + $0x78] sm:$0xfc] }
 0x252   :  { %3430 = vmatprep.subr.bf16.mxu0 %v8969_v13  ;;  %v9014_v13 = vld [vmem:[#allocation7 + $0xb04] ss:$16 sps:$4 sm:$0xff]  }
 0x253   :  { %3482 = vmatpush1.bf16.msra.mxu1 %v8964_v11  ;;  %v779_v11 = vld [vmem:[#allocation2 + $0xb8] sm:$0x3] }
 0x254   :  { %3483 = vmatprep.subr.bf16.mxu1 %v8972_v14  ;;  %v797_v14 = vrot.slane %v764_v61, 2  ;;  %v9018_v61 = vld [vmem:[#allocation7 + $0x2e8] ss:$16 sps:$4 sm:$0xff]  }
 0x255   :  { %3431 = vmatpush2.bf16.msra.mxu0 %v8967_v18  ;;  %v809_v18 = vrot.slane %v768_v0, 2 }
 0x256   :  { %3432 = vmatprep.subr.bf16.mxu0 %v8975_v20  ;;  %v813_v20 = vrot.slane %v770_v9, 2 }
 0x257   :  { %3484 = vmatpush2.bf16.msra.mxu1 %v8970_v19  ;;  %v803_v19 = vrot.slane %v766_v6, 2  ;;  %v9023_v6 = vld [vmem:[#allocation7 + $0xcc] ss:$16 sps:$4 sm:$0xff]  }
 0x258   :  { %3485 = vmatprep.subr.bf16.mxu1 %v8978_v22  ;;  %v820_v22 = vrot.slane %v773_v4, 2 }
 0x259   :  { %3433 = vmatpush2.bf16.msra.mxu0 %v8973_v23  ;;  %v831_v23 = vrot.slane %v777_v7, 2 }
 0x25a   :  { %3434 = vmatprep.subr.bf16.mxu0 %v8981_v24  ;;  %v9009_v24 = vld [vmem:[#allocation7 + $0x900] ss:$16 sps:$4 sm:$0xff]  }
 0x25b   :  { %3486 = vmatpush2.bf16.msra.mxu1 %v8976_v31  ;;  %v798_v31 = vrot.slane %v10614_v62, 2  ;;  %v827_v62 = vrot.slane %v10637_v15, 2  ;;  %v9015_v15 = vld [vmem:[#allocation7 + $0xe8] ss:$16 sps:$4 sm:$0xff]  }
 0x25c   :  { %3487 = vmatprep.subr.bf16.mxu1 %v8984_v32  ;;  %v826_v32 = vrot.slane %v775_v10, 2 }
 0x25d   :  { %3435 = vmatpush2.bf16.msra.mxu0 %v8979_v25  ;;  %v835_v25 = vrot.slane %v779_v11, 2 }
 0x25e   :  { %3436 = vmatprep.subr.bf16.mxu0 %v8987_v43  ;;  %v9012_v43 = vld [vmem:[#allocation7 + $0xb00] ss:$16 sps:$4 sm:$0xff]  }
 0x25f   :  { %3488 = vmatpush2.bf16.msra.mxu1 %v8982_v33  ;;  %v804_v33 = vrot.slane %v10623_v1, 2 }
 0x260   :  { %3489 = vmatprep.subr.bf16.mxu1 %v8990_v27  ;;  %v9017_v27 = vld [vmem:[#allocation7 + $0xec] ss:$16 sps:$4 sm:$0xff]  }
 0x261   :  { %3437 = vmatpush2.bf16.msra.mxu0 %v8985_v34  ;;  %v821_v34 = vrot.slane %v10630_v17, 2  ;;  %v828_v17 = vsel %vm796_vm6, %v826_v32, %v827_v62 }
 0x262   :  { %3438 = vmatprep.subr.bf16.mxu0 %v8993_v30  ;;  %v810_v30 = vsel %vm796_vm6, %v798_v31, %v809_v18  ;;  %v824_v18 = vrot.slane %v10655_v39, 2 }
 0x263   :  { %3490 = vmatpush2.bf16.msra.mxu1 %v8988_v35  ;;  %v799_v35 = vsel %vm796_vm6, %v797_v14, %v798_v31  ;;  %v822_v1 = vsel %vm796_vm6, %v820_v22, %v821_v34  ;;  %v9021_v14 = vld [vmem:[#allocation7 + $0xc8] ss:$16 sps:$4 sm:$0xff]  }
 0x264   :  { %3491 = vmatprep.subr.bf16.mxu1 %v8996_v36  ;;  %v9020_v36 = vld [vmem:[#allocation7 + $0x2ec] ss:$16 sps:$4 sm:$0xff]  }
 0x265   :  { %3439 = vmatpush2.bf16.msra.mxu0 %v8991_v42  ;;  %v805_v42 = vsel %vm796_vm6, %v803_v19, %v804_v33  ;;  %v9024_v19 = vld [vmem:[#allocation7 + $0x2c8] ss:$16 sps:$4 sm:$0xff]  }
 0x266   :  { %3440 = vmatprep.subr.bf16.mxu0 %v8999_v46  ;;  %v832_v46 = vsel %vm796_vm6, %v821_v34, %v831_v23  ;;  %v9029_v23 = vld [vmem:[#allocation7 + $0xac] ss:$16 sps:$4 sm:$0xff]   ;;  %v9033_v34 = vld [vmem:[#allocation7 + $0x88] ss:$16 sps:$4 sm:$0xff]  }
 0x267   :  { %3492 = vmatpush2.bf16.msra.mxu1 %v8994_v38  ;;  %v814_v38 = vsel %vm796_vm6, %v804_v33, %v813_v20  ;;  %v10734_v0 = vpack.c.bf16 %v832_v46, %v822_v1  ;;  %v9030_v33 = vld [vmem:[#allocation7 + $0x2a8] ss:$16 sps:$4 sm:$0xff]   ;;  %v9050_v1 = vld [vmem:[#allocation7 + $0x24c] ss:$16 sps:$4 sm:$0xff]  }
 0x268   :  { %3493 = vmatprep.subr.bf16.mxu1 %v9002_v57  ;;  %v772_v57 = vld [vmem:[#allocation2 + $0x60] sm:$0xfc] }
 0x269   :  { %3441 = vmatpush2.bf16.msra.mxu0 %v8997_v52  ;;  %v776_v52 = vld [vmem:[#allocation2 + $0xa0] sm:$0x3]  ;;  %v817_v9 = vrot.slane %v772_v57, 2 }
 0x26a   :  { %3442 = vmatprep.subr.bf16.mxu0 %v9005_v56  ;;  %v774_v56 = vld [vmem:[#allocation2 + $0x70] sm:$0xfc]  ;;  %v829_v4 = vrot.slane %v776_v52, 2  ;;  %v9051_v52 = vld [vmem:[#allocation7 + $0x28] ss:$16 sps:$4 sm:$0xff]  }
 0x26b   :  { %3494 = vmatpush2.bf16.msra.mxu1 %v9000_v54  ;;  %v836_v54 = vsel %vm796_vm6, %v827_v62, %v835_v25  ;;  %v823_v10 = vrot.slane %v774_v56, 2  ;;  %v9027_v25 = vld [vmem:[#allocation7 + $0xa8] ss:$16 sps:$4 sm:$0xff]   ;;  %v9053_v46 = vld [vmem:[#allocation7 + $0x2c] ss:$16 sps:$4 sm:$0xff]  }
 0x26c   :  { %3495 = vmatprep.subr.bf16.mxu1 %v9008_v59  ;;  %v10730_v59 = vpack.c.bf16 %v810_v30, %v799_v35  ;;  %v10737_v7 = vpack.c.bf16 %v836_v54, %v828_v17  ;;  %v9036_v35 = vld [vmem:[#allocation7 + $0x288] ss:$16 sps:$4 sm:$0xff]   ;;  %v9041_v30 = vld [vmem:[#allocation7 + $0x6c] ss:$16 sps:$4 sm:$0xff]  }
 0x26d   :  { %3443 = vmatpush2.bf16.msra.mxu0 %v9003_v58  ;;  %v778_v58 = vld [vmem:[#allocation2 + $0xb0] sm:$0x3]  ;;  %v825_v31 = vsel %vm796_vm6, %v823_v10, %v824_v18  ;;  %v9039_v62 = vld [vmem:[#allocation7 + $0x68] ss:$16 sps:$4 sm:$0xff]  }
 0x26e   :  { %3444 = vmatprep.subr.bf16.mxu0 %v9011_v8  ;;  %v9026_v8 = vld [vmem:[#allocation7 + $0x2cc] ss:$16 sps:$4 sm:$0xff]   ;;  %v833_v11 = vrot.slane %v778_v58, 2  ;;  %v9054_v17 = vld [vmem:[#allocation7 + $0x228] ss:$16 sps:$4 sm:$0xff]  }
 0x26f   :  { %3496 = vmatpush2.bf16.msra.mxu1 %v9006_v5  ;;  %v10732_v5 = vpack.c.bf16 %v814_v38, %v805_v42  ;;  %v9042_v42 = vld [vmem:[#allocation7 + $0x268] ss:$16 sps:$4 sm:$0xff]   ;;  %v9047_v38 = vld [vmem:[#allocation7 + $0x4c] ss:$16 sps:$4 sm:$0xff]  }
 0x270   :  { %3497 = vmatprep.subr.bf16.mxu1 %v9014_v13  ;;  %v818_v13 = vrot.slane %v10647_v29, 2  ;;  %v9032_v29 = vld [vmem:[#allocation7 + $0x2ac] ss:$16 sps:$4 sm:$0xff]   ;;  %v9057_v58 = vld [vmem:[#allocation7 + $0x8] ss:$16 sps:$4 sm:$0xff]  }
 0x271   :  { %3445 = vmatpush2.bf16.msra.mxu0 %v9009_v24  ;;  %v834_v24 = vsel %vm796_vm6, %v824_v18, %v833_v11  ;;  %v9056_v57 = vld [vmem:[#allocation7 + $0x22c] ss:$16 sps:$4 sm:$0xff]   ;;  %v9069_v11 = vld [vmem:[#allocation7 + $0x1c8] ss:$16 sps:$4 sm:$0xff]  }
 0x272   :  { %3520 = vmatprep.subr.bf16.mxu0 %v9017_v27  ;;  %v819_v20 = vsel %vm796_vm6, %v817_v9, %v818_v13  ;;  %v830_v22 = vsel %vm796_vm6, %v818_v13, %v829_v4  ;;  %v10750_v39 = vpack.c.bf16 %v834_v24, %v825_v31  ;;  %v9038_v27 = vld [vmem:[#allocation7 + $0x28c] ss:$16 sps:$4 sm:$0xff]   ;;  %v9063_v9 = vld [vmem:[#allocation7 + $0x1e8] ss:$16 sps:$4 sm:$0xff]  }
 0x273   :  { %3498 = vmatpush2.bf16.msra.mxu1 %v9012_v43  ;;  %v10748_v32 = vpack.c.bf16 %v830_v22, %v819_v20  ;;  %v9035_v43 = vld [vmem:[#allocation7 + $0x8c] ss:$16 sps:$4 sm:$0xff]   ;;  %v9066_v4 = vld [vmem:[#allocation7 + $0x3e8] ss:$16 sps:$4 sm:$0xff]  }
 0x274   :  { %3573 = vmatprep.subr.bf16.mxu1 %v9020_v36  ;;  %3447 = vmatmul.mubr.bf16.vlgmr.msra.gmra.mxu0 %v10730_v59  ;;  %v9044_v36 = vld [vmem:[#allocation7 + $0x26c] ss:$16 sps:$4 sm:$0xff]   ;;  %v9072_v13 = vld [vmem:[#allocation7 + $0x3c8] ss:$16 sps:$4 sm:$0xff]  }
 0x275   :  { %3456 = vmatprep.mubr.bf16.mxu0 %v10734_v0  ;;  %3521 = vmatpush1.bf16.msra.mxu0 %v9015_v15  ;;  %v9059_v54 = vld [vmem:[#allocation7 + $0xc] ss:$16 sps:$4 sm:$0xff]   ;;  %v9060_v15 = vld [vmem:[#allocation7 + $0x208] ss:$16 sps:$4 sm:$0xff]  }
 0x276   :  { %3500 = vmatmul.mubr.bf16.vlgmr.msra.gmra.mxu1 %v10732_v5  ;;  %3522 = vmatprep.subr.bf16.mxu0 %v9023_v6  ;;  %v9062_v56 = vld [vmem:[#allocation7 + $0x20c] ss:$16 sps:$4 sm:$0xff]   ;;  %v9078_v20 = vld [vmem:[#allocation7 + $0x3a8] ss:$16 sps:$4 sm:$0xff]  }
 0x277   :  { %3509 = vmatprep.mubr.bf16.mxu1 %v10737_v7  ;;  %3574 = vmatpush1.bf16.msra.mxu1 %v9018_v61  ;;  %v9065_v61 = vld [vmem:[#allocation7 + $0x1ec] ss:$16 sps:$4 sm:$0xff]   ;;  %v9081_v31 = vld [vmem:[#allocation7 + $0x188] ss:$16 sps:$4 sm:$0xff]  }
 0x278   :  { %3575 = vmatprep.subr.bf16.mxu1 %v9026_v8  ;;  %v9068_v6 = vld [vmem:[#allocation7 + $0x3ec] ss:$16 sps:$4 sm:$0xff]   ;;  %v9084_v24 = vld [vmem:[#allocation7 + $0x388] ss:$16 sps:$4 sm:$0xff]  }
 0x279   :  { %3523 = vmatpush1.bf16.msra.mxu0 %v9021_v14  ;;  %v9071_v8 = vld [vmem:[#allocation7 + $0x1cc] ss:$16 sps:$4 sm:$0xff]  }
 0x27a   :  { %3524 = vmatprep.subr.bf16.mxu0 %v9029_v23  ;;  %v9074_v10 = vld [vmem:[#allocation7 + $0x3cc] ss:$16 sps:$4 sm:$0xff]  }
 0x27b   :  { %3576 = vmatpush1.bf16.msra.mxu1 %v9024_v19  ;;  %v9077_v14 = vld [vmem:[#allocation7 + $0x1ac] ss:$16 sps:$4 sm:$0xff]   ;;  %v9075_v19 = vld [vmem:[#allocation7 + $0x1a8] ss:$16 sps:$4 sm:$0xff]  }
 0x27c   :  { %3457 = vmatmul.mubr.bf16.gmra.mxu0 %v10748_v32  ;;  %3577 = vmatprep.subr.bf16.mxu1 %v9032_v29  ;;  %v9080_v18 = vld [vmem:[#allocation7 + $0x3ac] ss:$16 sps:$4 sm:$0xff]  }
 0x27d   :  { %3552 = vmatprep.mubr.bf16.mxu0 %v10599_v47  ;;  %3525 = vmatpush1.bf16.msra.mxu0 %v9027_v25  ;;  %v9045_v47 = vld [vmem:[#allocation7 + $0x48] ss:$16 sps:$4 sm:$0xff]   ;;  %v9083_v22 = vld [vmem:[#allocation7 + $0x18c] ss:$16 sps:$4 sm:$0xff]  }
 0x27e   :  { %3510 = vmatmul.mubr.bf16.gmra.mxu1 %v10750_v39  ;;  %3526 = vmatprep.subr.bf16.mxu0 %v9035_v43  ;;  %v9086_v23 = vld [vmem:[#allocation7 + $0x38c] ss:$16 sps:$4 sm:$0xff]   ;;  %v9090_v43 = vld [vmem:[#allocation7 + $0x368] ss:$16 sps:$4 sm:$0xff]  }
 0x27f   :  { %3605 = vmatprep.mubr.bf16.mxu1 %v10608_v2  ;;  %3578 = vmatpush1.bf16.msra.mxu1 %v9030_v33  ;;  %v9048_v2 = vld [vmem:[#allocation7 + $0x248] ss:$16 sps:$4 sm:$0xff]   ;;  %v9089_v29 = vld [vmem:[#allocation7 + $0x16c] ss:$16 sps:$4 sm:$0xff]  }
 0x280   :  { %3579 = vmatprep.subr.bf16.mxu1 %v9038_v27  ;;  %v9092_v25 = vld [vmem:[#allocation7 + $0x36c] ss:$16 sps:$4 sm:$0xff]   ;;  %v9087_v33 = vld [vmem:[#allocation7 + $0x168] ss:$16 sps:$4 sm:$0xff]  }
 0x281   :  { %3527 = vmatpush1.bf16.msra.mxu0 %v9033_v34  ;;  %v9095_v27 = vld [vmem:[#allocation7 + $0x14c] ss:$16 sps:$4 sm:$0xff]  }
 0x282   :  { %3528 = vmatprep.subr.bf16.mxu0 %v9041_v30  ;;  %v9098_v34 = vld [vmem:[#allocation7 + $0x34c] ss:$16 sps:$4 sm:$0xff]   ;;  %v9096_v30 = vld [vmem:[#allocation7 + $0x348] ss:$16 sps:$4 sm:$0xff]  }
 0x283   :  { %3580 = vmatpush1.bf16.msra.mxu1 %v9036_v35  ;;  %v9093_v35 = vld [vmem:[#allocation7 + $0x148] ss:$16 sps:$4 sm:$0xff]  }
 0x284   :  { %3581 = vmatprep.subr.bf16.mxu1 %v9044_v36  ;;  %v9101_v36 = vld [vmem:[#allocation7 + $0x12c] ss:$16 sps:$4 sm:$0xff]  }
 0x285   :  { %3529 = vmatpush1.bf16.msra.mxu0 %v9039_v62  ;;  %v9104_v62 = vld [vmem:[#allocation7 + $0x32c] ss:$16 sps:$4 sm:$0xff]  }
 0x286   :  { %3530 = vmatprep.subr.bf16.mxu0 %v9047_v38  ;;  %v9102_v38 = vld [vmem:[#allocation7 + $0x328] ss:$16 sps:$4 sm:$0xff]  }
 0x287   :  { %3582 = vmatpush1.bf16.msra.mxu1 %v9042_v42  ;;  %v9099_v42 = vld [vmem:[#allocation7 + $0x128] ss:$16 sps:$4 sm:$0xff]  }
 0x288   :  { %3583 = vmatprep.subr.bf16.mxu1 %v9050_v1  ;;  %v9107_v1 = vld [vmem:[#allocation7 + $0x10c] ss:$16 sps:$4 sm:$0xff]  }
 0x289   :  { %3531 = vmatpush1.bf16.msra.mxu0 %v9045_v47  ;;  %v9110_v47 = vld [vmem:[#allocation7 + $0x30c] ss:$16 sps:$4 sm:$0xff]  }
 0x28a   :  { %3532 = vmatprep.subr.bf16.mxu0 %v9053_v46  ;;  %v9108_v46 = vld [vmem:[#allocation7 + $0x308] ss:$16 sps:$4 sm:$0xff]  }
 0x28b   :  { %3584 = vmatpush1.bf16.msra.mxu1 %v9048_v2  ;;  %v9105_v2 = vld [vmem:[#allocation7 + $0x108] ss:$16 sps:$4 sm:$0xff]  }
 0x28c   :  { %3585 = vmatprep.subr.bf16.mxu1 %v9056_v57  ;;  %v9113_v57 = vld [vmem:[#allocation7 + $0x4ec] ss:$16 sps:$4 sm:$0xff]  }
 0x28d   :  { %3533 = vmatpush1.bf16.msra.mxu0 %v9051_v52  ;;  %v9116_v52 = vld [vmem:[#allocation7 + $0x6ec] ss:$16 sps:$4 sm:$0xff]  }
 0x28e   :  { %3534 = vmatprep.subr.bf16.mxu0 %v9059_v54  ;;  %v9114_v54 = vld [vmem:[#allocation7 + $0x6e8] ss:$16 sps:$4 sm:$0xff]  }
 0x28f   :  { %3586 = vmatpush1.bf16.msra.mxu1 %v9054_v17  ;;  %v9111_v17 = vld [vmem:[#allocation7 + $0x4e8] ss:$16 sps:$4 sm:$0xff]  }
 0x290   :  { %3587 = vmatprep.subr.bf16.mxu1 %v9062_v56  ;;  %v9119_v56 = vld [vmem:[#allocation7 + $0x4cc] ss:$16 sps:$4 sm:$0xff]  }
 0x291   :  { %3535 = vmatpush1.bf16.msra.mxu0 %v9057_v58  ;;  %v9122_v58 = vld [vmem:[#allocation7 + $0x6cc] ss:$16 sps:$4 sm:$0xff]  }
 0x292   :  { %3536 = vmatprep.subr.bf16.mxu0 %v9065_v61  ;;  %v9120_v61 = vld [vmem:[#allocation7 + $0x6c8] ss:$16 sps:$4 sm:$0xff]  }
 0x293   :  { %3588 = vmatpush1.bf16.msra.mxu1 %v9060_v15  ;;  %v9117_v15 = vld [vmem:[#allocation7 + $0x4c8] ss:$16 sps:$4 sm:$0xff]  }
 0x294   :  { %3589 = vmatprep.subr.bf16.mxu1 %v9068_v6  ;;  %v9125_v6 = vld [vmem:[#allocation7 + $0x4ac] ss:$16 sps:$4 sm:$0xff]  }
 0x295   :  { %3537 = vmatpush2.bf16.msra.mxu0 %v9063_v9  ;;  %v9128_v9 = vld [vmem:[#allocation7 + $0x6ac] ss:$16 sps:$4 sm:$0xff]  }
 0x296   :  { %3538 = vmatprep.subr.bf16.mxu0 %v9071_v8  ;;  %v9131_v8 = vld [vmem:[#allocation7 + $0x48c] ss:$16 sps:$4 sm:$0xff]  }
 0x297   :  { %3590 = vmatpush2.bf16.msra.mxu1 %v9066_v4  ;;  %v9123_v4 = vld [vmem:[#allocation7 + $0x4a8] ss:$16 sps:$4 sm:$0xff]  }
 0x298   :  { %3591 = vmatprep.subr.bf16.mxu1 %v9074_v10  ;;  %v9137_v10 = vld [vmem:[#allocation7 + $0x46c] ss:$16 sps:$4 sm:$0xff]  }
 0x299   :  { %3539 = vmatpush2.bf16.msra.mxu0 %v9069_v11  ;;  %v9140_v11 = vld [vmem:[#allocation7 + $0x66c] ss:$16 sps:$4 sm:$0xff]  }
 0x29a   :  { %3540 = vmatprep.subr.bf16.mxu0 %v9077_v14  ;;  %v9143_v14 = vld [vmem:[#allocation7 + $0x44c] ss:$16 sps:$4 sm:$0xff]  }
 0x29b   :  { %3592 = vmatpush2.bf16.msra.mxu1 %v9072_v13  ;;  %v9135_v13 = vld [vmem:[#allocation7 + $0x468] ss:$16 sps:$4 sm:$0xff]  }
 0x29c   :  { %3593 = vmatprep.subr.bf16.mxu1 %v9080_v18  ;;  %v9149_v18 = vld [vmem:[#allocation7 + $0x42c] ss:$16 sps:$4 sm:$0xff]  }
 0x29d   :  { %3541 = vmatpush2.bf16.msra.mxu0 %v9075_v19  ;;  %v9152_v19 = vld [vmem:[#allocation7 + $0x62c] ss:$16 sps:$4 sm:$0xff]  }
 0x29e   :  { %3542 = vmatprep.subr.bf16.mxu0 %v9083_v22  ;;  %v9150_v22 = vld [vmem:[#allocation7 + $0x628] ss:$16 sps:$4 sm:$0xff]  }
 0x29f   :  { %3594 = vmatpush2.bf16.msra.mxu1 %v9078_v20  ;;  %v9147_v20 = vld [vmem:[#allocation7 + $0x428] ss:$16 sps:$4 sm:$0xff]  }
 0x2a0   :  { %3595 = vmatprep.subr.bf16.mxu1 %v9086_v23  ;;  %v9155_v23 = vld [vmem:[#allocation7 + $0x40c] ss:$16 sps:$4 sm:$0xff]  }
 0x2a1   :  { %3543 = vmatpush2.bf16.msra.mxu0 %v9081_v31  ;;  %v9158_v31 = vld [vmem:[#allocation7 + $0x60c] ss:$16 sps:$4 sm:$0xff]  }
 0x2a2   :  { %3544 = vmatprep.subr.bf16.mxu0 %v9089_v29  ;;  %v9156_v29 = vld [vmem:[#allocation7 + $0x608] ss:$16 sps:$4 sm:$0xff]  }
 0x2a3   :  { %3596 = vmatpush2.bf16.msra.mxu1 %v9084_v24  ;;  %v9153_v24 = vld [vmem:[#allocation7 + $0x408] ss:$16 sps:$4 sm:$0xff]  }
 0x2a4   :  { %3597 = vmatprep.subr.bf16.mxu1 %v9092_v25  ;;  %v9161_v25 = vld [vmem:[#allocation7 + $0x5ec] ss:$16 sps:$4 sm:$0xff]  }
 0x2a5   :  { %3545 = vmatpush2.bf16.msra.mxu0 %v9087_v33  ;;  %v9164_v33 = vld [vmem:[#allocation7 + $0x7ec] ss:$16 sps:$4 sm:$0xff]  }
 0x2a6   :  { %3546 = vmatprep.subr.bf16.mxu0 %v9095_v27  ;;  %v9162_v27 = vld [vmem:[#allocation7 + $0x7e8] ss:$16 sps:$4 sm:$0xff]  }
 0x2a7   :  { %3598 = vmatpush2.bf16.msra.mxu1 %v9090_v43  ;;  %v9159_v43 = vld [vmem:[#allocation7 + $0x5e8] ss:$16 sps:$4 sm:$0xff]  }
 0x2a8   :  { %3599 = vmatprep.subr.bf16.mxu1 %v9098_v34  ;;  %v9167_v34 = vld [vmem:[#allocation7 + $0x5cc] ss:$16 sps:$4 sm:$0xff]  }
 0x2a9   :  { %3547 = vmatpush2.bf16.msra.mxu0 %v9093_v35  ;;  %v9170_v35 = vld [vmem:[#allocation7 + $0x7cc] ss:$16 sps:$4 sm:$0xff]  }
 0x2aa   :  { %3548 = vmatprep.subr.bf16.mxu0 %v9101_v36  ;;  %v9168_v36 = vld [vmem:[#allocation7 + $0x7c8] ss:$16 sps:$4 sm:$0xff]  }
 0x2ab   :  { %3600 = vmatpush2.bf16.msra.mxu1 %v9096_v30  ;;  %v9165_v30 = vld [vmem:[#allocation7 + $0x5c8] ss:$16 sps:$4 sm:$0xff]  }
 0x2ac   :  { %3601 = vmatprep.subr.bf16.mxu1 %v9104_v62  ;;  %v9173_v62 = vld [vmem:[#allocation7 + $0x5ac] ss:$16 sps:$4 sm:$0xff]  }
 0x2ad   :  { %3549 = vmatpush2.bf16.msra.mxu0 %v9099_v42  ;;  %v9176_v42 = vld [vmem:[#allocation7 + $0x7ac] ss:$16 sps:$4 sm:$0xff]  }
 0x2ae   :  { %3550 = vmatprep.subr.bf16.mxu0 %v9107_v1  ;;  %v9174_v1 = vld [vmem:[#allocation7 + $0x7a8] ss:$16 sps:$4 sm:$0xff]  }
 0x2af   :  { %3602 = vmatpush2.bf16.msra.mxu1 %v9102_v38  ;;  %v9171_v38 = vld [vmem:[#allocation7 + $0x5a8] ss:$16 sps:$4 sm:$0xff]  }
 0x2b0   :  { %3603 = vmatprep.subr.bf16.mxu1 %v9110_v47  ;;  %v9179_v47 = vld [vmem:[#allocation7 + $0x58c] ss:$16 sps:$4 sm:$0xff]  }
 0x2b1   :  { %3551 = vmatpush2.bf16.msra.mxu0 %v9105_v2  ;;  %v9182_v2 = vld [vmem:[#allocation7 + $0x78c] ss:$16 sps:$4 sm:$0xff]  }
 0x2b2   :  { %3626 = vmatprep.subr.bf16.mxu0 %v9113_v57  ;;  %v9180_v57 = vld [vmem:[#allocation7 + $0x788] ss:$16 sps:$4 sm:$0xff]  }
 0x2b3   :  { %3604 = vmatpush2.bf16.msra.mxu1 %v9108_v46  ;;  %v9177_v46 = vld [vmem:[#allocation7 + $0x588] ss:$16 sps:$4 sm:$0xff]  }
 0x2b4   :  { %3679 = vmatprep.subr.bf16.mxu1 %v9116_v52  ;;  %3553 = vmatmul.mubr.bf16.vlgmr.msra.gmra.mxu0 %v10619_v3  ;;  %v9126_v3 = vld [vmem:[#allocation7 + $0x6a8] ss:$16 sps:$4 sm:$0xff]   ;;  %v9185_v52 = vld [vmem:[#allocation7 + $0x56c] ss:$16 sps:$4 sm:$0xff]  }
 0x2b5   :  { %3562 = vmatprep.mubr.bf16.mxu0 %v10634_v16  ;;  %3627 = vmatpush1.bf16.msra.mxu0 %v9111_v17  ;;  %v9129_v16 = vld [vmem:[#allocation7 + $0x488] ss:$16 sps:$4 sm:$0xff]   ;;  %v9188_v17 = vld [vmem:[#allocation7 + $0x76c] ss:$16 sps:$4 sm:$0xff]  }
 0x2b6   :  { %3606 = vmatmul.mubr.bf16.vlgmr.msra.gmra.mxu1 %v10627_v12  ;;  %3628 = vmatprep.subr.bf16.mxu0 %v9119_v56  ;;  %v9134_v12 = vld [vmem:[#allocation7 + $0x68c] ss:$16 sps:$4 sm:$0xff]   ;;  %v9186_v56 = vld [vmem:[#allocation7 + $0x768] ss:$16 sps:$4 sm:$0xff]  }
 0x2b7   :  { %3615 = vmatprep.mubr.bf16.mxu1 %v10641_v26  ;;  %3680 = vmatpush1.bf16.msra.mxu1 %v9114_v54  ;;  %v9132_v26 = vld [vmem:[#allocation7 + $0x688] ss:$16 sps:$4 sm:$0xff]  }
 0x2b8   :  { %3681 = vmatprep.subr.bf16.mxu1 %v9122_v58  ;;  %v9183_v54 = vld [vmem:[#allocation7 + $0x568] ss:$16 sps:$4 sm:$0xff]   ;;  %v9191_v58 = vld [vmem:[#allocation7 + $0x54c] ss:$16 sps:$4 sm:$0xff]  }
 0x2b9   :  { %3629 = vmatpush1.bf16.msra.mxu0 %v9117_v15  ;;  %v9194_v15 = vld [vmem:[#allocation7 + $0x74c] ss:$16 sps:$4 sm:$0xff]  }
 0x2ba   :  { %3630 = vmatprep.subr.bf16.mxu0 %v9125_v6  ;;  %v9192_v6 = vld [vmem:[#allocation7 + $0x748] ss:$16 sps:$4 sm:$0xff]  }
 0x2bb   :  { %3682 = vmatpush1.bf16.msra.mxu1 %v9120_v61  ;;  %v9189_v61 = vld [vmem:[#allocation7 + $0x548] ss:$16 sps:$4 sm:$0xff]  }
 0x2bc   :  { %3563 = vmatmul.mubr.bf16.gmra.mxu0 %v10652_v41  ;;  %3683 = vmatprep.subr.bf16.mxu1 %v9128_v9  ;;  %v9138_v41 = vld [vmem:[#allocation7 + $0x668] ss:$16 sps:$4 sm:$0xff]   ;;  %v9197_v9 = vld [vmem:[#allocation7 + $0x52c] ss:$16 sps:$4 sm:$0xff]  }
 0x2bd   :  { %3658 = vmatprep.mubr.bf16.mxu0 %v10663_v53  ;;  %3631 = vmatpush1.bf16.msra.mxu0 %v9123_v4  ;;  %v9141_v53 = vld [vmem:[#allocation7 + $0x448] ss:$16 sps:$4 sm:$0xff]   ;;  %v9200_v4 = vld [vmem:[#allocation7 + $0x72c] ss:$16 sps:$4 sm:$0xff]  }
 0x2be   :  { %3616 = vmatmul.mubr.bf16.gmra.mxu1 %v10660_v44  ;;  %3632 = vmatprep.subr.bf16.mxu0 %v9131_v8  ;;  %v9146_v44 = vld [vmem:[#allocation7 + $0x64c] ss:$16 sps:$4 sm:$0xff]   ;;  %v9198_v8 = vld [vmem:[#allocation7 + $0x728] ss:$16 sps:$4 sm:$0xff]  }
 0x2bf   :  { %3711 = vmatprep.mubr.bf16.mxu1 %v10666_v48  ;;  %3684 = vmatpush1.bf16.msra.mxu1 %v9126_v3  ;;  %v9144_v48 = vld [vmem:[#allocation7 + $0x648] ss:$16 sps:$4 sm:$0xff]  }
 0x2c0   :  { %3685 = vmatprep.subr.bf16.mxu1 %v9134_v12  ;;  %v9195_v3 = vld [vmem:[#allocation7 + $0x528] ss:$16 sps:$4 sm:$0xff]   ;;  %v9203_v12 = vld [vmem:[#allocation7 + $0x50c] ss:$16 sps:$4 sm:$0xff]  }
 0x2c1   :  { %3633 = vmatpush1.bf16.msra.mxu0 %v9129_v16  ;;  %v9206_v16 = vld [vmem:[#allocation7 + $0x70c] ss:$16 sps:$4 sm:$0xff]  }
 0x2c2   :  { %3634 = vmatprep.subr.bf16.mxu0 %v9137_v10  ;;  %v9204_v10 = vld [vmem:[#allocation7 + $0x708] ss:$16 sps:$4 sm:$0xff]  }
 0x2c3   :  { %3686 = vmatpush1.bf16.msra.mxu1 %v9132_v26  ;;  %v9201_v26 = vld [vmem:[#allocation7 + $0x508] ss:$16 sps:$4 sm:$0xff]  }
 0x2c4   :  { %3687 = vmatprep.subr.bf16.mxu1 %v9140_v11  ;;  %v9209_v11 = vld [vmem:[#allocation7 + $0x8ec] ss:$16 sps:$4 sm:$0xff]  }
 0x2c5   :  { %3635 = vmatpush1.bf16.msra.mxu0 %v9135_v13  ;;  %v9212_v13 = vld [vmem:[#allocation7 + $0xaec] ss:$16 sps:$4 sm:$0xff]  }
 0x2c6   :  { %3636 = vmatprep.subr.bf16.mxu0 %v9143_v14  ;;  %v9210_v14 = vld [vmem:[#allocation7 + $0xae8] ss:$16 sps:$4 sm:$0xff]  }
 0x2c7   :  { %3688 = vmatpush1.bf16.msra.mxu1 %v9138_v41  ;;  %v9207_v41 = vld [vmem:[#allocation7 + $0x8e8] ss:$16 sps:$4 sm:$0xff]  }
 0x2c8   :  { %3689 = vmatprep.subr.bf16.mxu1 %v9146_v44  ;;  %v9215_v44 = vld [vmem:[#allocation7 + $0x8cc] ss:$16 sps:$4 sm:$0xff]  }
 0x2c9   :  { %3637 = vmatpush1.bf16.msra.mxu0 %v9141_v53  ;;  %v9218_v53 = vld [vmem:[#allocation7 + $0xacc] ss:$16 sps:$4 sm:$0xff]  }
 0x2ca   :  { %3638 = vmatprep.subr.bf16.mxu0 %v9149_v18  ;;  %v9213_v18 = vld [vmem:[#allocation7 + $0x8c8] ss:$16 sps:$4 sm:$0xff]  }
 0x2cb   :  { %3690 = vmatpush1.bf16.msra.mxu1 %v9144_v48  ;;  %v10767_v48 = vpop.f32.mrf.mxu0 }
 0x2cc   :  { %3691 = vmatprep.subr.bf16.mxu1 %v9152_v19  ;;  %v10770_v19 = vpop.f32.mrf.mxu1 }
 0x2cd   :  { %3639 = vmatpush1.bf16.msra.mxu0 %v9147_v20  ;;  %v9216_v20 = vld [vmem:[#allocation7 + $0xac8] ss:$16 sps:$4 sm:$0xff]  }
 0x2ce   :  { %3640 = vmatprep.subr.bf16.mxu0 %v9155_v23  ;;  %v9224_v23 = vld [vmem:[#allocation7 + $0xaac] ss:$16 sps:$4 sm:$0xff]  }
 0x2cf   :  { %3692 = vmatpush1.bf16.msra.mxu1 %v9150_v22  ;;  %v9221_v22 = vld [vmem:[#allocation7 + $0x8ac] ss:$16 sps:$4 sm:$0xff]  }
 0x2d0   :  { %3693 = vmatprep.subr.bf16.mxu1 %v9158_v31  ;;  %v10774_v31 = vpop.f32.mrf.mxu1 }
 0x2d1   :  { %3641 = vmatpush1.bf16.msra.mxu0 %v9153_v24  ;;  %v9230_v24 = vld [vmem:[#allocation7 + $0xa8c] ss:$16 sps:$4 sm:$0xff]  }
 0x2d2   :  { %3642 = vmatprep.subr.bf16.mxu0 %v9161_v25  ;;  %v9225_v25 = vld [vmem:[#allocation7 + $0x888] ss:$16 sps:$4 sm:$0xff]  }
 0x2d3   :  { %3694 = vmatpush1.bf16.msra.mxu1 %v9156_v29 }
 0x2d4   :  { %3695 = vmatprep.subr.bf16.mxu1 %v9164_v33  ;;  %v10782_v33 = vpop.f32.mrf.mxu1 }
 0x2d5   :  { %3643 = vmatpush2.bf16.msra.mxu0 %v9159_v43  ;;  %v9228_v43 = vld [vmem:[#allocation7 + $0xa88] ss:$16 sps:$4 sm:$0xff]  }
 0x2d6   :  { %3644 = vmatprep.subr.bf16.mxu0 %v9167_v34 }
 0x2d7   :  { %3696 = vmatpush2.bf16.msra.mxu1 %v9162_v27  ;;  %v9233_v27 = vld [vmem:[#allocation7 + $0x86c] ss:$16 sps:$4 sm:$0xff]  }
 0x2d8   :  { %3697 = vmatprep.subr.bf16.mxu1 %v9170_v35  ;;  %v10786_v35 = vpop.f32.mrf.mxu1 }
 0x2d9   :  { %3645 = vmatpush2.bf16.msra.mxu0 %v9165_v30  ;;  %v9239_v30 = vld [vmem:[#allocation7 + $0x84c] ss:$16 sps:$4 sm:$0xff]  }
 0x2da   :  { %3646 = vmatprep.subr.bf16.mxu0 %v9173_v62  ;;  %v9237_v62 = vld [vmem:[#allocation7 + $0x848] ss:$16 sps:$4 sm:$0xff]  }
 0x2db   :  { %3698 = vmatpush2.bf16.msra.mxu1 %v9168_v36 }
 0x2dc   :  { %3699 = vmatprep.subr.bf16.mxu1 %v9176_v42  ;;  %v10790_v42 = vpop.f32.mrf.mxu1 }
 0x2dd   :  { %3647 = vmatpush2.bf16.msra.mxu0 %v9171_v38  ;;  %v9240_v38 = vld [vmem:[#allocation7 + $0xa48] ss:$16 sps:$4 sm:$0xff]  }
 0x2de   :  { %3648 = vmatprep.subr.bf16.mxu0 %v9179_v47  ;;  %v9248_v47 = vld [vmem:[#allocation7 + $0xa2c] ss:$16 sps:$4 sm:$0xff]  }
 0x2df   :  { %3700 = vmatpush2.bf16.msra.mxu1 %v9174_v1  ;;  %v9245_v1 = vld [vmem:[#allocation7 + $0x82c] ss:$16 sps:$4 sm:$0xff]  }
 0x2e0   :  { %3701 = vmatprep.subr.bf16.mxu1 %v9182_v2 }
 0x2e1   :  { %3649 = vmatpush2.bf16.msra.mxu0 %v9177_v46  ;;  %v9243_v46 = vld [vmem:[#allocation7 + $0x828] ss:$16 sps:$4 sm:$0xff]  }
 0x2e2   :  { %3650 = vmatprep.subr.bf16.mxu0 %v9185_v52  ;;  %v9246_v52 = vld [vmem:[#allocation7 + $0xa28] ss:$16 sps:$4 sm:$0xff]  }
 0x2e3   :  { %3702 = vmatpush2.bf16.msra.mxu1 %v9180_v57  ;;  %v10794_v57 = vpop.f32.mrf.mxu1 }
 0x2e4   :  { %3703 = vmatprep.subr.bf16.mxu1 %v9188_v17  ;;  %v9251_v17 = vld [vmem:[#allocation7 + $0x80c] ss:$16 sps:$4 sm:$0xff]  }
 0x2e5   :  { %3651 = vmatpush2.bf16.msra.mxu0 %v9183_v54  ;;  %v9254_v54 = vld [vmem:[#allocation7 + $0xa0c] ss:$16 sps:$4 sm:$0xff]  }
 0x2e6   :  { %3652 = vmatprep.subr.bf16.mxu0 %v9191_v58  ;;  %v9249_v58 = vld [vmem:[#allocation7 + $0x808] ss:$16 sps:$4 sm:$0xff]  }
 0x2e7   :  { %3704 = vmatpush2.bf16.msra.mxu1 %v9186_v56 }
 0x2e8   :  { %3705 = vmatprep.subr.bf16.mxu1 %v9194_v15  ;;  %v10798_v15 = vpop.f32.mrf.mxu1 }
 0x2e9   :  { %3653 = vmatpush2.bf16.msra.mxu0 %v9189_v61  ;;  %v9252_v61 = vld [vmem:[#allocation7 + $0xa08] ss:$16 sps:$4 sm:$0xff]  }
 0x2ea   :  { %3654 = vmatprep.subr.bf16.mxu0 %v9197_v9  ;;  %v9260_v9 = vld [vmem:[#allocation7 + $0xbec] ss:$16 sps:$4 sm:$0xff]  }
 0x2eb   :  { %3706 = vmatpush2.bf16.msra.mxu1 %v9192_v6  ;;  %v9257_v6 = vld [vmem:[#allocation7 + $0x9ec] ss:$16 sps:$4 sm:$0xff]  }
 0x2ec   :  { %3707 = vmatprep.subr.bf16.mxu1 %v9200_v4 }
 0x2ed   :  { %3655 = vmatpush2.bf16.msra.mxu0 %v9195_v3  ;;  %v9255_v3 = vld [vmem:[#allocation7 + $0x9e8] ss:$16 sps:$4 sm:$0xff]  }
 0x2ee   :  { %3656 = vmatprep.subr.bf16.mxu0 %v9203_v12  ;;  %v9258_v12 = vld [vmem:[#allocation7 + $0xbe8] ss:$16 sps:$4 sm:$0xff]  }
 0x2ef   :  { %3708 = vmatpush2.bf16.msra.mxu1 %v9198_v8  ;;  %v10802_v8 = vpop.f32.mrf.mxu1 }
 0x2f0   :  { %3709 = vmatprep.subr.bf16.mxu1 %v9206_v16  ;;  %v9263_v16 = vld [vmem:[#allocation7 + $0x9cc] ss:$16 sps:$4 sm:$0xff]  }
 0x2f1   :  { %3657 = vmatpush2.bf16.msra.mxu0 %v9201_v26 }
 0x2f2   :  { %3732 = vmatprep.subr.bf16.mxu0 %v9209_v11 }
 0x2f3   :  { %3710 = vmatpush2.bf16.msra.mxu1 %v9204_v10  ;;  %v9266_v10 = vld [vmem:[#allocation7 + $0xbcc] ss:$16 sps:$4 sm:$0xff]  }
 0x2f4   :  { %3785 = vmatprep.subr.bf16.mxu1 %v9212_v13  ;;  %3659 = vmatmul.mubr.bf16.vlgmr.msra.gmra.mxu0 %v10682_v55  ;;  %v10772_v55 = vpop.f32.mrf.mxu0  ;;  %v9261_v13 = vld [vmem:[#allocation7 + $0x9c8] ss:$16 sps:$4 sm:$0xff]  }
 0x2f5   :  { %3668 = vmatprep.mubr.bf16.mxu0 %v10686_v60  ;;  %3733 = vmatpush1.bf16.msra.mxu0 %v9207_v41  ;;  %v9222_v60 = vld [vmem:[#allocation7 + $0xaa8] ss:$16 sps:$4 sm:$0xff]  }
 0x2f6   :  { %3712 = vmatmul.mubr.bf16.vlgmr.msra.gmra.mxu1 %v10684_v50  ;;  %3734 = vmatprep.subr.bf16.mxu0 %v9215_v44  ;;  %v9219_v50 = vld [vmem:[#allocation7 + $0x8a8] ss:$16 sps:$4 sm:$0xff]   ;;  %v10779_v29 = vpop.f32.mrf.mxu0  ;;  %v10806_v11 = vpop.f32.mrf.mxu1 }
 0x2f7   :  { %3721 = vmatprep.mubr.bf16.mxu1 %v10688_v63  ;;  %3786 = vmatpush1.bf16.msra.mxu1 %v9210_v14  ;;  %v9227_v63 = vld [vmem:[#allocation7 + $0x88c] ss:$16 sps:$4 sm:$0xff]   ;;  %v9264_v41 = vld [vmem:[#allocation7 + $0xbc8] ss:$16 sps:$4 sm:$0xff]  }
 0x2f8   :  { %3787 = vmatprep.subr.bf16.mxu1 %v9218_v53  ;;  %v10784_v34 = vpop.f32.mrf.mxu0  ;;  %v9269_v14 = vld [vmem:[#allocation7 + $0x9ac] ss:$16 sps:$4 sm:$0xff]  }
 0x2f9   :  { %3735 = vmatpush1.bf16.msra.mxu0 %v9213_v18  ;;  %v9272_v53 = vld [vmem:[#allocation7 + $0xbac] ss:$16 sps:$4 sm:$0xff]   ;;  %v10810_v18 = vpop.f32.mrf.mxu1 }
 0x2fa   :  { %3736 = vmatprep.subr.bf16.mxu0 %v9221_v22  ;;  %v10788_v36 = vpop.f32.mrf.mxu0  ;;  %v9270_v22 = vld [vmem:[#allocation7 + $0xba8] ss:$16 sps:$4 sm:$0xff]  }
 0x2fb   :  { %3788 = vmatpush1.bf16.msra.mxu1 %v9216_v20  ;;  %v9267_v20 = vld [vmem:[#allocation7 + $0x9a8] ss:$16 sps:$4 sm:$0xff]  }
 0x2fc   :  { %3669 = vmatmul.mubr.bf16.gmra.mxu0 %v10706_v28  ;;  %3789 = vmatprep.subr.bf16.mxu1 %v9224_v23  ;;  %v9236_v28 = vld [vmem:[#allocation7 + $0xa6c] ss:$16 sps:$4 sm:$0xff]   ;;  %v10792_v2 = vpop.f32.mrf.mxu0 }
 0x2fd   :  { %3764 = vmatprep.mubr.bf16.mxu0 %v10710_v40  ;;  %3737 = vmatpush1.bf16.msra.mxu0 %v9219_v50  ;;  %v9234_v40 = vld [vmem:[#allocation7 + $0xa68] ss:$16 sps:$4 sm:$0xff]   ;;  %v9275_v23 = vld [vmem:[#allocation7 + $0x98c] ss:$16 sps:$4 sm:$0xff]  }
 0x2fe   :  { %3722 = vmatmul.mubr.bf16.gmra.mxu1 %v10708_v49  ;;  %3738 = vmatprep.subr.bf16.mxu0 %v9227_v63  ;;  %v9231_v49 = vld [vmem:[#allocation7 + $0x868] ss:$16 sps:$4 sm:$0xff]   ;;  %v10796_v56 = vpop.f32.mrf.mxu0  ;;  %v10814_v63 = vpop.f32.mrf.mxu1 }
 0x2ff   :  { %3817 = vmatprep.mubr.bf16.mxu1 %v10713_v37  ;;  %3790 = vmatpush1.bf16.msra.mxu1 %v9222_v60  ;;  %v9242_v37 = vld [vmem:[#allocation7 + $0xa4c] ss:$16 sps:$4 sm:$0xff]  }
 0x300   :  { %3791 = vmatprep.subr.bf16.mxu1 %v9230_v24  ;;  %v10800_v4 = vpop.f32.mrf.mxu0  ;;  %v9278_v60 = vld [vmem:[#allocation7 + $0xb8c] ss:$16 sps:$4 sm:$0xff]   ;;  %v9273_v24 = vld [vmem:[#allocation7 + $0x988] ss:$16 sps:$4 sm:$0xff]  }
 0x301   :  { %3739 = vmatpush1.bf16.msra.mxu0 %v9225_v25  ;;  %v9276_v25 = vld [vmem:[#allocation7 + $0xb88] ss:$16 sps:$4 sm:$0xff]  }
 0x302   :  { %3740 = vmatprep.subr.bf16.mxu0 %v9233_v27  ;;  %v10804_v26 = vpop.f32.mrf.mxu0 }
 0x303   :  { %3792 = vmatpush1.bf16.msra.mxu1 %v9228_v43  ;;  %v9281_v43 = vld [vmem:[#allocation7 + $0x96c] ss:$16 sps:$4 sm:$0xff]  }
 0x304   :  { %3793 = vmatprep.subr.bf16.mxu1 %v9236_v28  ;;  %v10808_v44 = vpop.f32.mrf.mxu0  ;;  %v9284_v28 = vld [vmem:[#allocation7 + $0xb6c] ss:$16 sps:$4 sm:$0xff]  }
 0x305   :  { %3741 = vmatpush1.bf16.msra.mxu0 %v9231_v49  ;;  %v10818_v49 = vpop.f32.mrf.mxu1 }
 0x306   :  { %3742 = vmatprep.subr.bf16.mxu0 %v9239_v30  ;;  %v10812_v50 = vpop.f32.mrf.mxu0  ;;  %v10820_v30 = vld [vmem:[#allocation8] sm:$0xf] }
 0x307   :  { %3794 = vmatpush1.bf16.msra.mxu1 %v9234_v40  ;;  %v9279_v40 = vld [vmem:[#allocation7 + $0x968] ss:$16 sps:$4 sm:$0xff]  }
 0x308   :  { %3795 = vmatprep.subr.bf16.mxu1 %v9242_v37  ;;  %v10816_v27 = vpop.f32.mrf.mxu0  ;;  %v9282_v37 = vld [vmem:[#allocation7 + $0xb68] ss:$16 sps:$4 sm:$0xff]  }
 0x309   :  { %3743 = vmatpush1.bf16.msra.mxu0 %v9237_v62  ;;  %v9287_v62 = vld [vmem:[#allocation7 + $0x94c] ss:$16 sps:$4 sm:$0xff]  }
 0x30a   :  { %3744 = vmatprep.subr.bf16.mxu0 %v9245_v1  ;;  %v3352_v1 = vpop.f32.mrf.mxu0 }
 0x30b   :  { %3796 = vmatpush1.bf16.msra.mxu1 %v9240_v38  ;;  %v10823_v38 = vsub.s32 1, %v10434_v45 }
 0x30c   :  { %3797 = vmatprep.subr.bf16.mxu1 %v9248_v47  ;;  %v9290_v47 = vld [vmem:[#allocation7 + $0xb4c] ss:$16 sps:$4 sm:$0xff]  }
 0x30d   :  { %3745 = vmatpush1.bf16.msra.mxu0 %v9243_v46  ;;  %11650 = vst [vmem:[#allocation23_spill] sm:$0xff] %v10823_v38  ;;  %v10825_v46 = vpop.f32.mrf.mxu1 }
 0x30e   :  { %3746 = vmatprep.subr.bf16.mxu0 %v9251_v17  ;;  %v9285_v17 = vld [vmem:[#allocation7 + $0x948] ss:$16 sps:$4 sm:$0xff]  }
 0x30f   :  { %3798 = vmatpush1.bf16.msra.mxu1 %v9246_v52  ;;  %v1265_v52 = vrot.slane %v10820_v30, %v10437_v51 }
 0x310   :  { %3799 = vmatprep.subr.bf16.mxu1 %v9254_v54  ;;  %v9288_v54 = vld [vmem:[#allocation7 + $0xb48] ss:$16 sps:$4 sm:$0xff]  }
 0x311   :  { %3747 = vmatpush1.bf16.msra.mxu0 %v9249_v58  ;;  %v9293_v58 = vld [vmem:[#allocation7 + $0x92c] ss:$16 sps:$4 sm:$0xff]  }
 0x312   :  { %3748 = vmatprep.subr.bf16.mxu0 %v9257_v6  ;;  %v3354_v6 = vpop.f32.mrf.mxu0 }
 0x313   :  { %3800 = vmatpush1.bf16.msra.mxu1 %v9252_v61  ;;  %v1269_v61 = vrot.slane %v10820_v30, %v10823_v38 }
 0x314   :  { %3801 = vmatprep.subr.bf16.mxu1 %v9260_v9  ;;  %v9296_v9 = vld [vmem:[#allocation7 + $0xb2c] ss:$16 sps:$4 sm:$0xff]  }
 0x315   :  { %3749 = vmatpush2.bf16.msra.mxu0 %v9255_v3  ;;  %v10831_v3 = vpop.f32.mrf.mxu1 }
 0x316   :  { %3750 = vmatprep.subr.bf16.mxu0 %v9263_v16  ;;  %v9291_v16 = vld [vmem:[#allocation7 + $0x928] ss:$16 sps:$4 sm:$0xff]  }
 0x317   :  { %3802 = vmatpush2.bf16.msra.mxu1 %v9258_v12  ;;  %v3237_v12 = vadd.f32 %v10767_v48, %v1265_v52  ;;  %v9297_v48 = vld [vmem:[#allocation7 + $0x908] ss:$16 sps:$4 sm:$0xff]  }
 0x318   :  { %3803 = vmatprep.subr.bf16.mxu1 %v9266_v10  ;;  %v3241_v10 = vadd.f32 %v10779_v29, %v1265_v52  ;;  %v3247_v29 = vadd.f32 %v10788_v36, %v1265_v52 }
 0x319   :  { %3751 = vmatpush2.bf16.msra.mxu0 %v9261_v13  ;;  %v9294_v13 = vld [vmem:[#allocation7 + $0xb28] ss:$16 sps:$4 sm:$0xff]  }
 0x31a   :  { %3752 = vmatprep.subr.bf16.mxu0 %v9269_v14  ;;  %v3239_v14 = vadd.f32 %v10772_v55, %v1269_v61 }
 0x31b   :  { %3804 = vmatpush2.bf16.msra.mxu1 %v9264_v41  ;;  %v9299_v41 = vld [vmem:[#allocation7 + $0x90c] ss:$16 sps:$4 sm:$0xff]  }
 0x31c   :  { %3805 = vmatprep.subr.bf16.mxu1 %v9272_v53  ;;  %v3356_v53 = vpop.f32.mrf.mxu0 }
 0x31d   :  { %3753 = vmatpush2.bf16.msra.mxu0 %v9267_v20  ;;  %v9302_v20 = vld [vmem:[#allocation7 + $0xb0c] ss:$16 sps:$4 sm:$0xff]  }
 0x31e   :  { %3754 = vmatprep.subr.bf16.mxu0 %v9275_v23  ;;  %v3409_v23 = vpop.f32.mrf.mxu1 }
 0x31f   :  { %3806 = vmatpush2.bf16.msra.mxu1 %v9270_v22  ;;  %v3243_v22 = vadd.f32 %v10784_v34, %v1269_v61 }
 0x320   :  { %3807 = vmatprep.subr.bf16.mxu1 %v9278_v60  ;;  %v3290_v60 = vadd.f32 %v10770_v19, %v3237_v12  ;;  %v3411_v19 = vpop.f32.mrf.mxu1 }
 0x321   :  { %3755 = vmatpush2.bf16.msra.mxu0 %v9273_v24  ;;  %v3294_v24 = vadd.f32 %v10782_v33, %v3241_v10  ;;  %v3296_v34 = vadd.f32 %v10786_v35, %v3243_v22 }
 0x322   :  { %3756 = vmatprep.subr.bf16.mxu0 %v9281_v43  ;;  %v3292_v43 = vadd.f32 %v10774_v31, %v3239_v14  ;;  %v3343_v55 = vadd.f32 %v10804_v26, %v3290_v60 }
 0x323   :  { %3808 = vmatpush2.bf16.msra.mxu1 %v9276_v25  ;;  %v9300_v25 = vld [vmem:[#allocation7 + $0xb08] ss:$16 sps:$4 sm:$0xff]   ;;  %v3349_v31 = vadd.f32 %v10816_v27, %v3296_v34 }
 0x324   :  { %3809 = vmatprep.subr.bf16.mxu1 %v9284_v28  ;;  %v3358_v28 = vpop.f32.mrf.mxu0  ;;  %v3345_v33 = vadd.f32 %v10808_v44, %v3292_v43  ;;  %v3396_v35 = vadd.f32 %v10806_v11, %v3343_v55 }
 0x325   :  { %3757 = vmatpush2.bf16.msra.mxu0 %v9279_v40  ;;  %v3347_v40 = vadd.f32 %v10812_v50, %v3294_v24  ;;  %v3402_v11 = vadd.f32 %v10818_v49, %v3349_v31 }
 0x326   :  { %3758 = vmatprep.subr.bf16.mxu0 %v9287_v62  ;;  %v3300_v62 = vadd.f32 %v10790_v42, %v3247_v29  ;;  %v3398_v42 = vadd.f32 %v10810_v18, %v3345_v33 }
 0x327   :  { %3810 = vmatpush2.bf16.msra.mxu1 %v9282_v37  ;;  %v3249_v37 = vadd.f32 %v10792_v2, %v1269_v61 }
 0x328   :  { %3811 = vmatprep.subr.bf16.mxu1 %v9290_v47  ;;  %v3251_v47 = vadd.f32 %v10796_v56, %v1265_v52  ;;  %v3353_v2 = vadd.f32 %v3352_v1, %v3300_v62 }
 0x329   :  { %3759 = vmatpush2.bf16.msra.mxu0 %v9285_v17  ;;  %v3253_v17 = vadd.f32 %v10800_v4, %v1269_v61 }
 0x32a   :  { %3760 = vmatprep.subr.bf16.mxu0 %v9293_v58  ;;  %v3302_v58 = vadd.f32 %v10794_v57, %v3249_v37  ;;  %v3304_v4 = vadd.f32 %v10798_v15, %v3251_v47  ;;  %v3406_v18 = vadd.f32 %v10825_v46, %v3353_v2 }
 0x32b   :  { %3812 = vmatpush2.bf16.msra.mxu1 %v9288_v54  ;;  %v3400_v54 = vadd.f32 %v10814_v63, %v3347_v40 }
 0x32c   :  { %3813 = vmatprep.subr.bf16.mxu1 %v9296_v9  ;;  %v3355_v52 = vadd.f32 %v3354_v6, %v3302_v58  ;;  %v3357_v9 = vadd.f32 %v3356_v53, %v3304_v4 }
 0x32d   :  { %3761 = vmatpush2.bf16.msra.mxu0 %v9291_v16 }
 0x32e   :  { %3762 = vmatprep.subr.bf16.mxu0 %v9299_v41  ;;  %v3410_v14 = vadd.f32 %v3409_v23, %v3357_v9 }
 0x32f   :  { %3814 = vmatpush2.bf16.msra.mxu1 %v9294_v13 }
 0x330   :  { %3815 = vmatprep.subr.bf16.mxu1 %v9302_v20 }
 0x331   :  { %3763 = vmatpush2.bf16.msra.mxu0 %v9297_v48 }
 0x333   :  { %3816 = vmatpush2.bf16.msra.mxu1 %v9300_v25 }
 0x334   :  { %v3448_v36 = vpop.f32.mrf.mxu0  ;;  %3765 = vmatmul.mubr.bf16.vlgmr.msra.gmra.mxu0 %v10730_v59  ;;  %v3306_v59 = vadd.f32 %v10802_v8, %v3253_v17  ;;  %v3408_v8 = vadd.f32 %v10831_v3, %v3355_v52 }
 0x335   :  { %v3449_v56 = vadd.f32 %v3448_v36, %v3396_v35  ;;  %3774 = vmatprep.mubr.bf16.mxu0 %v10734_v0 }
 0x336   :  { %v3501_v26 = vpop.f32.mrf.mxu1  ;;  %v3450_v50 = vpop.f32.mrf.mxu0  ;;  %3818 = vmatmul.mubr.bf16.vlgmr.msra.gmra.mxu1 %v10732_v5  ;;  %v3359_v49 = vadd.f32 %v3358_v28, %v3306_v59 }
 0x337   :  { %3827 = vmatprep.mubr.bf16.mxu1 %v10737_v7  ;;  %v3451_v57 = vadd.f32 %v3450_v50, %v3398_v42  ;;  %v10864_v16 = vadd.f32 %v3501_v26, %v3449_v56 }
 0x338   :  { %v3503_v44 = vpop.f32.mrf.mxu1  ;;  %v3452_v27 = vpop.f32.mrf.mxu0  ;;  %v3412_v24 = vadd.f32 %v3411_v19, %v3359_v49 }
 0x339   :  { %v3453_v63 = vadd.f32 %v3452_v27, %v3400_v54  ;;  %v10869_v6 = vadd.f32 %v3503_v44, %v3451_v57  ;;  %v3876_v22 = vmul.f32 %v10864_v16, %v10864_v16 }
 0x33a   :  { %v3505_v1 = vpop.f32.mrf.mxu1  ;;  %v3454_v61 = vpop.f32.mrf.mxu0 }
 0x33b   :  { %v10862_v5 = vadd.f32 %v3505_v1, %v3453_v63  ;;  %v3455_v0 = vadd.f32 %v3454_v61, %v3402_v11  ;;  %v3877_v43 = vmul.f32 %v10869_v6, %v10869_v6 }
 0x33c   :  { %v3507_v12 = vpop.f32.mrf.mxu1  ;;  %v3458_v15 = vpop.f32.mrf.mxu0  ;;  %3775 = vmatmul.mubr.bf16.gmra.mxu0 %v10748_v32 }
 0x33d   :  { %v10866_v10 = vadd.f32 %v3507_v12, %v3455_v0  ;;  %v3459_v7 = vadd.f32 %v3458_v15, %v3406_v18  ;;  %v3880_v46 = vmul.f32 %v10862_v5, %v10862_v5  ;;  %v3840_v29 = vadd.f32 %v10862_v5, %v10864_v16 }
 0x33e   :  { %v3511_v13 = vpop.f32.mrf.mxu1  ;;  %v3460_v41 = vpop.f32.mrf.mxu0  ;;  %3828 = vmatmul.mubr.bf16.gmra.mxu1 %v10750_v39 }
 0x33f   :  { %v10873_v53 = vadd.f32 %v3511_v13, %v3459_v7  ;;  %v3881_v60 = vmul.f32 %v10866_v10, %v10866_v10  ;;  %v3461_v3 = vadd.f32 %v3460_v41, %v3408_v8  ;;  %v3892_v55 = vadd.f32 %v3880_v46, %v3876_v22 }
 0x340   :  { %v3513_v20 = vpop.f32.mrf.mxu1  ;;  %v3462_v48 = vpop.f32.mrf.mxu0  ;;  %v3849_v39 = vadd.f32 %v10866_v10, %v10869_v6 }
 0x341   :  { %v3884_v23 = vmul.f32 %v10873_v53, %v10873_v53  ;;  %v3463_v25 = vadd.f32 %v3462_v48, %v3410_v14  ;;  %v10887_v28 = vadd.f32 %v3513_v20, %v3461_v3  ;;  %v3841_v40 = vadd.f32 %v3840_v29, %v10873_v53 }
 0x342   :  { %v3515_v32 = vpop.f32.mrf.mxu1  ;;  %v3464_v34 = vpop.f32.mrf.mxu0  ;;  %v3901_v33 = vadd.f32 %v3881_v60, %v3877_v43 }
 0x343   :  { %v10892_v19 = vadd.f32 %v3515_v32, %v3463_v25  ;;  %v3465_v37 = vadd.f32 %v3464_v34, %v3412_v24  ;;  %v3893_v36 = vadd.f32 %v3892_v55, %v3884_v23  ;;  %v3885_v62 = vmul.f32 %v10887_v28, %v10887_v28 }
 0x344   :  { %v3517_v47 = vpop.f32.mrf.mxu1  ;;  %v3850_v31 = vadd.f32 %v3849_v39, %v10887_v28 }
 0x345   :  { %11651 = vst [vmem:[#allocation24_spill] sm:$0xff] %v10892_v19  ;;  %v3842_v26 = vadd.f32 %v3841_v40, %v10892_v19  ;;  %v3888_v17 = vmul.f32 %v10892_v19, %v10892_v19  ;;  %v10900_v35 = vadd.f32 %v3517_v47, %v3465_v37  ;;  %v3902_v50 = vadd.f32 %v3901_v33, %v3885_v62 }
 0x347   :  { %v3843_v54 = vrot.slane %v3842_v26, 4  ;;  %v3894_v2 = vadd.f32 %v3893_v36, %v3888_v17  ;;  %v3851_v44 = vadd.f32 %v3850_v31, %v10900_v35  ;;  %v3889_v58 = vmul.f32 %v10900_v35, %v10900_v35 }
 0x349   :  { %v3844_v42 = vadd.f32 %v3843_v54, %v3842_v26  ;;  %v3895_v56 = vrot.slane %v3894_v2, 4  ;;  %v3852_v27 = vrot.slane %v3851_v44, 4  ;;  %v3903_v4 = vadd.f32 %v3902_v50, %v3889_v58 }
 0x34b   :  { %v3845_v11 = vrot.slane %v3844_v42, 2  ;;  %v3896_v63 = vadd.f32 %v3895_v56, %v3894_v2  ;;  %v3853_v52 = vadd.f32 %v3852_v27, %v3851_v44  ;;  %v3904_v57 = vrot.slane %v3903_v4, 4 }
 0x34c   :  { %v10938_v2 = vsub.s32 2, %v10434_v45  ;;  %v10941_v44 = vsub.s32 3, %v10434_v45 }
 0x34d   :  { %v3846_v1 = vadd.f32 %v3845_v11, %v3844_v42  ;;  %v3897_v59 = vrot.slane %v3896_v63, 2  ;;  %v3854_v9 = vrot.slane %v3853_v52, 2  ;;  %v3905_v0 = vadd.f32 %v3904_v57, %v3903_v4 }
 0x34e   :  { %11652 = vst [vmem:[#allocation25_spill] sm:$0xff] %v10938_v2  ;;  %11653 = vst [vmem:[#allocation26_spill] sm:$0xff] %v10941_v44  ;;  %v1273_v56 = vrot.slane %v10820_v30, %v10938_v2  ;;  %v1277_v27 = vrot.slane %v10820_v30, %v10941_v44 }
 0x34f   :  { %v3847_v61 = vrot.slane %v3846_v1, 1  ;;  %v3898_v18 = vadd.f32 %v3897_v59, %v3896_v63  ;;  %v3855_v49 = vadd.f32 %v3854_v9, %v3853_v52  ;;  %v3906_v7 = vrot.slane %v3905_v0, 2 }
 0x351   :  { %v10905_v12 = vadd.f32 %v3847_v61, %v3846_v1  ;;  %v3899_v15 = vrot.slane %v3898_v18, 1  ;;  %v3856_v8 = vrot.slane %v3855_v49, 1  ;;  %v3907_v46 = vadd.f32 %v3906_v7, %v3905_v0 }
 0x353   :  { %3933 = vrot.lane.b32.xlu1 %v10905_v12, %s10252_s25  ;;  %3929 = vrot.lane.b32.xlu0 %v10905_v12, %s10251_s23  ;;  %v10911_v13 = vadd.f32 %v3899_v15, %v3898_v18  ;;  %v10921_v41 = vadd.f32 %v3856_v8, %v3855_v49  ;;  %v3908_v14 = vrot.slane %v3907_v46, 1 }
 0x355   :  { %v10927_v20 = vadd.f32 %v3908_v14, %v3907_v46 }
 0x357   :  { %3937 = vrot.lane.b32.xlu1 %v10905_v12, %s10250_s6  ;;  %3985 = vrot.lane.b32.xlu0 %v10911_v13, %s10251_s23 }
 0x35b   :  { %3993 = vrot.lane.b32.xlu1 %v10911_v13, %s10250_s6  ;;  %3989 = vrot.lane.b32.xlu0 %v10911_v13, %s10252_s25 }
 0x35f   :  { %3947 = vrot.lane.b32.xlu1 %v10921_v41, %s10252_s25  ;;  %3943 = vrot.lane.b32.xlu0 %v10921_v41, %s10251_s23 }
 0x363   :  { %3951 = vrot.lane.b32.xlu1 %v10921_v41, %s10250_s6  ;;  %3999 = vrot.lane.b32.xlu0 %v10927_v20, %s10251_s23 }
 0x367   :  { %4007 = vrot.lane.b32.xlu1 %v10927_v20, %s10250_s6  ;;  %4003 = vrot.lane.b32.xlu0 %v10927_v20, %s10252_s25 }
 0x374   :  { %v3554_v22 = vpop.f32.mrf.mxu0 }
 0x375   :  { %v3555_v63 = vadd.f32 %v3554_v22, %v1273_v56 }
 0x376   :  { %v3607_v60 = vpop.f32.mrf.mxu1  ;;  %v3556_v3 = vpop.f32.mrf.mxu0 }
 0x377   :  { %v3557_v59 = vadd.f32 %v3556_v3, %v1277_v27  ;;  %v3608_v18 = vadd.f32 %v3607_v60, %v3555_v63 }
 0x378   :  { %v3609_v48 = vpop.f32.mrf.mxu1  ;;  %v3558_v24 = vpop.f32.mrf.mxu0 }
 0x379   :  { %v3559_v1 = vadd.f32 %v3558_v24, %v1273_v56  ;;  %v3610_v15 = vadd.f32 %v3609_v48, %v3557_v59 }
 0x37a   :  { %v3611_v29 = vpop.f32.mrf.mxu1  ;;  %v3560_v23 = vpop.f32.mrf.mxu0 }
 0x37b   :  { %v3561_v57 = vadd.f32 %v3560_v23, %v1277_v27  ;;  %v3612_v9 = vadd.f32 %v3611_v29, %v3559_v1 }
 0x37c   :  { %v3613_v25 = vpop.f32.mrf.mxu1  ;;  %v3564_v32 = vpop.f32.mrf.mxu0 }
 0x37d   :  { %v3565_v0 = vadd.f32 %v3564_v32, %v1273_v56  ;;  %v3614_v8 = vadd.f32 %v3613_v25, %v3561_v57 }
 0x37e   :  { %v3617_v43 = vpop.f32.mrf.mxu1  ;;  %v3566_v55 = vpop.f32.mrf.mxu0 }
 0x37f   :  { %v3567_v21 = vadd.f32 %v3566_v55, %v1277_v27  ;;  %v3618_v44 = vadd.f32 %v3617_v43, %v3565_v0 }
 0x380   :  { %v3619_v34 = vpop.f32.mrf.mxu1  ;;  %v3568_v39 = vpop.f32.mrf.mxu0 }
 0x381   :  { %v3569_v2 = vadd.f32 %v3568_v39, %v1273_v56  ;;  %v3620_v32 = vadd.f32 %v3619_v34, %v3567_v21 }
 0x382   :  { %v3621_v40 = vpop.f32.mrf.mxu1  ;;  %v3570_v37 = vpop.f32.mrf.mxu0 }
 0x383   :  { %v3571_v3 = vadd.f32 %v3570_v37, %v1277_v27  ;;  %v3622_v25 = vadd.f32 %v3621_v40, %v3569_v2 }
 0x384   :  { %v3623_v33 = vpop.f32.mrf.mxu1 }
 0x3b4   :  { %v3660_v36 = vpop.f32.mrf.mxu0 }
 0x3b5   :  { %v3661_v49 = vadd.f32 %v3660_v36, %v3608_v18 }
 0x3b6   :  { %v3713_v62 = vpop.f32.mrf.mxu1  ;;  %v3662_v47 = vpop.f32.mrf.mxu0 }
 0x3b7   :  { %v3663_v45 = vadd.f32 %v3662_v47, %v3610_v15  ;;  %v3714_v38 = vadd.f32 %v3713_v62, %v3661_v49  ;;  %v3624_v47 = vadd.f32 %v3623_v33, %v3571_v3 }
 0x3b8   :  { %v3715_v31 = vpop.f32.mrf.mxu1  ;;  %v3664_v26 = vpop.f32.mrf.mxu0 }
 0x3b9   :  { %v3665_v46 = vadd.f32 %v3664_v26, %v3612_v9  ;;  %v3716_v48 = vadd.f32 %v3715_v31, %v3663_v45 }
 0x3ba   :  { %v3717_v17 = vpop.f32.mrf.mxu1  ;;  %v3666_v50 = vpop.f32.mrf.mxu0 }
 0x3bb   :  { %v3667_v22 = vadd.f32 %v3666_v50, %v3614_v8  ;;  %v3718_v19 = vadd.f32 %v3717_v17, %v3665_v46 }
 0x3bc   :  { %v3719_v54 = vpop.f32.mrf.mxu1  ;;  %v3670_v58 = vpop.f32.mrf.mxu0 }
 0x3bd   :  { %v3671_v60 = vadd.f32 %v3670_v58, %v3618_v44  ;;  %v3720_v26 = vadd.f32 %v3719_v54, %v3667_v22 }
 0x3be   :  { %v3723_v42 = vpop.f32.mrf.mxu1  ;;  %v3672_v4 = vpop.f32.mrf.mxu0 }
 0x3bf   :  { %v3673_v59 = vadd.f32 %v3672_v4, %v3620_v32  ;;  %v3724_v50 = vadd.f32 %v3723_v42, %v3671_v60 }
 0x3c0   :  { %v3725_v11 = vpop.f32.mrf.mxu1  ;;  %v3674_v52 = vpop.f32.mrf.mxu0 }
 0x3c1   :  { %v3675_v56 = vadd.f32 %v3674_v52, %v3622_v25 }
 0x3c2   :  { %v3727_v61 = vpop.f32.mrf.mxu1  ;;  %v3676_v7 = vpop.f32.mrf.mxu0 }
 0x3c3   :  { %v3677_v45 = vadd.f32 %v3676_v7, %v3624_v47  ;;  %v3728_v2 = vadd.f32 %v3727_v61, %v3675_v56 }
 0x3c4   :  { %v3729_v14 = vpop.f32.mrf.mxu1 }
 0x3c5   :  { %v3730_v18 = vadd.f32 %v3729_v14, %v3677_v45 }
 0x3f4   :  { %v3766_v30 = vpop.f32.mrf.mxu0 }
 0x3f5   :  { %v3767_v36 = vadd.f32 %v3766_v30, %v3714_v38 }
 0x3f6   :  { %v3819_v24 = vpop.f32.mrf.mxu1  ;;  %v3768_v23 = vpop.f32.mrf.mxu0 }
 0x3f7   :  { %v3769_v43 = vadd.f32 %v3768_v23, %v3716_v48  ;;  %v10949_v44 = vadd.f32 %v3819_v24, %v3767_v36 }
 0x3f8   :  { %v3821_v29 = vpop.f32.mrf.mxu1  ;;  %v3770_v63 = vpop.f32.mrf.mxu0 }
 0x3f9   :  { %v3771_v1 = vadd.f32 %v3770_v63, %v3718_v19  ;;  %v3726_v19 = vadd.f32 %v3725_v11, %v3673_v59  ;;  %v10953_v31 = vadd.f32 %v3821_v29, %v3769_v43  ;;  %v3878_v27 = vmul.f32 %v10949_v44, %v10949_v44 }
 0x3fa   :  { %v3823_v55 = vpop.f32.mrf.mxu1  ;;  %v3772_v39 = vpop.f32.mrf.mxu0 }
 0x3fb   :  { %v10947_v37 = vadd.f32 %v3823_v55, %v3771_v1  ;;  %v3773_v62 = vadd.f32 %v3772_v39, %v3720_v26  ;;  %v3879_v15 = vmul.f32 %v10953_v31, %v10953_v31 }
 0x3fc   :  { %v3825_v17 = vpop.f32.mrf.mxu1  ;;  %v3776_v21 = vpop.f32.mrf.mxu0 }
 0x3fd   :  { %v10951_v38 = vadd.f32 %v3825_v17, %v3773_v62  ;;  %v3777_v34 = vadd.f32 %v3776_v21, %v3724_v50  ;;  %v3882_v33 = vmul.f32 %v10947_v37, %v10947_v37  ;;  %v3858_v11 = vadd.f32 %v10947_v37, %v10949_v44 }
 0x3fe   :  { %v3829_v40 = vpop.f32.mrf.mxu1  ;;  %v3778_v54 = vpop.f32.mrf.mxu0 }
 0x3ff   :  { %v10957_v58 = vadd.f32 %v3829_v40, %v3777_v34  ;;  %v3883_v4 = vmul.f32 %v10951_v38, %v10951_v38  ;;  %v3779_v52 = vadd.f32 %v3778_v54, %v3726_v19  ;;  %v3910_v49 = vadd.f32 %v3882_v33, %v3878_v27 }
 0x400   :  { %v3831_v42 = vpop.f32.mrf.mxu1  ;;  %v3780_v57 = vpop.f32.mrf.mxu0  ;;  %v3867_v46 = vadd.f32 %v10951_v38, %v10953_v31 }
 0x401   :  { %v3886_v9 = vmul.f32 %v10957_v58, %v10957_v58  ;;  %v3781_v0 = vadd.f32 %v3780_v57, %v3728_v2  ;;  %v10969_v7 = vadd.f32 %v3831_v42, %v3779_v52  ;;  %v3859_v14 = vadd.f32 %v3858_v11, %v10957_v58 }
 0x402   :  { %v3833_v61 = vpop.f32.mrf.mxu1  ;;  %v3782_v8 = vpop.f32.mrf.mxu0  ;;  %v3919_v24 = vadd.f32 %v3883_v4, %v3879_v15  ;;  %v9306_v15 = vld [vmem:[#allocation13 + $0x2e0] ss:$16 sps:$4 sm:$0xff]  }
 0x403   :  { %v10974_v30 = vadd.f32 %v3833_v61, %v3781_v0  ;;  %v3783_v22 = vadd.f32 %v3782_v8, %v3730_v18  ;;  %v3911_v3 = vadd.f32 %v3910_v49, %v3886_v9  ;;  %v3887_v23 = vmul.f32 %v10969_v7, %v10969_v7  ;;  %v9303_v0 = vld [vmem:[#allocation13 + $0xe0] ss:$16 sps:$4 sm:$0xff]   ;;  %v9305_v61 = vld [vmem:[#allocation13 + $0xe4] ss:$16 sps:$4 sm:$0xff]   ;;  %v3934_v8 = vpop.permute.xlu1 %3933 }
 0x404   :  { %v3835_v60 = vpop.f32.mrf.mxu1  ;;  %v3868_v29 = vadd.f32 %v3867_v46, %v10969_v7  ;;  %v9308_v49 = vld [vmem:[#allocation13 + $0x2e4] ss:$16 sps:$4 sm:$0xff]   ;;  %6856 = vmatprep.subr.bf16.mxu0 %v9305_v61  ;;  %v3930_v46 = vpop.permute.xlu0 %3929 }
 0x405   :  { %v3860_v32 = vadd.f32 %v3859_v14, %v10974_v30  ;;  %v3890_v48 = vmul.f32 %v10974_v30, %v10974_v30  ;;  %v10982_v36 = vadd.f32 %v3835_v60, %v3783_v22  ;;  %v3920_v63 = vadd.f32 %v3919_v24, %v3887_v23  ;;  %6909 = vmatprep.subr.bf16.mxu1 %v9308_v49 }
 0x406   :  { %6857 = vmatpush1.bf16.msra.mxu0 %v9303_v0  ;;  %6910 = vmatpush1.bf16.msra.mxu1 %v9306_v15  ;;  %v3932_v24 = vadd.f32 %v3930_v46, %v10905_v12 }
 0x407   :  { %v3861_v25 = vrot.slane %v3860_v32, 4  ;;  %v3912_v26 = vadd.f32 %v3911_v3, %v3890_v48  ;;  %v3869_v1 = vadd.f32 %v3868_v29, %v10982_v36  ;;  %v3891_v55 = vmul.f32 %v10982_v36, %v10982_v36  ;;  %v3938_v14 = vpop.permute.xlu1 %3937 }
 0x408   :  { %v3986_v22 = vpop.permute.xlu0 %3985  ;;  %v3936_v60 = vadd.f32 %v3934_v8, %v3932_v24 }
 0x409   :  { %v3862_v47 = vadd.f32 %v3861_v25, %v3860_v32  ;;  %v3913_v59 = vrot.slane %v3912_v26, 4  ;;  %v3870_v43 = vrot.slane %v3869_v1, 4  ;;  %v3921_v39 = vadd.f32 %v3920_v63, %v3891_v55 }
 0x40a   :  { %v3940_v29 = vadd.f32 %v3938_v14, %v3936_v60  ;;  %v3988_v63 = vadd.f32 %v3986_v22, %v10911_v13 }
 0x40b   :  { %v3863_v50 = vrot.slane %v3862_v47, 2  ;;  %v3914_v56 = vadd.f32 %v3913_v59, %v3912_v26  ;;  %v3871_v21 = vadd.f32 %v3870_v43, %v3869_v1  ;;  %v3922_v45 = vrot.slane %v3921_v39, 4  ;;  %v3994_v3 = vpop.permute.xlu1 %3993 }
 0x40c   :  { %v3990_v23 = vpop.permute.xlu0 %3989  ;;  %v3941_v26 = vadd.f32 %v3940_v29, %v10921_v41 }
 0x40d   :  { %v3864_v62 = vadd.f32 %v3863_v50, %v3862_v47  ;;  %v3915_v17 = vrot.slane %v3914_v56, 2  ;;  %v3872_v19 = vrot.slane %v3871_v21, 2  ;;  %v3923_v33 = vadd.f32 %v3922_v45, %v3921_v39 }
 0x40e   :  { %v3992_v25 = vadd.f32 %v3990_v23, %v3988_v63 }
 0x40f   :  { %v3865_v34 = vrot.slane %v3864_v62, 1  ;;  %v3916_v40 = vadd.f32 %v3915_v17, %v3914_v56  ;;  %v3873_v42 = vadd.f32 %v3872_v19, %v3871_v21  ;;  %v3924_v27 = vrot.slane %v3923_v33, 2  ;;  %v3948_v32 = vpop.permute.xlu1 %3947 }
 0x410   :  { %v3944_v48 = vpop.permute.xlu0 %3943  ;;  %v3996_v59 = vadd.f32 %v3994_v3, %v3992_v25 }
 0x411   :  { %v3866_v54 = vadd.f32 %v3865_v34, %v3864_v62  ;;  %v3917_v2 = vrot.slane %v3916_v40, 1  ;;  %v3874_v52 = vrot.slane %v3873_v42, 1  ;;  %v3925_v57 = vadd.f32 %v3924_v27, %v3923_v33 }
 0x412   :  { %v3946_v1 = vadd.f32 %v3944_v48, %v3941_v26  ;;  %v3997_v39 = vadd.f32 %v3996_v59, %v10927_v20  ;;  %v9309_v26 = vld [vmem:[#allocation13 + $0xc0] ss:$16 sps:$4 sm:$0xff]   ;;  %v9317_v59 = vld [vmem:[#allocation13 + $0xa4] ss:$16 sps:$4 sm:$0xff]  }
 0x413   :  { %3961 = vrot.lane.b32.xlu1 %v3866_v54, %s10252_s25  ;;  %3957 = vrot.lane.b32.xlu0 %v3866_v54, %s10251_s23  ;;  %v3918_v4 = vadd.f32 %v3917_v2, %v3916_v40  ;;  %v3875_v18 = vadd.f32 %v3874_v52, %v3873_v42  ;;  %v3926_v11 = vrot.slane %v3925_v57, 1  ;;  %v3952_v55 = vpop.permute.xlu1 %3951 }
 0x414   :  { %v4000_v47 = vpop.permute.xlu0 %3999  ;;  %v3950_v43 = vadd.f32 %v3948_v32, %v3946_v1  ;;  %v9311_v1 = vld [vmem:[#allocation13 + $0xc4] ss:$16 sps:$4 sm:$0xff]  }
 0x415   :  { %v3927_v9 = vadd.f32 %v3926_v11, %v3925_v57  ;;  %v4002_v62 = vadd.f32 %v4000_v47, %v3997_v39  ;;  %v9314_v47 = vld [vmem:[#allocation13 + $0x2c4] ss:$16 sps:$4 sm:$0xff]   ;;  %6858 = vmatprep.subr.bf16.mxu0 %v9311_v1  ;;  %v3838_v39 = vld [vmem:[#allocation10] sm:$0x1] }
 0x416   :  { %v3954_v56 = vadd.f32 %v3952_v55, %v3950_v43  ;;  %v9312_v55 = vld [vmem:[#allocation13 + $0x2c0] ss:$16 sps:$4 sm:$0xff]   ;;  %6911 = vmatprep.subr.bf16.mxu1 %v9314_v47  ;;  %6859 = vmatpush1.bf16.msra.mxu0 %v9309_v26  ;;  %v9371_v26 = vld [vmem:[#allocation13 + $0x184] ss:$16 sps:$4 sm:$0xff]  }
 0x417   :  { %3965 = vrot.lane.b32.xlu1 %v3866_v54, %s10250_s6  ;;  %4013 = vrot.lane.b32.xlu0 %v3918_v4, %s10251_s23  ;;  %v4008_v50 = vpop.permute.xlu1 %4007  ;;  %v9318_v43 = vld [vmem:[#allocation13 + $0x2a0] ss:$16 sps:$4 sm:$0xff]   ;;  %v9374_v1 = vld [vmem:[#allocation13 + $0x384] ss:$16 sps:$4 sm:$0xff]  }
 0x418   :  { %v4004_v12 = vpop.permute.xlu0 %4003  ;;  %v3955_v21 = vadd.f32 %v3954_v56, %v3866_v54  ;;  %6912 = vmatpush1.bf16.msra.mxu1 %v9312_v55  ;;  %6860 = vmatprep.subr.bf16.mxu0 %v9317_v59  ;;  %v9369_v55 = vld [vmem:[#allocation13 + $0x180] ss:$16 sps:$4 sm:$0xff]   ;;  %v9380_v59 = vld [vmem:[#allocation13 + $0x364] ss:$16 sps:$4 sm:$0xff]  }
 0x419   :  { %v4006_v17 = vadd.f32 %v4004_v12, %v4002_v62  ;;  %v3839_v62 = vld [vmem:[#allocation11] sm:$0x1]  ;;  %v9372_v47 = vld [vmem:[#allocation13 + $0x380] ss:$16 sps:$4 sm:$0xff]  }
 0x41b   :  { %4021 = vrot.lane.b32.xlu1 %v3918_v4, %s10250_s6  ;;  %4017 = vrot.lane.b32.xlu0 %v3918_v4, %s10252_s25  ;;  %v4010_v13 = vadd.f32 %v4008_v50, %v4006_v17  ;;  %v9320_v50 = vld [vmem:[#allocation13 + $0x2a4] ss:$16 sps:$4 sm:$0xff]   ;;  %v9321_v17 = vld [vmem:[#allocation13 + $0x80] ss:$16 sps:$4 sm:$0xff]  }
 0x41c   :  { %6913 = vmatprep.subr.bf16.mxu1 %v9320_v50  ;;  %v9383_v50 = vld [vmem:[#allocation13 + $0x144] ss:$16 sps:$4 sm:$0xff]  }
 0x41d   :  { %v4011_v2 = vadd.f32 %v4010_v13, %v3918_v4  ;;  %6914 = vmatpush1.bf16.msra.mxu1 %v9318_v43  ;;  %v9326_v13 = vld [vmem:[#allocation13 + $0x284] ss:$16 sps:$4 sm:$0xff]   ;;  %v9375_v43 = vld [vmem:[#allocation13 + $0x160] ss:$16 sps:$4 sm:$0xff]  }
 0x41e   :  { %6915 = vmatprep.subr.bf16.mxu1 %v9326_v13  ;;  %v9395_v13 = vld [vmem:[#allocation13 + $0x104] ss:$16 sps:$4 sm:$0xff]  }
 0x41f   :  { %3975 = vrot.lane.b32.xlu1 %v3875_v18, %s10252_s25  ;;  %3971 = vrot.lane.b32.xlu0 %v3875_v18, %s10251_s23 }
 0x423   :  { %3979 = vrot.lane.b32.xlu1 %v3875_v18, %s10250_s6  ;;  %4027 = vrot.lane.b32.xlu0 %v3927_v9, %s10251_s23 }
 0x427   :  { %4035 = vrot.lane.b32.xlu1 %v3927_v9, %s10250_s6  ;;  %4031 = vrot.lane.b32.xlu0 %v3927_v9, %s10252_s25 }
 0x485   :  { %v3962_v45 = vpop.permute.xlu1 %3961  ;;  %v3958_v34 = vpop.permute.xlu0 %3957 }
 0x486   :  { %v3960_v40 = vadd.f32 %v3958_v34, %v3955_v21  ;;  %v9323_v21 = vld [vmem:[#allocation13 + $0x84] ss:$16 sps:$4 sm:$0xff]  }
 0x488   :  { %v3964_v19 = vadd.f32 %v3962_v45, %v3960_v40  ;;  %v9324_v40 = vld [vmem:[#allocation13 + $0x280] ss:$16 sps:$4 sm:$0xff]  }
 0x489   :  { %v3966_v33 = vpop.permute.xlu1 %3965  ;;  %v4014_v41 = vpop.permute.xlu0 %4013  ;;  %6916 = vmatpush1.bf16.msra.mxu1 %v9324_v40  ;;  %v9390_v40 = vld [vmem:[#allocation13 + $0x320] ss:$16 sps:$4 sm:$0xff]  }
 0x48a   :  { %v3968_v42 = vadd.f32 %v3966_v33, %v3964_v19  ;;  %v4016_v27 = vadd.f32 %v4014_v41, %v4011_v2  ;;  %v9329_v19 = vld [vmem:[#allocation13 + $0x64] ss:$16 sps:$4 sm:$0xff]   ;;  %v9327_v2 = vld [vmem:[#allocation13 + $0x60] ss:$16 sps:$4 sm:$0xff]  }
 0x48b   :  { %v9332_v33 = vld [vmem:[#allocation13 + $0x264] ss:$16 sps:$4 sm:$0xff]  }
 0x48c   :  { %v3969_v20 = vadd.f32 %v3968_v42, %v3875_v18  ;;  %6917 = vmatprep.subr.bf16.mxu1 %v9332_v33  ;;  %v9393_v33 = vld [vmem:[#allocation13 + $0x100] ss:$16 sps:$4 sm:$0xff]  }
 0x48d   :  { %v4022_v52 = vpop.permute.xlu1 %4021  ;;  %v4018_v57 = vpop.permute.xlu0 %4017 }
 0x48e   :  { %v4020_v11 = vadd.f32 %v4018_v57, %v4016_v27  ;;  %v9330_v27 = vld [vmem:[#allocation13 + $0x260] ss:$16 sps:$4 sm:$0xff]   ;;  %v9338_v57 = vld [vmem:[#allocation13 + $0x244] ss:$16 sps:$4 sm:$0xff]  }
 0x48f   :  { %6918 = vmatpush1.bf16.msra.mxu1 %v9330_v27  ;;  %v9404_v27 = vld [vmem:[#allocation13 + $0x6e4] ss:$16 sps:$4 sm:$0xff]  }
 0x490   :  { %v4024_v15 = vadd.f32 %v4022_v52, %v4020_v11  ;;  %v9335_v52 = vld [vmem:[#allocation13 + $0x44] ss:$16 sps:$4 sm:$0xff]   ;;  %v9333_v11 = vld [vmem:[#allocation13 + $0x40] ss:$16 sps:$4 sm:$0xff]   ;;  %6919 = vmatprep.subr.bf16.mxu1 %v9338_v57 }
 0x491   :  { %v3976_v0 = vpop.permute.xlu1 %3975  ;;  %v3972_v61 = vpop.permute.xlu0 %3971 }
 0x492   :  { %v3974_v49 = vadd.f32 %v3972_v61, %v3969_v20  ;;  %v4025_v22 = vadd.f32 %v4024_v15, %v3927_v9  ;;  %v9315_v9 = vld [vmem:[#allocation13 + $0xa0] ss:$16 sps:$4 sm:$0xff]   ;;  %v9344_v61 = vld [vmem:[#allocation13 + $0x224] ss:$16 sps:$4 sm:$0xff]  }
 0x493   :  { %6861 = vmatpush1.bf16.msra.mxu0 %v9315_v9  ;;  %v9336_v20 = vld [vmem:[#allocation13 + $0x240] ss:$16 sps:$4 sm:$0xff]   ;;  %v9377_v9 = vld [vmem:[#allocation13 + $0x164] ss:$16 sps:$4 sm:$0xff]  }
 0x494   :  { %v3978_v8 = vadd.f32 %v3976_v0, %v3974_v49  ;;  %6862 = vmatprep.subr.bf16.mxu0 %v9323_v21  ;;  %v9341_v0 = vld [vmem:[#allocation13 + $0x24] ss:$16 sps:$4 sm:$0xff]   ;;  %v9339_v15 = vld [vmem:[#allocation13 + $0x20] ss:$16 sps:$4 sm:$0xff]   ;;  %6920 = vmatpush1.bf16.msra.mxu1 %v9336_v20 }
 0x495   :  { %v3980_v54 = vpop.permute.xlu1 %3979  ;;  %v4028_v46 = vpop.permute.xlu0 %4027  ;;  %v9342_v49 = vld [vmem:[#allocation13 + $0x220] ss:$16 sps:$4 sm:$0xff]   ;;  %6921 = vmatprep.subr.bf16.mxu1 %v9344_v61  ;;  %v9389_v21 = vld [vmem:[#allocation13 + $0x124] ss:$16 sps:$4 sm:$0xff]  }
 0x496   :  { %v3982_v14 = vadd.f32 %v3980_v54, %v3978_v8  ;;  %v4030_v24 = vadd.f32 %v4028_v46, %v4025_v22  ;;  %v9347_v8 = vld [vmem:[#allocation13 + $0x4] ss:$16 sps:$4 sm:$0xff]   ;;  %v9345_v46 = vld [vmem:[#allocation13] ss:$16 sps:$4 sm:$0xff]  }
 0x497   :  { %6863 = vmatpush1.bf16.msra.mxu0 %v9321_v17  ;;  %v9350_v54 = vld [vmem:[#allocation13 + $0x204] ss:$16 sps:$4 sm:$0xff]   ;;  %v9384_v17 = vld [vmem:[#allocation13 + $0x340] ss:$16 sps:$4 sm:$0xff]  }
 0x498   :  { %v3983_v23 = vmul.f32 0.001953125, %v3982_v14  ;;  %6864 = vmatprep.subr.bf16.mxu0 %v9329_v19  ;;  %6922 = vmatpush1.bf16.msra.mxu1 %v9342_v49  ;;  %v9348_v14 = vld [vmem:[#allocation13 + $0x200] ss:$16 sps:$4 sm:$0xff]   ;;  %v9353_v22 = vld [vmem:[#allocation13 + $0x1e4] ss:$16 sps:$4 sm:$0xff]  }
 0x499   :  { %v4032_v3 = vpop.permute.xlu0 %4031  ;;  %v4036_v4 = vpop.permute.xlu1 %4035  ;;  %6923 = vmatprep.subr.bf16.mxu1 %v9350_v54  ;;  %v9398_v19 = vld [vmem:[#allocation13 + $0x304] ss:$16 sps:$4 sm:$0xff]  }
 0x49a   :  { %v4034_v60 = vadd.f32 %v4032_v3, %v4030_v24  ;;  %v4040_v32 = vmul.f32 %v3983_v23, %v3983_v23  ;;  %v9356_v24 = vld [vmem:[#allocation13 + $0x3e4] ss:$16 sps:$4 sm:$0xff]   ;;  %v9351_v3 = vld [vmem:[#allocation13 + $0x1e0] ss:$16 sps:$4 sm:$0xff]  }
 0x49b   :  { %6865 = vmatpush1.bf16.msra.mxu0 %v9327_v2  ;;  %v9396_v2 = vld [vmem:[#allocation13 + $0x300] ss:$16 sps:$4 sm:$0xff]  }
 0x49c   :  { %v4038_v29 = vadd.f32 %v4036_v4, %v4034_v60  ;;  %6866 = vmatprep.subr.bf16.mxu0 %v9335_v52  ;;  %6924 = vmatpush1.bf16.msra.mxu1 %v9348_v14  ;;  %v9359_v60 = vld [vmem:[#allocation13 + $0x1c4] ss:$16 sps:$4 sm:$0xff]  }
 0x49d   :  { %6925 = vmatprep.subr.bf16.mxu1 %v9356_v24  ;;  %v9362_v4 = vld [vmem:[#allocation13 + $0x3c4] ss:$16 sps:$4 sm:$0xff]  }
 0x49e   :  { %v4039_v48 = vmul.f32 0.001953125, %v4038_v29  ;;  %v9357_v29 = vld [vmem:[#allocation13 + $0x1c0] ss:$16 sps:$4 sm:$0xff]  }
 0x49f   :  { %6867 = vmatpush1.bf16.msra.mxu0 %v9333_v11 }
 0x4a0   :  { %v4041_v63 = vsub.f32 %v4039_v48, %v4040_v32  ;;  %6868 = vmatprep.subr.bf16.mxu0 %v9341_v0  ;;  %v9360_v32 = vld [vmem:[#allocation13 + $0x3c0] ss:$16 sps:$4 sm:$0xff]   ;;  %v9365_v48 = vld [vmem:[#allocation13 + $0x1a4] ss:$16 sps:$4 sm:$0xff]  }
 0x4a2   :  { %v4042_v25 = vmax.f32 %v4041_v63, 0.0  ;;  %v9368_v63 = vld [vmem:[#allocation13 + $0x3a4] ss:$16 sps:$4 sm:$0xff]  }
 0x4a3   :  { %6869 = vmatpush1.bf16.msra.mxu0 %v9339_v15 }
 0x4a4   :  { %v4043_v18 = vadd.f32 1e-05, %v4042_v25  ;;  %6870 = vmatprep.subr.bf16.mxu0 %v9347_v8  ;;  %v9363_v25 = vld [vmem:[#allocation13 + $0x1a0] ss:$16 sps:$4 sm:$0xff]  }
 0x4a6   :  { %9947 = vrsqrt.f32 %v4043_v18  ;;  %v9366_v18 = vld [vmem:[#allocation13 + $0x3a0] ss:$16 sps:$4 sm:$0xff]  }
 0x4a7   :  { %6871 = vmatpush1.bf16.msra.mxu0 %v9345_v46 }
 0x4a8   :  { %6872 = vmatprep.subr.bf16.mxu0 %v9353_v22 }
 0x4ab   :  { %6873 = vmatpush2.bf16.msra.mxu0 %v9351_v3 }
 0x4ac   :  { %6874 = vmatprep.subr.bf16.mxu0 %v9359_v60 }
 0x4af   :  { %6875 = vmatpush2.bf16.msra.mxu0 %v9357_v29 }
 0x4b0   :  { %6876 = vmatprep.subr.bf16.mxu0 %v9365_v48 }
 0x4b3   :  { %v9948_v12 = vpop.eup %9947  ;;  %6877 = vmatpush2.bf16.msra.mxu0 %v9363_v25 }
 0x4b4   :  { %v11003_v56 = vmul.f32 %v9948_v12, %v3838_v39  ;;  %6878 = vmatprep.subr.bf16.mxu0 %v9371_v26  ;;  %v9378_v39 = vld [vmem:[#allocation13 + $0x360] ss:$16 sps:$4 sm:$0xff]   ;;  %v9386_v12 = vld [vmem:[#allocation13 + $0x344] ss:$16 sps:$4 sm:$0xff]  }
 0x4b6   :  { %v4052_v45 = vrot.slane %v11003_v56, %v10437_v51  ;;  %v4046_v34 = vmul.f32 %v11003_v56, %v3983_v23  ;;  %v9354_v23 = vld [vmem:[#allocation13 + $0x3e0] ss:$16 sps:$4 sm:$0xff]  }
 0x4b7   :  { %6926 = vmatpush2.bf16.msra.mxu1 %v9354_v23  ;;  %6879 = vmatpush2.bf16.msra.mxu0 %v9369_v55 }
 0x4b8   :  { %4056 = vrot.lane.b32.xlu1 %v4052_v45, %s10252_s25  ;;  %4053 = vrot.lane.b32.xlu0 %v4052_v45, %s10250_s6  ;;  %v11010_v41 = vsub.f32 %v3839_v62, %v4046_v34  ;;  %v9381_v62 = vld [vmem:[#allocation13 + $0x140] ss:$16 sps:$4 sm:$0xff]  }
 0x4b9   :  { %6927 = vmatprep.subr.bf16.mxu1 %v9362_v4  ;;  %6880 = vmatprep.subr.bf16.mxu0 %v9377_v9  ;;  %v9387_v34 = vld [vmem:[#allocation13 + $0x120] ss:$16 sps:$4 sm:$0xff]  }
 0x4ba   :  { %v4069_v42 = vrot.slane %v11010_v41, %v10437_v51 }
 0x4bb   :  { %6928 = vmatpush2.bf16.msra.mxu1 %v9360_v32  ;;  %6881 = vmatpush2.bf16.msra.mxu0 %v9375_v43 }
 0x4bc   :  { %4059 = vrot.lane.b32.xlu0 %v4052_v45, %s10251_s23  ;;  %4070 = vrot.lane.b32.xlu1 %v4069_v42, %s10250_s6  ;;  %v9392_v45 = vld [vmem:[#allocation13 + $0x324] ss:$16 sps:$4 sm:$0xff]  }
 0x4bd   :  { %6929 = vmatprep.subr.bf16.mxu1 %v9368_v63  ;;  %6882 = vmatprep.subr.bf16.mxu0 %v9383_v50  ;;  %v11654_v63 = vld [vmem:[#allocation24_spill] sm:$0xff] }
 0x4bf   :  { %6930 = vmatpush2.bf16.msra.mxu1 %v9366_v18  ;;  %6883 = vmatpush2.bf16.msra.mxu0 %v9381_v62 }
 0x4c0   :  { %4073 = vrot.lane.b32.xlu0 %v4069_v42, %s10252_s25  ;;  %4076 = vrot.lane.b32.xlu1 %v4069_v42, %s10251_s23  ;;  %v9401_v42 = vld [vmem:[#allocation13 + $0x4e4] ss:$16 sps:$4 sm:$0xff]  }
 0x4c1   :  { %6931 = vmatprep.subr.bf16.mxu1 %v9374_v1  ;;  %6884 = vmatprep.subr.bf16.mxu0 %v9389_v21 }
 0x4c3   :  { %6932 = vmatpush2.bf16.msra.mxu1 %v9372_v47  ;;  %6885 = vmatpush2.bf16.msra.mxu0 %v9387_v34 }
 0x4c4   :  { %6933 = vmatprep.subr.bf16.mxu1 %v9380_v59  ;;  %6886 = vmatprep.subr.bf16.mxu0 %v9395_v13 }
 0x4c7   :  { %6934 = vmatpush2.bf16.msra.mxu1 %v9378_v39  ;;  %6887 = vmatpush2.bf16.msra.mxu0 %v9393_v33 }
 0x4c8   :  { %6935 = vmatprep.subr.bf16.mxu1 %v9386_v12  ;;  %6962 = vmatprep.subr.bf16.mxu0 %v9401_v42 }
 0x4cb   :  { %6936 = vmatpush2.bf16.msra.mxu1 %v9384_v17 }
 0x4cc   :  { %6937 = vmatprep.subr.bf16.mxu1 %v9392_v45 }
 0x4cf   :  { %6938 = vmatpush2.bf16.msra.mxu1 %v9390_v40 }
 0x4d0   :  { %6939 = vmatprep.subr.bf16.mxu1 %v9398_v19 }
 0x4d3   :  { %6940 = vmatpush2.bf16.msra.mxu1 %v9396_v2 }
 0x4d4   :  { %7015 = vmatprep.subr.bf16.mxu1 %v9404_v27 }
 0x52a   :  { %v4057_v52 = vpop.permute.xlu1 %4056  ;;  %v4054_v57 = vpop.permute.xlu0 %4053 }
 0x52b   :  { %v4062_v11 = vsel %vm402_vm1, %v11003_v56, %v4054_v57 }
 0x52c   :  { %v4063_v20 = vsel %vm404_vm2, %v4062_v11, %v4057_v52 }
 0x52e   :  { %v4060_v0 = vpop.permute.xlu0 %4059  ;;  %v4071_v61 = vpop.permute.xlu1 %4070 }
 0x52f   :  { %v4064_v15 = vsel %vm406_vm3, %v4063_v20, %v4060_v0  ;;  %v4079_v8 = vsel %vm402_vm1, %v11010_v41, %v4071_v61 }
 0x530   :  { %v4085_v49 = vrot.slane %v4064_v15, %v10437_v51 }
 0x532   :  { %v4074_v54 = vpop.permute.xlu0 %4073  ;;  %v4077_v46 = vpop.permute.xlu1 %4076  ;;  %v4087_v14 = vmul.f32 %v4085_v49, %v10869_v6  ;;  %v4091_v24 = vmul.f32 %v4085_v49, %v10866_v10  ;;  %v4089_v56 = vmul.f32 %v4085_v49, %v10953_v31  ;;  %v4093_v3 = vmul.f32 %v4085_v49, %v10951_v38 }
 0x533   :  { %v4080_v22 = vsel %vm404_vm2, %v4079_v8, %v4074_v54  ;;  %v4086_v60 = vmul.f32 %v4085_v49, %v10864_v16  ;;  %v4090_v4 = vmul.f32 %v4085_v49, %v10862_v5  ;;  %v4088_v41 = vmul.f32 %v4085_v49, %v10949_v44 }
 0x534   :  { %v4081_v23 = vsel %vm406_vm3, %v4080_v22, %v4077_v46  ;;  %v4092_v6 = vmul.f32 %v4085_v49, %v10947_v37  ;;  %v4095_v32 = vmul.f32 %v4085_v49, %v10887_v28  ;;  %v4099_v10 = vmul.f32 %v4085_v49, %v10900_v35 }
 0x535   :  { %v4105_v29 = vrot.slane %v4081_v23, %v10437_v51  ;;  %v4097_v31 = vmul.f32 %v4085_v49, %v10969_v7  ;;  %v4101_v38 = vmul.f32 %v4085_v49, %v10982_v36  ;;  %v4094_v48 = vmul.f32 %v4085_v49, %v10873_v53 }
 0x536   :  { %v4098_v16 = vmul.f32 %v4085_v49, %v11654_v63  ;;  %v4096_v59 = vmul.f32 %v4085_v49, %v10957_v58  ;;  %v4100_v45 = vmul.f32 %v4085_v49, %v10974_v30 }
 0x537   :  { %v11042_v25 = vadd.f32 %v4105_v29, %v4087_v14  ;;  %v11044_v5 = vadd.f32 %v4105_v29, %v4091_v24  ;;  %v11046_v44 = vadd.f32 %v4105_v29, %v4089_v56  ;;  %v11048_v18 = vadd.f32 %v4105_v29, %v4093_v3 }
 0x538   :  { %v11050_v37 = vadd.f32 %v4105_v29, %v4086_v60  ;;  %v11052_v28 = vadd.f32 %v4105_v29, %v4090_v4  ;;  %v11054_v35 = vadd.f32 %v4105_v29, %v4088_v41  ;;  %v11056_v7 = vadd.f32 %v4105_v29, %v4092_v6 }
 0x539   :  { %v4123_v53 = vsub.f32 0.0, %v11042_v25  ;;  %v4127_v36 = vsub.f32 0.0, %v11044_v5  ;;  %v4125_v26 = vsub.f32 0.0, %v11046_v44  ;;  %v4129_v1 = vsub.f32 0.0, %v11048_v18 }
 0x53a   :  { %v4122_v55 = vsub.f32 0.0, %v11050_v37  ;;  %v4126_v47 = vsub.f32 0.0, %v11052_v28  ;;  %v4124_v9 = vsub.f32 0.0, %v11054_v35  ;;  %v11066_v12 = vadd.f32 %v4105_v29, %v4095_v32 }
 0x53b   :  { %v4140_v43 = vmul.f32 1.442695, %v4123_v53  ;;  %v4148_v39 = vmul.f32 1.442695, %v4127_v36  ;;  %v4144_v50 = vmul.f32 1.442695, %v4125_v26  ;;  %v11069_v21 = vadd.f32 %v4105_v29, %v4099_v10 }
 0x53c   :  { %v4152_v62 = vmul.f32 1.442695, %v4129_v1  ;;  %v4128_v17 = vsub.f32 0.0, %v11056_v7  ;;  %v4138_v34 = vmul.f32 1.442695, %v4122_v55  ;;  %v4131_v13 = vsub.f32 0.0, %v11066_v12 }
 0x53d   :  { %9949 = vpow2.f32 %v4140_v43  ;;  %v4146_v40 = vmul.f32 1.442695, %v4126_v47  ;;  %v4135_v58 = vsub.f32 0.0, %v11069_v21  ;;  %v11074_v19 = vadd.f32 %v4105_v29, %v4097_v31 }
 0x53e   :  { %9951 = vpow2.f32 %v4148_v39  ;;  %v11076_v33 = vadd.f32 %v4105_v29, %v4101_v38  ;;  %v4142_v2 = vmul.f32 1.442695, %v4124_v9  ;;  %v11078_v42 = vadd.f32 %v4105_v29, %v4094_v48 }
 0x53f   :  { %9953 = vpow2.f32 %v4144_v50  ;;  %v11080_v27 = vadd.f32 %v4105_v29, %v4098_v16  ;;  %v4150_v30 = vmul.f32 1.442695, %v4128_v17  ;;  %v4133_v52 = vsub.f32 0.0, %v11074_v19 }
 0x540   :  { %9955 = vpow2.f32 %v4152_v62  ;;  %v4137_v57 = vsub.f32 0.0, %v11076_v33  ;;  %v4156_v11 = vmul.f32 1.442695, %v4131_v13  ;;  %v4130_v20 = vsub.f32 0.0, %v11078_v42 }
 0x541   :  { %9957 = vpow2.f32 %v4138_v34  ;;  %v11085_v0 = vadd.f32 %v4105_v29, %v4096_v59  ;;  %v4164_v61 = vmul.f32 1.442695, %v4135_v58  ;;  %v4134_v15 = vsub.f32 0.0, %v11080_v27 }
 0x542   :  { %9959 = vpow2.f32 %v4146_v40  ;;  %v11088_v49 = vadd.f32 %v4105_v29, %v4100_v45  ;;  %v4160_v8 = vmul.f32 1.442695, %v4133_v52  ;;  %v4168_v46 = vmul.f32 1.442695, %v4137_v57 }
 0x543   :  { %9961 = vpow2.f32 %v4142_v2  ;;  %v4132_v54 = vsub.f32 0.0, %v11085_v0  ;;  %v4154_v22 = vmul.f32 1.442695, %v4130_v20  ;;  %v4162_v24 = vmul.f32 1.442695, %v4134_v15 }
 0x544   :  { %9963 = vpow2.f32 %v4150_v30  ;;  %v4136_v14 = vsub.f32 0.0, %v11088_v49 }
 0x545   :  { %9965 = vpow2.f32 %v4156_v11  ;;  %v4158_v56 = vmul.f32 1.442695, %v4132_v54 }
 0x546   :  { %9967 = vpow2.f32 %v4164_v61  ;;  %v4166_v3 = vmul.f32 1.442695, %v4136_v14 }
 0x547   :  { %9969 = vpow2.f32 %v4160_v8 }
 0x548   :  { %9971 = vpow2.f32 %v4168_v46 }
 0x549   :  { %9973 = vpow2.f32 %v4154_v22 }
 0x54a   :  { %v9950_v23 = vpop.eup %9949  ;;  %9975 = vpow2.f32 %v4162_v24 }
 0x54b   :  { %v9952_v60 = vpop.eup %9951  ;;  %v4171_v4 = vadd.f32 1.0, %v9950_v23  ;;  %9977 = vpow2.f32 %v4158_v56 }
 0x54c   :  { %v9954_v41 = vpop.eup %9953  ;;  %v4175_v29 = vadd.f32 1.0, %v9952_v60  ;;  %9979 = vpow2.f32 %v4166_v3 }
 0x54d   :  { %v9956_v6 = vpop.eup %9955  ;;  %9981 = vrcp.f32 %v4171_v4  ;;  %v4173_v32 = vadd.f32 1.0, %v9954_v41 }
 0x54e   :  { %v9958_v10 = vpop.eup %9957  ;;  %9983 = vrcp.f32 %v4175_v29  ;;  %v4177_v31 = vadd.f32 1.0, %v9956_v6 }
 0x54f   :  { %v9960_v38 = vpop.eup %9959  ;;  %9985 = vrcp.f32 %v4173_v32  ;;  %v4170_v48 = vadd.f32 1.0, %v9958_v10 }
 0x550   :  { %v9962_v63 = vpop.eup %9961  ;;  %9987 = vrcp.f32 %v4177_v31  ;;  %v4174_v16 = vadd.f32 1.0, %v9960_v38 }
 0x551   :  { %v9964_v53 = vpop.eup %9963  ;;  %9989 = vrcp.f32 %v4170_v48  ;;  %v4172_v36 = vadd.f32 1.0, %v9962_v63 }
 0x552   :  { %v9966_v26 = vpop.eup %9965  ;;  %9991 = vrcp.f32 %v4174_v16  ;;  %v4176_v1 = vadd.f32 1.0, %v9964_v53 }
 0x553   :  { %v9968_v55 = vpop.eup %9967  ;;  %9993 = vrcp.f32 %v4172_v36  ;;  %v4179_v47 = vadd.f32 1.0, %v9966_v26 }
 0x554   :  { %v9970_v9 = vpop.eup %9969  ;;  %9995 = vrcp.f32 %v4176_v1  ;;  %v4183_v59 = vadd.f32 1.0, %v9968_v55 }
 0x555   :  { %v9972_v43 = vpop.eup %9971  ;;  %9997 = vrcp.f32 %v4179_v47  ;;  %v4181_v39 = vadd.f32 1.0, %v9970_v9 }
 0x556   :  { %v9974_v50 = vpop.eup %9973  ;;  %9999 = vrcp.f32 %v4183_v59  ;;  %v4185_v62 = vadd.f32 1.0, %v9972_v43 }
 0x557   :  { %v9976_v17 = vpop.eup %9975  ;;  %10001 = vrcp.f32 %v4181_v39  ;;  %v4178_v45 = vadd.f32 1.0, %v9974_v50 }
 0x558   :  { %v9978_v34 = vpop.eup %9977  ;;  %10003 = vrcp.f32 %v4185_v62  ;;  %v4182_v40 = vadd.f32 1.0, %v9976_v17  ;;  %v9399_v17 = vld [vmem:[#allocation13 + $0x4e0] ss:$16 sps:$4 sm:$0xff]  }
 0x559   :  { %v9980_v13 = vpop.eup %9979  ;;  %10005 = vrcp.f32 %v4178_v45  ;;  %v4180_v58 = vadd.f32 1.0, %v9978_v34 }
 0x55a   :  { %v9982_v2 = vpop.eup %9981  ;;  %10007 = vrcp.f32 %v4182_v40  ;;  %v4184_v30 = vadd.f32 1.0, %v9980_v13 }
 0x55b   :  { %v9984_v52 = vpop.eup %9983  ;;  %v4203_v57 = vmul.f32 %v9982_v2, %v11042_v25  ;;  %10009 = vrcp.f32 %v4180_v58  ;;  %v9407_v2 = vld [vmem:[#allocation13 + $0x4c4] ss:$16 sps:$4 sm:$0xff]  }
 0x55c   :  { %v9986_v11 = vpop.eup %9985  ;;  %v4207_v20 = vmul.f32 %v9984_v52, %v11044_v5  ;;  %10011 = vrcp.f32 %v4184_v30 }
 0x55d   :  { %v9988_v61 = vpop.eup %9987  ;;  %v4236_v15 = vrot.slane %v4203_v57, 7  ;;  %v4205_v8 = vmul.f32 %v9986_v11, %v11046_v44 }
 0x55e   :  { %v9990_v54 = vpop.eup %9989  ;;  %v4241_v46 = vrot.slane %v4207_v20, 7  ;;  %v4209_v14 = vmul.f32 %v9988_v61, %v11048_v18  ;;  %v9410_v61 = vld [vmem:[#allocation13 + $0x6c4] ss:$16 sps:$4 sm:$0xff]  }
 0x55f   :  { %v9992_v22 = vpop.eup %9991  ;;  %4284 = vst [vmem:[#allocation2 + $0x8] sm:$0xfe] %v4236_v15  ;;  %v4238_v24 = vrot.slane %v4205_v8, 7  ;;  %v4202_v56 = vmul.f32 %v9990_v54, %v11050_v37 }
 0x560   :  { %v9994_v3 = vpop.eup %9993  ;;  %v11098_v25 = vsel %vm578_vm4, %v4236_v15, %v4241_v46  ;;  %4292 = vst [vmem:[#allocation2 + $0x48] sm:$0x1] %v4241_v46  ;;  %v4245_v5 = vrot.slane %v4209_v14, 7  ;;  %v4206_v23 = vmul.f32 %v9992_v22, %v11052_v28  ;;  %v9405_v46 = vld [vmem:[#allocation13 + $0x4c0] ss:$16 sps:$4 sm:$0xff]  }
 0x561   :  { %v9996_v60 = vpop.eup %9995  ;;  %4286 = vst [vmem:[#allocation2 + $0x18] sm:$0xfe] %v4238_v24  ;;  %v4235_v44 = vrot.slane %v4202_v56, 7  ;;  %v4204_v4 = vmul.f32 %v9994_v3, %v11054_v35 }
 0x562   :  { %v9998_v41 = vpop.eup %9997  ;;  %v11103_v18 = vsel %vm578_vm4, %v4238_v24, %v4245_v5  ;;  %4294 = vst [vmem:[#allocation2 + $0x58] sm:$0x1] %v4245_v5  ;;  %v4239_v29 = vrot.slane %v4206_v23, 7  ;;  %v4208_v37 = vmul.f32 %v9996_v60, %v11056_v7  ;;  %v9413_v24 = vld [vmem:[#allocation13 + $0x4a4] ss:$16 sps:$4 sm:$0xff]  }
 0x563   :  { %v10000_v6 = vpop.eup %9999  ;;  %4283 = vst [vmem:[#allocation2] sm:$0xfe] %v4235_v44  ;;  %v4237_v32 = vrot.slane %v4204_v4, 7  ;;  %v4211_v10 = vmul.f32 %v9998_v41, %v11066_v12  ;;  %v9408_v23 = vld [vmem:[#allocation13 + $0x6c0] ss:$16 sps:$4 sm:$0xff]   ;;  %v4367_v4 = vrot.slane %v11098_v25, 1 }
 0x564   :  { %v10002_v31 = vpop.eup %10001  ;;  %v11108_v28 = vsel %vm578_vm4, %v4235_v44, %v4239_v29  ;;  %4291 = vst [vmem:[#allocation2 + $0x40] sm:$0x1] %v4239_v29  ;;  %v4243_v38 = vrot.slane %v4208_v37, 7  ;;  %v4215_v35 = vmul.f32 %v10000_v6, %v11069_v21  ;;  %v9416_v29 = vld [vmem:[#allocation13 + $0x6a4] ss:$16 sps:$4 sm:$0xff]   ;;  %v4373_v37 = vrot.slane %v11103_v18, 1 }
 0x565   :  { %v10004_v48 = vpop.eup %10003  ;;  %4285 = vst [vmem:[#allocation2 + $0x10] sm:$0xfe] %v4237_v32  ;;  %v4248_v63 = vrot.slane %v4211_v10, 7  ;;  %v4213_v16 = vmul.f32 %v10002_v31, %v11074_v19  ;;  %v9411_v6 = vld [vmem:[#allocation13 + $0x4a0] ss:$16 sps:$4 sm:$0xff]  }
 0x566   :  { %v10006_v53 = vpop.eup %10005  ;;  %v4308_v7 = vld [vmem:[#allocation2 + $0x8] sm:$0xff]  ;;  %v11113_v36 = vsel %vm578_vm4, %v4237_v32, %v4243_v38  ;;  %4293 = vst [vmem:[#allocation2 + $0x50] sm:$0x1] %v4243_v38  ;;  %v4253_v12 = vrot.slane %v4215_v35, 7  ;;  %v4217_v26 = vmul.f32 %v10004_v48, %v11076_v33 }
 0x567   :  { %v10008_v1 = vpop.eup %10007  ;;  %v11117_v55 = vpack.c.bf16 %v11098_v25, %v4308_v7  ;;  %4296 = vst [vmem:[#allocation2 + $0x68] sm:$0xfe] %v4248_v63  ;;  %v4250_v21 = vrot.slane %v4213_v16, 7  ;;  %v4210_v43 = vmul.f32 %v10006_v53, %v11078_v42  ;;  %v4324_v11 = vld [vmem:[#allocation2 + $0x8] sm:$0xfe] }
 0x568   :  { %v10010_v47 = vpop.eup %10009  ;;  %v4310_v9 = vld [vmem:[#allocation2 + $0x18] sm:$0xff]  ;;  %v11120_v59 = vsel %vm578_vm4, %v4248_v63, %v4253_v12  ;;  %4304 = vst [vmem:[#allocation2 + $0xa8] sm:$0x1] %v4253_v12  ;;  %v4257_v19 = vrot.slane %v4217_v26, 7  ;;  %v4214_v39 = vmul.f32 %v10008_v1, %v11080_v27  ;;  %v4328_v20 = vld [vmem:[#allocation2 + $0x48] sm:$0x1] }
 0x569   :  { %v10012_v50 = vpop.eup %10011  ;;  %6888 = vmatprep.mubr.bf16.mxu0 %v11117_v55  ;;  %v11126_v33 = vpack.c.bf16 %v11103_v18, %v4310_v9  ;;  %4298 = vst [vmem:[#allocation2 + $0x78] sm:$0xfe] %v4250_v21  ;;  %v4212_v62 = vmul.f32 %v10010_v47, %v11085_v0  ;;  %v4247_v40 = vrot.slane %v4210_v43, 7  ;;  %v9402_v27 = vld [vmem:[#allocation13 + $0x6e0] ss:$16 sps:$4 sm:$0xff]   ;;  %v4366_v56 = vrot.slane %v4324_v11, 1 }
 0x56a   :  { %v4307_v45 = vld [vmem:[#allocation2] sm:$0xff]  ;;  %v11130_v34 = vsel %vm578_vm4, %v4250_v21, %v4257_v19  ;;  %4306 = vst [vmem:[#allocation2 + $0xb8] sm:$0x1] %v4257_v19  ;;  %v4251_v13 = vrot.slane %v4214_v39, 7  ;;  %v4216_v42 = vmul.f32 %v10012_v50, %v11088_v49  ;;  %v4326_v15 = vld [vmem:[#allocation2 + $0x18] sm:$0xfe] }
 0x56b   :  { %6941 = vmatprep.mubr.bf16.mxu1 %v11126_v33  ;;  %v11135_v58 = vpack.c.bf16 %v11108_v28, %v4307_v45  ;;  %v4249_v30 = vrot.slane %v4212_v62, 7  ;;  %4295 = vst [vmem:[#allocation2 + $0x60] sm:$0xfe] %v4247_v40  ;;  %v4330_v8 = vld [vmem:[#allocation2 + $0x58] sm:$0x1]  ;;  %v4377_v3 = vrot.slane %v4328_v20, 1  ;;  %v4368_v10 = vsel %vm707_vm5, %v4366_v56, %v4367_v4 }
 0x56c   :  { %v4309_v52 = vld [vmem:[#allocation2 + $0x10] sm:$0xff]  ;;  %v11138_v0 = vsel %vm578_vm4, %v4247_v40, %v4251_v13  ;;  %4303 = vst [vmem:[#allocation2 + $0xa0] sm:$0x1] %v4251_v13  ;;  %v4255_v57 = vrot.slane %v4216_v42, 7  ;;  %v4372_v60 = vrot.slane %v4326_v15, 1  ;;  %v4381_v44 = vrot.slane %v4330_v8, 1 }
 0x56d   :  { %6889 = vmatmul.mubr.bf16.vlgmr.msra.gmra.mxu0 %v11135_v58  ;;  %v11142_v49 = vpack.c.bf16 %v11113_v36, %v4309_v52  ;;  %4297 = vst [vmem:[#allocation2 + $0x70] sm:$0xfe] %v4249_v30  ;;  %v4378_v31 = vsel %vm707_vm5, %v4367_v4, %v4377_v3  ;;  %v9414_v38 = vld [vmem:[#allocation13 + $0x6a0] ss:$16 sps:$4 sm:$0xff]   ;;  %v9419_v7 = vld [vmem:[#allocation13 + $0x484] ss:$16 sps:$4 sm:$0xff]  }
 0x56e   :  { %6963 = vmatpush1.bf16.msra.mxu0 %v9399_v17  ;;  %v4316_v54 = vld [vmem:[#allocation2 + $0x68] sm:$0xff]  ;;  %v11145_v14 = vsel %vm578_vm4, %v4249_v30, %v4255_v57  ;;  %4305 = vst [vmem:[#allocation2 + $0xb0] sm:$0x1] %v4255_v57  ;;  %v4374_v63 = vsel %vm707_vm5, %v4372_v60, %v4373_v37  ;;  %v4382_v16 = vsel %vm707_vm5, %v4373_v37, %v4381_v44  ;;  %v9422_v26 = vld [vmem:[#allocation13 + $0x684] ss:$16 sps:$4 sm:$0xff]  }
 0x56f   :  { %6942 = vmatmul.mubr.bf16.vlgmr.msra.gmra.mxu1 %v11142_v49  ;;  %v11149_v22 = vpack.c.bf16 %v11120_v59, %v4316_v54  ;;  %6964 = vmatprep.subr.bf16.mxu0 %v9407_v2  ;;  %v11169_v12 = vpack.c.bf16 %v4378_v31, %v4368_v10  ;;  %v11172_v1 = vpack.c.bf16 %v4382_v16, %v4374_v63  ;;  %v9417_v21 = vld [vmem:[#allocation13 + $0x480] ss:$16 sps:$4 sm:$0xff]   ;;  %v9425_v9 = vld [vmem:[#allocation13 + $0x464] ss:$16 sps:$4 sm:$0xff]  }
 0x570   :  { %7016 = vmatpush1.bf16.msra.mxu1 %v9402_v27  ;;  %v4318_v5 = vld [vmem:[#allocation2 + $0x78] sm:$0xff]  ;;  %v9428_v19 = vld [vmem:[#allocation13 + $0x664] ss:$16 sps:$4 sm:$0xff]  }
 0x571   :  { %6898 = vmatprep.mubr.bf16.mxu0 %v11149_v22  ;;  %v11154_v41 = vpack.c.bf16 %v11130_v34, %v4318_v5  ;;  %7017 = vmatprep.subr.bf16.mxu1 %v9410_v61  ;;  %v9420_v47 = vld [vmem:[#allocation13 + $0x680] ss:$16 sps:$4 sm:$0xff]   ;;  %v9431_v50 = vld [vmem:[#allocation13 + $0x444] ss:$16 sps:$4 sm:$0xff]  }
 0x572   :  { %6965 = vmatpush1.bf16.msra.mxu0 %v9405_v46  ;;  %v4315_v32 = vld [vmem:[#allocation2 + $0x60] sm:$0xff]  ;;  %v9423_v43 = vld [vmem:[#allocation13 + $0x460] ss:$16 sps:$4 sm:$0xff]  }
 0x573   :  { %6951 = vmatprep.mubr.bf16.mxu1 %v11154_v41  ;;  %6966 = vmatprep.subr.bf16.mxu0 %v9413_v24  ;;  %v11161_v35 = vpack.c.bf16 %v11138_v0, %v4315_v32  ;;  %v9426_v39 = vld [vmem:[#allocation13 + $0x660] ss:$16 sps:$4 sm:$0xff]   ;;  %v9434_v62 = vld [vmem:[#allocation13 + $0x644] ss:$16 sps:$4 sm:$0xff]  }
 0x574   :  { %7018 = vmatpush1.bf16.msra.mxu1 %v9408_v23  ;;  %v4317_v48 = vld [vmem:[#allocation2 + $0x70] sm:$0xff]  ;;  %v9429_v17 = vld [vmem:[#allocation13 + $0x440] ss:$16 sps:$4 sm:$0xff]  }
 0x575   :  { %7019 = vmatprep.subr.bf16.mxu1 %v9416_v29  ;;  %v11166_v53 = vpack.c.bf16 %v11145_v14, %v4317_v48  ;;  %6899 = vmatmul.mubr.bf16.gmra.mxu0 %v11161_v35  ;;  %v9432_v45 = vld [vmem:[#allocation13 + $0x640] ss:$16 sps:$4 sm:$0xff]   ;;  %v9437_v40 = vld [vmem:[#allocation13 + $0x424] ss:$16 sps:$4 sm:$0xff]  }
 0x576   :  { %6967 = vmatpush1.bf16.msra.mxu0 %v9411_v6  ;;  %6994 = vmatprep.mubr.bf16.mxu0 %v11169_v12  ;;  %v9440_v13 = vld [vmem:[#allocation13 + $0x624] ss:$16 sps:$4 sm:$0xff]   ;;  %v9435_v42 = vld [vmem:[#allocation13 + $0x420] ss:$16 sps:$4 sm:$0xff]  }
 0x577   :  { %6952 = vmatmul.mubr.bf16.gmra.mxu1 %v11166_v53  ;;  %6968 = vmatprep.subr.bf16.mxu0 %v9419_v7  ;;  %v9438_v27 = vld [vmem:[#allocation13 + $0x620] ss:$16 sps:$4 sm:$0xff]   ;;  %v9443_v2 = vld [vmem:[#allocation13 + $0x404] ss:$16 sps:$4 sm:$0xff]  }
 0x578   :  { %7020 = vmatpush1.bf16.msra.mxu1 %v9414_v38  ;;  %7047 = vmatprep.mubr.bf16.mxu1 %v11172_v1  ;;  %v9446_v30 = vld [vmem:[#allocation13 + $0x604] ss:$16 sps:$4 sm:$0xff]   ;;  %v9441_v52 = vld [vmem:[#allocation13 + $0x400] ss:$16 sps:$4 sm:$0xff]  }
 0x579   :  { %7021 = vmatprep.subr.bf16.mxu1 %v9422_v26  ;;  %v9444_v57 = vld [vmem:[#allocation13 + $0x600] ss:$16 sps:$4 sm:$0xff]   ;;  %v9449_v11 = vld [vmem:[#allocation13 + $0x5e4] ss:$16 sps:$4 sm:$0xff]  }
 0x57a   :  { %6969 = vmatpush1.bf16.msra.mxu0 %v9417_v21  ;;  %v9452_v20 = vld [vmem:[#allocation13 + $0x7e4] ss:$16 sps:$4 sm:$0xff]   ;;  %v9447_v61 = vld [vmem:[#allocation13 + $0x5e0] ss:$16 sps:$4 sm:$0xff]  }
 0x57b   :  { %6970 = vmatprep.subr.bf16.mxu0 %v9425_v9  ;;  %v9450_v15 = vld [vmem:[#allocation13 + $0x7e0] ss:$16 sps:$4 sm:$0xff]   ;;  %v9455_v8 = vld [vmem:[#allocation13 + $0x5c4] ss:$16 sps:$4 sm:$0xff]  }
 0x57c   :  { %7022 = vmatpush1.bf16.msra.mxu1 %v9420_v47  ;;  %v9458_v54 = vld [vmem:[#allocation13 + $0x7c4] ss:$16 sps:$4 sm:$0xff]   ;;  %v9453_v46 = vld [vmem:[#allocation13 + $0x5c0] ss:$16 sps:$4 sm:$0xff]  }
 0x57d   :  { %7023 = vmatprep.subr.bf16.mxu1 %v9428_v19  ;;  %v9456_v24 = vld [vmem:[#allocation13 + $0x7c0] ss:$16 sps:$4 sm:$0xff]   ;;  %v9461_v56 = vld [vmem:[#allocation13 + $0x5a4] ss:$16 sps:$4 sm:$0xff]  }
 0x57e   :  { %6971 = vmatpush1.bf16.msra.mxu0 %v9423_v43  ;;  %v9464_v3 = vld [vmem:[#allocation13 + $0x7a4] ss:$16 sps:$4 sm:$0xff]   ;;  %v9459_v5 = vld [vmem:[#allocation13 + $0x5a0] ss:$16 sps:$4 sm:$0xff]  }
 0x57f   :  { %6972 = vmatprep.subr.bf16.mxu0 %v9431_v50  ;;  %v9462_v23 = vld [vmem:[#allocation13 + $0x7a0] ss:$16 sps:$4 sm:$0xff]   ;;  %v9467_v60 = vld [vmem:[#allocation13 + $0x584] ss:$16 sps:$4 sm:$0xff]   ;;  %v4336_v50 = vld [vmem:[#allocation2 + $0xa8] sm:$0x1] }
 0x580   :  { %7024 = vmatpush1.bf16.msra.mxu1 %v9426_v39  ;;  %v9470_v44 = vld [vmem:[#allocation13 + $0x784] ss:$16 sps:$4 sm:$0xff]   ;;  %v9465_v4 = vld [vmem:[#allocation13 + $0x580] ss:$16 sps:$4 sm:$0xff]  }
 0x581   :  { %7025 = vmatprep.subr.bf16.mxu1 %v9434_v62  ;;  %v9468_v29 = vld [vmem:[#allocation13 + $0x780] ss:$16 sps:$4 sm:$0xff]   ;;  %v9473_v37 = vld [vmem:[#allocation13 + $0x564] ss:$16 sps:$4 sm:$0xff]  }
 0x582   :  { %6973 = vmatpush1.bf16.msra.mxu0 %v9429_v17  ;;  %v9476_v6 = vld [vmem:[#allocation13 + $0x764] ss:$16 sps:$4 sm:$0xff]   ;;  %v9471_v32 = vld [vmem:[#allocation13 + $0x560] ss:$16 sps:$4 sm:$0xff]  }
 0x583   :  { %6974 = vmatprep.subr.bf16.mxu0 %v9437_v40  ;;  %v9474_v10 = vld [vmem:[#allocation13 + $0x760] ss:$16 sps:$4 sm:$0xff]   ;;  %v9479_v31 = vld [vmem:[#allocation13 + $0x544] ss:$16 sps:$4 sm:$0xff]  }
 0x584   :  { %7026 = vmatpush1.bf16.msra.mxu1 %v9432_v45  ;;  %v9482_v38 = vld [vmem:[#allocation13 + $0x744] ss:$16 sps:$4 sm:$0xff]   ;;  %v9477_v48 = vld [vmem:[#allocation13 + $0x540] ss:$16 sps:$4 sm:$0xff]   ;;  %v4338_v45 = vld [vmem:[#allocation2 + $0xb8] sm:$0x1] }
 0x585   :  { %7027 = vmatprep.subr.bf16.mxu1 %v9440_v13  ;;  %v9480_v63 = vld [vmem:[#allocation13 + $0x740] ss:$16 sps:$4 sm:$0xff]   ;;  %v9485_v16 = vld [vmem:[#allocation13 + $0x524] ss:$16 sps:$4 sm:$0xff]  }
 0x586   :  { %6975 = vmatpush1.bf16.msra.mxu0 %v9435_v42  ;;  %v9483_v7 = vld [vmem:[#allocation13 + $0x520] ss:$16 sps:$4 sm:$0xff]   ;;  %v9488_v26 = vld [vmem:[#allocation13 + $0x724] ss:$16 sps:$4 sm:$0xff]  }
 0x587   :  { %6976 = vmatprep.subr.bf16.mxu0 %v9443_v2  ;;  %v4323_v21 = vld [vmem:[#allocation2] sm:$0xfe]  ;;  %v4327_v47 = vld [vmem:[#allocation2 + $0x40] sm:$0x1]  ;;  %v4325_v9 = vld [vmem:[#allocation2 + $0x10] sm:$0xfe] }
 0x588   :  { %7028 = vmatpush1.bf16.msra.mxu1 %v9438_v27  ;;  %v4329_v19 = vld [vmem:[#allocation2 + $0x50] sm:$0x1]  ;;  %v9486_v43 = vld [vmem:[#allocation13 + $0x720] ss:$16 sps:$4 sm:$0xff]   ;;  %v4363_v13 = vrot.slane %v4323_v21, 1  ;;  %v4375_v42 = vrot.slane %v4327_v47, 1 }
 0x589   :  { %7029 = vmatprep.subr.bf16.mxu1 %v9446_v30  ;;  %v4332_v39 = vld [vmem:[#allocation2 + $0x68] sm:$0xfe]  ;;  %v9491_v62 = vld [vmem:[#allocation13 + $0x504] ss:$16 sps:$4 sm:$0xff]   ;;  %v4334_v17 = vld [vmem:[#allocation2 + $0x78] sm:$0xfe] }
 0x58a   :  { %6977 = vmatpush1.bf16.msra.mxu0 %v9441_v52  ;;  %v9494_v40 = vld [vmem:[#allocation13 + $0x704] ss:$16 sps:$4 sm:$0xff]   ;;  %v4369_v27 = vrot.slane %v4325_v9, 1  ;;  %v4379_v2 = vrot.slane %v4329_v19, 1  ;;  %v4386_v30 = vrot.slane %v4332_v39, 1  ;;  %v4397_v52 = vrot.slane %v4336_v50, 1 }
 0x58b   :  { %6978 = vmatprep.subr.bf16.mxu0 %v9449_v11  ;;  %v4370_v11 = vrot.slane %v11113_v36, 1  ;;  %v4422_v21 = vld [vmem:[#allocation2 + $0x18] sm:$0xfc]  ;;  %v4426_v47 = vld [vmem:[#allocation2 + $0x58] sm:$0x3] }
 0x58c   :  { %7030 = vmatpush1.bf16.msra.mxu1 %v9444_v57  ;;  %v4364_v57 = vrot.slane %v11108_v28, 1  ;;  %v9503_v19 = vld [vmem:[#allocation13 + $0x8c4] ss:$16 sps:$4 sm:$0xff]  }
 0x58d   :  { %7031 = vmatprep.subr.bf16.mxu1 %v9452_v20  ;;  %v9489_v20 = vld [vmem:[#allocation13 + $0x500] ss:$16 sps:$4 sm:$0xff]  }
 0x58e   :  { %6979 = vmatpush2.bf16.msra.mxu0 %v9447_v61  ;;  %v4392_v61 = vrot.slane %v4334_v17, 1  ;;  %v9506_v17 = vld [vmem:[#allocation13 + $0xac4] ss:$16 sps:$4 sm:$0xff]  }
 0x58f   :  { %6980 = vmatprep.subr.bf16.mxu0 %v9455_v8  ;;  %v4387_v8 = vrot.slane %v11120_v59, 1 }
 0x590   :  { %7032 = vmatpush2.bf16.msra.mxu1 %v9450_v15  ;;  %v4401_v15 = vrot.slane %v4338_v45, 1 }
 0x591   :  { %7033 = vmatprep.subr.bf16.mxu1 %v9458_v54  ;;  %v4393_v54 = vrot.slane %v11130_v34, 1 }
 0x592   :  { %6981 = vmatpush2.bf16.msra.mxu0 %v9453_v46  ;;  %v9492_v46 = vld [vmem:[#allocation13 + $0x700] ss:$16 sps:$4 sm:$0xff]  }
 0x593   :  { %6982 = vmatprep.subr.bf16.mxu0 %v9461_v56  ;;  %v4365_v56 = vsel %vm707_vm5, %v4363_v13, %v4364_v57 }
 0x594   :  { %7034 = vmatpush2.bf16.msra.mxu1 %v9456_v24  ;;  %v9497_v24 = vld [vmem:[#allocation13 + $0x8e4] ss:$16 sps:$4 sm:$0xff]  }
 0x595   :  { %7035 = vmatprep.subr.bf16.mxu1 %v9464_v3  ;;  %v4376_v3 = vsel %vm707_vm5, %v4364_v57, %v4375_v42  ;;  %v4384_v42 = vrot.slane %v11138_v0, 1  ;;  %v9501_v57 = vld [vmem:[#allocation13 + $0x8c0] ss:$16 sps:$4 sm:$0xff]  }
 0x596   :  { %6983 = vmatpush2.bf16.msra.mxu0 %v9459_v5  ;;  %v4371_v5 = vsel %vm707_vm5, %v4369_v27, %v4370_v11  ;;  %v4460_v27 = vrot.slane %v4422_v21, 2  ;;  %v9530_v21 = vld [vmem:[#allocation13 + $0xa44] ss:$16 sps:$4 sm:$0xff]  }
 0x597   :  { %6984 = vmatprep.subr.bf16.mxu0 %v9467_v60  ;;  %v9500_v60 = vld [vmem:[#allocation13 + $0xae4] ss:$16 sps:$4 sm:$0xff]  }
 0x598   :  { %7036 = vmatpush2.bf16.msra.mxu1 %v9462_v23  ;;  %v4380_v23 = vsel %vm707_vm5, %v4370_v11, %v4379_v2  ;;  %v4469_v2 = vrot.slane %v4426_v47, 2  ;;  %v4461_v11 = vrot.slane %v11103_v18, 2  ;;  %v9525_v47 = vld [vmem:[#allocation13 + $0x840] ss:$16 sps:$4 sm:$0xff]  }
 0x599   :  { %7037 = vmatprep.subr.bf16.mxu1 %v9470_v44  ;;  %v9495_v44 = vld [vmem:[#allocation13 + $0x8e0] ss:$16 sps:$4 sm:$0xff]  }
 0x59a   :  { %6985 = vmatpush2.bf16.msra.mxu0 %v9465_v4  ;;  %v4388_v4 = vsel %vm707_vm5, %v4386_v30, %v4387_v8  ;;  %v4455_v30 = vrot.slane %v11098_v25, 2  ;;  %v4462_v18 = vsel %vm796_vm6, %v4460_v27, %v4461_v11  ;;  %v9545_v27 = vld [vmem:[#allocation13 + $0x9e4] ss:$16 sps:$4 sm:$0xff]  }
 0x59b   :  { %6986 = vmatprep.subr.bf16.mxu0 %v9473_v37  ;;  %v4331_v37 = vld [vmem:[#allocation2 + $0x60] sm:$0xfe] }
 0x59c   :  { %7038 = vmatpush2.bf16.msra.mxu1 %v9468_v29  ;;  %v4398_v29 = vsel %vm707_vm5, %v4387_v8, %v4397_v52  ;;  %v4390_v52 = vrot.slane %v11145_v14, 1  ;;  %v9509_v8 = vld [vmem:[#allocation13 + $0x8a4] ss:$16 sps:$4 sm:$0xff]  }
 0x59d   :  { %7039 = vmatprep.subr.bf16.mxu1 %v9476_v6  ;;  %v4335_v6 = vld [vmem:[#allocation2 + $0xa0] sm:$0x1]  ;;  %v11192_v9 = vpack.c.bf16 %v4398_v29, %v4388_v4 }
 0x59e   :  { %6987 = vmatpush2.bf16.msra.mxu0 %v9471_v32  ;;  %v4333_v32 = vld [vmem:[#allocation2 + $0x70] sm:$0xfe]  ;;  %v4395_v39 = vrot.slane %v4335_v6, 1 }
 0x59f   :  { %6988 = vmatprep.subr.bf16.mxu0 %v9479_v31  ;;  %v4402_v31 = vsel %vm707_vm5, %v4393_v54, %v4401_v15  ;;  %v4389_v50 = vrot.slane %v4333_v32, 1  ;;  %v9515_v29 = vld [vmem:[#allocation13 + $0x884] ss:$16 sps:$4 sm:$0xff]   ;;  %v9513_v32 = vld [vmem:[#allocation13 + $0x880] ss:$16 sps:$4 sm:$0xff]  }
 0x5a0   :  { %7040 = vmatpush2.bf16.msra.mxu1 %v9474_v10  ;;  %v4394_v10 = vsel %vm707_vm5, %v4392_v61, %v4393_v54  ;;  %v4396_v15 = vsel %vm707_vm5, %v4384_v42, %v4395_v39  ;;  %v9518_v6 = vld [vmem:[#allocation13 + $0xa84] ss:$16 sps:$4 sm:$0xff]  }
 0x5a1   :  { %7041 = vmatprep.subr.bf16.mxu1 %v9482_v38  ;;  %v4337_v38 = vld [vmem:[#allocation2 + $0xb0] sm:$0x1]  ;;  %v4391_v54 = vsel %vm707_vm5, %v4389_v50, %v4390_v52  ;;  %v9531_v50 = vld [vmem:[#allocation13 + $0x820] ss:$16 sps:$4 sm:$0xff]  }
 0x5a2   :  { %6989 = vmatpush2.bf16.msra.mxu0 %v9477_v48  ;;  %v4420_v48 = vld [vmem:[#allocation2 + $0x8] sm:$0xfc]  ;;  %v4399_v45 = vrot.slane %v4337_v38, 1  ;;  %v9524_v38 = vld [vmem:[#allocation13 + $0xa64] ss:$16 sps:$4 sm:$0xff]  }
 0x5a3   :  { %6990 = vmatprep.subr.bf16.mxu0 %v9485_v16  ;;  %v11188_v16 = vpack.c.bf16 %v4376_v3, %v4365_v56  ;;  %v4470_v3 = vsel %vm796_vm6, %v4461_v11, %v4469_v2  ;;  %v9536_v39 = vld [vmem:[#allocation13 + $0xa24] ss:$16 sps:$4 sm:$0xff]  }
 0x5a4   :  { %7042 = vmatpush2.bf16.msra.mxu1 %v9480_v63  ;;  %v4424_v63 = vld [vmem:[#allocation2 + $0x48] sm:$0x3]  ;;  %v4400_v25 = vsel %vm707_vm5, %v4390_v52, %v4399_v45  ;;  %v9539_v45 = vld [vmem:[#allocation13 + $0x804] ss:$16 sps:$4 sm:$0xff]   ;;  %v9546_v52 = vld [vmem:[#allocation13 + $0xbe0] ss:$16 sps:$4 sm:$0xff]  }
 0x5a5   :  { %7043 = vmatprep.subr.bf16.mxu1 %v9488_v26  ;;  %v9498_v26 = vld [vmem:[#allocation13 + $0xae0] ss:$16 sps:$4 sm:$0xff]   ;;  %v4465_v13 = vrot.slane %v4424_v63, 2  ;;  %v9548_v2 = vld [vmem:[#allocation13 + $0xbe4] ss:$16 sps:$4 sm:$0xff]  }
 0x5a6   :  { %6991 = vmatpush2.bf16.msra.mxu0 %v9483_v7  ;;  %v11190_v7 = vpack.c.bf16 %v4380_v23, %v4371_v5  ;;  %v9507_v23 = vld [vmem:[#allocation13 + $0x8a0] ss:$16 sps:$4 sm:$0xff]   ;;  %v9554_v11 = vld [vmem:[#allocation13 + $0xbc4] ss:$16 sps:$4 sm:$0xff]  }
 0x5a7   :  { %6992 = vmatprep.subr.bf16.mxu0 %v9491_v62  ;;  %v11195_v62 = vpack.c.bf16 %v4402_v31, %v4394_v10  ;;  %v4466_v56 = vsel %vm796_vm6, %v4455_v30, %v4465_v13  ;;  %v9516_v10 = vld [vmem:[#allocation13 + $0xa80] ss:$16 sps:$4 sm:$0xff]   ;;  %v9521_v31 = vld [vmem:[#allocation13 + $0x864] ss:$16 sps:$4 sm:$0xff]  }
 0x5a8   :  { %7044 = vmatpush2.bf16.msra.mxu1 %v9486_v43  ;;  %v4383_v43 = vrot.slane %v4331_v37, 1  ;;  %v11219_v37 = vpack.c.bf16 %v4470_v3, %v4462_v18  ;;  %v9522_v63 = vld [vmem:[#allocation13 + $0xa60] ss:$16 sps:$4 sm:$0xff]   ;;  %v9569_v3 = vld [vmem:[#allocation13 + $0x964] ss:$16 sps:$4 sm:$0xff]  }
 0x5a9   :  { %7045 = vmatprep.subr.bf16.mxu1 %v9494_v40  ;;  %v4454_v40 = vrot.slane %v4420_v48, 2  ;;  %v9519_v48 = vld [vmem:[#allocation13 + $0x860] ss:$16 sps:$4 sm:$0xff]  }
 0x5aa   :  { %6993 = vmatpush2.bf16.msra.mxu0 %v9489_v20  ;;  %v9504_v20 = vld [vmem:[#allocation13 + $0xac0] ss:$16 sps:$4 sm:$0xff]   ;;  %v4385_v61 = vsel %vm707_vm5, %v4383_v43, %v4384_v42  ;;  %v9533_v43 = vld [vmem:[#allocation13 + $0x824] ss:$16 sps:$4 sm:$0xff]  }
 0x5ab   :  { %7068 = vmatprep.subr.bf16.mxu0 %v9497_v24  ;;  %v4456_v24 = vsel %vm796_vm6, %v4454_v40, %v4455_v30  ;;  %v11212_v5 = vpack.c.bf16 %v4396_v15, %v4385_v61  ;;  %v9542_v40 = vld [vmem:[#allocation13 + $0xa04] ss:$16 sps:$4 sm:$0xff]   ;;  %v9537_v13 = vld [vmem:[#allocation13 + $0x800] ss:$16 sps:$4 sm:$0xff]  }
 0x5ac   :  { %7046 = vmatpush2.bf16.msra.mxu1 %v9492_v46  ;;  %v9512_v46 = vld [vmem:[#allocation13 + $0xaa4] ss:$16 sps:$4 sm:$0xff]   ;;  %v11216_v4 = vpack.c.bf16 %v4466_v56, %v4456_v24  ;;  %v9540_v42 = vld [vmem:[#allocation13 + $0xa00] ss:$16 sps:$4 sm:$0xff]  }
 0x5ad   :  { %7121 = vmatprep.subr.bf16.mxu1 %v9500_v60  ;;  %6995 = vmatmul.mubr.bf16.vlgmr.msra.gmra.mxu0 %v11188_v16  ;;  %v11214_v60 = vpack.c.bf16 %v4400_v25, %v4391_v54  ;;  %v9543_v30 = vld [vmem:[#allocation13 + $0x9e0] ss:$16 sps:$4 sm:$0xff]   ;;  %v9557_v15 = vld [vmem:[#allocation13 + $0x9a4] ss:$16 sps:$4 sm:$0xff]  }
 0x5ae   :  { %7004 = vmatprep.mubr.bf16.mxu0 %v11192_v9  ;;  %7069 = vmatpush1.bf16.msra.mxu0 %v9495_v44  ;;  %v9510_v44 = vld [vmem:[#allocation13 + $0xaa0] ss:$16 sps:$4 sm:$0xff]   ;;  %v9566_v24 = vld [vmem:[#allocation13 + $0xb84] ss:$16 sps:$4 sm:$0xff]  }
 0x5af   :  { %7048 = vmatmul.mubr.bf16.vlgmr.msra.gmra.mxu1 %v11190_v7  ;;  %7070 = vmatprep.subr.bf16.mxu0 %v9503_v19  ;;  %v9528_v19 = vld [vmem:[#allocation13 + $0xa40] ss:$16 sps:$4 sm:$0xff]  }
 0x5b0   :  { %7057 = vmatprep.mubr.bf16.mxu1 %v11195_v62  ;;  %7122 = vmatpush1.bf16.msra.mxu1 %v9498_v26  ;;  %v9527_v26 = vld [vmem:[#allocation13 + $0x844] ss:$16 sps:$4 sm:$0xff]   ;;  %v9552_v61 = vld [vmem:[#allocation13 + $0xbc0] ss:$16 sps:$4 sm:$0xff]  }
 0x5b1   :  { %7123 = vmatprep.subr.bf16.mxu1 %v9506_v17  ;;  %v9534_v17 = vld [vmem:[#allocation13 + $0xa20] ss:$16 sps:$4 sm:$0xff]  }
 0x5b2   :  { %7071 = vmatpush1.bf16.msra.mxu0 %v9501_v57  ;;  %v9551_v57 = vld [vmem:[#allocation13 + $0x9c4] ss:$16 sps:$4 sm:$0xff]   ;;  %v9555_v54 = vld [vmem:[#allocation13 + $0x9a0] ss:$16 sps:$4 sm:$0xff]  }
 0x5b3   :  { %7072 = vmatprep.subr.bf16.mxu0 %v9509_v8  ;;  %v9560_v8 = vld [vmem:[#allocation13 + $0xba4] ss:$16 sps:$4 sm:$0xff]   ;;  %v9558_v25 = vld [vmem:[#allocation13 + $0xba0] ss:$16 sps:$4 sm:$0xff]  }
 0x5b4   :  { %7124 = vmatpush1.bf16.msra.mxu1 %v9504_v20  ;;  %v9549_v20 = vld [vmem:[#allocation13 + $0x9c0] ss:$16 sps:$4 sm:$0xff]  }
 0x5b5   :  { %7005 = vmatmul.mubr.bf16.gmra.mxu0 %v11212_v5  ;;  %7125 = vmatprep.subr.bf16.mxu1 %v9512_v46  ;;  %v9563_v46 = vld [vmem:[#allocation13 + $0x984] ss:$16 sps:$4 sm:$0xff]   ;;  %v9561_v56 = vld [vmem:[#allocation13 + $0x980] ss:$16 sps:$4 sm:$0xff]  }
 0x5b6   :  { %7100 = vmatprep.mubr.bf16.mxu0 %v11216_v4  ;;  %7073 = vmatpush1.bf16.msra.mxu0 %v9507_v23  ;;  %v9564_v18 = vld [vmem:[#allocation13 + $0xb80] ss:$16 sps:$4 sm:$0xff]   ;;  %v9572_v23 = vld [vmem:[#allocation13 + $0xb64] ss:$16 sps:$4 sm:$0xff]  }
 0x5b7   :  { %7058 = vmatmul.mubr.bf16.gmra.mxu1 %v11214_v60  ;;  %7074 = vmatprep.subr.bf16.mxu0 %v9515_v29  ;;  %v9570_v29 = vld [vmem:[#allocation13 + $0xb60] ss:$16 sps:$4 sm:$0xff]  }
 0x5b8   :  { %7153 = vmatprep.mubr.bf16.mxu1 %v11219_v37  ;;  %7126 = vmatpush1.bf16.msra.mxu1 %v9510_v44  ;;  %v9567_v44 = vld [vmem:[#allocation13 + $0x960] ss:$16 sps:$4 sm:$0xff]  }
 0x5b9   :  { %7127 = vmatprep.subr.bf16.mxu1 %v9518_v6  ;;  %v9575_v6 = vld [vmem:[#allocation13 + $0x944] ss:$16 sps:$4 sm:$0xff]  }
 0x5ba   :  { %7075 = vmatpush1.bf16.msra.mxu0 %v9513_v32  ;;  %v9578_v32 = vld [vmem:[#allocation13 + $0xb44] ss:$16 sps:$4 sm:$0xff]  }
 0x5bb   :  { %7076 = vmatprep.subr.bf16.mxu0 %v9521_v31  ;;  %v9576_v31 = vld [vmem:[#allocation13 + $0xb40] ss:$16 sps:$4 sm:$0xff]  }
 0x5bc   :  { %7128 = vmatpush1.bf16.msra.mxu1 %v9516_v10  ;;  %v9573_v10 = vld [vmem:[#allocation13 + $0x940] ss:$16 sps:$4 sm:$0xff]  }
 0x5bd   :  { %7129 = vmatprep.subr.bf16.mxu1 %v9524_v38  ;;  %v9581_v38 = vld [vmem:[#allocation13 + $0x924] ss:$16 sps:$4 sm:$0xff]  }
 0x5be   :  { %7077 = vmatpush1.bf16.msra.mxu0 %v9519_v48  ;;  %v9579_v48 = vld [vmem:[#allocation13 + $0x920] ss:$16 sps:$4 sm:$0xff]  }
 0x5bf   :  { %7078 = vmatprep.subr.bf16.mxu0 %v9527_v26  ;;  %v9582_v26 = vld [vmem:[#allocation13 + $0xb20] ss:$16 sps:$4 sm:$0xff]  }
 0x5c0   :  { %7130 = vmatpush1.bf16.msra.mxu1 %v9522_v63  ;;  %v9584_v63 = vld [vmem:[#allocation13 + $0xb24] ss:$16 sps:$4 sm:$0xff]  }
 0x5c1   :  { %7131 = vmatprep.subr.bf16.mxu1 %v9530_v21  ;;  %v4419_v21 = vld [vmem:[#allocation2] sm:$0xfc] }
 0x5c2   :  { %7079 = vmatpush1.bf16.msra.mxu0 %v9525_v47  ;;  %v4423_v47 = vld [vmem:[#allocation2 + $0x40] sm:$0x3] }
 0x5c3   :  { %7080 = vmatprep.subr.bf16.mxu0 %v9533_v43  ;;  %v4425_v43 = vld [vmem:[#allocation2 + $0x50] sm:$0x3] }
 0x5c4   :  { %7132 = vmatpush1.bf16.msra.mxu1 %v9528_v19  ;;  %v4421_v19 = vld [vmem:[#allocation2 + $0x10] sm:$0xfc] }
 0x5c5   :  { %7133 = vmatprep.subr.bf16.mxu1 %v9536_v39  ;;  %v4428_v39 = vld [vmem:[#allocation2 + $0x68] sm:$0xfc] }
 0x5c6   :  { %7081 = vmatpush1.bf16.msra.mxu0 %v9531_v50  ;;  %v4432_v50 = vld [vmem:[#allocation2 + $0xa8] sm:$0x3] }
 0x5c7   :  { %7082 = vmatprep.subr.bf16.mxu0 %v9539_v45  ;;  %v4430_v45 = vld [vmem:[#allocation2 + $0x78] sm:$0xfc] }
 0x5c8   :  { %7134 = vmatpush1.bf16.msra.mxu1 %v9534_v17  ;;  %v9587_v17 = vld [vmem:[#allocation13 + $0x904] ss:$16 sps:$4 sm:$0xff]  }
 0x5c9   :  { %7135 = vmatprep.subr.bf16.mxu1 %v9542_v40  ;;  %v4434_v40 = vld [vmem:[#allocation2 + $0xb8] sm:$0x3] }
 0x5ca   :  { %7083 = vmatpush1.bf16.msra.mxu0 %v9537_v13  ;;  %v9590_v13 = vld [vmem:[#allocation13 + $0xb04] ss:$16 sps:$4 sm:$0xff]  }
 0x5cb   :  { %7084 = vmatprep.subr.bf16.mxu0 %v9545_v27  ;;  %v4463_v27 = vrot.slane %v4423_v47, 2 }
 0x5cc   :  { %7136 = vmatpush1.bf16.msra.mxu1 %v9540_v42  ;;  %v4451_v42 = vrot.slane %v4419_v21, 2  ;;  %v9599_v21 = vld [vmem:[#allocation13 + $0xcc] ss:$16 sps:$4 sm:$0xff]  }
 0x5cd   :  { %7137 = vmatprep.subr.bf16.mxu1 %v9548_v2  ;;  %v4457_v2 = vrot.slane %v4421_v19, 2 }
 0x5ce   :  { %7085 = vmatpush2.bf16.msra.mxu0 %v9543_v30  ;;  %v4467_v30 = vrot.slane %v4425_v43, 2 }
 0x5cf   :  { %7086 = vmatprep.subr.bf16.mxu0 %v9551_v57  ;;  %v4485_v57 = vrot.slane %v4432_v50, 2 }
 0x5d0   :  { %7138 = vmatpush2.bf16.msra.mxu1 %v9546_v52  ;;  %v4474_v52 = vrot.slane %v4428_v39, 2  ;;  %v9602_v39 = vld [vmem:[#allocation13 + $0x2cc] ss:$16 sps:$4 sm:$0xff]  }
 0x5d1   :  { %7139 = vmatprep.subr.bf16.mxu1 %v9554_v11  ;;  %v4452_v11 = vrot.slane %v11108_v28, 2  ;;  %v9596_v28 = vld [vmem:[#allocation13 + $0x2ec] ss:$16 sps:$4 sm:$0xff]  }
 0x5d2   :  { %7087 = vmatpush2.bf16.msra.mxu0 %v9549_v20  ;;  %v9585_v20 = vld [vmem:[#allocation13 + $0x900] ss:$16 sps:$4 sm:$0xff]  }
 0x5d3   :  { %7088 = vmatprep.subr.bf16.mxu0 %v9557_v15  ;;  %v4489_v15 = vrot.slane %v4434_v40, 2  ;;  %v4478_v40 = vrot.slane %v11145_v14, 2 }
 0x5d4   :  { %7140 = vmatpush2.bf16.msra.mxu1 %v9552_v61  ;;  %v4480_v61 = vrot.slane %v4430_v45, 2  ;;  %v4472_v45 = vrot.slane %v11138_v0, 2 }
 0x5d5   :  { %7141 = vmatprep.subr.bf16.mxu1 %v9560_v8  ;;  %v4458_v8 = vrot.slane %v11113_v36, 2 }
 0x5d6   :  { %7089 = vmatpush2.bf16.msra.mxu0 %v9555_v54  ;;  %v4475_v54 = vrot.slane %v11120_v59, 2 }
 0x5d7   :  { %7090 = vmatprep.subr.bf16.mxu0 %v9563_v46  ;;  %v9593_v46 = vld [vmem:[#allocation13 + $0xec] ss:$16 sps:$4 sm:$0xff]  }
 0x5d8   :  { %7142 = vmatpush2.bf16.msra.mxu1 %v9558_v25  ;;  %v9588_v25 = vld [vmem:[#allocation13 + $0xb00] ss:$16 sps:$4 sm:$0xff]   ;;  %v4476_v36 = vsel %vm796_vm6, %v4474_v52, %v4475_v54  ;;  %v4486_v59 = vsel %vm796_vm6, %v4475_v54, %v4485_v57  ;;  %v9608_v57 = vld [vmem:[#allocation13 + $0x2ac] ss:$16 sps:$4 sm:$0xff]   ;;  %v9609_v54 = vld [vmem:[#allocation13 + $0x88] ss:$16 sps:$4 sm:$0xff]  }
 0x5d9   :  { %7143 = vmatprep.subr.bf16.mxu1 %v9566_v24  ;;  %v4481_v24 = vrot.slane %v11130_v34, 2 }
 0x5da   :  { %7091 = vmatpush2.bf16.msra.mxu0 %v9561_v56  ;;  %v4453_v56 = vsel %vm796_vm6, %v4451_v42, %v4452_v11  ;;  %v9600_v42 = vld [vmem:[#allocation13 + $0x2c8] ss:$16 sps:$4 sm:$0xff]  }
 0x5db   :  { %7092 = vmatprep.subr.bf16.mxu0 %v9569_v3  ;;  %v4459_v3 = vsel %vm796_vm6, %v4457_v2, %v4458_v8  ;;  %v4490_v34 = vsel %vm796_vm6, %v4481_v24, %v4489_v15  ;;  %v9611_v15 = vld [vmem:[#allocation13 + $0x8c] ss:$16 sps:$4 sm:$0xff]  }
 0x5dc   :  { %7144 = vmatpush2.bf16.msra.mxu1 %v9564_v18  ;;  %v4464_v18 = vsel %vm796_vm6, %v4452_v11, %v4463_v27  ;;  %v9603_v11 = vld [vmem:[#allocation13 + $0xa8] ss:$16 sps:$4 sm:$0xff]  }
 0x5dd   :  { %7145 = vmatprep.subr.bf16.mxu1 %v9572_v23  ;;  %v4468_v23 = vsel %vm796_vm6, %v4458_v8, %v4467_v30  ;;  %v9605_v30 = vld [vmem:[#allocation13 + $0xac] ss:$16 sps:$4 sm:$0xff]  }
 0x5de   :  { %7093 = vmatpush2.bf16.msra.mxu0 %v9567_v44  ;;  %v4427_v44 = vld [vmem:[#allocation2 + $0x60] sm:$0xfc]  ;;  %v9614_v8 = vld [vmem:[#allocation13 + $0x28c] ss:$16 sps:$4 sm:$0xff]  }
 0x5df   :  { %7094 = vmatprep.subr.bf16.mxu0 %v9575_v6  ;;  %v4482_v6 = vsel %vm796_vm6, %v4480_v61, %v4481_v24  ;;  %v4471_v47 = vrot.slane %v4427_v44, 2  ;;  %v9606_v61 = vld [vmem:[#allocation13 + $0x2a8] ss:$16 sps:$4 sm:$0xff]   ;;  %v9620_v24 = vld [vmem:[#allocation13 + $0x26c] ss:$16 sps:$4 sm:$0xff]  }
 0x5e0   :  { %7146 = vmatpush2.bf16.msra.mxu1 %v9570_v29  ;;  %v4431_v29 = vld [vmem:[#allocation2 + $0xa0] sm:$0x3]  ;;  %v11243_v43 = vpack.c.bf16 %v4490_v34, %v4482_v6  ;;  %v9630_v44 = vld [vmem:[#allocation13 + $0x228] ss:$16 sps:$4 sm:$0xff]   ;;  %v9638_v6 = vld [vmem:[#allocation13 + $0x20c] ss:$16 sps:$4 sm:$0xff]  }
 0x5e1   :  { %7147 = vmatprep.subr.bf16.mxu1 %v9578_v32  ;;  %v4429_v32 = vld [vmem:[#allocation2 + $0x70] sm:$0xfc]  ;;  %v4483_v19 = vrot.slane %v4431_v29, 2  ;;  %v4473_v27 = vsel %vm796_vm6, %v4471_v47, %v4472_v45  ;;  %v9635_v29 = vld [vmem:[#allocation13 + $0xc] ss:$16 sps:$4 sm:$0xff]  }
 0x5e2   :  { %7095 = vmatpush2.bf16.msra.mxu0 %v9573_v10  ;;  %v4433_v10 = vld [vmem:[#allocation2 + $0xb0] sm:$0x3]  ;;  %v4477_v50 = vrot.slane %v4429_v32, 2  ;;  %v9633_v34 = vld [vmem:[#allocation13 + $0x8] ss:$16 sps:$4 sm:$0xff]  }
 0x5e3   :  { %7096 = vmatprep.subr.bf16.mxu0 %v9581_v38  ;;  %v9591_v38 = vld [vmem:[#allocation13 + $0xe8] ss:$16 sps:$4 sm:$0xff]   ;;  %v4484_v2 = vsel %vm796_vm6, %v4472_v45, %v4483_v19  ;;  %v9647_v47 = vld [vmem:[#allocation13 + $0x1cc] ss:$16 sps:$4 sm:$0xff]  }
 0x5e4   :  { %7148 = vmatpush2.bf16.msra.mxu1 %v9576_v31  ;;  %v11236_v31 = vpack.c.bf16 %v4464_v18, %v4453_v56  ;;  %v4479_v0 = vsel %vm796_vm6, %v4477_v50, %v4478_v40  ;;  %v11254_v14 = vpack.c.bf16 %v4484_v2, %v4473_v27  ;;  %v9615_v56 = vld [vmem:[#allocation13 + $0x68] ss:$16 sps:$4 sm:$0xff]   ;;  %v9650_v19 = vld [vmem:[#allocation13 + $0x3cc] ss:$16 sps:$4 sm:$0xff]  }
 0x5e5   :  { %7149 = vmatprep.subr.bf16.mxu1 %v9584_v63  ;;  %v9594_v63 = vld [vmem:[#allocation13 + $0x2e8] ss:$16 sps:$4 sm:$0xff]   ;;  %v9656_v45 = vld [vmem:[#allocation13 + $0x3ac] ss:$16 sps:$4 sm:$0xff]  }
 0x5e6   :  { %7097 = vmatpush2.bf16.msra.mxu0 %v9579_v48  ;;  %v11238_v48 = vpack.c.bf16 %v4468_v23, %v4459_v3  ;;  %v9618_v18 = vld [vmem:[#allocation13 + $0x268] ss:$16 sps:$4 sm:$0xff]   ;;  %v9626_v3 = vld [vmem:[#allocation13 + $0x24c] ss:$16 sps:$4 sm:$0xff]  }
 0x5e7   :  { %7098 = vmatprep.subr.bf16.mxu0 %v9587_v17  ;;  %v4487_v17 = vrot.slane %v4433_v10, 2  ;;  %v9629_v23 = vld [vmem:[#allocation13 + $0x2c] ss:$16 sps:$4 sm:$0xff]   ;;  %v9636_v32 = vld [vmem:[#allocation13 + $0x208] ss:$16 sps:$4 sm:$0xff]  }
 0x5e8   :  { %7150 = vmatpush2.bf16.msra.mxu1 %v9582_v26  ;;  %v11240_v26 = vpack.c.bf16 %v4486_v59, %v4476_v36  ;;  %v9632_v36 = vld [vmem:[#allocation13 + $0x22c] ss:$16 sps:$4 sm:$0xff]   ;;  %v9627_v59 = vld [vmem:[#allocation13 + $0x28] ss:$16 sps:$4 sm:$0xff]  }
 0x5e9   :  { %7151 = vmatprep.subr.bf16.mxu1 %v9590_v13  ;;  %v9597_v13 = vld [vmem:[#allocation13 + $0xc8] ss:$16 sps:$4 sm:$0xff]   ;;  %v4488_v52 = vsel %vm796_vm6, %v4478_v40, %v4487_v17  ;;  %v9641_v10 = vld [vmem:[#allocation13 + $0x1ec] ss:$16 sps:$4 sm:$0xff]  }
 0x5ea   :  { %7099 = vmatpush2.bf16.msra.mxu0 %v9585_v20  ;;  %v11256_v20 = vpack.c.bf16 %v4488_v52, %v4479_v0  ;;  %v9648_v50 = vld [vmem:[#allocation13 + $0x3c8] ss:$16 sps:$4 sm:$0xff]   ;;  %v9653_v17 = vld [vmem:[#allocation13 + $0x1ac] ss:$16 sps:$4 sm:$0xff]  }
 0x5eb   :  { %7174 = vmatprep.subr.bf16.mxu0 %v9593_v46  ;;  %v9617_v46 = vld [vmem:[#allocation13 + $0x6c] ss:$16 sps:$4 sm:$0xff]   ;;  %v9651_v40 = vld [vmem:[#allocation13 + $0x1a8] ss:$16 sps:$4 sm:$0xff]  }
 0x5ec   :  { %7152 = vmatpush2.bf16.msra.mxu1 %v9588_v25  ;;  %v9612_v25 = vld [vmem:[#allocation13 + $0x288] ss:$16 sps:$4 sm:$0xff]   ;;  %v9662_v27 = vld [vmem:[#allocation13 + $0x38c] ss:$16 sps:$4 sm:$0xff]  }
 0x5ed   :  { %7227 = vmatprep.subr.bf16.mxu1 %v9596_v28  ;;  %7101 = vmatmul.mubr.bf16.vlgmr.msra.gmra.mxu0 %v11236_v31  ;;  %v9623_v28 = vld [vmem:[#allocation13 + $0x4c] ss:$16 sps:$4 sm:$0xff]   ;;  %v9657_v2 = vld [vmem:[#allocation13 + $0x188] ss:$16 sps:$4 sm:$0xff]  }
 0x5ee   :  { %7110 = vmatprep.mubr.bf16.mxu0 %v11240_v26  ;;  %7175 = vmatpush1.bf16.msra.mxu0 %v9591_v38  ;;  %v9644_v38 = vld [vmem:[#allocation13 + $0x3ec] ss:$16 sps:$4 sm:$0xff]  }
 0x5ef   :  { %7154 = vmatmul.mubr.bf16.vlgmr.msra.gmra.mxu1 %v11238_v48  ;;  %7176 = vmatprep.subr.bf16.mxu0 %v9599_v21  ;;  %v9642_v21 = vld [vmem:[#allocation13 + $0x3e8] ss:$16 sps:$4 sm:$0xff]   ;;  %v9665_v0 = vld [vmem:[#allocation13 + $0x16c] ss:$16 sps:$4 sm:$0xff]  }
 0x5f0   :  { %7163 = vmatprep.mubr.bf16.mxu1 %v11243_v43  ;;  %7228 = vmatpush1.bf16.msra.mxu1 %v9594_v63  ;;  %v9639_v63 = vld [vmem:[#allocation13 + $0x1e8] ss:$16 sps:$4 sm:$0xff]   ;;  %v9668_v52 = vld [vmem:[#allocation13 + $0x36c] ss:$16 sps:$4 sm:$0xff]  }
 0x5f1   :  { %7229 = vmatprep.subr.bf16.mxu1 %v9602_v39  ;;  %v9645_v39 = vld [vmem:[#allocation13 + $0x1c8] ss:$16 sps:$4 sm:$0xff]  }
 0x5f2   :  { %7177 = vmatpush1.bf16.msra.mxu0 %v9597_v13  ;;  %v9654_v13 = vld [vmem:[#allocation13 + $0x3a8] ss:$16 sps:$4 sm:$0xff]  }
 0x5f3   :  { %7178 = vmatprep.subr.bf16.mxu0 %v9605_v30  ;;  %v9660_v30 = vld [vmem:[#allocation13 + $0x388] ss:$16 sps:$4 sm:$0xff]  }
 0x5f4   :  { %7230 = vmatpush1.bf16.msra.mxu1 %v9600_v42  ;;  %v9659_v42 = vld [vmem:[#allocation13 + $0x18c] ss:$16 sps:$4 sm:$0xff]  }
 0x5f5   :  { %7111 = vmatmul.mubr.bf16.gmra.mxu0 %v11254_v14  ;;  %7231 = vmatprep.subr.bf16.mxu1 %v9608_v57  ;;  %v9663_v57 = vld [vmem:[#allocation13 + $0x168] ss:$16 sps:$4 sm:$0xff]  }
 0x5f6   :  { %7206 = vmatprep.mubr.bf16.mxu0 %v11117_v55  ;;  %7179 = vmatpush1.bf16.msra.mxu0 %v9603_v11  ;;  %v9621_v55 = vld [vmem:[#allocation13 + $0x48] ss:$16 sps:$4 sm:$0xff]  }
 0x5f7   :  { %7164 = vmatmul.mubr.bf16.gmra.mxu1 %v11256_v20  ;;  %7180 = vmatprep.subr.bf16.mxu0 %v9611_v15  ;;  %v9666_v11 = vld [vmem:[#allocation13 + $0x368] ss:$16 sps:$4 sm:$0xff]   ;;  %v9674_v15 = vld [vmem:[#allocation13 + $0x34c] ss:$16 sps:$4 sm:$0xff]  }
 0x5f8   :  { %7259 = vmatprep.mubr.bf16.mxu1 %v11126_v33  ;;  %7232 = vmatpush1.bf16.msra.mxu1 %v9606_v61  ;;  %v9624_v33 = vld [vmem:[#allocation13 + $0x248] ss:$16 sps:$4 sm:$0xff]   ;;  %v9671_v61 = vld [vmem:[#allocation13 + $0x14c] ss:$16 sps:$4 sm:$0xff]  }
 0x5f9   :  { %7233 = vmatprep.subr.bf16.mxu1 %v9614_v8  ;;  %v9669_v8 = vld [vmem:[#allocation13 + $0x148] ss:$16 sps:$4 sm:$0xff]  }
 0x5fa   :  { %7181 = vmatpush1.bf16.msra.mxu0 %v9609_v54  ;;  %v9672_v54 = vld [vmem:[#allocation13 + $0x348] ss:$16 sps:$4 sm:$0xff]  }
 0x5fb   :  { %7182 = vmatprep.subr.bf16.mxu0 %v9617_v46  ;;  %v9680_v46 = vld [vmem:[#allocation13 + $0x32c] ss:$16 sps:$4 sm:$0xff]  }
 0x5fc   :  { %7234 = vmatpush1.bf16.msra.mxu1 %v9612_v25  ;;  %v9677_v25 = vld [vmem:[#allocation13 + $0x12c] ss:$16 sps:$4 sm:$0xff]  }
 0x5fd   :  { %7235 = vmatprep.subr.bf16.mxu1 %v9620_v24  ;;  %v9675_v24 = vld [vmem:[#allocation13 + $0x128] ss:$16 sps:$4 sm:$0xff]  }
 0x5fe   :  { %7183 = vmatpush1.bf16.msra.mxu0 %v9615_v56  ;;  %v9678_v56 = vld [vmem:[#allocation13 + $0x328] ss:$16 sps:$4 sm:$0xff]  }
 0x5ff   :  { %7184 = vmatprep.subr.bf16.mxu0 %v9623_v28  ;;  %v9686_v28 = vld [vmem:[#allocation13 + $0x30c] ss:$16 sps:$4 sm:$0xff]  }
 0x600   :  { %7236 = vmatpush1.bf16.msra.mxu1 %v9618_v18  ;;  %v9683_v18 = vld [vmem:[#allocation13 + $0x10c] ss:$16 sps:$4 sm:$0xff]  }
 0x601   :  { %7237 = vmatprep.subr.bf16.mxu1 %v9626_v3  ;;  %v9681_v3 = vld [vmem:[#allocation13 + $0x108] ss:$16 sps:$4 sm:$0xff]  }
 0x602   :  { %7185 = vmatpush1.bf16.msra.mxu0 %v9621_v55  ;;  %v9684_v55 = vld [vmem:[#allocation13 + $0x308] ss:$16 sps:$4 sm:$0xff]  }
 0x603   :  { %7186 = vmatprep.subr.bf16.mxu0 %v9629_v23  ;;  %v9692_v23 = vld [vmem:[#allocation13 + $0x6ec] ss:$16 sps:$4 sm:$0xff]  }
 0x604   :  { %7238 = vmatpush1.bf16.msra.mxu1 %v9624_v33  ;;  %v9689_v33 = vld [vmem:[#allocation13 + $0x4ec] ss:$16 sps:$4 sm:$0xff]  }
 0x605   :  { %7239 = vmatprep.subr.bf16.mxu1 %v9632_v36  ;;  %v9687_v36 = vld [vmem:[#allocation13 + $0x4e8] ss:$16 sps:$4 sm:$0xff]  }
 0x606   :  { %7187 = vmatpush1.bf16.msra.mxu0 %v9627_v59  ;;  %v9690_v59 = vld [vmem:[#allocation13 + $0x6e8] ss:$16 sps:$4 sm:$0xff]  }
 0x607   :  { %7188 = vmatprep.subr.bf16.mxu0 %v9635_v29  ;;  %v9698_v29 = vld [vmem:[#allocation13 + $0x6cc] ss:$16 sps:$4 sm:$0xff]  }
 0x608   :  { %7240 = vmatpush1.bf16.msra.mxu1 %v9630_v44  ;;  %v9695_v44 = vld [vmem:[#allocation13 + $0x4cc] ss:$16 sps:$4 sm:$0xff]  }
 0x609   :  { %7241 = vmatprep.subr.bf16.mxu1 %v9638_v6  ;;  %v9693_v6 = vld [vmem:[#allocation13 + $0x4c8] ss:$16 sps:$4 sm:$0xff]  }
 0x60a   :  { %7189 = vmatpush1.bf16.msra.mxu0 %v9633_v34  ;;  %v9696_v34 = vld [vmem:[#allocation13 + $0x6c8] ss:$16 sps:$4 sm:$0xff]  }
 0x60b   :  { %7190 = vmatprep.subr.bf16.mxu0 %v9641_v10  ;;  %v9704_v10 = vld [vmem:[#allocation13 + $0x6ac] ss:$16 sps:$4 sm:$0xff]  }
 0x60c   :  { %7242 = vmatpush1.bf16.msra.mxu1 %v9636_v32  ;;  %v9701_v32 = vld [vmem:[#allocation13 + $0x4ac] ss:$16 sps:$4 sm:$0xff]  }
 0x60d   :  { %7243 = vmatprep.subr.bf16.mxu1 %v9644_v38  ;;  %v9699_v38 = vld [vmem:[#allocation13 + $0x4a8] ss:$16 sps:$4 sm:$0xff]  }
 0x60e   :  { %7191 = vmatpush2.bf16.msra.mxu0 %v9639_v63  ;;  %v9707_v63 = vld [vmem:[#allocation13 + $0x48c] ss:$16 sps:$4 sm:$0xff]  }
 0x60f   :  { %7192 = vmatprep.subr.bf16.mxu0 %v9647_v47  ;;  %v9716_v47 = vld [vmem:[#allocation13 + $0x66c] ss:$16 sps:$4 sm:$0xff]  }
 0x610   :  { %7244 = vmatpush2.bf16.msra.mxu1 %v9642_v21  ;;  %v9713_v21 = vld [vmem:[#allocation13 + $0x46c] ss:$16 sps:$4 sm:$0xff]  }
 0x611   :  { %7245 = vmatprep.subr.bf16.mxu1 %v9650_v19  ;;  %v9711_v19 = vld [vmem:[#allocation13 + $0x468] ss:$16 sps:$4 sm:$0xff]  }
 0x612   :  { %7193 = vmatpush2.bf16.msra.mxu0 %v9645_v39  ;;  %v9719_v39 = vld [vmem:[#allocation13 + $0x44c] ss:$16 sps:$4 sm:$0xff]  }
 0x613   :  { %7194 = vmatprep.subr.bf16.mxu0 %v9653_v17  ;;  %v9728_v17 = vld [vmem:[#allocation13 + $0x62c] ss:$16 sps:$4 sm:$0xff]  }
 0x614   :  { %7246 = vmatpush2.bf16.msra.mxu1 %v9648_v50  ;;  %v9725_v50 = vld [vmem:[#allocation13 + $0x42c] ss:$16 sps:$4 sm:$0xff]  }
 0x615   :  { %7247 = vmatprep.subr.bf16.mxu1 %v9656_v45  ;;  %v9723_v45 = vld [vmem:[#allocation13 + $0x428] ss:$16 sps:$4 sm:$0xff]  }
 0x616   :  { %7195 = vmatpush2.bf16.msra.mxu0 %v9651_v40  ;;  %v9726_v40 = vld [vmem:[#allocation13 + $0x628] ss:$16 sps:$4 sm:$0xff]  }
 0x617   :  { %7196 = vmatprep.subr.bf16.mxu0 %v9659_v42  ;;  %v9734_v42 = vld [vmem:[#allocation13 + $0x60c] ss:$16 sps:$4 sm:$0xff]  }
 0x618   :  { %7248 = vmatpush2.bf16.msra.mxu1 %v9654_v13  ;;  %v9731_v13 = vld [vmem:[#allocation13 + $0x40c] ss:$16 sps:$4 sm:$0xff]  }
 0x619   :  { %7249 = vmatprep.subr.bf16.mxu1 %v9662_v27  ;;  %v9729_v27 = vld [vmem:[#allocation13 + $0x408] ss:$16 sps:$4 sm:$0xff]  }
 0x61a   :  { %7197 = vmatpush2.bf16.msra.mxu0 %v9657_v2  ;;  %v9732_v2 = vld [vmem:[#allocation13 + $0x608] ss:$16 sps:$4 sm:$0xff]  }
 0x61b   :  { %7198 = vmatprep.subr.bf16.mxu0 %v9665_v0  ;;  %v9740_v0 = vld [vmem:[#allocation13 + $0x7ec] ss:$16 sps:$4 sm:$0xff]  }
 0x61c   :  { %7250 = vmatpush2.bf16.msra.mxu1 %v9660_v30  ;;  %v9737_v30 = vld [vmem:[#allocation13 + $0x5ec] ss:$16 sps:$4 sm:$0xff]  }
 0x61d   :  { %7251 = vmatprep.subr.bf16.mxu1 %v9668_v52  ;;  %v9735_v52 = vld [vmem:[#allocation13 + $0x5e8] ss:$16 sps:$4 sm:$0xff]  }
 0x61e   :  { %7199 = vmatpush2.bf16.msra.mxu0 %v9663_v57  ;;  %v9738_v57 = vld [vmem:[#allocation13 + $0x7e8] ss:$16 sps:$4 sm:$0xff]  }
 0x61f   :  { %7200 = vmatprep.subr.bf16.mxu0 %v9671_v61  ;;  %v9746_v61 = vld [vmem:[#allocation13 + $0x7cc] ss:$16 sps:$4 sm:$0xff]  }
 0x620   :  { %7252 = vmatpush2.bf16.msra.mxu1 %v9666_v11  ;;  %v9743_v11 = vld [vmem:[#allocation13 + $0x5cc] ss:$16 sps:$4 sm:$0xff]  }
 0x621   :  { %7253 = vmatprep.subr.bf16.mxu1 %v9674_v15  ;;  %v9741_v15 = vld [vmem:[#allocation13 + $0x5c8] ss:$16 sps:$4 sm:$0xff]  }
 0x622   :  { %7201 = vmatpush2.bf16.msra.mxu0 %v9669_v8  ;;  %v9744_v8 = vld [vmem:[#allocation13 + $0x7c8] ss:$16 sps:$4 sm:$0xff]  }
 0x623   :  { %7202 = vmatprep.subr.bf16.mxu0 %v9677_v25  ;;  %v9752_v25 = vld [vmem:[#allocation13 + $0x7ac] ss:$16 sps:$4 sm:$0xff]  }
 0x624   :  { %7254 = vmatpush2.bf16.msra.mxu1 %v9672_v54  ;;  %v9749_v54 = vld [vmem:[#allocation13 + $0x5ac] ss:$16 sps:$4 sm:$0xff]  }
 0x625   :  { %7255 = vmatprep.subr.bf16.mxu1 %v9680_v46  ;;  %v9747_v46 = vld [vmem:[#allocation13 + $0x5a8] ss:$16 sps:$4 sm:$0xff]  }
 0x626   :  { %7203 = vmatpush2.bf16.msra.mxu0 %v9675_v24  ;;  %v9750_v24 = vld [vmem:[#allocation13 + $0x7a8] ss:$16 sps:$4 sm:$0xff]  }
 0x627   :  { %7204 = vmatprep.subr.bf16.mxu0 %v9683_v18  ;;  %v9758_v18 = vld [vmem:[#allocation13 + $0x78c] ss:$16 sps:$4 sm:$0xff]  }
 0x628   :  { %7256 = vmatpush2.bf16.msra.mxu1 %v9678_v56  ;;  %v9755_v56 = vld [vmem:[#allocation13 + $0x58c] ss:$16 sps:$4 sm:$0xff]  }
 0x629   :  { %7257 = vmatprep.subr.bf16.mxu1 %v9686_v28  ;;  %v9753_v28 = vld [vmem:[#allocation13 + $0x588] ss:$16 sps:$4 sm:$0xff]  }
 0x62a   :  { %7205 = vmatpush2.bf16.msra.mxu0 %v9681_v3  ;;  %v9756_v3 = vld [vmem:[#allocation13 + $0x788] ss:$16 sps:$4 sm:$0xff]  }
 0x62b   :  { %7280 = vmatprep.subr.bf16.mxu0 %v9689_v33  ;;  %v9764_v33 = vld [vmem:[#allocation13 + $0x76c] ss:$16 sps:$4 sm:$0xff]  }
 0x62c   :  { %7258 = vmatpush2.bf16.msra.mxu1 %v9684_v55  ;;  %v9761_v55 = vld [vmem:[#allocation13 + $0x56c] ss:$16 sps:$4 sm:$0xff]  }
 0x62d   :  { %7333 = vmatprep.subr.bf16.mxu1 %v9692_v23  ;;  %7207 = vmatmul.mubr.bf16.vlgmr.msra.gmra.mxu0 %v11135_v58  ;;  %v9702_v58 = vld [vmem:[#allocation13 + $0x6a8] ss:$16 sps:$4 sm:$0xff]  }
 0x62e   :  { %7216 = vmatprep.mubr.bf16.mxu0 %v11149_v22  ;;  %7281 = vmatpush1.bf16.msra.mxu0 %v9687_v36  ;;  %v9705_v22 = vld [vmem:[#allocation13 + $0x488] ss:$16 sps:$4 sm:$0xff]  }
 0x62f   :  { %7260 = vmatmul.mubr.bf16.vlgmr.msra.gmra.mxu1 %v11142_v49  ;;  %7282 = vmatprep.subr.bf16.mxu0 %v9695_v44  ;;  %v9710_v49 = vld [vmem:[#allocation13 + $0x68c] ss:$16 sps:$4 sm:$0xff]   ;;  %v9759_v23 = vld [vmem:[#allocation13 + $0x568] ss:$16 sps:$4 sm:$0xff]  }
 0x630   :  { %7269 = vmatprep.mubr.bf16.mxu1 %v11154_v41  ;;  %7334 = vmatpush1.bf16.msra.mxu1 %v9690_v59  ;;  %v9708_v41 = vld [vmem:[#allocation13 + $0x688] ss:$16 sps:$4 sm:$0xff]   ;;  %v9767_v59 = vld [vmem:[#allocation13 + $0x54c] ss:$16 sps:$4 sm:$0xff]  }
 0x631   :  { %7335 = vmatprep.subr.bf16.mxu1 %v9698_v29  ;;  %v9762_v36 = vld [vmem:[#allocation13 + $0x768] ss:$16 sps:$4 sm:$0xff]   ;;  %v9770_v44 = vld [vmem:[#allocation13 + $0x74c] ss:$16 sps:$4 sm:$0xff]  }
 0x632   :  { %7283 = vmatpush1.bf16.msra.mxu0 %v9693_v6  ;;  %v9765_v29 = vld [vmem:[#allocation13 + $0x548] ss:$16 sps:$4 sm:$0xff]  }
 0x633   :  { %7284 = vmatprep.subr.bf16.mxu0 %v9701_v32  ;;  %v9768_v6 = vld [vmem:[#allocation13 + $0x748] ss:$16 sps:$4 sm:$0xff]   ;;  %v9776_v32 = vld [vmem:[#allocation13 + $0x72c] ss:$16 sps:$4 sm:$0xff]  }
 0x634   :  { %7336 = vmatpush1.bf16.msra.mxu1 %v9696_v34  ;;  %v9773_v34 = vld [vmem:[#allocation13 + $0x52c] ss:$16 sps:$4 sm:$0xff]  }
 0x635   :  { %7217 = vmatmul.mubr.bf16.gmra.mxu0 %v11161_v35  ;;  %7337 = vmatprep.subr.bf16.mxu1 %v9704_v10  ;;  %v9714_v35 = vld [vmem:[#allocation13 + $0x668] ss:$16 sps:$4 sm:$0xff]  }
 0x636   :  { %7312 = vmatprep.mubr.bf16.mxu0 %v11169_v12  ;;  %7285 = vmatpush1.bf16.msra.mxu0 %v9699_v38  ;;  %v9717_v12 = vld [vmem:[#allocation13 + $0x448] ss:$16 sps:$4 sm:$0xff]  }
 0x637   :  { %7270 = vmatmul.mubr.bf16.gmra.mxu1 %v11166_v53  ;;  %7286 = vmatprep.subr.bf16.mxu0 %v9707_v63  ;;  %v9722_v53 = vld [vmem:[#allocation13 + $0x64c] ss:$16 sps:$4 sm:$0xff]   ;;  %v9771_v10 = vld [vmem:[#allocation13 + $0x528] ss:$16 sps:$4 sm:$0xff]  }
 0x638   :  { %7365 = vmatprep.mubr.bf16.mxu1 %v11172_v1  ;;  %7338 = vmatpush1.bf16.msra.mxu1 %v9702_v58  ;;  %v9720_v1 = vld [vmem:[#allocation13 + $0x648] ss:$16 sps:$4 sm:$0xff]   ;;  %v9779_v58 = vld [vmem:[#allocation13 + $0x50c] ss:$16 sps:$4 sm:$0xff]  }
 0x639   :  { %7339 = vmatprep.subr.bf16.mxu1 %v9710_v49  ;;  %v9774_v38 = vld [vmem:[#allocation13 + $0x728] ss:$16 sps:$4 sm:$0xff]   ;;  %v9782_v63 = vld [vmem:[#allocation13 + $0x70c] ss:$16 sps:$4 sm:$0xff]  }
 0x63a   :  { %7287 = vmatpush1.bf16.msra.mxu0 %v9705_v22  ;;  %v9777_v49 = vld [vmem:[#allocation13 + $0x508] ss:$16 sps:$4 sm:$0xff]  }
 0x63b   :  { %7288 = vmatprep.subr.bf16.mxu0 %v9713_v21  ;;  %v9780_v22 = vld [vmem:[#allocation13 + $0x708] ss:$16 sps:$4 sm:$0xff]   ;;  %v9788_v21 = vld [vmem:[#allocation13 + $0xaec] ss:$16 sps:$4 sm:$0xff]  }
 0x63c   :  { %7340 = vmatpush1.bf16.msra.mxu1 %v9708_v41  ;;  %v9785_v41 = vld [vmem:[#allocation13 + $0x8ec] ss:$16 sps:$4 sm:$0xff]  }
 0x63d   :  { %7341 = vmatprep.subr.bf16.mxu1 %v9716_v47  ;;  %v9783_v47 = vld [vmem:[#allocation13 + $0x8e8] ss:$16 sps:$4 sm:$0xff]  }
 0x63e   :  { %7289 = vmatpush1.bf16.msra.mxu0 %v9711_v19  ;;  %v9786_v19 = vld [vmem:[#allocation13 + $0xae8] ss:$16 sps:$4 sm:$0xff]  }
 0x63f   :  { %7290 = vmatprep.subr.bf16.mxu0 %v9719_v39  ;;  %v9794_v39 = vld [vmem:[#allocation13 + $0xacc] ss:$16 sps:$4 sm:$0xff]  }
 0x640   :  { %7342 = vmatpush1.bf16.msra.mxu1 %v9714_v35  ;;  %v9791_v35 = vld [vmem:[#allocation13 + $0x8cc] ss:$16 sps:$4 sm:$0xff]  }
 0x641   :  { %7343 = vmatprep.subr.bf16.mxu1 %v9722_v53  ;;  %v11273_v53 = vpop.f32.mrf.mxu0 }
 0x642   :  { %7291 = vmatpush1.bf16.msra.mxu0 %v9717_v12  ;;  %v9789_v12 = vld [vmem:[#allocation13 + $0x8c8] ss:$16 sps:$4 sm:$0xff]  }
 0x643   :  { %7292 = vmatprep.subr.bf16.mxu0 %v9725_v50  ;;  %v9792_v50 = vld [vmem:[#allocation13 + $0xac8] ss:$16 sps:$4 sm:$0xff]  }
 0x644   :  { %7344 = vmatpush1.bf16.msra.mxu1 %v9720_v1  ;;  %v11276_v1 = vpop.f32.mrf.mxu1 }
 0x645   :  { %7345 = vmatprep.subr.bf16.mxu1 %v9728_v17  ;;  %v9797_v17 = vld [vmem:[#allocation13 + $0x8ac] ss:$16 sps:$4 sm:$0xff]  }
 0x646   :  { %7293 = vmatpush1.bf16.msra.mxu0 %v9723_v45  ;;  %v9800_v45 = vld [vmem:[#allocation13 + $0xaac] ss:$16 sps:$4 sm:$0xff]  }
 0x647   :  { %7294 = vmatprep.subr.bf16.mxu0 %v9731_v13  ;;  %v9806_v13 = vld [vmem:[#allocation13 + $0xa8c] ss:$16 sps:$4 sm:$0xff]  }
 0x648   :  { %7346 = vmatpush1.bf16.msra.mxu1 %v9726_v40  ;;  %v11280_v40 = vpop.f32.mrf.mxu1 }
 0x649   :  { %7347 = vmatprep.subr.bf16.mxu1 %v9734_v42 }
 0x64a   :  { %7295 = vmatpush1.bf16.msra.mxu0 %v9729_v27  ;;  %v9801_v27 = vld [vmem:[#allocation13 + $0x888] ss:$16 sps:$4 sm:$0xff]  }
 0x64b   :  { %7296 = vmatprep.subr.bf16.mxu0 %v9737_v30  ;;  %v9804_v30 = vld [vmem:[#allocation13 + $0xa88] ss:$16 sps:$4 sm:$0xff]  }
 0x64c   :  { %7348 = vmatpush1.bf16.msra.mxu1 %v9732_v2  ;;  %v11288_v2 = vpop.f32.mrf.mxu1 }
 0x64d   :  { %7349 = vmatprep.subr.bf16.mxu1 %v9740_v0  ;;  %v9809_v0 = vld [vmem:[#allocation13 + $0x86c] ss:$16 sps:$4 sm:$0xff]  }
 0x64e   :  { %7297 = vmatpush2.bf16.msra.mxu0 %v9735_v52 }
 0x64f   :  { %7298 = vmatprep.subr.bf16.mxu0 %v9743_v11  ;;  %v9815_v11 = vld [vmem:[#allocation13 + $0x84c] ss:$16 sps:$4 sm:$0xff]  }
 0x650   :  { %7350 = vmatpush2.bf16.msra.mxu1 %v9738_v57  ;;  %v11292_v57 = vpop.f32.mrf.mxu1 }
 0x651   :  { %7351 = vmatprep.subr.bf16.mxu1 %v9746_v61 }
 0x652   :  { %7299 = vmatpush2.bf16.msra.mxu0 %v9741_v15  ;;  %v9813_v15 = vld [vmem:[#allocation13 + $0x848] ss:$16 sps:$4 sm:$0xff]  }
 0x653   :  { %7300 = vmatprep.subr.bf16.mxu0 %v9749_v54  ;;  %v9816_v54 = vld [vmem:[#allocation13 + $0xa48] ss:$16 sps:$4 sm:$0xff]  }
 0x654   :  { %7352 = vmatpush2.bf16.msra.mxu1 %v9744_v8  ;;  %v11296_v8 = vpop.f32.mrf.mxu1 }
 0x655   :  { %7353 = vmatprep.subr.bf16.mxu1 %v9752_v25  ;;  %v9821_v25 = vld [vmem:[#allocation13 + $0x82c] ss:$16 sps:$4 sm:$0xff]  }
 0x656   :  { %7301 = vmatpush2.bf16.msra.mxu0 %v9747_v46  ;;  %v9824_v46 = vld [vmem:[#allocation13 + $0xa2c] ss:$16 sps:$4 sm:$0xff]  }
 0x657   :  { %7302 = vmatprep.subr.bf16.mxu0 %v9755_v56  ;;  %v9819_v56 = vld [vmem:[#allocation13 + $0x828] ss:$16 sps:$4 sm:$0xff]  }
 0x658   :  { %7354 = vmatpush2.bf16.msra.mxu1 %v9750_v24 }
 0x659   :  { %7355 = vmatprep.subr.bf16.mxu1 %v9758_v18  ;;  %v11300_v18 = vpop.f32.mrf.mxu1 }
 0x65a   :  { %7303 = vmatpush2.bf16.msra.mxu0 %v9753_v28  ;;  %v9822_v28 = vld [vmem:[#allocation13 + $0xa28] ss:$16 sps:$4 sm:$0xff]  }
 0x65b   :  { %7304 = vmatprep.subr.bf16.mxu0 %v9761_v55  ;;  %v9830_v55 = vld [vmem:[#allocation13 + $0xa0c] ss:$16 sps:$4 sm:$0xff]  }
 0x65c   :  { %7356 = vmatpush2.bf16.msra.mxu1 %v9756_v3  ;;  %v9827_v3 = vld [vmem:[#allocation13 + $0x80c] ss:$16 sps:$4 sm:$0xff]  }
 0x65d   :  { %7357 = vmatprep.subr.bf16.mxu1 %v9764_v33 }
 0x65e   :  { %7305 = vmatpush2.bf16.msra.mxu0 %v9759_v23  ;;  %v9825_v23 = vld [vmem:[#allocation13 + $0x808] ss:$16 sps:$4 sm:$0xff]  }
 0x65f   :  { %7306 = vmatprep.subr.bf16.mxu0 %v9767_v59  ;;  %v9828_v59 = vld [vmem:[#allocation13 + $0xa08] ss:$16 sps:$4 sm:$0xff]  }
 0x660   :  { %7358 = vmatpush2.bf16.msra.mxu1 %v9762_v36  ;;  %v11304_v36 = vpop.f32.mrf.mxu1 }
 0x661   :  { %7359 = vmatprep.subr.bf16.mxu1 %v9770_v44  ;;  %v9833_v44 = vld [vmem:[#allocation13 + $0x9ec] ss:$16 sps:$4 sm:$0xff]  }
 0x662   :  { %7307 = vmatpush2.bf16.msra.mxu0 %v9765_v29  ;;  %v9836_v29 = vld [vmem:[#allocation13 + $0xbec] ss:$16 sps:$4 sm:$0xff]  }
 0x663   :  { %7308 = vmatprep.subr.bf16.mxu0 %v9773_v34  ;;  %v9831_v34 = vld [vmem:[#allocation13 + $0x9e8] ss:$16 sps:$4 sm:$0xff]  }
 0x664   :  { %7360 = vmatpush2.bf16.msra.mxu1 %v9768_v6 }
 0x665   :  { %7361 = vmatprep.subr.bf16.mxu1 %v9776_v32  ;;  %v11308_v32 = vpop.f32.mrf.mxu1 }
 0x666   :  { %7309 = vmatpush2.bf16.msra.mxu0 %v9771_v10  ;;  %v9834_v10 = vld [vmem:[#allocation13 + $0xbe8] ss:$16 sps:$4 sm:$0xff]  }
 0x667   :  { %7310 = vmatprep.subr.bf16.mxu0 %v9779_v58 }
 0x668   :  { %7362 = vmatpush2.bf16.msra.mxu1 %v9774_v38  ;;  %v9839_v38 = vld [vmem:[#allocation13 + $0x9cc] ss:$16 sps:$4 sm:$0xff]  }
 0x669   :  { %7363 = vmatprep.subr.bf16.mxu1 %v9782_v63  ;;  %v9842_v63 = vld [vmem:[#allocation13 + $0xbcc] ss:$16 sps:$4 sm:$0xff]  }
 0x66a   :  { %7311 = vmatpush2.bf16.msra.mxu0 %v9777_v49 }
 0x66b   :  { %7386 = vmatprep.subr.bf16.mxu0 %v9785_v41  ;;  %v9840_v41 = vld [vmem:[#allocation13 + $0xbc8] ss:$16 sps:$4 sm:$0xff]  }
 0x66c   :  { %7364 = vmatpush2.bf16.msra.mxu1 %v9780_v22  ;;  %v9837_v22 = vld [vmem:[#allocation13 + $0x9c8] ss:$16 sps:$4 sm:$0xff]  }
 0x66d   :  { %7439 = vmatprep.subr.bf16.mxu1 %v9788_v21  ;;  %7313 = vmatmul.mubr.bf16.vlgmr.msra.gmra.mxu0 %v11188_v16  ;;  %v11278_v16 = vpop.f32.mrf.mxu0  ;;  %v9845_v21 = vld [vmem:[#allocation13 + $0x9ac] ss:$16 sps:$4 sm:$0xff]  }
 0x66e   :  { %7322 = vmatprep.mubr.bf16.mxu0 %v11192_v9  ;;  %7387 = vmatpush1.bf16.msra.mxu0 %v9783_v47  ;;  %v9798_v9 = vld [vmem:[#allocation13 + $0xaa8] ss:$16 sps:$4 sm:$0xff]  }
 0x66f   :  { %7366 = vmatmul.mubr.bf16.vlgmr.msra.gmra.mxu1 %v11190_v7  ;;  %7388 = vmatprep.subr.bf16.mxu0 %v9791_v35  ;;  %v9795_v7 = vld [vmem:[#allocation13 + $0x8a8] ss:$16 sps:$4 sm:$0xff]   ;;  %v11285_v42 = vpop.f32.mrf.mxu0  ;;  %v11312_v49 = vpop.f32.mrf.mxu1 }
 0x670   :  { %7375 = vmatprep.mubr.bf16.mxu1 %v11195_v62  ;;  %7440 = vmatpush1.bf16.msra.mxu1 %v9786_v19  ;;  %v9803_v62 = vld [vmem:[#allocation13 + $0x88c] ss:$16 sps:$4 sm:$0xff]  }
 0x671   :  { %7441 = vmatprep.subr.bf16.mxu1 %v9794_v39  ;;  %v11290_v52 = vpop.f32.mrf.mxu0  ;;  %v9848_v19 = vld [vmem:[#allocation13 + $0xbac] ss:$16 sps:$4 sm:$0xff]   ;;  %v11316_v35 = vpop.f32.mrf.mxu1  ;;  %v9843_v39 = vld [vmem:[#allocation13 + $0x9a8] ss:$16 sps:$4 sm:$0xff]  }
 0x672   :  { %7389 = vmatpush1.bf16.msra.mxu0 %v9789_v12  ;;  %v9846_v12 = vld [vmem:[#allocation13 + $0xba8] ss:$16 sps:$4 sm:$0xff]  }
 0x673   :  { %7390 = vmatprep.subr.bf16.mxu0 %v9797_v17  ;;  %v11294_v61 = vpop.f32.mrf.mxu0 }
 0x674   :  { %7442 = vmatpush1.bf16.msra.mxu1 %v9792_v50  ;;  %v9851_v50 = vld [vmem:[#allocation13 + $0x98c] ss:$16 sps:$4 sm:$0xff]  }
 0x675   :  { %7323 = vmatmul.mubr.bf16.gmra.mxu0 %v11212_v5  ;;  %7443 = vmatprep.subr.bf16.mxu1 %v9800_v45  ;;  %v9812_v5 = vld [vmem:[#allocation13 + $0xa6c] ss:$16 sps:$4 sm:$0xff]   ;;  %v11298_v24 = vpop.f32.mrf.mxu0 }
 0x676   :  { %7418 = vmatprep.mubr.bf16.mxu0 %v11216_v4  ;;  %7391 = vmatpush1.bf16.msra.mxu0 %v9795_v7  ;;  %v9810_v4 = vld [vmem:[#allocation13 + $0xa68] ss:$16 sps:$4 sm:$0xff]   ;;  %v9854_v45 = vld [vmem:[#allocation13 + $0xb8c] ss:$16 sps:$4 sm:$0xff]   ;;  %v11320_v7 = vpop.f32.mrf.mxu1 }
 0x677   :  { %7376 = vmatmul.mubr.bf16.gmra.mxu1 %v11214_v60  ;;  %7392 = vmatprep.subr.bf16.mxu0 %v9803_v62  ;;  %v9807_v60 = vld [vmem:[#allocation13 + $0x868] ss:$16 sps:$4 sm:$0xff]   ;;  %v11302_v33 = vpop.f32.mrf.mxu0 }
 0x678   :  { %7471 = vmatprep.mubr.bf16.mxu1 %v11219_v37  ;;  %7444 = vmatpush1.bf16.msra.mxu1 %v9798_v9  ;;  %v9818_v37 = vld [vmem:[#allocation13 + $0xa4c] ss:$16 sps:$4 sm:$0xff]   ;;  %v9849_v9 = vld [vmem:[#allocation13 + $0x988] ss:$16 sps:$4 sm:$0xff]  }
 0x679   :  { %7445 = vmatprep.subr.bf16.mxu1 %v9806_v13  ;;  %v11306_v6 = vpop.f32.mrf.mxu0  ;;  %v9852_v62 = vld [vmem:[#allocation13 + $0xb88] ss:$16 sps:$4 sm:$0xff]   ;;  %v9857_v13 = vld [vmem:[#allocation13 + $0x96c] ss:$16 sps:$4 sm:$0xff]  }
 0x67a   :  { %7393 = vmatpush1.bf16.msra.mxu0 %v9801_v27 }
 0x67b   :  { %7394 = vmatprep.subr.bf16.mxu0 %v9809_v0  ;;  %v11310_v58 = vpop.f32.mrf.mxu0  ;;  %v11322_v0 = vpop.f32.mrf.mxu1 }
 0x67c   :  { %7446 = vmatpush1.bf16.msra.mxu1 %v9804_v30  ;;  %v9860_v30 = vld [vmem:[#allocation13 + $0xb6c] ss:$16 sps:$4 sm:$0xff]  }
 0x67d   :  { %7447 = vmatprep.subr.bf16.mxu1 %v9812_v5  ;;  %v11314_v47 = vpop.f32.mrf.mxu0  ;;  %v11324_v5 = vld [vmem:[#allocation14] sm:$0xf] }
 0x67e   :  { %7395 = vmatpush1.bf16.msra.mxu0 %v9807_v60  ;;  %v9855_v60 = vld [vmem:[#allocation13 + $0x968] ss:$16 sps:$4 sm:$0xff]  }
 0x67f   :  { %7396 = vmatprep.subr.bf16.mxu0 %v9815_v11  ;;  %v11318_v17 = vpop.f32.mrf.mxu0  ;;  %v9863_v11 = vld [vmem:[#allocation13 + $0x94c] ss:$16 sps:$4 sm:$0xff]  }
 0x680   :  { %7448 = vmatpush1.bf16.msra.mxu1 %v9810_v4  ;;  %v9858_v4 = vld [vmem:[#allocation13 + $0xb68] ss:$16 sps:$4 sm:$0xff]  }
 0x681   :  { %7449 = vmatprep.subr.bf16.mxu1 %v9818_v37  ;;  %v7002_v27 = vpop.f32.mrf.mxu0 }
 0x682   :  { %7397 = vmatpush1.bf16.msra.mxu0 %v9813_v15  ;;  %v9866_v15 = vld [vmem:[#allocation13 + $0xb4c] ss:$16 sps:$4 sm:$0xff]  }
 0x683   :  { %7398 = vmatprep.subr.bf16.mxu0 %v9821_v25  ;;  %v11326_v37 = vpop.f32.mrf.mxu0  ;;  %v11330_v25 = vpop.f32.mrf.mxu1 }
 0x684   :  { %7450 = vmatpush1.bf16.msra.mxu1 %v9816_v54  ;;  %v4919_v54 = vrot.slane %v11324_v5, %v10437_v51 }
 0x685   :  { %7451 = vmatprep.subr.bf16.mxu1 %v9824_v46  ;;  %v9861_v46 = vld [vmem:[#allocation13 + $0x948] ss:$16 sps:$4 sm:$0xff]  }
 0x686   :  { %7399 = vmatpush1.bf16.msra.mxu0 %v9819_v56  ;;  %v11655_v56 = vld [vmem:[#allocation23_spill] sm:$0xff] }
 0x687   :  { %7400 = vmatprep.subr.bf16.mxu0 %v9827_v3  ;;  %v9864_v3 = vld [vmem:[#allocation13 + $0xb48] ss:$16 sps:$4 sm:$0xff]  }
 0x688   :  { %7452 = vmatpush1.bf16.msra.mxu1 %v9822_v28  ;;  %v4923_v28 = vrot.slane %v11324_v5, %v11655_v56 }
 0x689   :  { %7453 = vmatprep.subr.bf16.mxu1 %v9830_v55  ;;  %v9869_v55 = vld [vmem:[#allocation13 + $0x92c] ss:$16 sps:$4 sm:$0xff]  }
 0x68a   :  { %7401 = vmatpush1.bf16.msra.mxu0 %v9825_v23  ;;  %v11334_v23 = vpop.f32.mrf.mxu0 }
 0x68b   :  { %7402 = vmatprep.subr.bf16.mxu0 %v9833_v44  ;;  %v6891_v44 = vadd.f32 %v11273_v53, %v4919_v54 }
 0x68c   :  { %7454 = vmatpush1.bf16.msra.mxu1 %v9828_v59  ;;  %v9872_v59 = vld [vmem:[#allocation13 + $0xb2c] ss:$16 sps:$4 sm:$0xff]  }
 0x68d   :  { %7455 = vmatprep.subr.bf16.mxu1 %v9836_v29  ;;  %v11337_v29 = vpop.f32.mrf.mxu1 }
 0x68e   :  { %7403 = vmatpush2.bf16.msra.mxu0 %v9831_v34  ;;  %v9867_v34 = vld [vmem:[#allocation13 + $0x928] ss:$16 sps:$4 sm:$0xff]  }
 0x68f   :  { %7404 = vmatprep.subr.bf16.mxu0 %v9839_v38  ;;  %v6895_v38 = vadd.f32 %v11285_v42, %v4919_v54  ;;  %v7063_v53 = vpop.f32.mrf.mxu1 }
 0x690   :  { %7456 = vmatpush2.bf16.msra.mxu1 %v9834_v10  ;;  %v6893_v10 = vadd.f32 %v11278_v16, %v4923_v28 }
 0x691   :  { %7457 = vmatprep.subr.bf16.mxu1 %v9842_v63  ;;  %v9870_v63 = vld [vmem:[#allocation13 + $0xb28] ss:$16 sps:$4 sm:$0xff]   ;;  %v6948_v16 = vadd.f32 %v11288_v2, %v6895_v38 }
 0x692   :  { %7405 = vmatpush2.bf16.msra.mxu0 %v9837_v22  ;;  %v9875_v22 = vld [vmem:[#allocation13 + $0x90c] ss:$16 sps:$4 sm:$0xff]  }
 0x693   :  { %7406 = vmatprep.subr.bf16.mxu0 %v9845_v21  ;;  %v9878_v21 = vld [vmem:[#allocation13 + $0xb0c] ss:$16 sps:$4 sm:$0xff]  }
 0x694   :  { %7458 = vmatpush2.bf16.msra.mxu1 %v9840_v41  ;;  %v7010_v41 = vpop.f32.mrf.mxu0 }
 0x695   :  { %7459 = vmatprep.subr.bf16.mxu1 %v9848_v19  ;;  %v6944_v19 = vadd.f32 %v11276_v1, %v6891_v44 }
 0x696   :  { %7407 = vmatpush2.bf16.msra.mxu0 %v9843_v39  ;;  %v6897_v39 = vadd.f32 %v11290_v52, %v4923_v28 }
 0x697   :  { %7408 = vmatprep.subr.bf16.mxu0 %v9851_v50  ;;  %v6946_v50 = vadd.f32 %v11280_v40, %v6893_v10  ;;  %v6997_v42 = vadd.f32 %v11310_v58, %v6944_v19  ;;  %v6903_v40 = vadd.f32 %v11298_v24, %v4923_v28  ;;  %v6905_v58 = vadd.f32 %v11302_v33, %v4919_v54 }
 0x698   :  { %7460 = vmatpush2.bf16.msra.mxu1 %v9846_v12  ;;  %v9873_v12 = vld [vmem:[#allocation13 + $0x908] ss:$16 sps:$4 sm:$0xff]   ;;  %v6950_v1 = vadd.f32 %v11292_v57, %v6897_v39 }
 0x699   :  { %7461 = vmatprep.subr.bf16.mxu1 %v9854_v45  ;;  %v9876_v45 = vld [vmem:[#allocation13 + $0xb08] ss:$16 sps:$4 sm:$0xff]   ;;  %v6999_v52 = vadd.f32 %v11314_v47, %v6946_v50  ;;  %v6907_v47 = vadd.f32 %v11306_v6, %v4923_v28  ;;  %v6958_v6 = vadd.f32 %v11304_v36, %v6905_v58 }
 0x69a   :  { %7409 = vmatpush2.bf16.msra.mxu0 %v9849_v9  ;;  %v6901_v9 = vadd.f32 %v11294_v61, %v4919_v54 }
 0x69b   :  { %7410 = vmatprep.subr.bf16.mxu0 %v9857_v13  ;;  %v7001_v13 = vadd.f32 %v11318_v17, %v6948_v16  ;;  %v7052_v24 = vadd.f32 %v11316_v35, %v6999_v52 }
 0x69c   :  { %7462 = vmatpush2.bf16.msra.mxu1 %v9852_v62  ;;  %v7012_v62 = vpop.f32.mrf.mxu0  ;;  %v6954_v57 = vadd.f32 %v11296_v8, %v6901_v9 }
 0x69d   :  { %7463 = vmatprep.subr.bf16.mxu1 %v9860_v30  ;;  %v7065_v30 = vpop.f32.mrf.mxu1  ;;  %v7054_v17 = vadd.f32 %v11320_v7, %v7001_v13 }
 0x69e   :  { %7411 = vmatpush2.bf16.msra.mxu0 %v9855_v60  ;;  %v7050_v60 = vadd.f32 %v11312_v49, %v6997_v42  ;;  %v6956_v49 = vadd.f32 %v11300_v18, %v6903_v40 }
 0x69f   :  { %7412 = vmatprep.subr.bf16.mxu0 %v9863_v11  ;;  %v11656_v11 = vmov 0.0  }
 0x6a0   :  { %7464 = vmatpush2.bf16.msra.mxu1 %v9858_v4  ;;  %v7003_v4 = vadd.f32 %v7002_v27, %v6950_v1  ;;  %v7007_v27 = vadd.f32 %v11326_v37, %v6954_v57  ;;  %v7009_v18 = vadd.f32 %v11334_v23, %v6956_v49  ;;  %v7011_v37 = vadd.f32 %v7010_v41, %v6958_v6 }
 0x6a1   :  { %7465 = vmatprep.subr.bf16.mxu1 %v9866_v15 }
 0x6a2   :  { %7413 = vmatpush2.bf16.msra.mxu0 %v9861_v46  ;;  %v7056_v54 = vadd.f32 %v11322_v0, %v7003_v4  ;;  %v7060_v36 = vadd.f32 %v11330_v25, %v7007_v27  ;;  %v7062_v10 = vadd.f32 %v11337_v29, %v7009_v18 }
 0x6a3   :  { %7414 = vmatprep.subr.bf16.mxu0 %v9869_v55 }
 0x6a4   :  { %7466 = vmatpush2.bf16.msra.mxu1 %v9864_v3 }
 0x6a5   :  { %7467 = vmatprep.subr.bf16.mxu1 %v9872_v59 }
 0x6a6   :  { %7415 = vmatpush2.bf16.msra.mxu0 %v9867_v34 }
 0x6a7   :  { %7416 = vmatprep.subr.bf16.mxu0 %v9875_v22 }
 0x6a8   :  { %7468 = vmatpush2.bf16.msra.mxu1 %v9870_v63  ;;  %v7064_v63 = vadd.f32 %v7063_v53, %v7011_v37 }
 0x6a9   :  { %7469 = vmatprep.subr.bf16.mxu1 %v9878_v21 }
 0x6aa   :  { %7417 = vmatpush2.bf16.msra.mxu0 %v9873_v12 }
 0x6ab   :  { %8696 = vmatprep.subr.bf16.mxu0 %v11656_v11 }
 0x6ac   :  { %7470 = vmatpush2.bf16.msra.mxu1 %v9876_v45 }
 0x6ad   :  { %v7102_v2 = vpop.f32.mrf.mxu0  ;;  %8704 = vmatprep.subr.bf16.mxu1 %v11656_v11  ;;  %7419 = vmatmul.mubr.bf16.vlgmr.msra.gmra.mxu0 %v11236_v31  ;;  %v6960_v31 = vadd.f32 %v11308_v32, %v6907_v47 }
 0x6ae   :  { %v7103_v46 = vadd.f32 %v7102_v2, %v7050_v60  ;;  %7428 = vmatprep.mubr.bf16.mxu0 %v11240_v26 }
 0x6af   :  { %v7155_v61 = vpop.f32.mrf.mxu1  ;;  %v7104_v15 = vpop.f32.mrf.mxu0  ;;  %7472 = vmatmul.mubr.bf16.vlgmr.msra.gmra.mxu1 %v11238_v48  ;;  %v7013_v44 = vadd.f32 %v7012_v62, %v6960_v31 }
 0x6b0   :  { %7481 = vmatprep.mubr.bf16.mxu1 %v11243_v43  ;;  %v7105_v35 = vadd.f32 %v7104_v15, %v7052_v24  ;;  %v11369_v55 = vadd.f32 %v7155_v61, %v7103_v46 }
 0x6b1   :  { %v7157_v33 = vpop.f32.mrf.mxu1  ;;  %v7106_v8 = vpop.f32.mrf.mxu0  ;;  %v7066_v12 = vadd.f32 %v7065_v30, %v7013_v44 }
 0x6b2   :  { %v7107_v7 = vadd.f32 %v7106_v8, %v7054_v17  ;;  %v11374_v43 = vadd.f32 %v7157_v33, %v7105_v35 }
 0x6b3   :  { %v7159_v28 = vpop.f32.mrf.mxu1  ;;  %v7108_v3 = vpop.f32.mrf.mxu0 }
 0x6b4   :  { %v11371_v48 = vadd.f32 %v7159_v28, %v7107_v7  ;;  %v7109_v26 = vadd.f32 %v7108_v3, %v7056_v54 }
 0x6b5   :  { %v7161_v59 = vpop.f32.mrf.mxu1  ;;  %v7112_v0 = vpop.f32.mrf.mxu0  ;;  %7429 = vmatmul.mubr.bf16.gmra.mxu0 %v11254_v14 }
 0x6b6   :  { %v7492_v34 = vadd.f32 %v11371_v48, %v11369_v55  ;;  %v11378_v32 = vadd.f32 %v7161_v59, %v7109_v26  ;;  %v7113_v21 = vadd.f32 %v7112_v0, %v7060_v36  ;;  %8700 = vmatprep.mubr.msk.bf16.mxu0 %vm10254_vm7, %v11656_v11 }
 0x6b7   :  { %v7165_v23 = vpop.f32.mrf.mxu1  ;;  %v7114_v38 = vpop.f32.mrf.mxu0  ;;  %7482 = vmatmul.mubr.bf16.gmra.mxu1 %v11256_v20 }
 0x6b8   :  { %v7493_v22 = vrot.slane %v7492_v34, 4  ;;  %v7499_v41 = vadd.f32 %v11378_v32, %v11374_v43  ;;  %v7115_v19 = vadd.f32 %v7114_v38, %v7062_v10  ;;  %v11385_v53 = vadd.f32 %v7165_v23, %v7113_v21  ;;  %8706 = vmatprep.mubr.msk.bf16.mxu1 %vm10254_vm7, %v11656_v11 }
 0x6b9   :  { %v7167_v25 = vpop.f32.mrf.mxu1  ;;  %v7116_v39 = vpop.f32.mrf.mxu0 }
 0x6ba   :  { %v7494_v50 = vadd.f32 %v7493_v22, %v7492_v34  ;;  %v7500_v16 = vrot.slane %v7499_v41, 4  ;;  %v7117_v42 = vadd.f32 %v7116_v39, %v7064_v63  ;;  %11657 = vst [vmem:[#allocation24_spill] sm:$0xff] %v11385_v53  ;;  %v11389_v52 = vadd.f32 %v7167_v25, %v7115_v19 }
 0x6bb   :  { %v7169_v45 = vpop.f32.mrf.mxu1  ;;  %v7118_v29 = vpop.f32.mrf.mxu0 }
 0x6bc   :  { %v7495_v9 = vrot.slane %v7494_v50, 2  ;;  %v11387_v62 = vadd.f32 %v7169_v45, %v7117_v42  ;;  %v7119_v1 = vadd.f32 %v7118_v29, %v7066_v12  ;;  %11659 = vst [vmem:[#allocation27_spill] sm:$0xff] %v11389_v52  ;;  %v7501_v40 = vadd.f32 %v7500_v16, %v7499_v41  ;;  %v11661_v45 = vld [vmem:[#allocation25_spill] sm:$0xff] }
 0x6bd   :  { %v7171_v14 = vpop.f32.mrf.mxu1  ;;  %v4927_v29 = vrot.slane %v11324_v5, %v11661_v45 }
 0x6be   :  { %11658 = vst [vmem:[#allocation23_spill] sm:$0xff] %v11387_v62  ;;  %v7496_v13 = vadd.f32 %v7495_v9, %v7494_v50  ;;  %v7520_v20 = vadd.f32 %v11387_v62, %v11385_v53  ;;  %v11393_v30 = vadd.f32 %v7171_v14, %v7119_v1  ;;  %v7502_v4 = vrot.slane %v7501_v40, 2  ;;  %v11662_v1 = vld [vmem:[#allocation26_spill] sm:$0xff] }
 0x6bf   :  { %v4931_v14 = vrot.slane %v11324_v5, %v11662_v1 }
 0x6c0   :  { %11660 = vst [vmem:[#allocation28_spill] sm:$0xff] %v11393_v30  ;;  %v7497_v2 = vrot.slane %v7496_v13, 1  ;;  %v7521_v58 = vrot.slane %v7520_v20, 4  ;;  %v7527_v60 = vadd.f32 %v11393_v30, %v11389_v52  ;;  %v7503_v24 = vadd.f32 %v7502_v4, %v7501_v40 }
 0x6c2   :  { %v7522_v61 = vadd.f32 %v7521_v58, %v7520_v20  ;;  %v7528_v57 = vrot.slane %v7527_v60, 4  ;;  %v11397_v47 = vadd.f32 %v7497_v2, %v7496_v13  ;;  %v7504_v49 = vrot.slane %v7503_v24, 1 }
 0x6c4   :  { %v7523_v15 = vrot.slane %v7522_v61, 2  ;;  %7550 = vrot.lane.b32.xlu1 %v11397_v47, %s10251_s23  ;;  %v7529_v46 = vadd.f32 %v7528_v57, %v7527_v60  ;;  %v11409_v54 = vadd.f32 %v7504_v49, %v7503_v24 }
 0x6c6   :  { %v7524_v17 = vadd.f32 %v7523_v15, %v7522_v61  ;;  %v7530_v27 = vrot.slane %v7529_v46, 2 }
 0x6c8   :  { %v7525_v33 = vrot.slane %v7524_v17, 1  ;;  %7558 = vrot.lane.b32.xlu1 %v11397_v47, %s10252_s25  ;;  %v7531_v6 = vadd.f32 %v7530_v27, %v7529_v46 }
 0x6ca   :  { %v11403_v8 = vadd.f32 %v7525_v33, %v7524_v17  ;;  %v7532_v35 = vrot.slane %v7531_v6, 1 }
 0x6cc   :  { %7552 = vrot.lane.b32.xlu0 %v11403_v8, %s10251_s23  ;;  %7566 = vrot.lane.b32.xlu1 %v11397_v47, %s10250_s6  ;;  %v11419_v7 = vadd.f32 %v7532_v35, %v7531_v6 }
 0x6d0   :  { %7560 = vrot.lane.b32.xlu0 %v11403_v8, %s10252_s25  ;;  %7578 = vrot.lane.b32.xlu1 %v11409_v54, %s10251_s23 }
 0x6d4   :  { %7568 = vrot.lane.b32.xlu0 %v11403_v8, %s10250_s6  ;;  %7586 = vrot.lane.b32.xlu1 %v11409_v54, %s10252_s25 }
 0x6d8   :  { %7580 = vrot.lane.b32.xlu0 %v11419_v7, %s10251_s23  ;;  %7594 = vrot.lane.b32.xlu1 %v11409_v54, %s10250_s6 }
 0x6dc   :  { %7588 = vrot.lane.b32.xlu0 %v11419_v7, %s10252_s25 }
 0x6e0   :  { %7596 = vrot.lane.b32.xlu0 %v11419_v7, %s10250_s6 }
 0x6ed   :  { %v7208_v28 = vpop.f32.mrf.mxu0 }
 0x6ee   :  { %v7209_v40 = vadd.f32 %v7208_v28, %v4927_v29 }
 0x6ef   :  { %v7261_v31 = vpop.f32.mrf.mxu1  ;;  %v7210_v18 = vpop.f32.mrf.mxu0 }
 0x6f0   :  { %v7211_v2 = vadd.f32 %v7210_v18, %v4931_v14  ;;  %v7262_v4 = vadd.f32 %v7261_v31, %v7209_v40 }
 0x6f1   :  { %v7263_v3 = vpop.f32.mrf.mxu1  ;;  %v7212_v37 = vpop.f32.mrf.mxu0 }
 0x6f2   :  { %v7213_v58 = vadd.f32 %v7212_v37, %v4927_v29  ;;  %v7264_v15 = vadd.f32 %v7263_v3, %v7211_v2 }
 0x6f3   :  { %v7265_v26 = vpop.f32.mrf.mxu1  ;;  %v7214_v59 = vpop.f32.mrf.mxu0 }
 0x6f4   :  { %v7215_v61 = vadd.f32 %v7214_v59, %v4931_v14  ;;  %v7266_v24 = vadd.f32 %v7265_v26, %v7213_v58 }
 0x6f5   :  { %v7267_v36 = vpop.f32.mrf.mxu1  ;;  %v7218_v0 = vpop.f32.mrf.mxu0 }
 0x6f6   :  { %v7219_v46 = vadd.f32 %v7218_v0, %v4927_v29  ;;  %v7268_v49 = vadd.f32 %v7267_v36, %v7215_v61 }
 0x6f7   :  { %v7271_v44 = vpop.f32.mrf.mxu1  ;;  %v7220_v34 = vpop.f32.mrf.mxu0 }
 0x6f8   :  { %v7221_v30 = vadd.f32 %v7220_v34, %v4931_v14  ;;  %v7272_v37 = vadd.f32 %v7271_v44, %v7219_v46 }
 0x6f9   :  { %v7273_v23 = vpop.f32.mrf.mxu1  ;;  %v7222_v10 = vpop.f32.mrf.mxu0 }
 0x6fa   :  { %v7223_v62 = vadd.f32 %v7222_v10, %v4927_v29 }
 0x6fb   :  { %v7275_v38 = vpop.f32.mrf.mxu1  ;;  %v7224_v63 = vpop.f32.mrf.mxu0 }
 0x6fc   :  { %v7225_v53 = vadd.f32 %v7224_v63, %v4931_v14  ;;  %v7276_v36 = vadd.f32 %v7275_v38, %v7223_v62 }
 0x6fd   :  { %v7277_v22 = vpop.f32.mrf.mxu1 }
 0x72d   :  { %v7314_v41 = vpop.f32.mrf.mxu0 }
 0x72e   :  { %v7315_v17 = vadd.f32 %v7314_v41, %v7262_v4  ;;  %v7274_v41 = vadd.f32 %v7273_v23, %v7221_v30  ;;  %v7278_v4 = vadd.f32 %v7277_v22, %v7225_v53 }
 0x72f   :  { %v7367_v21 = vpop.f32.mrf.mxu1  ;;  %v7316_v25 = vpop.f32.mrf.mxu0 }
 0x730   :  { %v7317_v27 = vadd.f32 %v7316_v25, %v7264_v15  ;;  %v7368_v28 = vadd.f32 %v7367_v21, %v7315_v17 }
 0x731   :  { %v7369_v19 = vpop.f32.mrf.mxu1  ;;  %v7318_v39 = vpop.f32.mrf.mxu0 }
 0x732   :  { %v7319_v6 = vadd.f32 %v7318_v39, %v7266_v24  ;;  %v7370_v59 = vadd.f32 %v7369_v19, %v7317_v27 }
 0x733   :  { %v7371_v12 = vpop.f32.mrf.mxu1  ;;  %v7320_v50 = vpop.f32.mrf.mxu0 }
 0x734   :  { %v7321_v52 = vadd.f32 %v7320_v50, %v7268_v49  ;;  %v7372_v40 = vadd.f32 %v7371_v12, %v7319_v6 }
 0x735   :  { %v7373_v16 = vpop.f32.mrf.mxu1  ;;  %v7324_v42 = vpop.f32.mrf.mxu0 }
 0x736   :  { %v7325_v0 = vadd.f32 %v7324_v42, %v7272_v37  ;;  %v7374_v25 = vadd.f32 %v7373_v16, %v7321_v52 }
 0x737   :  { %v7377_v9 = vpop.f32.mrf.mxu1  ;;  %v7326_v13 = vpop.f32.mrf.mxu0 }
 0x738   :  { %v7327_v10 = vadd.f32 %v7326_v13, %v7274_v41  ;;  %v7378_v12 = vadd.f32 %v7377_v9, %v7325_v0 }
 0x739   :  { %v7379_v20 = vpop.f32.mrf.mxu1  ;;  %v7328_v60 = vpop.f32.mrf.mxu0 }
 0x73a   :  { %v7329_v50 = vadd.f32 %v7328_v60, %v7276_v36  ;;  %v7380_v38 = vadd.f32 %v7379_v20, %v7327_v10 }
 0x73b   :  { %v7381_v57 = vpop.f32.mrf.mxu1  ;;  %v7330_v33 = vpop.f32.mrf.mxu0 }
 0x73c   :  { %v7331_v30 = vadd.f32 %v7330_v33, %v7278_v4  ;;  %v7382_v16 = vadd.f32 %v7381_v57, %v7329_v50 }
 0x73d   :  { %v7383_v35 = vpop.f32.mrf.mxu1 }
 0x73e   :  { %v7384_v24 = vadd.f32 %v7383_v35, %v7331_v30 }
 0x76d   :  { %v7420_v5 = vpop.f32.mrf.mxu0 }
 0x76e   :  { %v7421_v3 = vadd.f32 %v7420_v5, %v7368_v28 }
 0x76f   :  { %v7473_v18 = vpop.f32.mrf.mxu1  ;;  %v7422_v31 = vpop.f32.mrf.mxu0 }
 0x770   :  { %v7423_v39 = vadd.f32 %v7422_v31, %v7370_v59  ;;  %v11433_v29 = vadd.f32 %v7473_v18, %v7421_v3 }
 0x771   :  { %v7475_v26 = vpop.f32.mrf.mxu1  ;;  %v7424_v2 = vpop.f32.mrf.mxu0 }
 0x772   :  { %v7425_v58 = vadd.f32 %v7424_v2, %v7372_v40  ;;  %v11437_v23 = vadd.f32 %v7475_v26, %v7423_v39 }
 0x773   :  { %v7477_v34 = vpop.f32.mrf.mxu1  ;;  %v7426_v21 = vpop.f32.mrf.mxu0 }
 0x774   :  { %v11435_v44 = vadd.f32 %v7477_v34, %v7425_v58  ;;  %v7427_v63 = vadd.f32 %v7426_v21, %v7374_v25 }
 0x775   :  { %v7479_v19 = vpop.f32.mrf.mxu1  ;;  %v7430_v14 = vpop.f32.mrf.mxu0 }
 0x776   :  { %v7506_v62 = vadd.f32 %v11435_v44, %v11433_v29  ;;  %v11441_v52 = vadd.f32 %v7479_v19, %v7427_v63  ;;  %v7431_v60 = vadd.f32 %v7430_v14, %v7378_v12  ;;  %v9879_v12 = vld [vmem:[%s11632_s9 + $0x8] sm:$0xff]  }
 0x777   :  { %v7483_v53 = vpop.f32.mrf.mxu1  ;;  %v7432_v22 = vpop.f32.mrf.mxu0  ;;  %8697 = vmatpush3.bf16.msra.mxu0 %v9879_v12 }
 0x778   :  { %v7507_v42 = vrot.slane %v7506_v62, 4  ;;  %v7513_v13 = vadd.f32 %v11441_v52, %v11437_v23  ;;  %v7433_v9 = vadd.f32 %v7432_v22, %v7380_v38  ;;  %v11445_v5 = vadd.f32 %v7483_v53, %v7431_v60  ;;  %8698 = vmatprep.subr.bf16.mxu0 %v11656_v11  ;;  %v7731_v53 = vld [vmem:[#allocation16] sm:$0x1]  ;;  %v7551_v22 = vpop.permute.xlu1 %7550 }
 0x779   :  { %v7485_v61 = vpop.f32.mrf.mxu1  ;;  %v7434_v15 = vpop.f32.mrf.mxu0  ;;  %v7737_v38 = vsel %vm578_vm4, %v7731_v53, 0 }
 0x77a   :  { %v7508_v17 = vadd.f32 %v7507_v42, %v7506_v62  ;;  %v7514_v46 = vrot.slane %v7513_v13, 4  ;;  %v7435_v33 = vadd.f32 %v7434_v15, %v7382_v16  ;;  %v11449_v28 = vadd.f32 %v7485_v61, %v7433_v9  ;;  %v9880_v62 = vld [vmem:[%s11632_s9] sm:$0xff]   ;;  %8705 = vmatpush3.bf16.msra.mxu1 %v7737_v38  ;;  %v7553_v42 = vpop.permute.xlu0 %7552 }
 0x77b   :  { %v7487_v49 = vpop.f32.mrf.mxu1  ;;  %v7436_v27 = vpop.f32.mrf.mxu0  ;;  %8699 = vmatpush3.bf16.msra.mxu0 %v9880_v62  ;;  %v7556_v15 = vadd.f32 %v7551_v22, %v11397_v47  ;;  %v7557_v11 = vadd.f32 %v7553_v42, %v11403_v8 }
 0x77c   :  { %v7509_v6 = vrot.slane %v7508_v17, 2  ;;  %v11447_v20 = vadd.f32 %v7487_v49, %v7435_v33  ;;  %v7437_v57 = vadd.f32 %v7436_v27, %v7384_v24  ;;  %v7515_v31 = vadd.f32 %v7514_v46, %v7513_v13  ;;  %v7559_v16 = vpop.permute.xlu1 %7558 }
 0x77d   :  { %v7489_v18 = vpop.f32.mrf.mxu1 }
 0x77e   :  { %v7510_v37 = vadd.f32 %v7509_v6, %v7508_v17  ;;  %v7534_v59 = vadd.f32 %v11447_v20, %v11445_v5  ;;  %v11453_v35 = vadd.f32 %v7489_v18, %v7437_v57  ;;  %v7516_v41 = vrot.slane %v7515_v31, 2  ;;  %v7561_v60 = vpop.permute.xlu0 %7560 }
 0x77f   :  { %v7564_v17 = vadd.f32 %v7559_v16, %v7556_v15  ;;  %v7565_v49 = vadd.f32 %v7561_v60, %v7557_v11 }
 0x780   :  { %v7511_v40 = vrot.slane %v7510_v37, 1  ;;  %v7535_v3 = vrot.slane %v7534_v59, 4  ;;  %v7541_v26 = vadd.f32 %v11453_v35, %v11449_v28  ;;  %v7517_v39 = vadd.f32 %v7516_v41, %v7515_v31  ;;  %v7567_v13 = vpop.permute.xlu1 %7566 }
 0x781   :  { %v7572_v33 = vadd.f32 %v7567_v13, %v7564_v17 }
 0x782   :  { %v7536_v0 = vadd.f32 %v7535_v3, %v7534_v59  ;;  %v7542_v2 = vrot.slane %v7541_v26, 4  ;;  %v11457_v36 = vadd.f32 %v7511_v40, %v7510_v37  ;;  %v7518_v10 = vrot.slane %v7517_v39, 1  ;;  %v7569_v9 = vpop.permute.xlu0 %7568 }
 0x783   :  { %v7574_v6 = vadd.f32 %v7572_v33, %v11409_v54  ;;  %v7573_v57 = vadd.f32 %v7569_v9, %v7565_v49 }
 0x784   :  { %v7537_v25 = vrot.slane %v7536_v0, 2  ;;  %7606 = vrot.lane.b32.xlu1 %v11457_v36, %s10251_s23  ;;  %v7543_v34 = vadd.f32 %v7542_v2, %v7541_v26  ;;  %v11466_v19 = vadd.f32 %v7518_v10, %v7517_v39  ;;  %v7579_v61 = vpop.permute.xlu1 %7578 }
 0x785   :  { %v7584_v31 = vadd.f32 %v7579_v61, %v7574_v6  ;;  %v7575_v59 = vadd.f32 %v7573_v57, %v11419_v7 }
 0x786   :  { %v7538_v58 = vadd.f32 %v7537_v25, %v7536_v0  ;;  %v7544_v21 = vrot.slane %v7543_v34, 2  ;;  %v7581_v46 = vpop.permute.xlu0 %7580 }
 0x787   :  { %v7585_v47 = vadd.f32 %v7581_v46, %v7575_v59 }
 0x788   :  { %v7539_v4 = vrot.slane %v7538_v58, 1  ;;  %7614 = vrot.lane.b32.xlu1 %v11457_v36, %s10252_s25  ;;  %v7545_v63 = vadd.f32 %v7544_v21, %v7543_v34  ;;  %v7587_v24 = vpop.permute.xlu1 %7586 }
 0x789   :  { %v7592_v40 = vadd.f32 %v7587_v24, %v7584_v31 }
 0x78a   :  { %v7540_v50 = vadd.f32 %v7539_v4, %v7538_v58  ;;  %v7546_v14 = vrot.slane %v7545_v63, 1  ;;  %v7589_v18 = vpop.permute.xlu0 %7588 }
 0x78b   :  { %v7593_v0 = vadd.f32 %v7589_v18, %v7585_v47 }
 0x78c   :  { %7608 = vrot.lane.b32.xlu0 %v7540_v50, %s10251_s23  ;;  %7622 = vrot.lane.b32.xlu1 %v11457_v36, %s10250_s6  ;;  %v7547_v30 = vadd.f32 %v7546_v14, %v7545_v63  ;;  %v7595_v27 = vpop.permute.xlu1 %7594 }
 0x78d   :  { %v7600_v41 = vadd.f32 %v7595_v27, %v7592_v40 }
 0x78e   :  { %v7597_v3 = vpop.permute.xlu0 %7596 }
 0x78f   :  { %v7602_v2 = vadd.f32 %v7600_v41, %v11457_v36  ;;  %v7601_v39 = vadd.f32 %v7597_v3, %v7593_v0 }
 0x790   :  { %7616 = vrot.lane.b32.xlu0 %v7540_v50, %s10252_s25  ;;  %7634 = vrot.lane.b32.xlu1 %v11466_v19, %s10251_s23 }
 0x791   :  { %v7603_v54 = vadd.f32 %v7601_v39, %v7540_v50  ;;  %v10255_v39 = vmov 1966171168  }
 0x794   :  { %7624 = vrot.lane.b32.xlu0 %v7540_v50, %s10250_s6  ;;  %7642 = vrot.lane.b32.xlu1 %v11466_v19, %s10252_s25 }
 0x798   :  { %7636 = vrot.lane.b32.xlu0 %v7547_v30, %s10251_s23  ;;  %7650 = vrot.lane.b32.xlu1 %v11466_v19, %s10250_s6 }
 0x79c   :  { %7644 = vrot.lane.b32.xlu0 %v7547_v30, %s10252_s25 }
 0x7a0   :  { %7652 = vrot.lane.b32.xlu0 %v7547_v30, %s10250_s6 }
 0x7f6   :  { %v7607_v37 = vpop.permute.xlu1 %7606 }
 0x7f7   :  { %v7612_v58 = vadd.f32 %v7607_v37, %v7602_v2 }
 0x7fa   :  { %v7615_v26 = vpop.permute.xlu1 %7614 }
 0x7fb   :  { %v7620_v34 = vadd.f32 %v7615_v26, %v7612_v58  ;;  %v7800_v58 = vunpack.c.l.s4 %v10255_v39 }
 0x7fe   :  { %v7609_v8 = vpop.permute.xlu0 %7608  ;;  %v7623_v25 = vpop.permute.xlu1 %7622 }
 0x7ff   :  { %v7613_v21 = vadd.f32 %v7609_v8, %v7603_v54  ;;  %v7628_v63 = vadd.f32 %v7623_v25, %v7620_v34  ;;  %v7801_v54 = vunpack.c.0.s8 %v7800_v58  ;;  %v10043_v58 = vld [vmem:[%s11623_s0 + $0x50] sm:$0xff] }
 0x801   :  { %v7630_v62 = vadd.f32 %v7628_v63, %v11466_v19  ;;  %v11663_v63 = vld [vmem:[#allocation22_spill] sm:$0xff] }
 0x802   :  { %v7617_v4 = vpop.permute.xlu0 %7616  ;;  %v7635_v10 = vpop.permute.xlu1 %7634 }
 0x803   :  { %v7621_v12 = vadd.f32 %v7617_v4, %v7613_v21  ;;  %v7640_v22 = vadd.f32 %v7635_v10, %v7630_v62 }
 0x806   :  { %v7625_v7 = vpop.permute.xlu0 %7624  ;;  %v7643_v14 = vpop.permute.xlu1 %7642 }
 0x807   :  { %v7629_v53 = vadd.f32 %v7625_v7, %v7621_v12  ;;  %v7648_v42 = vadd.f32 %v7643_v14, %v7640_v22  ;;  %v7804_v12 = vsub.s32 %v7801_v54, %v11663_v63  ;;  %v10044_v54 = vld [vmem:[%s11623_s0 + $0x58] sm:$0xff]  ;;  %v10046_v63 = vld [vmem:[%s11623_s0 + $0x68] sm:$0xff] }
 0x809   :  { %v7631_v16 = vadd.f32 %v7629_v53, %v7547_v30 }
 0x80a   :  { %v7637_v38 = vpop.permute.xlu0 %7636  ;;  %v7651_v36 = vpop.permute.xlu1 %7650 }
 0x80b   :  { %v7641_v60 = vadd.f32 %v7637_v38, %v7631_v16  ;;  %v7656_v61 = vadd.f32 %v7651_v36, %v7648_v42 }
 0x80d   :  { %v7658_v15 = vmul.f32 0.00390625, %v7656_v61 }
 0x80e   :  { %v7645_v13 = vpop.permute.xlu0 %7644 }
 0x80f   :  { %v7649_v9 = vadd.f32 %v7645_v13, %v7641_v60  ;;  %v7660_v46 = vpack.c.bf16 %v7658_v15, %v7658_v15 }
 0x811   :  { %v7668_v49 = vunpack.c.l.b16 %v7660_v46 }
 0x812   :  { %v7653_v50 = vpop.permute.xlu0 %7652 }
 0x813   :  { %v7657_v24 = vadd.f32 %v7653_v50, %v7649_v9 }
 0x815   :  { %v7659_v17 = vmul.f32 0.00390625, %v7657_v24 }
 0x817   :  { %v7661_v11 = vpack.c.bf16 %v7659_v17, %v7659_v17 }
 0x819   :  { %v7669_v33 = vunpack.c.l.b16 %v7661_v11 }
 0x81b   :  { %v7670_v19 = vrot.slane %v7669_v33, 7 }
 0x81d   :  { %v7672_v27 = vsel %vm7671_vm8, %v7670_v19, %v7668_v49 }
 0x81e   :  { %v7673_v6 = vpack.c.b16 %v7672_v27, %v7672_v27  ;;  %v11664_v27 = vld [vmem:[#allocation24_spill] sm:$0xff] }
 0x820   :  { %8701 = vmatmul.mubr.msk.bf16.vlgmr.msra.gmra.mxu0 %vm402_vm1, %v7673_v6  ;;  %v11665_v6 = vld [vmem:[#allocation27_spill] sm:$0xff] }
 0x8e0   :  { %v7723_v30 = vpop.f32.mrf.mxu0 }
 0x8e1   :  { %v7729_v57 = vmax.f32 %v7723_v30, 0.0  ;;  %v11666_v30 = vld [vmem:[#allocation23_spill] sm:$0xff] }
 0x8e2   :  { %v8702_v18 = vpop.f32.mrf.mxu0 }
 0x8e3   :  { %v7730_v37 = vpack.c.bf16 %v7729_v57, %v7729_v57  ;;  %v11667_v57 = vld [vmem:[#allocation28_spill] sm:$0xff] }
 0x8e4   :  { %v7726_v31 = vpop.f32.mrf.mxu0  ;;  %v10034_v18 = vld [vmem:[%s11623_s0 + $0x8] sm:$0xff] }
 0x8e5   :  { %8707 = vmatmul.mubr.msk.bf16.vlgmr.msra.gmra.mxu1 %vm7732_vm9, %v7730_v37  ;;  %v10037_v31 = vld [vmem:[%s11623_s0 + $0x20] sm:$0xff] }
 0x8e6   :  { %v8703_v59 = vpop.f32.mrf.mxu0 }
 0x9a5   :  { %v7773_v40 = vpop.f32.mrf.mxu1 }
 0x9a6   :  { %v7779_v3 = vsub.f32 0.0, %v7773_v40  ;;  %v10038_v40 = vld [vmem:[%s11623_s0 + $0x28] sm:$0xff] }
 0x9a7   :  { %v8708_v26 = vpop.f32.mrf.mxu1 }
 0x9a8   :  { %v7780_v47 = vmul.f32 1.442695, %v7779_v3  ;;  %v10039_v26 = vld [vmem:[%s11623_s0 + $0x30] sm:$0xff] }
 0x9a9   :  { %v7776_v41 = vpop.f32.mrf.mxu1 }
 0x9aa   :  { %10013 = vpow2.f32 %v7780_v47  ;;  %v10040_v41 = vld [vmem:[%s11623_s0 + $0x38] sm:$0xff] }
 0x9ab   :  { %v8709_v0 = vpop.f32.mrf.mxu1 }
 0x9b7   :  { %v10014_v2 = vpop.eup %10013 }
 0x9b8   :  { %v7782_v8 = vadd.f32 1.0, %v10014_v2  ;;  %v10041_v2 = vld [vmem:[%s11623_s0 + $0x40] sm:$0xff] }
 0x9ba   :  { %10015 = vrcp.f32 %v7782_v8 }
 0x9c7   :  { %v10016_v25 = vpop.eup %10015 }
 0x9c8   :  { %7788 = vrot.lane.b32.xlu1 %v10016_v25, %s10252_s25  ;;  %7785 = vrot.lane.b32.xlu0 %v10016_v25, %s10250_s6 }
 0x9cc   :  { %7791 = vrot.lane.b32.xlu0 %v10016_v25, %s10251_s23 }
 0xa3a   :  { %v7786_v34 = vpop.permute.xlu0 %7785  ;;  %v7789_v4 = vpop.permute.xlu1 %7788 }
 0xa3b   :  { %v7794_v10 = vsel %vm402_vm1, %v10016_v25, %v7786_v34  ;;  %v10042_v25 = vld [vmem:[%s11623_s0 + $0x48] sm:$0xff] }
 0xa3c   :  { %v7795_v21 = vsel %vm404_vm2, %v7794_v10, %v7789_v4  ;;  %v10045_v10 = vld [vmem:[%s11623_s0 + $0x60] sm:$0xff] }
 0xa3e   :  { %v7792_v7 = vpop.permute.xlu0 %7791 }
 0xa3f   :  { %v7796_v14 = vsel %vm406_vm3, %v7795_v21, %v7792_v7  ;;  %v10047_v7 = vld [vmem:[%s11623_s0 + $0x70] sm:$0xff] }
 0xa40   :  { %v7798_v62 = vcombine.low %v7796_v14, %v7796_v14 }
 0xa42   :  { %v7805_v53 = vrot.slane %v7798_v62, %v7804_v12  ;;  %v10048_v62 = vld [vmem:[%s11623_s0 + $0x78] sm:$0xff] }
 0xa44   :  { %v7806_v38 = vcombine.low %v7805_v53, %v7805_v53  ;;  %v7807_v22 = vcombine.high %v7805_v53, %v7805_v53 }
 0xa46   :  { %v7814_v16 = vrot.slane %v7806_v38, %v7804_v12  ;;  %v7821_v36 = vrot.slane %v7807_v22, %v7804_v12 }
 0xa48   :  { %v7825_v42 = vrot.slane %v7814_v16, %v10437_v51  ;;  %v7829_v13 = vrot.slane %v7814_v16, %v11655_v56  ;;  %v7833_v60 = vrot.slane %v7814_v16, %v11661_v45  ;;  %v7837_v61 = vrot.slane %v7814_v16, %v11662_v1 }
 0xa49   :  { %v7841_v9 = vrot.slane %v7821_v36, %v10437_v51  ;;  %v7845_v50 = vrot.slane %v7821_v36, %v11655_v56  ;;  %v7849_v15 = vrot.slane %v7821_v36, %v11661_v45  ;;  %v7853_v24 = vrot.slane %v7821_v36, %v11662_v1 }
 0xa4a   :  { %v7862_v17 = vmul.f32 %v7825_v42, %v11369_v55  ;;  %v7863_v46 = vmul.f32 %v7829_v13, %v11374_v43  ;;  %v7864_v11 = vmul.f32 %v7833_v60, %v11433_v29  ;;  %v7865_v33 = vmul.f32 %v7837_v61, %v11437_v23 }
 0xa4b   :  { %v7866_v49 = vmul.f32 %v7825_v42, %v11371_v48  ;;  %v7867_v19 = vmul.f32 %v7829_v13, %v11378_v32  ;;  %v7868_v51 = vmul.f32 %v7833_v60, %v11435_v44  ;;  %v7869_v56 = vmul.f32 %v7837_v61, %v11441_v52  ;;  %v10033_v44 = vld [vmem:[%s11623_s0] sm:$0xff] }
 0xa4c   :  { %v7870_v45 = vmul.f32 %v7841_v9, %v11664_v27  ;;  %v7871_v1 = vmul.f32 %v7845_v50, %v11665_v6  ;;  %v7872_v55 = vmul.f32 %v7849_v15, %v11445_v5  ;;  %v7873_v43 = vmul.f32 %v7853_v24, %v11449_v28  ;;  %v10035_v28 = vld [vmem:[%s11623_s0 + $0x10] sm:$0xff] }
 0xa4d   :  { %v7874_v29 = vmul.f32 %v7841_v9, %v11666_v30  ;;  %v7875_v23 = vmul.f32 %v7845_v50, %v11667_v57  ;;  %v7876_v48 = vmul.f32 %v7849_v15, %v11447_v20  ;;  %v7877_v32 = vmul.f32 %v7853_v24, %v11453_v35  ;;  %v10036_v20 = vld [vmem:[%s11623_s0 + $0x18] sm:$0xff] }
 0xa4e   :  { %v7878_v52 = vadd.f32 %v10033_v44, %v7862_v17  ;;  %v7879_v5 = vadd.f32 %v10034_v18, %v7863_v46  ;;  %v7880_v37 = vadd.f32 %v10035_v28, %v7864_v11  ;;  %v7881_v35 = vadd.f32 %v10036_v20, %v7865_v33 }
 0xa4f   :  { %v7882_v59 = vadd.f32 %v10037_v31, %v7866_v49  ;;  %v7883_v3 = vadd.f32 %v10038_v40, %v7867_v19  ;;  %v7884_v47 = vadd.f32 %v10039_v26, %v7868_v51  ;;  %v7885_v0 = vadd.f32 %v10040_v41, %v7869_v56 }
 0xa50   :  { %v7886_v8 = vadd.f32 %v10041_v2, %v7870_v45  ;;  %v7887_v39 = vadd.f32 %v10042_v25, %v7871_v1  ;;  %v7888_v34 = vadd.f32 %v10043_v58, %v7872_v55  ;;  %v7889_v4 = vadd.f32 %v10044_v54, %v7873_v43  ;;  %7894 = vst [vmem:[%s11634_s11] sm:$0xff] %v7878_v52 }
 0xa51   :  { %7895 = vst [vmem:[%s11634_s11 + $0x8] sm:$0xff] %v7879_v5  ;;  %7896 = vst [vmem:[%s11634_s11 + $0x10] sm:$0xff] %v7880_v37  ;;  %v7890_v21 = vadd.f32 %v10045_v10, %v7874_v29  ;;  %v7891_v12 = vadd.f32 %v10046_v63, %v7875_v23  ;;  %v7892_v14 = vadd.f32 %v10047_v7, %v7876_v48 }
 0xa52   :  { %7897 = vst [vmem:[%s11634_s11 + $0x18] sm:$0xff] %v7881_v35  ;;  %v7893_v53 = vadd.f32 %v10048_v62, %v7877_v32  ;;  %7898 = vst [vmem:[%s11634_s11 + $0x20] sm:$0xff] %v7882_v59 }
 0xa53   :  { %7899 = vst [vmem:[%s11634_s11 + $0x28] sm:$0xff] %v7883_v3  ;;  %7900 = vst [vmem:[%s11634_s11 + $0x30] sm:$0xff] %v7884_v47 }
 0xa54   :  { %7901 = vst [vmem:[%s11634_s11 + $0x38] sm:$0xff] %v7885_v0  ;;  %7902 = vst [vmem:[%s11634_s11 + $0x40] sm:$0xff] %v7886_v8 }
 0xa55   :  { %7903 = vst [vmem:[%s11634_s11 + $0x48] sm:$0xff] %v7887_v39  ;;  %7904 = vst [vmem:[%s11634_s11 + $0x50] sm:$0xff] %v7888_v34 }
 0xa56   :  { %7905 = vst [vmem:[%s11634_s11 + $0x58] sm:$0xff] %v7889_v4  ;;  %7906 = vst [vmem:[%s11634_s11 + $0x60] sm:$0xff] %v7890_v21 }
 0xa57   :  { %7907 = vst [vmem:[%s11634_s11 + $0x68] sm:$0xff] %v7891_v12  ;;  %7908 = vst [vmem:[%s11634_s11 + $0x70] sm:$0xff] %v7892_v14 }
 0xa58   :  { %7909 = vst [vmem:[%s11634_s11 + $0x78] sm:$0xff] %v7893_v53 }
 0xa59   :  { %7914 = vsyncpa [#allocation4], 1 }
 0xa5a   :  { %7915 = vsyncpa [#allocation6], 1 }
 0xa5b   :  { %7916 = vsyncpa [#allocation9], 1 }
 0xa5c   :  { %7917 = vsyncpa [#allocation12], 1 }
 0xa5d   :  { %7918 = vsyncpa [#allocation15], 1 }

</bundles_post_ra>
